<compile_context>
chip_gen: v7x
topology: tpu7x:2x2x1
jax: 0.10.0
libtpu: 0.0.40
codegen_flags: <defaults>
</compile_context>

<pallas_src>
import jax
import jax.numpy as jnp
import numpy as np
from jax.experimental import pallas as pl
from jax.experimental.pallas import tpu as pltpu


# ---------------------------------------------------------------------------
# Fused, batch-blocked forward kernel
# ---------------------------------------------------------------------------

def _make_kernel(bb):
    """Build the fused forward kernel for a per-grid-step batch block `bb`."""
    M1 = bb * 30 - 2      # stacked conv-output rows, layer 1 (28x28, pad 1)
    M2 = bb * 16 - 2      # layer 2 (14x14, pad 1)
    M3 = bb * 9 - 2       # layer 3 (7x7,  pad 1)
    f32, bf16 = jnp.float32, jnp.bfloat16

    def conv_pool(lhs, w_ref, bias, sh_ref, sv_ref, c_out):
        # Conv: 3 "ky-banded" matmuls over the full padded row width (kx and
        # the spatial structure are folded into the prepacked weights), then
        # bias + ReLU.  2x2/stride-2 max pool: adjacent-column max + exact 0/1
        # column-selection matmul (also re-inserts the next layer's zero pad
        # columns), adjacent-row max + exact 0/1 row-selection matmul (also
        # extracts per-image rows from the stacked layout and re-inserts the
        # next layer's zero pad rows).  Rows straddling two images are junk
        # and are never selected.
        acc = jnp.dot(lhs(0), w_ref[0], preferred_element_type=f32)
        acc = acc + jnp.dot(lhs(1), w_ref[1], preferred_element_type=f32)
        acc = acc + jnp.dot(lhs(2), w_ref[2], preferred_element_type=f32)
        a = jnp.maximum(acc + bias, 0.0)                      # (M, W*c_out) f32
        hm = jnp.maximum(a[:, :-c_out], a[:, c_out:]).astype(bf16)
        dh = jnp.dot(hm, sh_ref[...], preferred_element_type=f32)
        vm = jnp.maximum(dh[:-1, :], dh[1:, :]).astype(bf16)
        return jnp.dot(sv_ref[...], vm, preferred_element_type=f32)

    def kernel(x_ref,                                         # (bb*30, 30) zero-padded, stacked images
               w1_ref, b1_ref, w2_ref, b2_ref, w3_ref, b3_ref,
               sh1_ref, sh2_ref, sh3_ref, sv1_ref, sv2_ref, sv3_ref,
               wfc1_ref, bfc1_ref, wout_ref, bout_ref,
               o_ref,                                         # (1, bb, 128)
               pad2_ref, pad3_ref):                           # VMEM scratch (f32)
        # ---- layer 1: conv(1->16) + relu + pool -> padded (bb*16, 16*16) ----
        pad2_ref[...] = conv_pool(
            lambda ky: x_ref[pl.ds(ky, M1), :].astype(bf16),
            w1_ref, b1_ref[...], sh1_ref, sv1_ref, 16)

        # ---- layer 2: conv(16->32) + relu + pool -> padded (bb*9, 9*32) -----
        pad3_ref[...] = conv_pool(
            lambda ky: pad2_ref[pl.ds(ky, M2), :].astype(bf16),
            w2_ref, b2_ref[...], sh2_ref, sv2_ref, 32)

        # ---- layer 3: conv(32->64) + relu + pool -> (3*bb, 3*64) ------------
        # sv3 groups rows as (spatial row r, image i) for the fc stage.
        q = conv_pool(
            lambda ky: pad3_ref[pl.ds(ky, M3), :].astype(bf16),
            w3_ref, b3_ref[...], sh3_ref, sv3_ref, 64)

        # ---- fc1 (576 -> 72, padded to 128 lanes) + relu --------------------
        # Accumulated over the 3 spatial rows -> no (3*bb,192)->(bb,576)
        # reshape needed; a single (bb,192)x(192,128) matmul per row.
        h = bfc1_ref[...]
        for r in range(3):
            h = h + jnp.dot(q[r * bb:(r + 1) * bb, :].astype(bf16),
                            wfc1_ref[r], preferred_element_type=f32)
        h = jnp.maximum(h, 0.0)                               # (bb, 128)

        # ---- output (72 -> 10, padded to 128 lanes) + relu (per module) -----
        logits = jnp.dot(h.astype(bf16), wout_ref[...],
                         preferred_element_type=f32) + bout_ref[...]
        o_ref[0] = jnp.maximum(logits, 0.0)                   # (bb, 128)

    return kernel


def convnet_forward(prep, x):
    """x: (B, 1, 28, 28) NCHW float32 -> (B, 10) float32."""
    B = x.shape[0]
    bb = prep["sv1"].shape[0] // 16          # per-step batch block (static)
    Bp = ((B + bb - 1) // bb) * bb           # pad batch to a multiple of bb
    G = Bp // bb

    # Zero-pad spatially (conv padding=1) and along batch, then stack images
    # along the sublane axis so each conv matmul sees M = bb*30 rows.
    x2d = jnp.pad(x[:, 0, :, :],
                  ((0, Bp - B), (1, 1), (1, 1))).reshape(Bp * 30, 30)

    names = ["w1", "b1", "w2", "b2", "w3", "b3",
             "sh1", "sh2", "sh3", "sv1", "sv2", "sv3",
             "wfc1", "bfc1", "wout", "bout"]
    weights = [prep[n] for n in names]

    def _const_spec(w):
        nd = w.ndim
        return pl.BlockSpec(w.shape, lambda b, nd=nd: (0,) * nd)

    in_specs = [pl.BlockSpec((bb * 30, 30), lambda b: (b, 0))]
    in_specs += [_const_spec(w) for w in weights]

    out = pl.pallas_call(
        _make_kernel(bb),
        out_shape=jax.ShapeDtypeStruct((G, bb, 128), jnp.float32),
        grid_spec=pltpu.PrefetchScalarGridSpec(
            num_scalar_prefetch=0,
            grid=(G,),
            in_specs=in_specs,
            out_specs=pl.BlockSpec((1, bb, 128), lambda b: (b, 0, 0)),
            scratch_shapes=[
                pltpu.VMEM((bb * 16, 16 * 16), jnp.float32),  # padded conv2 input
                pltpu.VMEM((bb * 9, 9 * 32), jnp.float32),    # padded conv3 input
            ],
        ),
        compiler_params=pltpu.CompilerParams(
            dimension_semantics=("parallel",),
            vmem_limit_bytes=24 * 1024 * 1024,
        ),
    )(x2d, *weights)
    return out.reshape(Bp, 128)[:B, :10]


# ---------------------------------------------------------------------------
# One-time weight preparation (done at init, NOT per forward call)
# ---------------------------------------------------------------------------

def prepare_params(params, bblk=4):
    """Prepack weights for a per-grid-step batch block of `bblk` images
    (bblk must be a multiple of 4 so stacked blocks are sublane aligned)."""
    if bblk % 4 != 0:
        raise ValueError("bblk must be a multiple of 4")
    f32, bf16 = jnp.float32, jnp.bfloat16

    def banded_conv_weight(w, w_in):
        # (c_out, c_in, 3, 3) -> (3, (w_in+2)*c_in, w_in*c_out): per-ky banded
        # weight so conv == 3 matmuls over the full padded row width.
        w = np.asarray(w, np.float32)
        c_out, c_in = w.shape[0], w.shape[1]
        wp = w_in + 2
        out = np.zeros((3, wp * c_in, w_in * c_out), np.float32)
        for ky in range(3):
            for kx in range(3):
                tap = w[:, :, ky, kx].T                       # (c_in, c_out)
                for wo in range(w_in):
                    ci = wo + kx                              # padded input column block
                    out[ky, ci * c_in:(ci + 1) * c_in,
                        wo * c_out:(wo + 1) * c_out] += tap
        return jnp.asarray(out, bf16)

    def col_pool_select(w_in, c, pad_out):
        # Stride-2 horizontal decimation (applied after the adjacent-column
        # max); if pad_out, also re-inserts the next layer's zero pad columns.
        wo = w_in // 2
        nb = wo + 2 * pad_out
        m = np.zeros(((w_in - 1) * c, nb * c), np.float32)
        eye = np.eye(c, dtype=np.float32)
        for j in range(wo):
            dst = j + pad_out
            m[(2 * j) * c:(2 * j + 1) * c, dst * c:(dst + 1) * c] = eye
        return jnp.asarray(m, bf16)

    def row_pool_select(h_in, hp_next):
        # Stride-2 vertical decimation on the stacked layout (applied after
        # the adjacent-row max): picks row i*(h_in+2)+2r of the pairwise-max
        # array for image i / pooled row r.  If hp_next is given, rows are
        # emitted directly in the next layer's padded-row layout (zero rows
        # where the padding goes); otherwise grouped as (r, image) for fc1.
        hp_in = h_in + 2
        ho = h_in // 2
        k = bblk * hp_in - 3                   # rows of the pairwise-max array
        if hp_next is not None:
            m = np.zeros((bblk * hp_next, k), np.float32)
            for i in range(bblk):
                for r in range(ho):
                    m[i * hp_next + 1 + r, i * hp_in + 2 * r] = 1.0
        else:
            m = np.zeros((3 * bblk, k), np.float32)
            for r in range(ho):
                for i in range(bblk):
                    m[r * bblk + i, i * hp_in + 2 * r] = 1.0
        return jnp.asarray(m, bf16)

    def conv_bias(b, w_in):
        return jnp.asarray(np.tile(np.asarray(b, np.float32), w_in)[None, :], f32)

    # fc1: columns re-permuted so the in-kernel (h, w, c) order reproduces
    # PyTorch's NCHW .view(B, -1) flatten order; outputs padded to 128 lanes.
    wfc1 = np.zeros((3, 192, 128), np.float32)
    wfc1[:, :, :72] = (np.asarray(params["fc1_w"], np.float32)
                       .reshape(72, 64, 3, 3).transpose(2, 3, 1, 0)
                       .reshape(3, 192, 72))
    bfc1 = np.zeros((1, 128), np.float32)
    bfc1[0, :72] = np.asarray(params["fc1_b"], np.float32)
    wout = np.zeros((128, 128), np.float32)
    wout[:72, :10] = np.asarray(params["out_w"], np.float32).T
    bout = np.zeros((1, 128), np.float32)
    bout[0, :10] = np.asarray(params["out_b"], np.float32)

    return {
        "w1": banded_conv_weight(params["conv1_w"], 28),
        "b1": conv_bias(params["conv1_b"], 28),
        "w2": banded_conv_weight(params["conv2_w"], 14),
        "b2": conv_bias(params["conv2_b"], 14),
        "w3": banded_conv_weight(params["conv3_w"], 7),
        "b3": conv_bias(params["conv3_b"], 7),
        "sh1": col_pool_select(28, 16, 1),     # (432, 256)
        "sh2": col_pool_select(14, 32, 1),     # (416, 288)
        "sh3": col_pool_select(7, 64, 0),      # (384, 192)
        "sv1": row_pool_select(28, 16),        # (bblk*16, bblk*30-3)
        "sv2": row_pool_select(14, 9),         # (bblk*9,  bblk*16-3)
        "sv3": row_pool_select(7, None),       # (3*bblk,  bblk*9-3)
        "wfc1": jnp.asarray(wfc1, bf16),
        "bfc1": jnp.asarray(bfc1, f32),
        "wout": jnp.asarray(wout, bf16),
        "bout": jnp.asarray(bout, f32),
    }


# ---------------------------------------------------------------------------
# Parameters (deterministic, PyTorch-style shapes) and pure-JAX reference
# ---------------------------------------------------------------------------

def init_params(key):
    ks = jax.random.split(key, 10)

    def uniform(k, shape, fan_in):
        bound = 1.0 / jnp.sqrt(float(fan_in))
        return jax.random.uniform(k, shape, jnp.float32, -bound, bound)

    return {
        "conv1_w": uniform(ks[0], (16, 1, 3, 3), 1 * 9),
        "conv1_b": uniform(ks[1], (16,), 1 * 9),
        "conv2_w": uniform(ks[2], (32, 16, 3, 3), 16 * 9),
        "conv2_b": uniform(ks[3], (32,), 16 * 9),
        "conv3_w": uniform(ks[4], (64, 32, 3, 3), 32 * 9),
        "conv3_b": uniform(ks[5], (64,), 32 * 9),
        "fc1_w": uniform(ks[6], (72, 576), 576),
        "fc1_b": uniform(ks[7], (72,), 576),
        "out_w": uniform(ks[8], (10, 72), 72),
        "out_b": uniform(ks[9], (10,), 72),
    }


def convnet_reference(params, x):
    """Plain-JAX reference mirroring the PyTorch module exactly (NCHW)."""
    def conv(x, w, b):
        y = jax.lax.conv_general_dilated(
            x, w, window_strides=(1, 1), padding=((1, 1), (1, 1)),
            dimension_numbers=("NCHW", "OIHW", "NCHW"),
            precision=jax.lax.Precision.HIGHEST)
        return jax.nn.relu(y + b[None, :, None, None])

    def pool(x):
        return jax.lax.reduce_window(x, -jnp.inf, jax.lax.max,
                                     (1, 1, 2, 2), (1, 1, 2, 2), "VALID")

    out = pool(conv(x, params["conv1_w"], params["conv1_b"]))
    out = pool(conv(out, params["conv2_w"], params["conv2_b"]))
    out = pool(conv(out, params["conv3_w"], params["conv3_b"]))
    out = out.reshape(out.shape[0], -1)
    out = jax.nn.relu(out @ params["fc1_w"].T + params["fc1_b"])
    out = jax.nn.relu(out @ params["out_w"].T + params["out_b"])
    return out


# ---------------------------------------------------------------------------

if __name__ == "__main__":
    key = jax.random.PRNGKey(0)
    pkey, xkey = jax.random.split(key)
    params = init_params(pkey)

    # batch=8 processed as 2 grid steps of 4 stacked images (keeps the grid
    # length >= 2 so both v7x TensorCores get work).
    B, BBLK = 8, 4
    prep = prepare_params(params, bblk=BBLK)

    x = jax.random.normal(xkey, (B, 1, 28, 28), jnp.float32)

    y = jax.jit(convnet_forward)(prep, x)
    jax.block_until_ready(y)

    y_ref = jax.jit(convnet_reference)(params, x)
    jax.block_until_ready(y_ref)

    assert y.shape == (B, 10) and y.dtype == jnp.float32
    assert jnp.allclose(y, y_ref, rtol=3e-2, atol=3e-2), (y, y_ref)
    print("KERNEL_OK")
</pallas_src>

<mosaic_0001>
module attributes {stable_mosaic.version = 11 : i64} {
  func.func @kernel(%arg0: i32, %arg1: memref<120x30xf32, #tpu.memory_space<vmem>>, %arg2: memref<3x30x448xbf16, #tpu.memory_space<vmem>>, %arg3: memref<1x448xf32, #tpu.memory_space<vmem>>, %arg4: memref<3x256x448xbf16, #tpu.memory_space<vmem>>, %arg5: memref<1x448xf32, #tpu.memory_space<vmem>>, %arg6: memref<3x288x448xbf16, #tpu.memory_space<vmem>>, %arg7: memref<1x448xf32, #tpu.memory_space<vmem>>, %arg8: memref<432x256xbf16, #tpu.memory_space<vmem>>, %arg9: memref<416x288xbf16, #tpu.memory_space<vmem>>, %arg10: memref<384x192xbf16, #tpu.memory_space<vmem>>, %arg11: memref<64x117xbf16, #tpu.memory_space<vmem>>, %arg12: memref<36x61xbf16, #tpu.memory_space<vmem>>, %arg13: memref<12x33xbf16, #tpu.memory_space<vmem>>, %arg14: memref<3x192x128xbf16, #tpu.memory_space<vmem>>, %arg15: memref<1x128xf32, #tpu.memory_space<vmem>>, %arg16: memref<128x128xbf16, #tpu.memory_space<vmem>>, %arg17: memref<1x128xf32, #tpu.memory_space<vmem>>, %arg18: memref<1x4x128xf32, #tpu.memory_space<vmem>>, %arg19: memref<64x256xf32, #tpu.memory_space<vmem>>, %arg20: memref<36x288xf32, #tpu.memory_space<vmem>>) attributes {dimension_semantics = [#tpu.dimension_semantics<parallel>], iteration_bounds = array<i64: 2>, scalar_prefetch = 0 : i64, scratch_operands = 2 : i64, tpu.core_type = #tpu.core_type<tc>, window_params = [{transform_indices = @transform_0, window_bounds = array<i64: 120, 30>}, {pipeline_mode = #tpu.pipeline_mode<synchronous>, transform_indices = @transform_1, window_bounds = array<i64: 3, 30, 448>}, {pipeline_mode = #tpu.pipeline_mode<synchronous>, transform_indices = @transform_2, window_bounds = array<i64: 1, 448>}, {pipeline_mode = #tpu.pipeline_mode<synchronous>, transform_indices = @transform_3, window_bounds = array<i64: 3, 256, 448>}, {pipeline_mode = #tpu.pipeline_mode<synchronous>, transform_indices = @transform_4, window_bounds = array<i64: 1, 448>}, {pipeline_mode = #tpu.pipeline_mode<synchronous>, transform_indices = @transform_5, window_bounds = array<i64: 3, 288, 448>}, {pipeline_mode = #tpu.pipeline_mode<synchronous>, transform_indices = @transform_6, window_bounds = array<i64: 1, 448>}, {pipeline_mode = #tpu.pipeline_mode<synchronous>, transform_indices = @transform_7, window_bounds = array<i64: 432, 256>}, {pipeline_mode = #tpu.pipeline_mode<synchronous>, transform_indices = @transform_8, window_bounds = array<i64: 416, 288>}, {pipeline_mode = #tpu.pipeline_mode<synchronous>, transform_indices = @transform_9, window_bounds = array<i64: 384, 192>}, {pipeline_mode = #tpu.pipeline_mode<synchronous>, transform_indices = @transform_10, window_bounds = array<i64: 64, 117>}, {pipeline_mode = #tpu.pipeline_mode<synchronous>, transform_indices = @transform_11, window_bounds = array<i64: 36, 61>}, {pipeline_mode = #tpu.pipeline_mode<synchronous>, transform_indices = @transform_12, window_bounds = array<i64: 12, 33>}, {pipeline_mode = #tpu.pipeline_mode<synchronous>, transform_indices = @transform_13, window_bounds = array<i64: 3, 192, 128>}, {pipeline_mode = #tpu.pipeline_mode<synchronous>, transform_indices = @transform_14, window_bounds = array<i64: 1, 128>}, {pipeline_mode = #tpu.pipeline_mode<synchronous>, transform_indices = @transform_15, window_bounds = array<i64: 128, 128>}, {pipeline_mode = #tpu.pipeline_mode<synchronous>, transform_indices = @transform_16, window_bounds = array<i64: 1, 128>}, {transform_indices = @transform_17, window_bounds = array<i64: 1, 4, 128>}]} {
    %c0 = arith.constant 0 : index
    %c0_0 = arith.constant 0 : index
    %0 = vector.load %arg3[%c0, %c0_0] : memref<1x448xf32, #tpu.memory_space<vmem>>, vector<1x448xf32>
    %c0_1 = arith.constant 0 : index
    %c0_2 = arith.constant 0 : index
    %1 = vector.load %arg1[%c0_1, %c0_2] : memref<120x30xf32, #tpu.memory_space<vmem>>, vector<118x30xf32>
    %2 = arith.truncf %1 : vector<118x30xf32> to vector<118x30xbf16>
    %c0_3 = arith.constant 0 : index
    %c0_4 = arith.constant 0 : index
    %c0_5 = arith.constant 0 : index
    %3 = vector.load %arg2[%c0_3, %c0_4, %c0_5] : memref<3x30x448xbf16, #tpu.memory_space<vmem>>, vector<1x30x448xbf16>
    %4 = vector.shape_cast %3 : vector<1x30x448xbf16> to vector<30x448xbf16>
    %cst = arith.constant dense<0.000000e+00> : vector<118x448xf32>
    %5 = tpu.matmul %2, %4, %cst {dimension_numbers = #tpu.dot_dimension_numbers<[1], [0], [0], [1], [0, 0, 1, 1], [], []>} : vector<118x30xbf16>, vector<30x448xbf16>, vector<118x448xf32> -> vector<118x448xf32>
    %c1 = arith.constant 1 : index
    %c0_6 = arith.constant 0 : index
    %6 = vector.load %arg1[%c1, %c0_6] : memref<120x30xf32, #tpu.memory_space<vmem>>, vector<118x30xf32>
    %7 = arith.truncf %6 : vector<118x30xf32> to vector<118x30xbf16>
    %c1_7 = arith.constant 1 : index
    %c0_8 = arith.constant 0 : index
    %c0_9 = arith.constant 0 : index
    %8 = vector.load %arg2[%c1_7, %c0_8, %c0_9] : memref<3x30x448xbf16, #tpu.memory_space<vmem>>, vector<1x30x448xbf16>
    %9 = vector.shape_cast %8 : vector<1x30x448xbf16> to vector<30x448xbf16>
    %cst_10 = arith.constant dense<0.000000e+00> : vector<118x448xf32>
    %10 = tpu.matmul %7, %9, %cst_10 {dimension_numbers = #tpu.dot_dimension_numbers<[1], [0], [0], [1], [0, 0, 1, 1], [], []>} : vector<118x30xbf16>, vector<30x448xbf16>, vector<118x448xf32> -> vector<118x448xf32>
    %11 = arith.addf %5, %10 : vector<118x448xf32>
    %c2 = arith.constant 2 : index
    %c0_11 = arith.constant 0 : index
    %12 = vector.load %arg1[%c2, %c0_11] : memref<120x30xf32, #tpu.memory_space<vmem>>, vector<118x30xf32>
    %13 = arith.truncf %12 : vector<118x30xf32> to vector<118x30xbf16>
    %c2_12 = arith.constant 2 : index
    %c0_13 = arith.constant 0 : index
    %c0_14 = arith.constant 0 : index
    %14 = vector.load %arg2[%c2_12, %c0_13, %c0_14] : memref<3x30x448xbf16, #tpu.memory_space<vmem>>, vector<1x30x448xbf16>
    %15 = vector.shape_cast %14 : vector<1x30x448xbf16> to vector<30x448xbf16>
    %cst_15 = arith.constant dense<0.000000e+00> : vector<118x448xf32>
    %16 = tpu.matmul %13, %15, %cst_15 {dimension_numbers = #tpu.dot_dimension_numbers<[1], [0], [0], [1], [0, 0, 1, 1], [], []>} : vector<118x30xbf16>, vector<30x448xbf16>, vector<118x448xf32> -> vector<118x448xf32>
    %17 = arith.addf %11, %16 : vector<118x448xf32>
    %18 = vector.broadcast %0 : vector<1x448xf32> to vector<118x448xf32>
    %19 = arith.addf %17, %18 : vector<118x448xf32>
    %cst_16 = arith.constant 0.000000e+00 : f32
    %20 = vector.broadcast %cst_16 : f32 to vector<118x448xf32>
    %21 = arith.maximumf %19, %20 : vector<118x448xf32>
    %22 = vector.extract_strided_slice %21 {offsets = [0, 0], sizes = [118, 432], strides = [1, 1]} : vector<118x448xf32> to vector<118x432xf32>
    %23 = vector.extract_strided_slice %21 {offsets = [0, 16], sizes = [118, 432], strides = [1, 1]} : vector<118x448xf32> to vector<118x432xf32>
    %24 = arith.maximumf %22, %23 : vector<118x432xf32>
    %25 = arith.truncf %24 : vector<118x432xf32> to vector<118x432xbf16>
    %c0_17 = arith.constant 0 : index
    %c0_18 = arith.constant 0 : index
    %26 = vector.load %arg8[%c0_17, %c0_18] : memref<432x256xbf16, #tpu.memory_space<vmem>>, vector<432x256xbf16>
    %cst_19 = arith.constant dense<0.000000e+00> : vector<118x256xf32>
    %27 = tpu.matmul %25, %26, %cst_19 {dimension_numbers = #tpu.dot_dimension_numbers<[1], [0], [0], [1], [0, 0, 1, 1], [], []>} : vector<118x432xbf16>, vector<432x256xbf16>, vector<118x256xf32> -> vector<118x256xf32>
    %28 = vector.extract_strided_slice %27 {offsets = [0, 0], sizes = [117, 256], strides = [1, 1]} : vector<118x256xf32> to vector<117x256xf32>
    %29 = vector.extract_strided_slice %27 {offsets = [1, 0], sizes = [117, 256], strides = [1, 1]} : vector<118x256xf32> to vector<117x256xf32>
    %30 = arith.maximumf %28, %29 : vector<117x256xf32>
    %31 = arith.truncf %30 : vector<117x256xf32> to vector<117x256xbf16>
    %c0_20 = arith.constant 0 : index
    %c0_21 = arith.constant 0 : index
    %32 = vector.load %arg11[%c0_20, %c0_21] : memref<64x117xbf16, #tpu.memory_space<vmem>>, vector<64x117xbf16>
    %cst_22 = arith.constant dense<0.000000e+00> : vector<64x256xf32>
    %33 = tpu.matmul %32, %31, %cst_22 {dimension_numbers = #tpu.dot_dimension_numbers<[1], [0], [0], [1], [0, 0, 1, 1], [], []>} : vector<64x117xbf16>, vector<117x256xbf16>, vector<64x256xf32> -> vector<64x256xf32>
    %c0_23 = arith.constant 0 : index
    %c0_24 = arith.constant 0 : index
    %34 = vector.load %arg19[%c0_23, %c0_24] : memref<64x256xf32, #tpu.memory_space<vmem>>, vector<64x256xf32>
    tpu.vector_store %arg19[%c0_23, %c0_24], %33 {strides = array<i32>} : memref<64x256xf32, #tpu.memory_space<vmem>>, vector<64x256xf32>,
    %c0_25 = arith.constant 0 : index
    %c0_26 = arith.constant 0 : index
    %35 = vector.load %arg5[%c0_25, %c0_26] : memref<1x448xf32, #tpu.memory_space<vmem>>, vector<1x448xf32>
    %c0_27 = arith.constant 0 : index
    %c0_28 = arith.constant 0 : index
    %36 = vector.load %arg19[%c0_27, %c0_28] : memref<64x256xf32, #tpu.memory_space<vmem>>, vector<62x256xf32>
    %37 = arith.truncf %36 : vector<62x256xf32> to vector<62x256xbf16>
    %c0_29 = arith.constant 0 : index
    %c0_30 = arith.constant 0 : index
    %c0_31 = arith.constant 0 : index
    %38 = vector.load %arg4[%c0_29, %c0_30, %c0_31] : memref<3x256x448xbf16, #tpu.memory_space<vmem>>, vector<1x256x448xbf16>
    %39 = vector.shape_cast %38 : vector<1x256x448xbf16> to vector<256x448xbf16>
    %cst_32 = arith.constant dense<0.000000e+00> : vector<62x448xf32>
    %40 = tpu.matmul %37, %39, %cst_32 {dimension_numbers = #tpu.dot_dimension_numbers<[1], [0], [0], [1], [0, 0, 1, 1], [], []>} : vector<62x256xbf16>, vector<256x448xbf16>, vector<62x448xf32> -> vector<62x448xf32>
    %c1_33 = arith.constant 1 : index
    %c0_34 = arith.constant 0 : index
    %41 = vector.load %arg19[%c1_33, %c0_34] : memref<64x256xf32, #tpu.memory_space<vmem>>, vector<62x256xf32>
    %42 = arith.truncf %41 : vector<62x256xf32> to vector<62x256xbf16>
    %c1_35 = arith.constant 1 : index
    %c0_36 = arith.constant 0 : index
    %c0_37 = arith.constant 0 : index
    %43 = vector.load %arg4[%c1_35, %c0_36, %c0_37] : memref<3x256x448xbf16, #tpu.memory_space<vmem>>, vector<1x256x448xbf16>
    %44 = vector.shape_cast %43 : vector<1x256x448xbf16> to vector<256x448xbf16>
    %cst_38 = arith.constant dense<0.000000e+00> : vector<62x448xf32>
    %45 = tpu.matmul %42, %44, %cst_38 {dimension_numbers = #tpu.dot_dimension_numbers<[1], [0], [0], [1], [0, 0, 1, 1], [], []>} : vector<62x256xbf16>, vector<256x448xbf16>, vector<62x448xf32> -> vector<62x448xf32>
    %46 = arith.addf %40, %45 : vector<62x448xf32>
    %c2_39 = arith.constant 2 : index
    %c0_40 = arith.constant 0 : index
    %47 = vector.load %arg19[%c2_39, %c0_40] : memref<64x256xf32, #tpu.memory_space<vmem>>, vector<62x256xf32>
    %48 = arith.truncf %47 : vector<62x256xf32> to vector<62x256xbf16>
    %c2_41 = arith.constant 2 : index
    %c0_42 = arith.constant 0 : index
    %c0_43 = arith.constant 0 : index
    %49 = vector.load %arg4[%c2_41, %c0_42, %c0_43] : memref<3x256x448xbf16, #tpu.memory_space<vmem>>, vector<1x256x448xbf16>
    %50 = vector.shape_cast %49 : vector<1x256x448xbf16> to vector<256x448xbf16>
    %cst_44 = arith.constant dense<0.000000e+00> : vector<62x448xf32>
    %51 = tpu.matmul %48, %50, %cst_44 {dimension_numbers = #tpu.dot_dimension_numbers<[1], [0], [0], [1], [0, 0, 1, 1], [], []>} : vector<62x256xbf16>, vector<256x448xbf16>, vector<62x448xf32> -> vector<62x448xf32>
    %52 = arith.addf %46, %51 : vector<62x448xf32>
    %53 = vector.broadcast %35 : vector<1x448xf32> to vector<62x448xf32>
    %54 = arith.addf %52, %53 : vector<62x448xf32>
    %cst_45 = arith.constant 0.000000e+00 : f32
    %55 = vector.broadcast %cst_45 : f32 to vector<62x448xf32>
    %56 = arith.maximumf %54, %55 : vector<62x448xf32>
    %57 = vector.extract_strided_slice %56 {offsets = [0, 0], sizes = [62, 416], strides = [1, 1]} : vector<62x448xf32> to vector<62x416xf32>
    %58 = vector.extract_strided_slice %56 {offsets = [0, 32], sizes = [62, 416], strides = [1, 1]} : vector<62x448xf32> to vector<62x416xf32>
    %59 = arith.maximumf %57, %58 : vector<62x416xf32>
    %60 = arith.truncf %59 : vector<62x416xf32> to vector<62x416xbf16>
    %c0_46 = arith.constant 0 : index
    %c0_47 = arith.constant 0 : index
    %61 = vector.load %arg9[%c0_46, %c0_47] : memref<416x288xbf16, #tpu.memory_space<vmem>>, vector<416x288xbf16>
    %cst_48 = arith.constant dense<0.000000e+00> : vector<62x288xf32>
    %62 = tpu.matmul %60, %61, %cst_48 {dimension_numbers = #tpu.dot_dimension_numbers<[1], [0], [0], [1], [0, 0, 1, 1], [], []>} : vector<62x416xbf16>, vector<416x288xbf16>, vector<62x288xf32> -> vector<62x288xf32>
    %63 = vector.extract_strided_slice %62 {offsets = [0, 0], sizes = [61, 288], strides = [1, 1]} : vector<62x288xf32> to vector<61x288xf32>
    %64 = vector.extract_strided_slice %62 {offsets = [1, 0], sizes = [61, 288], strides = [1, 1]} : vector<62x288xf32> to vector<61x288xf32>
    %65 = arith.maximumf %63, %64 : vector<61x288xf32>
    %66 = arith.truncf %65 : vector<61x288xf32> to vector<61x288xbf16>
    %c0_49 = arith.constant 0 : index
    %c0_50 = arith.constant 0 : index
    %67 = vector.load %arg12[%c0_49, %c0_50] : memref<36x61xbf16, #tpu.memory_space<vmem>>, vector<36x61xbf16>
    %cst_51 = arith.constant dense<0.000000e+00> : vector<36x288xf32>
    %68 = tpu.matmul %67, %66, %cst_51 {dimension_numbers = #tpu.dot_dimension_numbers<[1], [0], [0], [1], [0, 0, 1, 1], [], []>} : vector<36x61xbf16>, vector<61x288xbf16>, vector<36x288xf32> -> vector<36x288xf32>
    %c0_52 = arith.constant 0 : index
    %c0_53 = arith.constant 0 : index
    %69 = vector.load %arg20[%c0_52, %c0_53] : memref<36x288xf32, #tpu.memory_space<vmem>>, vector<36x288xf32>
    tpu.vector_store %arg20[%c0_52, %c0_53], %68 {strides = array<i32>} : memref<36x288xf32, #tpu.memory_space<vmem>>, vector<36x288xf32>,
    %c0_54 = arith.constant 0 : index
    %c0_55 = arith.constant 0 : index
    %70 = vector.load %arg7[%c0_54, %c0_55] : memref<1x448xf32, #tpu.memory_space<vmem>>, vector<1x448xf32>
    %c0_56 = arith.constant 0 : index
    %c0_57 = arith.constant 0 : index
    %71 = vector.load %arg20[%c0_56, %c0_57] : memref<36x288xf32, #tpu.memory_space<vmem>>, vector<34x288xf32>
    %72 = arith.truncf %71 : vector<34x288xf32> to vector<34x288xbf16>
    %c0_58 = arith.constant 0 : index
    %c0_59 = arith.constant 0 : index
    %c0_60 = arith.constant 0 : index
    %73 = vector.load %arg6[%c0_58, %c0_59, %c0_60] : memref<3x288x448xbf16, #tpu.memory_space<vmem>>, vector<1x288x448xbf16>
    %74 = vector.shape_cast %73 : vector<1x288x448xbf16> to vector<288x448xbf16>
    %cst_61 = arith.constant dense<0.000000e+00> : vector<34x448xf32>
    %75 = tpu.matmul %72, %74, %cst_61 {dimension_numbers = #tpu.dot_dimension_numbers<[1], [0], [0], [1], [0, 0, 1, 1], [], []>} : vector<34x288xbf16>, vector<288x448xbf16>, vector<34x448xf32> -> vector<34x448xf32>
    %c1_62 = arith.constant 1 : index
    %c0_63 = arith.constant 0 : index
    %76 = vector.load %arg20[%c1_62, %c0_63] : memref<36x288xf32, #tpu.memory_space<vmem>>, vector<34x288xf32>
    %77 = arith.truncf %76 : vector<34x288xf32> to vector<34x288xbf16>
    %c1_64 = arith.constant 1 : index
    %c0_65 = arith.constant 0 : index
    %c0_66 = arith.constant 0 : index
    %78 = vector.load %arg6[%c1_64, %c0_65, %c0_66] : memref<3x288x448xbf16, #tpu.memory_space<vmem>>, vector<1x288x448xbf16>
    %79 = vector.shape_cast %78 : vector<1x288x448xbf16> to vector<288x448xbf16>
    %cst_67 = arith.constant dense<0.000000e+00> : vector<34x448xf32>
    %80 = tpu.matmul %77, %79, %cst_67 {dimension_numbers = #tpu.dot_dimension_numbers<[1], [0], [0], [1], [0, 0, 1, 1], [], []>} : vector<34x288xbf16>, vector<288x448xbf16>, vector<34x448xf32> -> vector<34x448xf32>
    %81 = arith.addf %75, %80 : vector<34x448xf32>
    %c2_68 = arith.constant 2 : index
    %c0_69 = arith.constant 0 : index
    %82 = vector.load %arg20[%c2_68, %c0_69] : memref<36x288xf32, #tpu.memory_space<vmem>>, vector<34x288xf32>
    %83 = arith.truncf %82 : vector<34x288xf32> to vector<34x288xbf16>
    %c2_70 = arith.constant 2 : index
    %c0_71 = arith.constant 0 : index
    %c0_72 = arith.constant 0 : index
    %84 = vector.load %arg6[%c2_70, %c0_71, %c0_72] : memref<3x288x448xbf16, #tpu.memory_space<vmem>>, vector<1x288x448xbf16>
    %85 = vector.shape_cast %84 : vector<1x288x448xbf16> to vector<288x448xbf16>
    %cst_73 = arith.constant dense<0.000000e+00> : vector<34x448xf32>
    %86 = tpu.matmul %83, %85, %cst_73 {dimension_numbers = #tpu.dot_dimension_numbers<[1], [0], [0], [1], [0, 0, 1, 1], [], []>} : vector<34x288xbf16>, vector<288x448xbf16>, vector<34x448xf32> -> vector<34x448xf32>
    %87 = arith.addf %81, %86 : vector<34x448xf32>
    %88 = vector.broadcast %70 : vector<1x448xf32> to vector<34x448xf32>
    %89 = arith.addf %87, %88 : vector<34x448xf32>
    %cst_74 = arith.constant 0.000000e+00 : f32
    %90 = vector.broadcast %cst_74 : f32 to vector<34x448xf32>
    %91 = arith.maximumf %89, %90 : vector<34x448xf32>
    %92 = vector.extract_strided_slice %91 {offsets = [0, 0], sizes = [34, 384], strides = [1, 1]} : vector<34x448xf32> to vector<34x384xf32>
    %93 = vector.extract_strided_slice %91 {offsets = [0, 64], sizes = [34, 384], strides = [1, 1]} : vector<34x448xf32> to vector<34x384xf32>
    %94 = arith.maximumf %92, %93 : vector<34x384xf32>
    %95 = arith.truncf %94 : vector<34x384xf32> to vector<34x384xbf16>
    %c0_75 = arith.constant 0 : index
    %c0_76 = arith.constant 0 : index
    %96 = vector.load %arg10[%c0_75, %c0_76] : memref<384x192xbf16, #tpu.memory_space<vmem>>, vector<384x192xbf16>
    %cst_77 = arith.constant dense<0.000000e+00> : vector<34x192xf32>
    %97 = tpu.matmul %95, %96, %cst_77 {dimension_numbers = #tpu.dot_dimension_numbers<[1], [0], [0], [1], [0, 0, 1, 1], [], []>} : vector<34x384xbf16>, vector<384x192xbf16>, vector<34x192xf32> -> vector<34x192xf32>
    %98 = vector.extract_strided_slice %97 {offsets = [0, 0], sizes = [33, 192], strides = [1, 1]} : vector<34x192xf32> to vector<33x192xf32>
    %99 = vector.extract_strided_slice %97 {offsets = [1, 0], sizes = [33, 192], strides = [1, 1]} : vector<34x192xf32> to vector<33x192xf32>
    %100 = arith.maximumf %98, %99 : vector<33x192xf32>
    %101 = arith.truncf %100 : vector<33x192xf32> to vector<33x192xbf16>
    %c0_78 = arith.constant 0 : index
    %c0_79 = arith.constant 0 : index
    %102 = vector.load %arg13[%c0_78, %c0_79] : memref<12x33xbf16, #tpu.memory_space<vmem>>, vector<12x33xbf16>
    %cst_80 = arith.constant dense<0.000000e+00> : vector<12x192xf32>
    %103 = tpu.matmul %102, %101, %cst_80 {dimension_numbers = #tpu.dot_dimension_numbers<[1], [0], [0], [1], [0, 0, 1, 1], [], []>} : vector<12x33xbf16>, vector<33x192xbf16>, vector<12x192xf32> -> vector<12x192xf32>
    %c0_81 = arith.constant 0 : index
    %c0_82 = arith.constant 0 : index
    %104 = vector.load %arg15[%c0_81, %c0_82] : memref<1x128xf32, #tpu.memory_space<vmem>>, vector<1x128xf32>
    %105 = vector.extract_strided_slice %103 {offsets = [0, 0], sizes = [4, 192], strides = [1, 1]} : vector<12x192xf32> to vector<4x192xf32>
    %106 = arith.truncf %105 : vector<4x192xf32> to vector<4x192xbf16>
    %c0_83 = arith.constant 0 : index
    %c0_84 = arith.constant 0 : index
    %c0_85 = arith.constant 0 : index
    %107 = vector.load %arg14[%c0_83, %c0_84, %c0_85] : memref<3x192x128xbf16, #tpu.memory_space<vmem>>, vector<1x192x128xbf16>
    %108 = vector.shape_cast %107 : vector<1x192x128xbf16> to vector<192x128xbf16>
    %cst_86 = arith.constant dense<0.000000e+00> : vector<4x128xf32>
    %109 = tpu.matmul %106, %108, %cst_86 {dimension_numbers = #tpu.dot_dimension_numbers<[1], [0], [0], [1], [0, 0, 1, 1], [], []>} : vector<4x192xbf16>, vector<192x128xbf16>, vector<4x128xf32> -> vector<4x128xf32>
    %110 = vector.broadcast %104 : vector<1x128xf32> to vector<4x128xf32>
    %111 = arith.addf %110, %109 : vector<4x128xf32>
    %112 = vector.extract_strided_slice %103 {offsets = [4, 0], sizes = [4, 192], strides = [1, 1]} : vector<12x192xf32> to vector<4x192xf32>
    %113 = arith.truncf %112 : vector<4x192xf32> to vector<4x192xbf16>
    %c1_87 = arith.constant 1 : index
    %c0_88 = arith.constant 0 : index
    %c0_89 = arith.constant 0 : index
    %114 = vector.load %arg14[%c1_87, %c0_88, %c0_89] : memref<3x192x128xbf16, #tpu.memory_space<vmem>>, vector<1x192x128xbf16>
    %115 = vector.shape_cast %114 : vector<1x192x128xbf16> to vector<192x128xbf16>
    %cst_90 = arith.constant dense<0.000000e+00> : vector<4x128xf32>
    %116 = tpu.matmul %113, %115, %cst_90 {dimension_numbers = #tpu.dot_dimension_numbers<[1], [0], [0], [1], [0, 0, 1, 1], [], []>} : vector<4x192xbf16>, vector<192x128xbf16>, vector<4x128xf32> -> vector<4x128xf32>
    %117 = arith.addf %111, %116 : vector<4x128xf32>
    %118 = vector.extract_strided_slice %103 {offsets = [8, 0], sizes = [4, 192], strides = [1, 1]} : vector<12x192xf32> to vector<4x192xf32>
    %119 = arith.truncf %118 : vector<4x192xf32> to vector<4x192xbf16>
    %c2_91 = arith.constant 2 : index
    %c0_92 = arith.constant 0 : index
    %c0_93 = arith.constant 0 : index
    %120 = vector.load %arg14[%c2_91, %c0_92, %c0_93] : memref<3x192x128xbf16, #tpu.memory_space<vmem>>, vector<1x192x128xbf16>
    %121 = vector.shape_cast %120 : vector<1x192x128xbf16> to vector<192x128xbf16>
    %cst_94 = arith.constant dense<0.000000e+00> : vector<4x128xf32>
    %122 = tpu.matmul %119, %121, %cst_94 {dimension_numbers = #tpu.dot_dimension_numbers<[1], [0], [0], [1], [0, 0, 1, 1], [], []>} : vector<4x192xbf16>, vector<192x128xbf16>, vector<4x128xf32> -> vector<4x128xf32>
    %123 = arith.addf %117, %122 : vector<4x128xf32>
    %cst_95 = arith.constant 0.000000e+00 : f32
    %124 = vector.broadcast %cst_95 : f32 to vector<4x128xf32>
    %125 = arith.maximumf %123, %124 : vector<4x128xf32>
    %126 = arith.truncf %125 : vector<4x128xf32> to vector<4x128xbf16>
    %c0_96 = arith.constant 0 : index
    %c0_97 = arith.constant 0 : index
    %127 = vector.load %arg16[%c0_96, %c0_97] : memref<128x128xbf16, #tpu.memory_space<vmem>>, vector<128x128xbf16>
    %cst_98 = arith.constant dense<0.000000e+00> : vector<4x128xf32>
    %128 = tpu.matmul %126, %127, %cst_98 {dimension_numbers = #tpu.dot_dimension_numbers<[1], [0], [0], [1], [0, 0, 1, 1], [], []>} : vector<4x128xbf16>, vector<128x128xbf16>, vector<4x128xf32> -> vector<4x128xf32>
    %c0_99 = arith.constant 0 : index
    %c0_100 = arith.constant 0 : index
    %129 = vector.load %arg17[%c0_99, %c0_100] : memref<1x128xf32, #tpu.memory_space<vmem>>, vector<1x128xf32>
    %130 = vector.broadcast %129 : vector<1x128xf32> to vector<4x128xf32>
    %131 = arith.addf %128, %130 : vector<4x128xf32>
    %cst_101 = arith.constant 0.000000e+00 : f32
    %132 = vector.broadcast %cst_101 : f32 to vector<4x128xf32>
    %133 = arith.maximumf %131, %132 : vector<4x128xf32>
    %c0_102 = arith.constant 0 : index
    %c0_103 = arith.constant 0 : index
    %c0_104 = arith.constant 0 : index
    %134 = vector.load %arg18[%c0_102, %c0_103, %c0_104] : memref<1x4x128xf32, #tpu.memory_space<vmem>>, vector<1x4x128xf32>
    %135 = vector.shape_cast %134 : vector<1x4x128xf32> to vector<4x128xf32>
    %136 = vector.shape_cast %133 : vector<4x128xf32> to vector<1x4x128xf32>
    tpu.vector_store %arg18[%c0_102, %c0_103, %c0_104], %136 {strides = array<i32>} : memref<1x4x128xf32, #tpu.memory_space<vmem>>, vector<1x4x128xf32>,
    return
  }
  func.func @transform_0(%arg0: i32) -> (i32, i32) {
    %c0_i32 = arith.constant 0 : i32
    %c0_i32_0 = arith.constant 0 : i32
    return %arg0, %c0_i32 : i32, i32
  }
  func.func @transform_1(%arg0: i32) -> (i32, i32, i32) {
    %c0_i32 = arith.constant 0 : i32
    %c0_i32_0 = arith.constant 0 : i32
    %c0_i32_1 = arith.constant 0 : i32
    %c0_i32_2 = arith.constant 0 : i32
    return %c0_i32, %c0_i32_0, %c0_i32_1 : i32, i32, i32
  }
  func.func @transform_2(%arg0: i32) -> (i32, i32) {
    %c0_i32 = arith.constant 0 : i32
    %c0_i32_0 = arith.constant 0 : i32
    %c0_i32_1 = arith.constant 0 : i32
    return %c0_i32, %c0_i32_0 : i32, i32
  }
  func.func @transform_3(%arg0: i32) -> (i32, i32, i32) {
    %c0_i32 = arith.constant 0 : i32
    %c0_i32_0 = arith.constant 0 : i32
    %c0_i32_1 = arith.constant 0 : i32
    %c0_i32_2 = arith.constant 0 : i32
    return %c0_i32, %c0_i32_0, %c0_i32_1 : i32, i32, i32
  }
  func.func @transform_4(%arg0: i32) -> (i32, i32) {
    %c0_i32 = arith.constant 0 : i32
    %c0_i32_0 = arith.constant 0 : i32
    %c0_i32_1 = arith.constant 0 : i32
    return %c0_i32, %c0_i32_0 : i32, i32
  }
  func.func @transform_5(%arg0: i32) -> (i32, i32, i32) {
    %c0_i32 = arith.constant 0 : i32
    %c0_i32_0 = arith.constant 0 : i32
    %c0_i32_1 = arith.constant 0 : i32
    %c0_i32_2 = arith.constant 0 : i32
    return %c0_i32, %c0_i32_0, %c0_i32_1 : i32, i32, i32
  }
  func.func @transform_6(%arg0: i32) -> (i32, i32) {
    %c0_i32 = arith.constant 0 : i32
    %c0_i32_0 = arith.constant 0 : i32
    %c0_i32_1 = arith.constant 0 : i32
    return %c0_i32, %c0_i32_0 : i32, i32
  }
  func.func @transform_7(%arg0: i32) -> (i32, i32) {
    %c0_i32 = arith.constant 0 : i32
    %c0_i32_0 = arith.constant 0 : i32
    %c0_i32_1 = arith.constant 0 : i32
    return %c0_i32, %c0_i32_0 : i32, i32
  }
  func.func @transform_8(%arg0: i32) -> (i32, i32) {
    %c0_i32 = arith.constant 0 : i32
    %c0_i32_0 = arith.constant 0 : i32
    %c0_i32_1 = arith.constant 0 : i32
    return %c0_i32, %c0_i32_0 : i32, i32
  }
  func.func @transform_9(%arg0: i32) -> (i32, i32) {
    %c0_i32 = arith.constant 0 : i32
    %c0_i32_0 = arith.constant 0 : i32
    %c0_i32_1 = arith.constant 0 : i32
    return %c0_i32, %c0_i32_0 : i32, i32
  }
  func.func @transform_10(%arg0: i32) -> (i32, i32) {
    %c0_i32 = arith.constant 0 : i32
    %c0_i32_0 = arith.constant 0 : i32
    %c0_i32_1 = arith.constant 0 : i32
    return %c0_i32, %c0_i32_0 : i32, i32
  }
  func.func @transform_11(%arg0: i32) -> (i32, i32) {
    %c0_i32 = arith.constant 0 : i32
    %c0_i32_0 = arith.constant 0 : i32
    %c0_i32_1 = arith.constant 0 : i32
    return %c0_i32, %c0_i32_0 : i32, i32
  }
  func.func @transform_12(%arg0: i32) -> (i32, i32) {
    %c0_i32 = arith.constant 0 : i32
    %c0_i32_0 = arith.constant 0 : i32
    %c0_i32_1 = arith.constant 0 : i32
    return %c0_i32, %c0_i32_0 : i32, i32
  }
  func.func @transform_13(%arg0: i32) -> (i32, i32, i32) {
    %c0_i32 = arith.constant 0 : i32
    %c0_i32_0 = arith.constant 0 : i32
    %c0_i32_1 = arith.constant 0 : i32
    %c0_i32_2 = arith.constant 0 : i32
    return %c0_i32, %c0_i32_0, %c0_i32_1 : i32, i32, i32
  }
  func.func @transform_14(%arg0: i32) -> (i32, i32) {
    %c0_i32 = arith.constant 0 : i32
    %c0_i32_0 = arith.constant 0 : i32
    %c0_i32_1 = arith.constant 0 : i32
    return %c0_i32, %c0_i32_0 : i32, i32
  }
  func.func @transform_15(%arg0: i32) -> (i32, i32) {
    %c0_i32 = arith.constant 0 : i32
    %c0_i32_0 = arith.constant 0 : i32
    %c0_i32_1 = arith.constant 0 : i32
    return %c0_i32, %c0_i32_0 : i32, i32
  }
  func.func @transform_16(%arg0: i32) -> (i32, i32) {
    %c0_i32 = arith.constant 0 : i32
    %c0_i32_0 = arith.constant 0 : i32
    %c0_i32_1 = arith.constant 0 : i32
    return %c0_i32, %c0_i32_0 : i32, i32
  }
  func.func @transform_17(%arg0: i32) -> (i32, i32, i32) {
    %c0_i32 = arith.constant 0 : i32
    %c0_i32_0 = arith.constant 0 : i32
    %c0_i32_1 = arith.constant 0 : i32
    return %arg0, %c0_i32, %c0_i32_0 : i32, i32, i32
  }
}

</mosaic_0001>

<bundles_post_ra>
// kernel: convnet_forward.1
= control target key start
LH: loop header
LB: loop body
LE: loop exit
PB: predicated region body
PF: predicated region fallthrough
CT: control target
= control target key end

     0   :  { %s16781_s0 = inlined_call_operand.vmem [shape: f32[240,30], index: 0, kind: input, shape index: {}]   ;;  %s16782_s1 = inlined_call_operand.vmem [shape: bf16[3,30,448], index: 1, kind: input, shape index: {}]   ;;  %s16783_s2 = inlined_call_operand.vmem [shape: f32[1,448], index: 2, kind: input, shape index: {}]   ;;  %s16784_s3 = inlined_call_operand.vmem [shape: bf16[3,256,448], index: 3, kind: input, shape index: {}]   ;;  %s16785_s4 = inlined_call_operand.vmem [shape: f32[1,448], index: 4, kind: input, shape index: {}]   ;;  %s16786_s5 = inlined_call_operand.vmem [shape: bf16[3,288,448], index: 5, kind: input, shape index: {}]   ;;  %s16787_s6 = inlined_call_operand.vmem [shape: f32[1,448], index: 6, kind: input, shape index: {}]   ;;  %s16788_s7 = inlined_call_operand.vmem [shape: bf16[432,256], index: 7, kind: input, shape index: {}]   ;;  %s16789_s8 = inlined_call_operand.vmem [shape: bf16[416,288], index: 8, kind: input, shape index: {}]   ;;  %s16790_s9 = inlined_call_operand.vmem [shape: bf16[384,192], index: 9, kind: input, shape index: {}]   ;;  %s16791_s10 = inlined_call_operand.vmem [shape: bf16[64,117], index: 10, kind: input, shape index: {}]   ;;  %s16792_s11 = inlined_call_operand.vmem [shape: bf16[36,61], index: 11, kind: input, shape index: {}]   ;;  %s16793_s12 = inlined_call_operand.vmem [shape: bf16[12,33], index: 12, kind: input, shape index: {}]   ;;  %s16794_s13 = inlined_call_operand.vmem [shape: bf16[3,192,128], index: 13, kind: input, shape index: {}]   ;;  %s16795_s14 = inlined_call_operand.vmem [shape: f32[1,128], index: 14, kind: input, shape index: {}]   ;;  %s16796_s15 = inlined_call_operand.vmem [shape: bf16[128,128], index: 15, kind: input, shape index: {}]   ;;  %s16797_s16 = inlined_call_operand.vmem [shape: f32[1,128], index: 16, kind: input, shape index: {}]   ;;  %s16798_s17 = inlined_call_operand.hbm [shape: f32[2,4,128], index: 17, kind: output, shape index: {}]  }
   0x1   :  { %16919 = sst [smem:[#allocation32_spill]] %s16781_s0 }
   0x2   :  { %16920 = sst [smem:[#allocation33_spill]] %s16782_s1 }
   0x3   :  { %16921 = sst [smem:[#allocation34_spill]] %s16783_s2 }
   0x4   :  { %22 = vsyncpa [#allocation5], 0 }
   0x5   :  { %24 = vsyncpa [#allocation5 + $0x1], 0  ;;  %s12681_s24 = smov 0   ;;  %s12683_s25 = smov 0  }
   0x6   :  { %s12685_s26 = smov 0   ;;  %s12687_s27 = smov 0  }
   0x7 LB: > { %16922 = sst [smem:[#allocation7_spill]] %s12569_s24  ;;  %s12702_s28 = sadd.s32 4294967295, %s12581_s27   ;;  %s12581_s27 = sphi %s12687_s27, %s17065_s27   ;;  %s12577_s26 = sphi %s12685_s26, %s17067_s26   ;;  %s12573_s25 = sphi %s12683_s25, %s17069_s25   ;;  %s12569_s24 = sphi %s12681_s24, %s17068_s24  }
   0x8   : > { %16923 = sst [smem:[#allocation8_spill]] %s12577_s26  ;;  %s9707_s29 = sadd.s32 4294967294, %s12581_s27  }
   0x9   : > { %s12706_s0 = sadd.s32 1, %s12581_s27   ;;  %s399_s30 = sadd.s32 1, %s12577_s26 }
   0xa   : > { %16924 = sst [smem:[#allocation9_spill]] %s12706_s0  ;;  %s396_s18 = ssub.s32 %s12581_s27, %s12706_s0 }
   0xb   : > { %p409_p0 = scmp.ne.s32.totalorder %s12577_s26, %s12573_s25  ;;  %p397_p1 = scmp.eq.s32.totalorder %s396_s18, 0 }
   0xc   : > { %p410_p2 = scmp.eq.s32.totalorder %s12702_s28, 1  ;;  %p415_p3 = scmp.ne.s32.totalorder %s12573_s25, %s12569_s24 }
   0xd   : > { %p416_p4 = scmp.eq.s32.totalorder %s9707_s29, 1  ;;  %p9710_p7 = scmp.ge.s32.totalorder %s12581_s27, 1 }
   0xe   : > { %s12717_s19 = scalar_select %p397_p1, %s12577_s26, %s399_s30  }
   0xf   : > { %p12719_p5 = por %p410_p2, %p409_p0  ;;  %p12723_p6 = por %p416_p4, %p415_p3 }
  0x10   : > { %16925 = sst [smem:[#allocation10_spill]] %s12717_s19  ;;  %p491_p8 = scmp.lt.s32.totalorder %s12581_s27, 3 }
  0x11   : > { %s16927_s20 = scalar_select %p12723_p6, 1, 0 }
  0x12   : > { %p492_p9 = pnand %p9710_p7, %p491_p8 }
  0x13   : > { %16928 = sst [smem:[#allocation11_spill]] %s16927_s20 }
  0x14   : > { %495 = sbr.rel (%p492_p9) target bundleno = 3713 (0xe81), region = 88 }
  0x1b   : > { %s16929_s23 = sld [smem:[#allocation33_spill]]  ;;  %v16805_v2 = vmov 0   ;;  %s543_s18 = smul.u32 15, %s12702_s28  ;;  %vm675_vm0 = vcmask 1046528   ;;  %vm650_vm1 = vcmask 244736   ;;  %vm1911_vm2 = vcmask 916480  }
  0x1c   : > { %720 = vmatprep.mubr.bf16.mxu0 %v16805_v2  ;;  %871 = vmatprep.mubr.bf16.mxu1 %v16805_v2  ;;  %s16930_s19 = sld [smem:[#allocation32_spill]]  ;;  %s16932_s2 = sld [smem:[#allocation34_spill]]  ;;  %vm2433_vm3 = vcmask 392192   ;;  %vm2885_vm4 = vcmask 1041408   ;;  %vm2886_vm5 = vcmask 1042432   ;;  %vm2872_vm6 = vcmask 957440  }
  0x1d   : > { %p544_p10 = scmp.lt.s32.totalorder %s543_s18, 29  ;;  %vm3146_vm7 = vsmask.f32 7424  ;;  %vm4932_vm8 = vcmask 785408   ;;  %vm5557_vm9 = vcmask 261120   ;;  %vm6003_vm10 = vcmask 1045504  }
  0x1e   : > { %vm5993_vm11 = vcmask 498688   ;;  %vm12588_vm12 = vmmov 0   ;;  %vm6146_vm13 = vcmask 257024   ;;  %s12589_s0 = smov 64   ;;  %vm8499_vm14 = vcmask 523264   ;;  %s540_s21 = sand.u32 1, %s12573_s25  }
  0x1f   : > { %s17071_s18 = smov (!%p544_p10, %s543_s18), 29  ;;  %vm9029_vm15 = vcmask 1040384   ;;  %s9711_s22 = sshll.u32 %s540_s21, 2 }
  0x20   : > { %s9712_s29 = sshll.u32 %s17071_s18, 3  ;;  %s10818_s26 = sshll.u32 %s12702_s28, 6 }
  0x21   : > { %v11562_v0 = vld [vmem:[%s16929_s23 + $0x44] ss:$16 sps:$4 sm:$0xff]   ;;  %v11564_v1 = vld [vmem:[%s16929_s23 + $0x4c] ss:$16 sps:$4 sm:$0xff]   ;;  %v11566_v3 = vld [vmem:[%s16929_s23 + $0x40] ss:$16 sps:$4 sm:$0xff]  }
  0x22   : > { %688 = vmatprep.subr.bf16.mxu0 %v11562_v0  ;;  %v11567_v4 = vld [vmem:[%s16929_s23 + $0x48] ss:$16 sps:$4 sm:$0xff]   ;;  %10917 = vmatprep.subr.bf16.mxu1 %v11564_v1  ;;  %v11568_v5 = vld [vmem:[%s16929_s23 + $0x64] ss:$16 sps:$4 sm:$0x7f]   ;;  %s12766_s24 = scalar_lea.vmem %s16930_s19, %s9712_s29  ;;  %s12584_s19 = smov 112  }
  0x23   : > { %689 = vmatpush1.bf16.msra.mxu0 %v11566_v3  ;;  %10919 = vmatpush1.bf16.msra.mxu1 %v11567_v4  ;;  %v11570_v6 = vld [vmem:[%s16929_s23 + $0x6c] ss:$16 sps:$4 sm:$0x7f]   ;;  %v11572_v7 = vld [vmem:[%s16929_s23 + $0x60] ss:$16 sps:$4 sm:$0x7f]  }
  0x24   : > { %9729 = vmatprep.subr.msk.bf16.mxu0 %vm675_vm0, %v11568_v5  ;;  %v11573_v8 = vld [vmem:[%s16929_s23 + $0x68] ss:$16 sps:$4 sm:$0x7f]   ;;  %10918 = vmatprep.subr.msk.bf16.mxu1 %vm675_vm0, %v11570_v6  ;;  %v677_v9 = vsel %vm675_vm0, %v11572_v7, 0  ;;  %v11576_v11 = vld [vmem:[%s16929_s23 + $0xc] ss:$16 sps:$4 sm:$0xff]  }
  0x25   : > { %v683_v10 = vsel %vm675_vm0, %v11573_v8, 0  ;;  %v582_v12 = vld [vmem:[%s12766_s24 + $0x1] sm:$0xff]  ;;  %v583_v13 = vld [vmem:[%s12766_s24 + $0x9] sm:$0xff]  ;;  %v584_v21 = vld [vmem:[%s12766_s24 + $0x11] sm:$0xff]  ;;  %s12586_s29 = smov 96  }
  0x26   : > { %v590_v14 = vld [vmem:[%s12766_s24 + $0x41] sm:$0xff]  ;;  %v12771_v15 = vpack.c.bf16 %v583_v13, %v582_v12  ;;  %v591_v16 = vld [vmem:[%s12766_s24 + $0x49] sm:$0xff]  ;;  %v585_v22 = vld [vmem:[%s12766_s24 + $0x19] sm:$0xff] }
  0x27   : > { %691 = vmatpush1.bf16.msra.mxu0 %v677_v9  ;;  %10920 = vmatpush1.bf16.msra.mxu1 %v683_v10  ;;  %v601_v17 = vpack.c.bf16 %v591_v16, %v590_v14  ;;  %v11574_v18 = vld [vmem:[%s16929_s23 + $0x8] ss:$16 sps:$4 sm:$0xff]   ;;  %v11577_v19 = vld [vmem:[%s16929_s23 + $0x2c] ss:$16 sps:$4 sm:$0x7f]   ;;  %v12793_v25 = vpack.c.bf16 %v585_v22, %v584_v21  ;;  %v551_v41 = vld [vmem:[%s12766_s24] sm:$0xff] }
  0x28   : > { %799 = vmatprep.subr.bf16.mxu0 %v11564_v1  ;;  %1093 = vmatprep.subr.bf16.mxu1 %v11576_v11  ;;  %v11579_v20 = vld [vmem:[%s16929_s23 + $0x28] ss:$16 sps:$4 sm:$0x7f]   ;;  %v11582_v28 = vld [vmem:[%s16929_s23 + $0x4] ss:$16 sps:$4 sm:$0xff]  }
  0x29   : > { %v592_v23 = vld [vmem:[%s12766_s24 + $0x51] sm:$0xff]  ;;  %v593_v24 = vld [vmem:[%s12766_s24 + $0x59] sm:$0xff]  ;;  %v977_v26 = vsel %vm675_vm0, %v11579_v20, 0  ;;  %v586_v29 = vld [vmem:[%s12766_s24 + $0x21] sm:$0xff] }
  0x2a   : > { %9730 = vmatmul.mubr.msk.bf16.vlgmr.msra.gmra.mrb[0].mxu0 %vm650_vm1, %v12771_v15  ;;  %9743 = vmatmul.mubr.msk.bf16.vlgmr.msra.gmra.mrb[0].mxu1 %vm650_vm1, %v601_v17  ;;  %v602_v27 = vpack.c.bf16 %v593_v24, %v592_v23  ;;  %v587_v30 = vld [vmem:[%s12766_s24 + $0x29] sm:$0xff]  ;;  %v594_v32 = vld [vmem:[%s12766_s24 + $0x61] sm:$0xff]  ;;  %v588_v36 = vld [vmem:[%s12766_s24 + $0x31] sm:$0xff] }
  0x2b   : > { %730 = vmatprep.mubr.bf16.mxu0 %v16805_v2  ;;  %881 = vmatprep.mubr.bf16.mxu1 %v16805_v2  ;;  %v11587_v31 = vld [vmem:[%s16929_s23 + $0x8c] ss:$16 sps:$4 sm:$0xff]   ;;  %v12812_v34 = vpack.c.bf16 %v587_v30, %v586_v29  ;;  %v596_v38 = vld [vmem:[%s12766_s24 + $0x71] sm:$0x3f]  ;;  %v11585_v43 = vld [vmem:[%s16929_s23 + $0x88] ss:$16 sps:$4 sm:$0xff]  }
  0x2c   : > { %800 = vmatpush1.bf16.msra.mxu0 %v11567_v4  ;;  %1094 = vmatpush1.bf16.msra.mxu1 %v11574_v18  ;;  %v595_v33 = vld [vmem:[%s12766_s24 + $0x69] sm:$0xff]  ;;  %v589_v37 = vld [vmem:[%s12766_s24 + $0x39] sm:$0xff]  ;;  %v604_v40 = vpack.c.bf16 %v596_v38, %v596_v38  ;;  %v11583_v61 = vld [vmem:[%s16929_s23 + $0x24] ss:$16 sps:$4 sm:$0x7f]  }
  0x2d   : > { %9738 = vmatprep.subr.msk.bf16.mxu0 %vm675_vm0, %v11570_v6  ;;  %9764 = vmatprep.subr.msk.bf16.mxu1 %vm675_vm0, %v11577_v19  ;;  %v603_v35 = vpack.c.bf16 %v595_v33, %v594_v32  ;;  %v12822_v39 = vpack.c.bf16 %v589_v37, %v588_v36  ;;  %v552_v42 = vld [vmem:[%s12766_s24 + $0x8] sm:$0xff]  ;;  %v553_v47 = vld [vmem:[%s12766_s24 + $0x10] sm:$0xff]  ;;  %v554_v48 = vld [vmem:[%s12766_s24 + $0x18] sm:$0xff] }
  0x2e   : > { %v12834_v44 = vpack.c.bf16 %v552_v42, %v551_v41  ;;  %v11589_v45 = vld [vmem:[%s16929_s23 + $0xac] ss:$16 sps:$4 sm:$0x7f]   ;;  %v11591_v46 = vld [vmem:[%s16929_s23 + $0xa8] ss:$16 sps:$4 sm:$0x7f]   ;;  %v12851_v50 = vpack.c.bf16 %v554_v48, %v553_v47 }
  0x2f   : > { %v1303_v49 = vsel %vm675_vm0, %v11591_v46, 0  ;;  %v555_v51 = vld [vmem:[%s12766_s24 + $0x20] sm:$0xff]  ;;  %v556_v52 = vld [vmem:[%s12766_s24 + $0x28] sm:$0xff]  ;;  %v557_v54 = vld [vmem:[%s12766_s24 + $0x30] sm:$0xff] }
  0x30   : > { %802 = vmatpush1.bf16.msra.mxu0 %v683_v10  ;;  %1096 = vmatpush1.bf16.msra.mxu1 %v977_v26  ;;  %v12860_v53 = vpack.c.bf16 %v556_v52, %v555_v51  ;;  %v558_v55 = vld [vmem:[%s12766_s24 + $0x38] sm:$0xff]  ;;  %v559_v57 = vld [vmem:[%s12766_s24 + $0x40] sm:$0xff]  ;;  %v560_v58 = vld [vmem:[%s12766_s24 + $0x48] sm:$0xff] }
  0x31   : > { %982 = vmatprep.subr.bf16.mxu0 %v11582_v28  ;;  %1419 = vmatprep.subr.bf16.mxu1 %v11587_v31  ;;  %v12869_v56 = vpack.c.bf16 %v558_v55, %v557_v54  ;;  %v11580_v59 = vld [vmem:[%s16929_s23] ss:$16 sps:$4 sm:$0xff]   ;;  %v12881_v60 = vpack.c.bf16 %v560_v58, %v559_v57  ;;  %v562_v0 = vld [vmem:[%s12766_s24 + $0x58] sm:$0xff]  ;;  %v11594_v1 = vld [vmem:[%s16929_s23 + $0x84] ss:$16 sps:$4 sm:$0xff]  }
  0x32   : > { %9731 = vmatmul.mubr.msk.bf16.gmra.mrb[4].mxu0 %vm650_vm1, %v12793_v25  ;;  %9744 = vmatmul.mubr.msk.bf16.gmra.mrb[4].mxu1 %vm650_vm1, %v602_v27  ;;  %v11588_v62 = vld [vmem:[%s16929_s23 + $0x20] ss:$16 sps:$4 sm:$0x7f]   ;;  %v564_v6 = vld [vmem:[%s12766_s24 + $0x68] sm:$0xff] }
  0x33   : > { %740 = vmatprep.mubr.bf16.mxu0 %v16805_v2  ;;  %891 = vmatprep.mubr.bf16.mxu1 %v16805_v2  ;;  %v561_v63 = vld [vmem:[%s12766_s24 + $0x50] sm:$0xff]  ;;  %v971_v3 = vsel %vm675_vm0, %v11588_v62, 0  ;;  %v563_v5 = vld [vmem:[%s12766_s24 + $0x60] sm:$0xff] }
  0x34   : > { %v12902_v4 = vpack.c.bf16 %v562_v0, %v561_v63  ;;  %v12912_v7 = vpack.c.bf16 %v564_v6, %v563_v5  ;;  %v565_v8 = vld [vmem:[%s12766_s24 + $0x70] sm:$0x3f]  ;;  %v1204_v10 = vld [vmem:[%s12766_s24 + $0x2] sm:$0xff]  ;;  %v1211_v24 = vld [vmem:[%s12766_s24 + $0x3a] sm:$0xff] }
  0x35   : > { %v12921_v9 = vpack.c.bf16 %v565_v8, %v565_v8  ;;  %v1205_v11 = vld [vmem:[%s12766_s24 + $0xa] sm:$0xff]  ;;  %v11595_v14 = vld [vmem:[%s16929_s23 + $0xa4] ss:$16 sps:$4 sm:$0x7f]   ;;  %v1215_v30 = vld [vmem:[%s12766_s24 + $0x5a] sm:$0xff] }
  0x36   : > { %v11592_v12 = vld [vmem:[%s16929_s23 + $0x80] ss:$16 sps:$4 sm:$0xff]   ;;  %v1219_v13 = vpack.c.bf16 %v1205_v11, %v1204_v10 }
  0x37   : > { %v1206_v16 = vld [vmem:[%s12766_s24 + $0x12] sm:$0xff]  ;;  %v1208_v20 = vld [vmem:[%s12766_s24 + $0x22] sm:$0xff]  ;;  %v1209_v21 = vld [vmem:[%s12766_s24 + $0x2a] sm:$0xff] }
  0x38   : > { %v1221_v22 = vpack.c.bf16 %v1209_v21, %v1208_v20  ;;  %v1210_v23 = vld [vmem:[%s12766_s24 + $0x32] sm:$0xff]  ;;  %v1212_v26 = vld [vmem:[%s12766_s24 + $0x42] sm:$0xff]  ;;  %v1217_v33 = vld [vmem:[%s12766_s24 + $0x6a] sm:$0xff] }
  0x39   : > { %v1214_v29 = vld [vmem:[%s12766_s24 + $0x52] sm:$0xff]  ;;  %v1216_v32 = vld [vmem:[%s12766_s24 + $0x62] sm:$0xff] }
  0x3a   : > { %9732 = vmatmul.mubr.msk.bf16.gmra.mrb[8].mxu0 %vm650_vm1, %v12812_v34  ;;  %9745 = vmatmul.mubr.msk.bf16.gmra.mrb[8].mxu1 %vm650_vm1, %v603_v35  ;;  %v1224_v31 = vpack.c.bf16 %v1215_v30, %v1214_v29  ;;  %v11607_v29 = vld [vmem:[%s16788_s7 + $0x30] ss:$8 sps:$4 sm:$0xff]   ;;  %v11609_v30 = vld [vmem:[%s16788_s7 + $0x34] ss:$8 sps:$4 sm:$0xff]  }
  0x3b   : > { %750 = vmatprep.mubr.bf16.mxu0 %v16805_v2  ;;  %901 = vmatprep.mubr.bf16.mxu1 %v16805_v2 }
  0x42   : > { %9733 = vmatmul.mubr.msk.bf16.gmra.mrb[12].mxu0 %vm650_vm1, %v12822_v39  ;;  %9746 = vmatmul.mubr.msk.bf16.gmra.mrb[12].mxu1 %vm650_vm1, %v604_v40 }
  0x43   : > { %760 = vmatprep.mubr.bf16.mxu0 %v16805_v2  ;;  %1125 = vmatprep.mubr.bf16.mxu1 %v16805_v2 }
  0x4a   : > { %9734 = vmatmul.mubr.msk.bf16.gmra.mrb[16].mxu0 %vm650_vm1, %v601_v17  ;;  %9765 = vmatmul.mubr.msk.bf16.vlgmr.msra.gmra.mrb[16].mxu1 %vm650_vm1, %v12834_v44  ;;  %v1207_v17 = vld [vmem:[%s12766_s24 + $0x1a] sm:$0xff] }
  0x4b   : > { %770 = vmatprep.mubr.bf16.mxu0 %v16805_v2  ;;  %1135 = vmatprep.mubr.bf16.mxu1 %v16805_v2  ;;  %v1220_v19 = vpack.c.bf16 %v1207_v17, %v1206_v16  ;;  %v11601_v17 = vld [vmem:[%s16788_s7 + $0x10] ss:$8 sps:$4 sm:$0xff]  }
  0x4c   : > { %1420 = vmatpush1.bf16.msra.mxu1 %v11585_v43 }
  0x4d   : > { %9798 = vmatprep.subr.msk.bf16.mxu1 %vm675_vm0, %v11589_v45 }
  0x50   : > { %1422 = vmatpush1.bf16.msra.mxu1 %v1303_v49 }
  0x52   : > { %9735 = vmatmul.mubr.msk.bf16.gmra.mrb[20].mxu0 %vm650_vm1, %v602_v27  ;;  %9766 = vmatmul.mubr.msk.bf16.gmra.mrb[20].mxu1 %vm650_vm1, %v12851_v50  ;;  %v1213_v27 = vld [vmem:[%s12766_s24 + $0x4a] sm:$0xff] }
  0x53   : > { %780 = vmatprep.mubr.bf16.mxu0 %v16805_v2  ;;  %1145 = vmatprep.mubr.bf16.mxu1 %v16805_v2  ;;  %v1223_v28 = vpack.c.bf16 %v1213_v27, %v1212_v26 }
  0x5a   : > { %9736 = vmatmul.mubr.msk.bf16.gmra.mrb[24].mxu0 %vm650_vm1, %v603_v35  ;;  %9767 = vmatmul.mubr.msk.bf16.gmra.mrb[24].mxu1 %vm650_vm1, %v12860_v53  ;;  %v1218_v35 = vld [vmem:[%s12766_s24 + $0x72] sm:$0x3f]  ;;  %s16739_s24 = scalar_lea.hbm %s16798_s17, %s10818_s26 }
  0x5b   : > { %790 = vmatprep.mubr.bf16.mxu0 %v16805_v2  ;;  %1155 = vmatprep.mubr.bf16.mxu1 %v16805_v2  ;;  %v1226_v36 = vpack.c.bf16 %v1218_v35, %v1218_v35 }
  0x62   : > { %9737 = vmatmul.mubr.msk.bf16.gmra.mrb[28].mxu0 %vm650_vm1, %v604_v40  ;;  %9768 = vmatmul.mubr.msk.bf16.gmra.mrb[28].mxu1 %vm650_vm1, %v12869_v56 }
  0x63   : > { %831 = vmatprep.mubr.bf16.mxu0 %v16805_v2  ;;  %1165 = vmatprep.mubr.bf16.mxu1 %v16805_v2 }
  0x6a   : > { %9739 = vmatmul.mubr.msk.bf16.vlgmr.msra.gmra.mrb[32].mxu0 %vm650_vm1, %v12771_v15  ;;  %9769 = vmatmul.mubr.msk.bf16.gmra.mrb[0].mxu1 %vm650_vm1, %v12881_v60  ;;  %v11597_v15 = vld [vmem:[%s16929_s23 + $0xa0] ss:$16 sps:$4 sm:$0x7f]  }
  0x6b   : > { %841 = vmatprep.mubr.bf16.mxu0 %v16805_v2  ;;  %1175 = vmatprep.mubr.bf16.mxu1 %v16805_v2  ;;  %v1297_v18 = vsel %vm675_vm0, %v11597_v15, 0 }
  0x6c   : > { %983 = vmatpush1.bf16.msra.mxu0 %v11580_v59 }
  0x6d   : > { %9755 = vmatprep.subr.msk.bf16.mxu0 %vm675_vm0, %v11583_v61 }
  0x70   : > { %985 = vmatpush1.bf16.msra.mxu0 %v971_v3 }
  0x71   : > { %1308 = vmatprep.subr.bf16.mxu0 %v11594_v1 }
  0x72   : > { %9740 = vmatmul.mubr.msk.bf16.gmra.mrb[36].mxu0 %vm650_vm1, %v12793_v25  ;;  %9770 = vmatmul.mubr.msk.bf16.gmra.mrb[4].mxu1 %vm650_vm1, %v12902_v4  ;;  %v1222_v25 = vpack.c.bf16 %v1211_v24, %v1210_v23  ;;  %v11604_v24 = vld [vmem:[%s16788_s7 + $0x20] ss:$8 sps:$4 sm:$0xff]  }
  0x73   : > { %851 = vmatprep.mubr.bf16.mxu0 %v16805_v2  ;;  %1185 = vmatprep.mubr.bf16.mxu1 %v16805_v2 }
  0x7a   : > { %9741 = vmatmul.mubr.msk.bf16.gmra.mrb[40].mxu0 %vm650_vm1, %v12812_v34  ;;  %9771 = vmatmul.mubr.msk.bf16.gmra.mrb[8].mxu1 %vm650_vm1, %v12912_v7  ;;  %v1225_v34 = vpack.c.bf16 %v1217_v33, %v1216_v32  ;;  %v11612_v33 = vld [vmem:[%s16788_s7 + $0x44] ss:$8 sps:$4 sm:$0xff]  }
  0x7b   : > { %861 = vmatprep.mubr.bf16.mxu0 %v16805_v2  ;;  %1195 = vmatprep.mubr.bf16.mxu1 %v16805_v2 }
  0x82   : > { %9742 = vmatmul.mubr.msk.bf16.gmra.mrb[44].mxu0 %vm650_vm1, %v12822_v39  ;;  %9772 = vmatmul.mubr.msk.bf16.gmra.mrb[32].mxu1 %vm650_vm1, %v12921_v9 }
  0x83   : > { %1014 = vmatprep.mubr.bf16.mxu0 %v16805_v2  ;;  %1451 = vmatprep.mubr.bf16.mxu1 %v16805_v2 }
  0x8a   : > { %9756 = vmatmul.mubr.msk.bf16.vlgmr.msra.gmra.mrb[0].mxu0 %vm650_vm1, %v12834_v44  ;;  %9799 = vmatmul.mubr.msk.bf16.vlgmr.msra.gmra.mrb[16].mxu1 %vm650_vm1, %v1219_v13 }
  0x8b   : > { %1024 = vmatprep.mubr.bf16.mxu0 %v16805_v2  ;;  %1461 = vmatprep.mubr.bf16.mxu1 %v16805_v2 }
  0x8c   : > { %1309 = vmatpush1.bf16.msra.mxu0 %v11592_v12  ;;  %v11598_v12 = vld [vmem:[%s16788_s7] ss:$8 sps:$4 sm:$0xff]  }
  0x8d   : > { %9789 = vmatprep.subr.msk.bf16.mxu0 %vm675_vm0, %v11595_v14 }
  0x90   : > { %1311 = vmatpush1.bf16.msra.mxu0 %v1297_v18  ;;  %v11603_v18 = vld [vmem:[%s16788_s7 + $0x14] ss:$8 sps:$4 sm:$0xff]  }
  0x92   : > { %9757 = vmatmul.mubr.msk.bf16.gmra.mrb[4].mxu0 %vm650_vm1, %v12851_v50  ;;  %9800 = vmatmul.mubr.msk.bf16.gmra.mrb[20].mxu1 %vm650_vm1, %v1220_v19 }
  0x93   : > { %1034 = vmatprep.mubr.bf16.mxu0 %v16805_v2  ;;  %1471 = vmatprep.mubr.bf16.mxu1 %v16805_v2 }
  0x9a   : > { %9758 = vmatmul.mubr.msk.bf16.gmra.mrb[8].mxu0 %vm650_vm1, %v12860_v53  ;;  %9801 = vmatmul.mubr.msk.bf16.gmra.mrb[24].mxu1 %vm650_vm1, %v1221_v22 }
  0x9b   : > { %1044 = vmatprep.mubr.bf16.mxu0 %v16805_v2  ;;  %1481 = vmatprep.mubr.bf16.mxu1 %v16805_v2 }
  0xa2   : > { %9759 = vmatmul.mubr.msk.bf16.gmra.mrb[12].mxu0 %vm650_vm1, %v12869_v56  ;;  %9802 = vmatmul.mubr.msk.bf16.gmra.mrb[28].mxu1 %vm650_vm1, %v1222_v25 }
  0xa3   : > { %1054 = vmatprep.mubr.bf16.mxu0 %v16805_v2  ;;  %1491 = vmatprep.mubr.bf16.mxu1 %v16805_v2 }
  0xaa   : > { %9760 = vmatmul.mubr.msk.bf16.gmra.mrb[16].mxu0 %vm650_vm1, %v12881_v60  ;;  %9803 = vmatmul.mubr.msk.bf16.gmra.mrb[0].mxu1 %vm650_vm1, %v1223_v28 }
  0xab   : > { %1064 = vmatprep.mubr.bf16.mxu0 %v16805_v2  ;;  %1501 = vmatprep.mubr.bf16.mxu1 %v16805_v2 }
  0xb2   : > { %9761 = vmatmul.mubr.msk.bf16.gmra.mrb[20].mxu0 %vm650_vm1, %v12902_v4  ;;  %9804 = vmatmul.mubr.msk.bf16.gmra.mrb[4].mxu1 %vm650_vm1, %v1224_v31 }
  0xb3   : > { %1074 = vmatprep.mubr.bf16.mxu0 %v16805_v2  ;;  %1511 = vmatprep.mubr.bf16.mxu1 %v16805_v2 }
  0xba   : > { %9762 = vmatmul.mubr.msk.bf16.gmra.mrb[24].mxu0 %vm650_vm1, %v12912_v7  ;;  %9805 = vmatmul.mubr.msk.bf16.gmra.mrb[8].mxu1 %vm650_vm1, %v1225_v34 }
  0xbb   : > { %1084 = vmatprep.mubr.bf16.mxu0 %v16805_v2  ;;  %1521 = vmatprep.mubr.bf16.mxu1 %v16805_v2 }
  0xc2   : > { %9763 = vmatmul.mubr.msk.bf16.gmra.mrb[48].mxu0 %vm650_vm1, %v12921_v9  ;;  %9806 = vmatmul.mubr.msk.bf16.gmra.mrb[36].mxu1 %vm650_vm1, %v1226_v36 }
  0xc3   : > { %1340 = vmatprep.mubr.bf16.mxu0 %v16805_v2  ;;  %2927 = vmatprep.mubr.bf16.mxu1 %v16805_v2 }
  0xca   : > { %9790 = vmatmul.mubr.msk.bf16.vlgmr.msra.gmra.mrb[0].mxu0 %vm650_vm1, %v1219_v13  ;;  %v11600_v13 = vld [vmem:[%s16788_s7 + $0x4] ss:$8 sps:$4 sm:$0xff]  }
  0xcb   : > { %1350 = vmatprep.mubr.bf16.mxu0 %v16805_v2  ;;  %2458 = vmatprep.subr.bf16.mxu0 %v11600_v13 }
  0xcc   : > { %2459 = vmatpush1.bf16.msra.mxu0 %v11598_v12  ;;  %v1591_v12 = vlaneseq }
  0xcd   : > { %2460 = vmatprep.subr.bf16.mxu0 %v11603_v18 }
  0xd0   : > { %2461 = vmatpush1.bf16.msra.mxu0 %v11601_v17  ;;  %v11636_v17 = vld [vmem:[%s16788_s7 + $0xc4] ss:$8 sps:$4 sm:$0xff]  }
  0xd2   : > { %9791 = vmatmul.mubr.msk.bf16.gmra.mrb[4].mxu0 %vm650_vm1, %v1220_v19 }
  0xd3   : > { %1360 = vmatprep.mubr.bf16.mxu0 %v16805_v2 }
  0xda   : > { %9792 = vmatmul.mubr.msk.bf16.gmra.mrb[8].mxu0 %vm650_vm1, %v1221_v22 }
  0xdb   : > { %1370 = vmatprep.mubr.bf16.mxu0 %v16805_v2 }
  0xe2   : > { %9793 = vmatmul.mubr.msk.bf16.gmra.mrb[12].mxu0 %vm650_vm1, %v1222_v25  ;;  %v11606_v25 = vld [vmem:[%s16788_s7 + $0x24] ss:$8 sps:$4 sm:$0xff]  }
  0xe3   : > { %1380 = vmatprep.mubr.bf16.mxu0 %v16805_v2  ;;  %2462 = vmatprep.subr.bf16.mxu0 %v11606_v25 }
  0xe4   : > { %2463 = vmatpush1.bf16.msra.mxu0 %v11604_v24  ;;  %v11634_v24 = vld [vmem:[%s16788_s7 + $0xc0] ss:$8 sps:$4 sm:$0xff]  }
  0xe5   : > { %2464 = vmatprep.subr.bf16.mxu0 %v11609_v30 }
  0xe8   : > { %2465 = vmatpush1.bf16.msra.mxu0 %v11607_v29 }
  0xe9   : > { %2466 = vmatprep.subr.bf16.mxu0 %v11612_v33 }
  0xea   : > { %9794 = vmatmul.mubr.msk.bf16.gmra.mrb[16].mxu0 %vm650_vm1, %v1223_v28 }
  0xeb   : > { %1390 = vmatprep.mubr.bf16.mxu0 %v16805_v2 }
  0xf2   : > { %9795 = vmatmul.mubr.msk.bf16.gmra.mrb[20].mxu0 %vm650_vm1, %v1224_v31 }
  0xf3   : > { %1400 = vmatprep.mubr.bf16.mxu0 %v16805_v2 }
  0xfa   : > { %9796 = vmatmul.mubr.msk.bf16.gmra.mrb[24].mxu0 %vm650_vm1, %v1225_v34 }
  0xfb   : > { %1410 = vmatprep.mubr.bf16.mxu0 %v16805_v2 }
 0x102   : > { %9797 = vmatmul.mubr.msk.bf16.gmra.mrb[52].mxu0 %vm650_vm1, %v1226_v36  ;;  %vm9025_vm1 = vcmask 269312  }
 0x115   : > { %v903_v37 = vpop.f32.mrb[12].mxu1 }
 0x116   : > { %v905_v38 = vpop.f32.mrb[13].mxu1 }
 0x117   : > { %v907_v39 = vpop.f32.mrb[14].mxu1 }
 0x118   : > { %v908_v40 = vpop.f32.mrb[15].mxu1 }
 0x119   : > { %v11613_v40 = vld [vmem:[%s16788_s7 + $0x50] ss:$8 sps:$4 sm:$0xff]  }
 0x135   : > { %v13010_v41 = vpop.f32.mrb[28].mxu0 }
 0x136   : > { %v13012_v42 = vpop.f32.mrb[29].mxu0 }
 0x137   : > { %v796_v43 = vpop.f32.mrb[30].mxu0 }
 0x138   : > { %v797_v44 = vpop.f32.mrb[31].mxu0 }
 0x13d   : > { %v833_v45 = vpop.f32.mrb[32].mxu0 }
 0x13e   : > { %v835_v46 = vpop.f32.mrb[33].mxu0 }
 0x13f   : > { %v837_v47 = vpop.f32.mrb[34].mxu0 }
 0x140   : > { %v839_v48 = vpop.f32.mrb[35].mxu0 }
 0x145   : > { %v843_v49 = vpop.f32.mrb[36].mxu0 }
 0x146   : > { %v845_v50 = vpop.f32.mrb[37].mxu0 }
 0x147   : > { %v847_v51 = vpop.f32.mrb[38].mxu0 }
 0x148   : > { %v849_v52 = vpop.f32.mrb[39].mxu0 }
 0x14d   : > { %v853_v53 = vpop.f32.mrb[40].mxu0 }
 0x14e   : > { %v855_v54 = vpop.f32.mrb[41].mxu0 }
 0x14f   : > { %v857_v55 = vpop.f32.mrb[42].mxu0 }
 0x150   : > { %v859_v56 = vpop.f32.mrb[43].mxu0 }
 0x155   : > { %v863_v57 = vpop.f32.mrb[44].mxu0  ;;  %v1197_v58 = vpop.f32.mrb[32].mxu1 }
 0x156   : > { %v865_v59 = vpop.f32.mrb[45].mxu0  ;;  %v13014_v60 = vadd.f32 %v1197_v58, %v903_v37  ;;  %v1199_v61 = vpop.f32.mrb[33].mxu1  ;;  %v11610_v37 = vld [vmem:[%s16788_s7 + $0x40] ss:$8 sps:$4 sm:$0xff]  }
 0x157   : > { %v867_v62 = vpop.f32.mrb[46].mxu0  ;;  %v13016_v63 = vadd.f32 %v1199_v61, %v905_v38  ;;  %v1201_v1 = vpop.f32.mrb[34].mxu1  ;;  %v11615_v38 = vld [vmem:[%s16788_s7 + $0x54] ss:$8 sps:$4 sm:$0xff]   ;;  %2467 = vmatpush1.bf16.msra.mxu0 %v11610_v37 }
 0x158   : > { %v869_v0 = vpop.f32.mrb[47].mxu0  ;;  %v1202_v3 = vpop.f32.mrb[35].mxu1  ;;  %2468 = vmatprep.subr.bf16.mxu0 %v11615_v38  ;;  %v11627_v61 = vld [vmem:[%s16788_s7 + $0x94] ss:$8 sps:$4 sm:$0xff]  }
 0x159   : > { %v11630_v3 = vld [vmem:[%s16788_s7 + $0xa4] ss:$8 sps:$4 sm:$0xff]  }
 0x15b   : > { %2469 = vmatpush1.bf16.msra.mxu0 %v11613_v40 }
 0x15d   : > { %v1453_v4 = vpop.f32.mrb[16].mxu1 }
 0x15e   : > { %v13018_v5 = vadd.f32 %v1453_v4, %v833_v45  ;;  %v1455_v6 = vpop.f32.mrb[17].mxu1  ;;  %v11618_v45 = vld [vmem:[%s16788_s7 + $0x64] ss:$8 sps:$4 sm:$0xff]  }
 0x15f   : > { %v13020_v7 = vadd.f32 %v1455_v6, %v835_v46  ;;  %v1457_v8 = vpop.f32.mrb[18].mxu1  ;;  %2470 = vmatprep.subr.bf16.mxu0 %v11618_v45 }
 0x160   : > { %v13022_v9 = vadd.f32 %v1457_v8, %v837_v47  ;;  %v1459_v10 = vpop.f32.mrb[19].mxu1  ;;  %v11628_v8 = vld [vmem:[%s16788_s7 + $0xa0] ss:$8 sps:$4 sm:$0xff]  }
 0x161   : > { %v13024_v11 = vadd.f32 %v1459_v10, %v839_v48  ;;  %v11633_v10 = vld [vmem:[%s16788_s7 + $0xb4] ss:$8 sps:$4 sm:$0xff]  }
 0x165   : > { %v1463_v14 = vpop.f32.mrb[20].mxu1 }
 0x166   : > { %v13032_v15 = vadd.f32 %v1463_v14, %v843_v49  ;;  %v1465_v16 = vpop.f32.mrb[21].mxu1  ;;  %v11631_v14 = vld [vmem:[%s16788_s7 + $0xb0] ss:$8 sps:$4 sm:$0xff]  }
 0x167   : > { %v13040_v19 = vadd.f32 %v1465_v16, %v845_v50  ;;  %v1467_v20 = vpop.f32.mrb[22].mxu1 }
 0x168   : > { %v13042_v21 = vadd.f32 %v1467_v20, %v847_v51  ;;  %v1469_v22 = vpop.f32.mrb[23].mxu1  ;;  %v11616_v51 = vld [vmem:[%s16788_s7 + $0x60] ss:$8 sps:$4 sm:$0xff]   ;;  %v13147_v20 = vshrl.u32 %v1591_v12, 7 }
 0x169   : > { %v13044_v23 = vadd.f32 %v1469_v22, %v849_v52  ;;  %v11621_v52 = vld [vmem:[%s16788_s7 + $0x74] ss:$8 sps:$4 sm:$0xff]   ;;  %2471 = vmatpush1.bf16.msra.mxu0 %v11616_v51 }
 0x16a   : > { %2472 = vmatprep.subr.bf16.mxu0 %v11621_v52  ;;  %v13155_v25 = vsub.s32 2, %v13147_v20  ;;  %v13166_v33 = vsub.s32 0, %v13147_v20  ;;  %v13175_v40 = vsub.s32 1, %v13147_v20  ;;  %v11642_v52 = vld [vmem:[%s16788_s7 + $0xe4] ss:$8 sps:$4 sm:$0xff]  }
 0x16c   : > { %16931 = vst [vmem:[#allocation12_spill] sm:$0xff] %v13155_v25  ;;  %16933 = vst [vmem:[#allocation13_spill] sm:$0xff] %v13166_v33 }
 0x16d   : > { %v1473_v26 = vpop.f32.mrb[24].mxu1  ;;  %16934 = vst [vmem:[#allocation14_spill] sm:$0xff] %v13175_v40 }
 0x16e   : > { %v13052_v27 = vadd.f32 %v1473_v26, %v853_v53  ;;  %v1475_v28 = vpop.f32.mrb[25].mxu1 }
 0x16f   : > { %v13060_v31 = vadd.f32 %v1475_v28, %v855_v54  ;;  %v1477_v32 = vpop.f32.mrb[26].mxu1  ;;  %v11619_v54 = vld [vmem:[%s16788_s7 + $0x70] ss:$8 sps:$4 sm:$0xff]   ;;  %v13160_v28 = vld [vmem:[%s16932_s2] sm:$0xf] }
 0x170   : > { %v13065_v34 = vadd.f32 %v1477_v32, %v857_v55  ;;  %v1479_v35 = vpop.f32.mrb[27].mxu1  ;;  %2473 = vmatpush1.bf16.msra.mxu0 %v11619_v54  ;;  %v13192_v51 = vrot.slane %v13160_v28, %v13166_v33  ;;  %v11640_v54 = vld [vmem:[%s16788_s7 + $0xe0] ss:$8 sps:$4 sm:$0xff]  }
 0x171   : > { %v13067_v36 = vadd.f32 %v1479_v35, %v859_v56  ;;  %v11624_v56 = vld [vmem:[%s16788_s7 + $0x84] ss:$8 sps:$4 sm:$0xff]  }
 0x172   : > { %2474 = vmatprep.subr.bf16.mxu0 %v11624_v56 }
 0x175   : > { %v1483_v39 = vpop.f32.mrb[28].mxu1 }
 0x176   : > { %v13078_v43 = vadd.f32 %v1483_v39, %v863_v57  ;;  %v1485_v44 = vpop.f32.mrb[29].mxu1 }
 0x177   : > { %v13083_v46 = vadd.f32 %v1485_v44, %v865_v59  ;;  %v1487_v47 = vpop.f32.mrb[30].mxu1  ;;  %v11622_v59 = vld [vmem:[%s16788_s7 + $0x80] ss:$8 sps:$4 sm:$0xff]  }
 0x178   : > { %v13085_v48 = vadd.f32 %v1487_v47, %v867_v62  ;;  %v1489_v49 = vpop.f32.mrb[31].mxu1  ;;  %2475 = vmatpush1.bf16.msra.mxu0 %v11622_v59 }
 0x179   : > { %v13087_v50 = vadd.f32 %v1489_v49, %v869_v0  ;;  %v11625_v0 = vld [vmem:[%s16788_s7 + $0x90] ss:$8 sps:$4 sm:$0xff]   ;;  %2476 = vmatprep.subr.bf16.mxu0 %v11627_v61 }
 0x17c   : > { %2477 = vmatpush1.bf16.msra.mxu0 %v11625_v0 }
 0x17d   : > { %v13095_v53 = vpop.f32.mrb[0].mxu1  ;;  %2478 = vmatprep.subr.bf16.mxu0 %v11630_v3 }
 0x17e   : > { %v13100_v55 = vpop.f32.mrb[1].mxu1 }
 0x17f   : > { %v13105_v57 = vpop.f32.mrb[2].mxu1 }
 0x180   : > { %v13107_v58 = vpop.f32.mrb[3].mxu1  ;;  %2479 = vmatpush1.bf16.msra.mxu0 %v11628_v8 }
 0x181   : > { %2480 = vmatprep.subr.bf16.mxu0 %v11633_v10  ;;  %v11645_v10 = vld [vmem:[%s16788_s7 + $0xf4] ss:$8 sps:$4 sm:$0xff]  }
 0x184   : > { %2481 = vmatpush1.bf16.msra.mxu0 %v11631_v14  ;;  %v11643_v14 = vld [vmem:[%s16788_s7 + $0xf0] ss:$8 sps:$4 sm:$0xff]  }
 0x185   : > { %v13115_v62 = vpop.f32.mrb[4].mxu1  ;;  %2482 = vmatprep.subr.bf16.mxu0 %v11636_v17 }
 0x186   : > { %v13120_v1 = vpop.f32.mrb[5].mxu1 }
 0x187   : > { %v13125_v4 = vpop.f32.mrb[6].mxu1 }
 0x188   : > { %v13127_v6 = vpop.f32.mrb[7].mxu1  ;;  %2483 = vmatpush1.bf16.msra.mxu0 %v11634_v24 }
 0x18d   : > { %v13135_v13 = vpop.f32.mrb[8].mxu1 }
 0x18e   : > { %v13140_v16 = vpop.f32.mrb[9].mxu1 }
 0x18f   : > { %v13145_v18 = vpop.f32.mrb[10].mxu1 }
 0x190   : > { %v13149_v22 = vpop.f32.mrb[11].mxu1 }
 0x195   : > { %v1086_v26 = vpop.f32.mrb[48].mxu0  ;;  %v1523_v30 = vpop.f32.mrb[36].mxu1 }
 0x196   : > { %v13163_v29 = vadd.f32 %v1086_v26, %v13010_v41  ;;  %v1088_v32 = vpop.f32.mrb[49].mxu0  ;;  %v13169_v35 = vadd.f32 %v1523_v30, %v13014_v60  ;;  %v1525_v38 = vpop.f32.mrb[37].mxu1  ;;  %v11639_v41 = vld [vmem:[%s16788_s7 + $0xd4] ss:$8 sps:$4 sm:$0xff]   ;;  %v11637_v60 = vld [vmem:[%s16788_s7 + $0xd0] ss:$8 sps:$4 sm:$0xff]  }
 0x197   : > { %v13172_v37 = vadd.f32 %v1088_v32, %v13012_v42  ;;  %v1090_v39 = vpop.f32.mrb[50].mxu0  ;;  %v13181_v44 = vadd.f32 %v1525_v38, %v13016_v63  ;;  %v1527_v47 = vpop.f32.mrb[38].mxu1  ;;  %v13188_v42 = vrot.slane %v13160_v28, %v13155_v25  ;;  %2484 = vmatprep.subr.bf16.mxu0 %v11639_v41  ;;  %v13196_v63 = vrot.slane %v13160_v28, %v13175_v40 }
 0x198   : > { %v1091_v45 = vpop.f32.mrb[51].mxu0  ;;  %v1528_v49 = vpop.f32.mrb[39].mxu1  ;;  %2485 = vmatpush1.bf16.msra.mxu0 %v11637_v60 }
 0x199   : > { %v13206_v56 = vadd.f32 %v13018_v5, %v13188_v42  ;;  %2486 = vmatprep.subr.bf16.mxu0 %v11642_v52  ;;  %v13226_v24 = vadd.f32 %v13022_v9, %v13188_v42  ;;  %v13246_v47 = vadd.f32 %v13032_v15, %v13188_v42  ;;  %v13252_v52 = vadd.f32 %v13042_v21, %v13188_v42 }
 0x19b   : > { %16935 = vst [vmem:[#allocation15_spill] sm:$0xff] %v13206_v56  ;;  %v16807_v17 = vmax.f32 %v13206_v56, 0.0  ;;  %v16809_v45 = vmax.f32 %v13226_v24, 0.0  ;;  %16936 = vst [vmem:[#allocation16_spill] sm:$0xff] %v13246_v47 }
 0x19c   : > { %2487 = vmatpush1.bf16.msra.mxu0 %v11640_v54  ;;  %16937 = vst [vmem:[#allocation17_spill] sm:$0xff] %v13252_v52 }
 0x19d   : > { %v1342_v59 = vpop.f32.mrb[0].mxu0  ;;  %2488 = vmatprep.subr.bf16.mxu0 %v11645_v10  ;;  %v16808_v10 = vmax.f32 %v13246_v47, 0.0 }
 0x19e   : > { %v13209_v61 = vadd.f32 %v13192_v51, %v1342_v59  ;;  %v1344_v0 = vpop.f32.mrb[1].mxu0 }
 0x19f   : > { %v13212_v3 = vadd.f32 %v13196_v63, %v1344_v0  ;;  %v1346_v8 = vpop.f32.mrb[2].mxu0 }
 0x1a0   : > { %v13218_v12 = vadd.f32 %v13192_v51, %v1346_v8  ;;  %v1348_v5 = vpop.f32.mrb[3].mxu0  ;;  %v16820_v32 = vmax.f32 %v13209_v61, 0.0  ;;  %2489 = vmatpush1.bf16.msra.mxu0 %v11643_v14 }
 0x1a1   : > { %v16814_v26 = vmax.f32 %v13212_v3, 0.0  ;;  %v13230_v30 = vadd.f32 %v13196_v63, %v1348_v5 }
 0x1a2   : > { %v16817_v38 = vmax.f32 %v13218_v12, 0.0 }
 0x1a3   : > { %v16813_v39 = vmax.f32 %v13230_v30, 0.0  ;;  %v11292_v41 = vpack.i.bf16 %v16807_v17, %v16814_v26 }
 0x1a4   : > { %v11302_v9 = vpack.i.bf16 %v16817_v38, %v16820_v32 }
 0x1a5   : > { %11293 = vrot.lane.b32.xlu0 %v11292_v41, %s12584_s19  ;;  %v1352_v60 = vpop.f32.mrb[4].mxu0  ;;  %v11297_v54 = vpack.i.bf16 %v16809_v45, %v16813_v39  ;;  %v16811_v41 = vmax.f32 %v13252_v52, 0.0  ;;  %v13295_v45 = vadd.f32 %v13065_v34, %v13188_v42 }
 0x1a6   : > { %11303 = vrot.lane.b32.xlu1 %v11302_v9, %s12584_s19  ;;  %v1354_v49 = vpop.f32.mrb[5].mxu0  ;;  %v13266_v5 = vadd.f32 %v13192_v51, %v1352_v60  ;;  %v13282_v60 = vadd.f32 %v13052_v27, %v13188_v42 }
 0x1a7   : > { %v13259_v59 = vadd.f32 %v13196_v63, %v1354_v49  ;;  %v1356_v15 = vpop.f32.mrb[6].mxu0  ;;  %16939 = vst [vmem:[#allocation19_spill] sm:$0xff] %v13295_v45 }
 0x1a8   : > { %v13262_v0 = vadd.f32 %v13192_v51, %v1356_v15  ;;  %v1358_v8 = vpop.f32.mrb[7].mxu0  ;;  %16938 = vst [vmem:[#allocation18_spill] sm:$0xff] %v13282_v60  ;;  %v16818_v39 = vmax.f32 %v13282_v60, 0.0 }
 0x1a9   : > { %v16810_v21 = vmax.f32 %v13259_v59, 0.0  ;;  %v13270_v14 = vadd.f32 %v13196_v63, %v1358_v8  ;;  %11298 = vrot.lane.b32.xlu0 %v11297_v54, %s12584_s19  ;;  %v16816_v8 = vmax.f32 %v13266_v5, 0.0 }
 0x1aa   : > { %v16815_v49 = vmax.f32 %v13262_v0, 0.0 }
 0x1ab   : > { %v11307_v9 = vpack.i.bf16 %v16808_v10, %v16810_v21  ;;  %v16812_v15 = vmax.f32 %v13270_v14, 0.0  ;;  %v11648_v10 = vld [vmem:[%s16788_s7 + $0x104] ss:$8 sps:$4 sm:$0xff]  }
 0x1ac   : > { %v11317_v27 = vpack.i.bf16 %v16815_v49, %v16816_v8  ;;  %2569 = vmatprep.subr.bf16.mxu0 %v11648_v10 }
 0x1ad   : > { %v11312_v54 = vpack.i.bf16 %v16811_v41, %v16812_v15  ;;  %11308 = vrot.lane.b32.xlu1 %v11307_v9, %s12584_s19  ;;  %v1362_v2 = vpop.f32.mrb[8].mxu0 }
 0x1ae   : > { %v1364_v17 = vpop.f32.mrb[9].mxu0  ;;  %v13310_v34 = vadd.f32 %v13192_v51, %v1362_v2  ;;  %v13326_v2 = vadd.f32 %v13078_v43, %v13188_v42 }
 0x1af   : > { %v13302_v21 = vadd.f32 %v13196_v63, %v1364_v17  ;;  %11313 = vrot.lane.b32.xlu0 %v11312_v54, %s12584_s19  ;;  %v1366_v9 = vpop.f32.mrb[10].mxu0  ;;  %v16821_v17 = vmax.f32 %v13295_v45, 0.0 }
 0x1b0   : > { %v13306_v41 = vadd.f32 %v13192_v51, %v1366_v9  ;;  %v1368_v15 = vpop.f32.mrb[11].mxu0  ;;  %16940 = vst [vmem:[#allocation20_spill] sm:$0xff] %v13326_v2 }
 0x1b1   : > { %v16819_v26 = vmax.f32 %v13302_v21, 0.0  ;;  %v13314_v49 = vadd.f32 %v13196_v63, %v1368_v15  ;;  %11318 = vrot.lane.b32.xlu1 %v11317_v27, %s12584_s19  ;;  %v16828_v15 = vmax.f32 %v13310_v34, 0.0 }
 0x1b2   : > { %v16827_v10 = vmax.f32 %v13306_v41, 0.0 }
 0x1b3   : > { %v11322_v54 = vpack.i.bf16 %v16818_v39, %v16819_v26  ;;  %v16822_v9 = vmax.f32 %v13314_v49, 0.0  ;;  %v13336_v39 = vadd.f32 %v13085_v48, %v13188_v42 }
 0x1b4   : > { %v11332_v43 = vpack.i.bf16 %v16827_v10, %v16828_v15 }
 0x1b5   : > { %v11327_v27 = vpack.i.bf16 %v16821_v17, %v16822_v9  ;;  %11323 = vrot.lane.b32.xlu0 %v11322_v54, %s12584_s19  ;;  %v1372_v8 = vpop.f32.mrb[12].mxu0  ;;  %16941 = vst [vmem:[#allocation21_spill] sm:$0xff] %v13336_v39  ;;  %v16831_v9 = vmax.f32 %v13326_v2, 0.0 }
 0x1b6   : > { %v1374_v38 = vpop.f32.mrb[13].mxu0  ;;  %v13351_v48 = vadd.f32 %v13192_v51, %v1372_v8  ;;  %v13367_v8 = vadd.f32 %v13188_v42, %v13095_v53 }
 0x1b7   : > { %v13343_v26 = vadd.f32 %v13196_v63, %v1374_v38  ;;  %11328 = vrot.lane.b32.xlu1 %v11327_v27, %s12584_s19  ;;  %v1376_v32 = vpop.f32.mrb[14].mxu0  ;;  %v16834_v38 = vmax.f32 %v13336_v39, 0.0 }
 0x1b8   : > { %v13347_v17 = vadd.f32 %v13192_v51, %v1376_v32  ;;  %v1378_v54 = vpop.f32.mrb[15].mxu0  ;;  %16942 = vst [vmem:[#allocation22_spill] sm:$0xff] %v13367_v8 }
 0x1b9   : > { %v16832_v33 = vmax.f32 %v13343_v26, 0.0  ;;  %v13355_v40 = vadd.f32 %v13196_v63, %v1378_v54  ;;  %11333 = vrot.lane.b32.xlu0 %v11332_v43, %s12584_s19  ;;  %v16839_v54 = vmax.f32 %v13351_v48, 0.0 }
 0x1ba   : > { %v16838_v27 = vmax.f32 %v13347_v17, 0.0 }
 0x1bb   : > { %v11337_v32 = vpack.i.bf16 %v16831_v9, %v16832_v33  ;;  %v16835_v10 = vmax.f32 %v13355_v40, 0.0  ;;  %v13377_v9 = vadd.f32 %v13188_v42, %v13105_v57 }
 0x1bc   : > { %v11347_v53 = vpack.i.bf16 %v16838_v27, %v16839_v54 }
 0x1bd   : > { %v11342_v43 = vpack.i.bf16 %v16834_v38, %v16835_v10  ;;  %11338 = vrot.lane.b32.xlu1 %v11337_v32, %s12584_s19  ;;  %v1382_v15 = vpop.f32.mrb[16].mxu0  ;;  %16943 = vst [vmem:[#allocation23_spill] sm:$0xff] %v13377_v9  ;;  %v16841_v10 = vmax.f32 %v13367_v8, 0.0 }
 0x1be   : > { %v1384_v25 = vpop.f32.mrb[17].mxu0  ;;  %v13392_v57 = vadd.f32 %v13192_v51, %v1382_v15  ;;  %v13408_v15 = vadd.f32 %v13188_v42, %v13115_v62 }
 0x1bf   : > { %v13384_v33 = vadd.f32 %v13196_v63, %v1384_v25  ;;  %11343 = vrot.lane.b32.xlu0 %v11342_v43, %s12584_s19  ;;  %v1386_v39 = vpop.f32.mrb[18].mxu0  ;;  %v16844_v25 = vmax.f32 %v13377_v9, 0.0 }
 0x1c0   : > { %v13388_v38 = vadd.f32 %v13192_v51, %v1386_v39  ;;  %v1388_v32 = vpop.f32.mrb[19].mxu0  ;;  %16944 = vst [vmem:[#allocation24_spill] sm:$0xff] %v13408_v15 }
 0x1c1   : > { %v16842_v2 = vmax.f32 %v13384_v33, 0.0  ;;  %v13396_v45 = vadd.f32 %v13196_v63, %v1388_v32  ;;  %11348 = vrot.lane.b32.xlu1 %v11347_v53, %s12584_s19  ;;  %v16849_v32 = vmax.f32 %v13392_v57, 0.0 }
 0x1c2   : > { %v16848_v43 = vmax.f32 %v13388_v38, 0.0 }
 0x1c3   : > { %v11352_v39 = vpack.i.bf16 %v16841_v10, %v16842_v2  ;;  %v16845_v27 = vmax.f32 %v13396_v45, 0.0  ;;  %v13418_v10 = vadd.f32 %v13188_v42, %v13125_v4 }
 0x1c4   : > { %v11362_v62 = vpack.i.bf16 %v16848_v43, %v16849_v32 }
 0x1c5   : > { %v11357_v53 = vpack.i.bf16 %v16844_v25, %v16845_v27  ;;  %11353 = vrot.lane.b32.xlu0 %v11352_v39, %s12584_s19  ;;  %v1392_v54 = vpop.f32.mrb[20].mxu0  ;;  %16945 = vst [vmem:[#allocation25_spill] sm:$0xff] %v13418_v10  ;;  %v16851_v27 = vmax.f32 %v13408_v15, 0.0 }
 0x1c6   : > { %v1394_v8 = vpop.f32.mrb[21].mxu0  ;;  %v13433_v4 = vadd.f32 %v13192_v51, %v1392_v54  ;;  %v13449_v54 = vadd.f32 %v13188_v42, %v13135_v13 }
 0x1c7   : > { %v13425_v2 = vadd.f32 %v13196_v63, %v1394_v8  ;;  %11358 = vrot.lane.b32.xlu1 %v11357_v53, %s12584_s19  ;;  %v1396_v9 = vpop.f32.mrb[22].mxu0  ;;  %v16854_v8 = vmax.f32 %v13418_v10, 0.0 }
 0x1c8   : > { %v13429_v25 = vadd.f32 %v13192_v51, %v1396_v9  ;;  %v1398_v39 = vpop.f32.mrb[23].mxu0  ;;  %16946 = vst [vmem:[#allocation26_spill] sm:$0xff] %v13449_v54 }
 0x1c9   : > { %v16852_v60 = vmax.f32 %v13425_v2, 0.0  ;;  %v13437_v52 = vadd.f32 %v13196_v63, %v1398_v39  ;;  %11363 = vrot.lane.b32.xlu0 %v11362_v62, %s12584_s19  ;;  %v16858_v39 = vmax.f32 %v13433_v4, 0.0 }
 0x1ca   : > { %v16857_v53 = vmax.f32 %v13429_v25, 0.0 }
 0x1cb   : > { %v11367_v9 = vpack.i.bf16 %v16851_v27, %v16852_v60  ;;  %v16855_v43 = vmax.f32 %v13437_v52, 0.0  ;;  %v13459_v27 = vadd.f32 %v13188_v42, %v13145_v18  ;;  %v16861_v18 = vmax.f32 %v13449_v54, 0.0 }
 0x1cc   : > { %v11377_v13 = vpack.i.bf16 %v16857_v53, %v16858_v39 }
 0x1cd   : > { %v11372_v62 = vpack.i.bf16 %v16854_v8, %v16855_v43  ;;  %11368 = vrot.lane.b32.xlu1 %v11367_v9, %s12584_s19  ;;  %v1402_v32 = vpop.f32.mrb[24].mxu0  ;;  %v13470_v8 = vsub.s32 3, %v13147_v20 }
 0x1ce   : > { %v1404_v15 = vpop.f32.mrb[25].mxu0  ;;  %v13477_v47 = vadd.f32 %v13192_v51, %v1402_v32 }
 0x1cf   : > { %v13466_v60 = vadd.f32 %v13196_v63, %v1404_v15  ;;  %11373 = vrot.lane.b32.xlu0 %v11372_v62, %s12584_s19  ;;  %v1406_v10 = vpop.f32.mrb[26].mxu0  ;;  %16947 = vst [vmem:[#allocation27_spill] sm:$0xff] %v13470_v8  ;;  %v16865_v62 = vmax.f32 %v13459_v27, 0.0  ;;  %v1606_v32 = vrot.slane %v13160_v28, %v13470_v8 }
 0x1d0   : > { %v13473_v9 = vadd.f32 %v13192_v51, %v1406_v10  ;;  %v1408_v43 = vpop.f32.mrb[27].mxu0  ;;  %v16884_v56 = vmax.f32 %v13477_v47, 0.0  ;;  %v13505_v10 = vadd.f32 %v13188_v42, %v13169_v35 }
 0x1d1   : > { %v16862_v53 = vmax.f32 %v13466_v60, 0.0  ;;  %v13481_v15 = vadd.f32 %v13196_v63, %v1408_v43  ;;  %11378 = vrot.lane.b32.xlu1 %v11377_v13, %s12584_s19  ;;  %v13520_v35 = vadd.f32 %v13040_v19, %v1606_v32 }
 0x1d2   : > { %16948 = vst [vmem:[#allocation28_spill] sm:$0xff] %v13505_v10  ;;  %v16949_v28 = vmax.f32 %v13473_v9, 0.0 }
 0x1d3   : > { %v11382_v20 = vpack.i.bf16 %v16861_v18, %v16862_v53  ;;  %v16885_v39 = vmax.f32 %v13481_v15, 0.0  ;;  %v13501_v53 = vadd.f32 %v13044_v23, %v1606_v32 }
 0x1d4   : > { %v11392_v8 = vpack.i.bf16 %v16949_v28, %v16884_v56  ;;  %v13553_v28 = vadd.f32 %v13060_v31, %v1606_v32  ;;  %v16954_v56 = vmax.f32 %v13218_v12, 0.0 }
 0x1d5   : > { %v11387_v43 = vpack.i.bf16 %v16865_v62, %v16885_v39  ;;  %11383 = vrot.lane.b32.xlu0 %v11382_v20, %s12584_s19  ;;  %v1412_v13 = vpop.f32.mrb[52].mxu0 }
 0x1d6   : > { %v1586_v54 = vadd.f32 %v1412_v13, %v13163_v29  ;;  %v1414_v18 = vpop.f32.mrb[53].mxu0  ;;  %v13514_v29 = vadd.f32 %v13024_v11, %v1606_v32  ;;  %v16869_v11 = vmax.f32 %v13501_v53, 0.0 }
 0x1d7   : > { %v1587_v62 = vadd.f32 %v1414_v18, %v13172_v37  ;;  %11388 = vrot.lane.b32.xlu1 %v11387_v43, %s12584_s19  ;;  %v1416_v20 = vpop.f32.mrb[54].mxu0  ;;  %v13527_v37 = vadd.f32 %v13020_v7, %v1606_v32  ;;  %v13532_v43 = vadd.f32 %v13087_v50, %v1606_v32  ;;  %v13542_v7 = vadd.f32 %v13083_v46, %v1606_v32 }
 0x1d8   : > { %v13517_v23 = vadd.f32 %v13192_v51, %v1586_v54  ;;  %v1417_v13 = vpop.f32.mrb[55].mxu0  ;;  %v16866_v51 = vmax.f32 %v13505_v10, 0.0  ;;  %v16882_v54 = vmax.f32 %v13514_v29, 0.0  ;;  %v13557_v20 = vadd.f32 %v1606_v32, %v13127_v6 }
 0x1d9   : > { %v13523_v42 = vadd.f32 %v13196_v63, %v1587_v62  ;;  %11393 = vrot.lane.b32.xlu0 %v11392_v8, %s12584_s19  ;;  %v16868_v63 = vmax.f32 %v13520_v35, 0.0  ;;  %v13539_v8 = vadd.f32 %v13067_v36, %v1606_v32  ;;  %v16870_v62 = vmax.f32 %v13527_v37, 0.0 }
 0x1da   : > { %v16867_v18 = vmax.f32 %v13517_v23, 0.0  ;;  %v16872_v36 = vmax.f32 %v13532_v43, 0.0  ;;  %v13574_v6 = vadd.f32 %v1606_v32, %v13120_v1 }
 0x1db   : > { %v16883_v19 = vmax.f32 %v13523_v42, 0.0  ;;  %v11407_v46 = vpack.i.bf16 %v16869_v11, %v16868_v63  ;;  %v11402_v13 = vpack.i.bf16 %v16882_v54, %v16870_v62  ;;  %v16874_v31 = vmax.f32 %v13539_v8, 0.0 }
 0x1dc   : > { %v13579_v63 = vadd.f32 %v1606_v32, %v13100_v55  ;;  %v16876_v11 = vmax.f32 %v13557_v20, 0.0  ;;  %v16875_v1 = vmax.f32 %v13574_v6, 0.0 }
 0x1dd   : > { %1903 = vrot.lane.b32.xlu0 %v16867_v18, %s12584_s19  ;;  %v11397_v50 = vpack.i.bf16 %v16866_v51, %v16883_v19  ;;  %v16871_v51 = vmax.f32 %v13542_v7, 0.0  ;;  %v13571_v18 = vadd.f32 %v1606_v32, %v13107_v58 }
 0x1df   : > { %11398 = vrot.lane.b32.xlu1 %v11397_v50, %s12584_s19  ;;  %v16873_v50 = vmax.f32 %v13553_v28, 0.0  ;;  %v11417_v58 = vpack.i.bf16 %v16872_v36, %v16871_v51  ;;  %v16881_v62 = vmax.f32 %v13571_v18, 0.0  ;;  %v11427_v51 = vpack.i.bf16 %v16876_v11, %v16875_v1 }
 0x1e0   : > { %v13603_v36 = vadd.f32 %v1606_v32, %v13140_v16 }
 0x1e1   : > { %11408 = vrot.lane.b32.xlu0 %v11407_v46, %s12584_s19  ;;  %v13590_v46 = vadd.f32 %v1606_v32, %v13149_v22  ;;  %v11412_v55 = vpack.i.bf16 %v16874_v31, %v16873_v50  ;;  %v13606_v22 = vadd.f32 %v1606_v32, %v13181_v44 }
 0x1e2   : > { %16951 = vst [vmem:[#allocation30_spill] sm:$0xff] %v13603_v36  ;;  %v16878_v31 = vmax.f32 %v13603_v36, 0.0 }
 0x1e3   : > { %11403 = vrot.lane.b32.xlu1 %v11402_v13, %s12584_s19  ;;  %16950 = vst [vmem:[#allocation29_spill] sm:$0xff] %v13590_v46  ;;  %v16877_v13 = vmax.f32 %v13579_v63, 0.0  ;;  %16952 = vst [vmem:[#allocation31_spill] sm:$0xff] %v13606_v22  ;;  %v16880_v50 = vmax.f32 %v13590_v46, 0.0  ;;  %v16879_v1 = vmax.f32 %v13606_v22, 0.0 }
 0x1e5   : > { %11418 = vrot.lane.b32.xlu0 %v11417_v58, %s12584_s19  ;;  %v11422_v58 = vpack.i.bf16 %v16881_v62, %v16877_v13  ;;  %v11432_v16 = vpack.i.bf16 %v16880_v50, %v16878_v31 }
 0x1e7   : > { %11413 = vrot.lane.b32.xlu1 %v11412_v55, %s12584_s19 }
 0x1e9   : > { %11428 = vrot.lane.b32.xlu0 %v11427_v51, %s12584_s19 }
 0x1eb   : > { %11423 = vrot.lane.b32.xlu1 %v11422_v58, %s12584_s19 }
 0x1ed   : > { %1909 = vrot.lane.b32.xlu0 %v16879_v1, %s12584_s19 }
 0x1ef   : > { %11433 = vrot.lane.b32.xlu1 %v11432_v16, %s12584_s19  ;;  %s542_s19 = scalar_lea.vmem [#allocation4], %s9711_s22  ;;  %s12590_s22 = smov [#allocation4]  }
 0x1f0   : > { %s9648_s18 = sshll.u32 %s542_s19, 4  ;;  %s12523_s30 = sshll.u32 %s12590_s22, 4  ;;  %s16741_s18 = int_to_ptr.vmem [resolvable:$true] %s9648_s18  ;;  %s12524_s30 = int_to_ptr.vmem [resolvable:$false] %s12523_s30 }
 0x1f1   : > { %s12519_s28 = scalar_lea.vmem %s16741_s18, 64  ;;  %s12525_s2 = scalar_lea.vmem %s12524_s30, 128 }
 0x1f2   : > { %p12520_p11 = scmp.ne.s32.totalorder %s16741_s18, %s12519_s28  ;;  %p12526_p0 = scmp.lt.s32.totalorder %s16741_s18, %s12524_s30 }
 0x1f3   : > { %p12527_p1 = scmp.lt.s32.totalorder %s12525_s2, %s12519_s28 }
 0x1f4   : > { %p12521_p12 = pnand %p12520_p11, %p12719_p5 }
 0x1f5   : > { %p12528_p2 = por %p12527_p1, %p12526_p0 }
 0x1f6   : > { %p12522_p13 = pneg %p12521_p12 }
 0x1f8   : > { %p12529_p3 = pnand %p12528_p2, %p12522_p13 }
 0x217   : > { %v13626_v44 = vpop.permute.xlu0 %11293 }
 0x218   : > { %v16887_v32 = vunpack.i.h.bf16 %v13626_v44  ;;  %v11295_v51 = vunpack.i.l.bf16 %v13626_v44  ;;  %v11304_v55 = vpop.permute.xlu1 %11303 }
 0x219   : > { %v11305_v58 = vunpack.i.l.bf16 %v11304_v55  ;;  %v11306_v11 = vunpack.i.h.bf16 %v11304_v55  ;;  %v16953_v55 = vmax.f32 %v13209_v61, 0.0 }
 0x21a   : > { %v1913_v31 = vsel %vm1911_vm2, %v11295_v51, %v16887_v32  ;;  %v16956_v32 = vmax.f32 %v13230_v30, 0.0 }
 0x21b   : > { %v13630_v13 = vpop.permute.xlu0 %11298  ;;  %v1912_v1 = vsel %vm1911_vm2, %v11305_v58, %v11295_v51  ;;  %v16955_v51 = vmax.f32 %v13212_v3, 0.0 }
 0x21c   : > { %v11301_v16 = vunpack.i.h.bf16 %v13630_v13  ;;  %v11300_v50 = vunpack.i.l.bf16 %v13630_v13  ;;  %v2017_v19 = vmax.f32 %v16953_v55, %v1912_v1  ;;  %v16957_v1 = vmax.f32 %v13259_v59, 0.0 }
 0x21d   : > { %v2018_v58 = vmax.f32 %v16955_v51, %v1913_v31  ;;  %v11649_v51 = vld [vmem:[%s16788_s7 + $0x110] ss:$8 sps:$4 sm:$0xff]   ;;  %v16986_v13 = vmax.f32 %v13226_v24, 0.0 }
 0x21e   : > { %v1915_v62 = vsel %vm1911_vm2, %v11306_v11, %v11300_v50  ;;  %v1916_v54 = vsel %vm1911_vm2, %v11300_v50, %v11301_v16 }
 0x21f   : > { %v2021_v39 = vmax.f32 %v16954_v56, %v1915_v62  ;;  %v13646_v10 = vpop.permute.xlu1 %11308  ;;  %v2022_v22 = vmax.f32 %v16956_v32, %v1916_v54  ;;  %v11646_v56 = vld [vmem:[%s16788_s7 + $0x100] ss:$8 sps:$4 sm:$0xff]   ;;  %v11651_v54 = vld [vmem:[%s16788_s7 + $0x114] ss:$8 sps:$4 sm:$0xff]   ;;  %v16958_v32 = vmax.f32 %v13270_v14, 0.0  ;;  %v16959_v14 = vmax.f32 %v13266_v5, 0.0 }
 0x220   : > { %v11311_v11 = vunpack.i.h.bf16 %v13646_v10  ;;  %v11310_v36 = vunpack.i.l.bf16 %v13646_v10 }
 0x221   : > { %v2077_v46 = vpack.c.bf16 %v2021_v39, %v2017_v19  ;;  %v13654_v50 = vpop.permute.xlu0 %11313  ;;  %v2078_v61 = vpack.c.bf16 %v2022_v22, %v2018_v58 }
 0x222   : > { %v1919_v3 = vsel %vm1911_vm2, %v11310_v36, %v11311_v11  ;;  %v11316_v12 = vunpack.i.h.bf16 %v13654_v50  ;;  %v11315_v30 = vunpack.i.l.bf16 %v13654_v50 }
 0x223   : > { %2490 = vmatprep.mubr.bf16.mxu0 %v2078_v61  ;;  %v11319_v39 = vpop.permute.xlu1 %11318  ;;  %v2026_v22 = vmax.f32 %v16957_v1, %v1919_v3 }
 0x224   : > { %v1922_v19 = vsel %vm1911_vm2, %v11315_v30, %v11316_v12  ;;  %v11321_v62 = vunpack.i.h.bf16 %v11319_v39  ;;  %v11320_v31 = vunpack.i.l.bf16 %v11319_v39  ;;  %2491 = vmatmul.mubr.bf16.vlgmr.msra.gmra.mrb[56].mxu0 %v2077_v46  ;;  %v11654_v46 = vld [vmem:[%s16788_s7 + $0x124] ss:$8 sps:$4 sm:$0xff]  }
 0x225   : > { %v2030_v55 = vmax.f32 %v16958_v32, %v1922_v19  ;;  %2570 = vmatpush1.bf16.msra.mxu0 %v11646_v56  ;;  %v16960_v56 = vmax.f32 %v13262_v0, 0.0 }
 0x226   : > { %v1918_v58 = vsel %vm1911_vm2, %v11320_v31, %v11310_v36  ;;  %v1921_v61 = vsel %vm1911_vm2, %v11321_v62, %v11315_v30  ;;  %2571 = vmatprep.subr.bf16.mxu0 %v11651_v54  ;;  %v11652_v62 = vld [vmem:[%s16788_s7 + $0x120] ss:$8 sps:$4 sm:$0xff]  }
 0x227   : > { %v13682_v39 = vpop.permute.xlu0 %11323  ;;  %v2082_v59 = vpack.c.bf16 %v2030_v55, %v2026_v22  ;;  %v2025_v3 = vmax.f32 %v16959_v14, %v1918_v58  ;;  %v2029_v19 = vmax.f32 %v16960_v56, %v1921_v61  ;;  %v11657_v22 = vld [vmem:[%s16788_s7 + $0x134] ss:$8 sps:$4 sm:$0xff]   ;;  %v16961_v61 = vmax.f32 %v13302_v21, 0.0 }
 0x228   : > { %v11326_v1 = vunpack.i.h.bf16 %v13682_v39  ;;  %v11325_v36 = vunpack.i.l.bf16 %v13682_v39  ;;  %v16962_v14 = vmax.f32 %v13314_v49, 0.0  ;;  %v16963_v49 = vmax.f32 %v13310_v34, 0.0 }
 0x229   : > { %2500 = vmatprep.mubr.bf16.mxu0 %v2082_v59  ;;  %v13690_v30 = vpop.permute.xlu1 %11328  ;;  %v2081_v54 = vpack.c.bf16 %v2029_v19, %v2025_v3  ;;  %2572 = vmatpush1.bf16.msra.mxu0 %v11649_v51 }
 0x22a   : > { %v1925_v5 = vsel %vm1911_vm2, %v11325_v36, %v11326_v1  ;;  %v11331_v0 = vunpack.i.h.bf16 %v13690_v30  ;;  %v11330_v31 = vunpack.i.l.bf16 %v13690_v30  ;;  %2573 = vmatprep.subr.bf16.mxu0 %v11654_v46  ;;  %v11655_v46 = vld [vmem:[%s16788_s7 + $0x130] ss:$8 sps:$4 sm:$0xff]  }
 0x22b   : > { %v11334_v32 = vpop.permute.xlu0 %11333  ;;  %v2034_v59 = vmax.f32 %v16961_v61, %v1925_v5 }
 0x22c   : > { %v1928_v55 = vsel %vm1911_vm2, %v11330_v31, %v11331_v0  ;;  %v11336_v51 = vunpack.i.h.bf16 %v11334_v32  ;;  %v11335_v58 = vunpack.i.l.bf16 %v11334_v32  ;;  %2501 = vmatmul.mubr.bf16.gmra.mrb[60].mxu0 %v2081_v54  ;;  %v11660_v54 = vld [vmem:[%s16788_s7 + $0x144] ss:$8 sps:$4 sm:$0xff]  }
 0x22d   : > { %v2038_v3 = vmax.f32 %v16962_v14, %v1928_v55  ;;  %2574 = vmatpush1.bf16.msra.mxu0 %v11652_v62  ;;  %v16964_v62 = vmax.f32 %v13306_v41, 0.0 }
 0x22e   : > { %v1924_v56 = vsel %vm1911_vm2, %v11335_v58, %v11325_v36  ;;  %v1927_v19 = vsel %vm1911_vm2, %v11336_v51, %v11330_v31  ;;  %2575 = vmatprep.subr.bf16.mxu0 %v11657_v22  ;;  %v11658_v51 = vld [vmem:[%s16788_s7 + $0x140] ss:$8 sps:$4 sm:$0xff]  }
 0x22f   : > { %v13718_v32 = vpop.permute.xlu1 %11338  ;;  %v2086_v21 = vpack.c.bf16 %v2038_v3, %v2034_v59  ;;  %v2033_v5 = vmax.f32 %v16963_v49, %v1924_v56  ;;  %v2037_v55 = vmax.f32 %v16964_v62, %v1927_v19  ;;  %v11663_v59 = vld [vmem:[%s16788_s7 + $0x154] ss:$8 sps:$4 sm:$0xff]   ;;  %v16965_v19 = vmax.f32 %v13343_v26, 0.0 }
 0x230   : > { %v11341_v61 = vunpack.i.h.bf16 %v13718_v32  ;;  %v11340_v36 = vunpack.i.l.bf16 %v13718_v32  ;;  %v16966_v49 = vmax.f32 %v13355_v40, 0.0  ;;  %v16967_v40 = vmax.f32 %v13351_v48, 0.0 }
 0x231   : > { %2510 = vmatprep.mubr.bf16.mxu0 %v2086_v21  ;;  %v13726_v31 = vpop.permute.xlu0 %11343  ;;  %v2085_v22 = vpack.c.bf16 %v2037_v55, %v2033_v5  ;;  %2576 = vmatpush1.bf16.msra.mxu0 %v11655_v46 }
 0x232   : > { %v1931_v34 = vsel %vm1911_vm2, %v11340_v36, %v11341_v61  ;;  %v11346_v41 = vunpack.i.h.bf16 %v13726_v31  ;;  %v11345_v58 = vunpack.i.l.bf16 %v13726_v31  ;;  %2577 = vmatprep.subr.bf16.mxu0 %v11660_v54  ;;  %v11661_v54 = vld [vmem:[%s16788_s7 + $0x150] ss:$8 sps:$4 sm:$0xff]  }
 0x233   : > { %v11349_v14 = vpop.permute.xlu1 %11348  ;;  %v2042_v21 = vmax.f32 %v16965_v19, %v1931_v34 }
 0x234   : > { %v1934_v3 = vsel %vm1911_vm2, %v11345_v58, %v11346_v41  ;;  %v11351_v46 = vunpack.i.h.bf16 %v11349_v14  ;;  %v11350_v56 = vunpack.i.l.bf16 %v11349_v14  ;;  %2511 = vmatmul.mubr.bf16.gmra.mrb[64].mxu0 %v2085_v22  ;;  %v11666_v22 = vld [vmem:[%s16788_s7 + $0x164] ss:$8 sps:$4 sm:$0xff]  }
 0x235   : > { %v2046_v5 = vmax.f32 %v16966_v49, %v1934_v3  ;;  %2578 = vmatpush1.bf16.msra.mxu0 %v11658_v51  ;;  %v16968_v51 = vmax.f32 %v13347_v17, 0.0 }
 0x236   : > { %v1930_v62 = vsel %vm1911_vm2, %v11350_v56, %v11340_v36  ;;  %v1933_v55 = vsel %vm1911_vm2, %v11351_v46, %v11345_v58  ;;  %2579 = vmatprep.subr.bf16.mxu0 %v11663_v59  ;;  %v11664_v46 = vld [vmem:[%s16788_s7 + $0x160] ss:$8 sps:$4 sm:$0xff]  }
 0x237   : > { %v13754_v14 = vpop.permute.xlu0 %11353  ;;  %v2090_v26 = vpack.c.bf16 %v2046_v5, %v2042_v21  ;;  %v2041_v34 = vmax.f32 %v16967_v40, %v1930_v62  ;;  %v2045_v3 = vmax.f32 %v16968_v51, %v1933_v55  ;;  %v11669_v21 = vld [vmem:[%s16788_s7 + $0x174] ss:$8 sps:$4 sm:$0xff]   ;;  %v16969_v55 = vmax.f32 %v13384_v33, 0.0 }
 0x238   : > { %v16892_v19 = vunpack.i.h.bf16 %v13754_v14  ;;  %v11355_v36 = vunpack.i.l.bf16 %v13754_v14  ;;  %v16970_v40 = vmax.f32 %v13396_v45, 0.0  ;;  %v16971_v45 = vmax.f32 %v13392_v57, 0.0 }
 0x239   : > { %2520 = vmatprep.mubr.bf16.mxu0 %v2090_v26  ;;  %v13762_v58 = vpop.permute.xlu1 %11358  ;;  %v2089_v59 = vpack.c.bf16 %v2045_v3, %v2041_v34  ;;  %2580 = vmatpush1.bf16.msra.mxu0 %v11661_v54 }
 0x23a   : > { %v1937_v48 = vsel %vm1911_vm2, %v11355_v36, %v16892_v19  ;;  %v11361_v17 = vunpack.i.h.bf16 %v13762_v58  ;;  %v11360_v56 = vunpack.i.l.bf16 %v13762_v58  ;;  %2581 = vmatprep.subr.bf16.mxu0 %v11666_v22  ;;  %v11667_v22 = vld [vmem:[%s16788_s7 + $0x170] ss:$8 sps:$4 sm:$0xff]  }
 0x23b   : > { %v11364_v49 = vpop.permute.xlu0 %11363  ;;  %v2050_v26 = vmax.f32 %v16969_v55, %v1937_v48 }
 0x23c   : > { %v1940_v5 = vsel %vm1911_vm2, %v11360_v56, %v11361_v17  ;;  %v11366_v54 = vunpack.i.h.bf16 %v11364_v49  ;;  %v11365_v62 = vunpack.i.l.bf16 %v11364_v49  ;;  %2521 = vmatmul.mubr.bf16.gmra.mrb[68].mxu0 %v2089_v59  ;;  %v11672_v59 = vld [vmem:[%s16788_s7 + $0x184] ss:$8 sps:$4 sm:$0xff]  }
 0x23d   : > { %v2054_v34 = vmax.f32 %v16970_v40, %v1940_v5  ;;  %2582 = vmatpush1.bf16.msra.mxu0 %v11664_v46  ;;  %v16972_v46 = vmax.f32 %v13388_v38, 0.0 }
 0x23e   : > { %v1936_v51 = vsel %vm1911_vm2, %v11365_v62, %v11355_v36  ;;  %v1939_v3 = vsel %vm1911_vm2, %v11366_v54, %v11360_v56  ;;  %2583 = vmatprep.subr.bf16.mxu0 %v11669_v21  ;;  %v11670_v54 = vld [vmem:[%s16788_s7 + $0x180] ss:$8 sps:$4 sm:$0xff]  }
 0x23f   : > { %v13790_v49 = vpop.permute.xlu1 %11368  ;;  %v2094_v33 = vpack.c.bf16 %v2054_v34, %v2050_v26  ;;  %v2049_v48 = vmax.f32 %v16971_v45, %v1936_v51  ;;  %v2053_v5 = vmax.f32 %v16972_v46, %v1939_v3  ;;  %v11675_v26 = vld [vmem:[%s16788_s7 + $0x194] ss:$8 sps:$4 sm:$0xff]   ;;  %v16973_v3 = vmax.f32 %v13425_v2, 0.0 }
 0x240   : > { %v11371_v55 = vunpack.i.h.bf16 %v13790_v49  ;;  %v11370_v36 = vunpack.i.l.bf16 %v13790_v49  ;;  %v16974_v45 = vmax.f32 %v13437_v52, 0.0  ;;  %v16975_v52 = vmax.f32 %v13433_v4, 0.0 }
 0x241   : > { %2530 = vmatprep.mubr.bf16.mxu0 %v2094_v33  ;;  %v13798_v56 = vpop.permute.xlu0 %11373  ;;  %v2093_v21 = vpack.c.bf16 %v2053_v5, %v2049_v48  ;;  %2584 = vmatpush1.bf16.msra.mxu0 %v11667_v22 }
 0x242   : > { %v1943_v57 = vsel %vm1911_vm2, %v11370_v36, %v11371_v55  ;;  %v11376_v38 = vunpack.i.h.bf16 %v13798_v56  ;;  %v11375_v62 = vunpack.i.l.bf16 %v13798_v56  ;;  %2585 = vmatprep.subr.bf16.mxu0 %v11672_v59  ;;  %v11673_v59 = vld [vmem:[%s16788_s7 + $0x190] ss:$8 sps:$4 sm:$0xff]  }
 0x243   : > { %v11379_v40 = vpop.permute.xlu1 %11378  ;;  %v2058_v33 = vmax.f32 %v16973_v3, %v1943_v57 }
 0x244   : > { %v1946_v34 = vsel %vm1911_vm2, %v11375_v62, %v11376_v38  ;;  %v11381_v22 = vunpack.i.h.bf16 %v11379_v40  ;;  %v11380_v51 = vunpack.i.l.bf16 %v11379_v40  ;;  %2531 = vmatmul.mubr.bf16.gmra.mrb[72].mxu0 %v2093_v21  ;;  %v11678_v21 = vld [vmem:[%s16788_s7 + $0x1a4] ss:$8 sps:$4 sm:$0xff]  }
 0x245   : > { %v2062_v48 = vmax.f32 %v16974_v45, %v1946_v34  ;;  %2586 = vmatpush1.bf16.msra.mxu0 %v11670_v54  ;;  %v16976_v54 = vmax.f32 %v13429_v25, 0.0 }
 0x246   : > { %v1942_v46 = vsel %vm1911_vm2, %v11380_v51, %v11370_v36  ;;  %v1945_v5 = vsel %vm1911_vm2, %v11381_v22, %v11375_v62  ;;  %2587 = vmatprep.subr.bf16.mxu0 %v11675_v26  ;;  %v11676_v22 = vld [vmem:[%s16788_s7 + $0x1a0] ss:$8 sps:$4 sm:$0xff]  }
 0x247   : > { %v13826_v40 = vpop.permute.xlu0 %11383  ;;  %v2098_v2 = vpack.c.bf16 %v2062_v48, %v2058_v33  ;;  %v2057_v57 = vmax.f32 %v16975_v52, %v1942_v46  ;;  %v2061_v34 = vmax.f32 %v16976_v54, %v1945_v5  ;;  %v16977_v46 = vmax.f32 %v13466_v60, 0.0 }
 0x248   : > { %v16891_v3 = vunpack.i.h.bf16 %v13826_v40  ;;  %v11385_v36 = vunpack.i.l.bf16 %v13826_v40 }
 0x249   : > { %2540 = vmatprep.mubr.bf16.mxu0 %v2098_v2  ;;  %v13834_v62 = vpop.permute.xlu1 %11388  ;;  %v2097_v26 = vpack.c.bf16 %v2061_v34, %v2057_v57  ;;  %2588 = vmatpush1.bf16.msra.mxu0 %v11673_v59  ;;  %v16978_v2 = vmax.f32 %v13481_v15, 0.0 }
 0x24a   : > { %v1949_v4 = vsel %vm1911_vm2, %v11385_v36, %v16891_v3  ;;  %v16893_v25 = vunpack.i.h.bf16 %v13834_v62  ;;  %v11390_v51 = vunpack.i.l.bf16 %v13834_v62  ;;  %2589 = vmatprep.subr.bf16.mxu0 %v11678_v21  ;;  %v16979_v3 = vmax.f32 %v13477_v47, 0.0 }
 0x24b   : > { %v11394_v33 = vpop.permute.xlu0 %11393  ;;  %v2066_v5 = vmax.f32 %v16977_v46, %v1949_v4 }
 0x24c   : > { %v1952_v45 = vsel %vm1911_vm2, %v11390_v51, %v16893_v25  ;;  %v11396_v48 = vunpack.i.h.bf16 %v11394_v33  ;;  %v11395_v59 = vunpack.i.l.bf16 %v11394_v33  ;;  %2541 = vmatmul.mubr.bf16.gmra.mrb[76].mxu0 %v2097_v26  ;;  %v16980_v25 = vmax.f32 %v13473_v9, 0.0 }
 0x24d   : > { %v2070_v52 = vmax.f32 %v16978_v2, %v1952_v45  ;;  %2590 = vmatpush1.bf16.msra.mxu0 %v11676_v22  ;;  %v16981_v9 = vmax.f32 %v13523_v42, 0.0  ;;  %v16983_v42 = vmax.f32 %v13514_v29, 0.0 }
 0x24e   : > { %v1948_v57 = vsel %vm1911_vm2, %v11395_v59, %v11385_v36  ;;  %v1951_v54 = vsel %vm1911_vm2, %v11396_v48, %v11390_v51 }
 0x24f   : > { %v1904_v21 = vpop.permute.xlu0 %1903  ;;  %v2102_v34 = vpack.c.bf16 %v2070_v52, %v2066_v5  ;;  %v2065_v19 = vmax.f32 %v16979_v3, %v1948_v57  ;;  %v2069_v33 = vmax.f32 %v16980_v25, %v1951_v54 }
 0x251   : > { %2550 = vmatprep.mubr.bf16.mxu0 %v2102_v34  ;;  %v13857_v26 = vpop.permute.xlu1 %11398  ;;  %v2101_v60 = vpack.c.bf16 %v2069_v33, %v2065_v19  ;;  %v16982_v19 = vmax.f32 %v13517_v23, 0.0  ;;  %v16984_v23 = vunpack.i.h.bf16 %v13626_v44  ;;  %v16985_v34 = vmax.f32 %v13527_v37, 0.0 }
 0x252   : > { %v11401_v15 = vunpack.i.h.bf16 %v13857_v26  ;;  %v11400_v22 = vunpack.i.l.bf16 %v13857_v26  ;;  %v16989_v44 = vmax.f32 %v13501_v53, 0.0  ;;  %v11694_v26 = vld [vmem:[%s16784_s3 + $0x22c] ss:$16 sps:$4 sm:$0xff]  }
 0x253   : > { %v11409_v4 = vpop.permute.xlu0 %11408 }
 0x254   : > { %v11410_v36 = vunpack.i.l.bf16 %v11409_v4  ;;  %2551 = vmatmul.mubr.bf16.gmra.mrb[80].mxu0 %v2101_v60  ;;  %v1955_v51 = vsel %vm1911_vm2, %v11400_v22, %v11401_v15  ;;  %v1954_v47 = vsel %vm1911_vm2, %v1904_v21, %v11400_v22  ;;  %v11411_v45 = vunpack.i.h.bf16 %v11409_v4 }
 0x255   : > { %v11404_v3 = vpop.permute.xlu1 %11403  ;;  %v2074_v25 = vmax.f32 %v16981_v9, %v1955_v51  ;;  %v2073_v48 = vmax.f32 %v16982_v19, %v1954_v47 }
 0x256   : > { %v11406_v59 = vunpack.i.h.bf16 %v11404_v3  ;;  %v11405_v46 = vunpack.i.l.bf16 %v11404_v3  ;;  %v1920_v52 = vsel %vm1911_vm2, %v11311_v11, %v11410_v36  ;;  %v1923_v10 = vsel %vm1911_vm2, %v11316_v12, %v11411_v45  ;;  %v16990_v12 = vld [vmem:[#allocation16_spill] sm:$0xff] }
 0x257   : > { %v13869_v5 = vpop.permute.xlu0 %11418  ;;  %v2106_v2 = vpack.c.bf16 %v2074_v25, %v2074_v25  ;;  %v2105_v4 = vpack.c.bf16 %v2073_v48, %v2073_v48  ;;  %v2032_v51 = vmax.f32 %v16989_v44, %v11411_v45  ;;  %v16991_v19 = vmax.f32 %v16990_v12, 0.0  ;;  %v17007_v12 = vld [vmem:[#allocation22_spill] sm:$0xff] }
 0x258   : > { %v1917_v57 = vsel %vm1911_vm2, %v11301_v16, %v11406_v59  ;;  %v2024_v54 = vmax.f32 %v16983_v42, %v11406_v59  ;;  %v1914_v21 = vsel %vm1911_vm2, %v16984_v23, %v11405_v46  ;;  %v2020_v33 = vmax.f32 %v16985_v34, %v11405_v46  ;;  %v16987_v16 = vld [vmem:[#allocation15_spill] sm:$0xff] }
 0x259   : > { %v11414_v60 = vpop.permute.xlu1 %11413  ;;  %2560 = vmatprep.mubr.bf16.mxu0 %v2106_v2  ;;  %v2023_v11 = vmax.f32 %v16986_v13, %v1917_v57  ;;  %v16988_v22 = vmax.f32 %v16987_v16, 0.0  ;;  %v11420_v37 = vunpack.i.l.bf16 %v13869_v5  ;;  %v2027_v24 = vmax.f32 %v16991_v19, %v1920_v52  ;;  %v16993_v2 = vld [vmem:[#allocation17_spill] sm:$0xff]  ;;  %v16998_v13 = vld [vmem:[#allocation19_spill] sm:$0xff]  ;;  %v17000_v16 = vld [vmem:[#allocation20_spill] sm:$0xff] }
 0x25a   : > { %v2080_v47 = vpack.c.bf16 %v2024_v54, %v2020_v33  ;;  %v11416_v25 = vunpack.i.h.bf16 %v11414_v60  ;;  %v11415_v50 = vunpack.i.l.bf16 %v11414_v60  ;;  %v16992_v59 = vmax.f32 %v13520_v35, 0.0 }
 0x25b   : > { %v2019_v29 = vmax.f32 %v16988_v22, %v1914_v21  ;;  %v13894_v3 = vpop.permute.xlu0 %11428  ;;  %v11421_v48 = vunpack.i.h.bf16 %v13869_v5  ;;  %v16994_v57 = vmax.f32 %v16993_v2, 0.0  ;;  %v1932_v52 = vsel %vm1911_vm2, %v11341_v61, %v11420_v37 }
 0x25c   : > { %2561 = vmatmul.mubr.bf16.gmra.mrb[84].mxu0 %v2105_v4  ;;  %v2028_v46 = vmax.f32 %v16992_v59, %v11410_v36  ;;  %v11431_v53 = vunpack.i.h.bf16 %v13894_v3  ;;  %v11430_v54 = vunpack.i.l.bf16 %v13894_v3  ;;  %v1929_v35 = vsel %vm1911_vm2, %v11331_v0, %v11416_v25 }
 0x25d   : > { %v2079_v9 = vpack.c.bf16 %v2023_v11, %v2019_v29  ;;  %v11424_v45 = vpop.permute.xlu1 %11423  ;;  %9861 = vmatprep.mubr.msk.bf16.mxu0 %vm2433_vm3, %v2080_v47  ;;  %v2031_v42 = vmax.f32 %v16994_v57, %v1923_v10  ;;  %v1926_v36 = vsel %vm1911_vm2, %v11326_v1, %v11415_v50  ;;  %v1935_v33 = vsel %vm1911_vm2, %v11346_v41, %v11421_v48  ;;  %v16996_v41 = vld [vmem:[#allocation18_spill] sm:$0xff] }
 0x25e   : > { %v11426_v23 = vunpack.i.h.bf16 %v11424_v45  ;;  %v11425_v21 = vunpack.i.l.bf16 %v11424_v45  ;;  %v2084_v34 = vpack.c.bf16 %v2032_v51, %v2028_v46  ;;  %v1947_v32 = vsel %vm1911_vm2, %v11376_v38, %v11431_v53  ;;  %v17005_v51 = vld [vmem:[#allocation21_spill] sm:$0xff] }
 0x25f   : > { %v2083_v5 = vpack.c.bf16 %v2031_v42, %v2027_v24  ;;  %v1944_v30 = vsel %vm1911_vm2, %v11371_v55, %v11430_v54  ;;  %v16995_v1 = vunpack.i.h.bf16 %v13754_v14  ;;  %v16997_v10 = vmax.f32 %v16996_v41, 0.0 }
 0x260   : > { %v1941_v39 = vsel %vm1911_vm2, %v11361_v17, %v11426_v23  ;;  %v16999_v38 = vmax.f32 %v16998_v13, 0.0  ;;  %v17001_v49 = vmax.f32 %v17000_v16, 0.0  ;;  %v17002_v55 = vunpack.i.h.bf16 %v13834_v62  ;;  %v17009_v62 = vld [vmem:[#allocation23_spill] sm:$0xff]  ;;  %v17025_v16 = vld [vmem:[#allocation29_spill] sm:$0xff] }
 0x261   : > { %v11434_v60 = vpop.permute.xlu1 %11433  ;;  %v1938_v0 = vsel %vm1911_vm2, %v16995_v1, %v11425_v21  ;;  %v2035_v56 = vmax.f32 %v16997_v10, %v1926_v36  ;;  %v17003_v14 = vmax.f32 %v13539_v8, 0.0  ;;  %v17004_v29 = vunpack.i.h.bf16 %v13826_v40 }
 0x262   : > { %v11436_v61 = vunpack.i.h.bf16 %v11434_v60  ;;  %v11435_v31 = vunpack.i.l.bf16 %v11434_v60  ;;  %v2039_v11 = vmax.f32 %v16999_v38, %v1929_v35  ;;  %v2043_v22 = vmax.f32 %v17001_v49, %v1932_v52  ;;  %v17016_v35 = vld [vmem:[#allocation26_spill] sm:$0xff] }
 0x263   : > { %v2040_v17 = vmax.f32 %v17003_v14, %v11416_v25  ;;  %v17006_v47 = vmax.f32 %v17005_v51, 0.0  ;;  %v17008_v19 = vmax.f32 %v17007_v12, 0.0  ;;  %v17010_v59 = vmax.f32 %v17009_v62, 0.0  ;;  %v17013_v25 = vld [vmem:[#allocation25_spill] sm:$0xff]  ;;  %v17027_v49 = vld [vmem:[#allocation30_spill] sm:$0xff] }
 0x264   : > { %v1953_v58 = vsel %vm1911_vm2, %v17002_v55, %v11436_v61  ;;  %2602 = vmatmul.mubr.bf16.vlgmr.msra.gmra.mrb[56].mxu0 %v2079_v9  ;;  %v1950_v4 = vsel %vm1911_vm2, %v17004_v29, %v11435_v31  ;;  %v2087_v44 = vpack.c.bf16 %v2039_v11, %v2035_v56  ;;  %v17011_v9 = vld [vmem:[#allocation24_spill] sm:$0xff]  ;;  %v17014_v2 = vmax.f32 %v17013_v25, 0.0  ;;  %v1910_v55 = vpop.permute.xlu0 %1909  ;;  %v11686_v29 = vld [vmem:[%s16784_s3 + $0x208] ss:$16 sps:$4 sm:$0xff]   ;;  %v11712_v12 = vld [vmem:[%s16784_s3 + $0x28c] ss:$16 sps:$4 sm:$0xff]  }
 0x265   : > { %9862 = vmatprep.mubr.msk.bf16.mxu0 %vm2433_vm3, %v2084_v34  ;;  %v2047_v3 = vmax.f32 %v17006_v47, %v1935_v33  ;;  %v2051_v24 = vmax.f32 %v17008_v19, %v1938_v0  ;;  %v2055_v46 = vmax.f32 %v17010_v59, %v1941_v39  ;;  %v17012_v45 = vmax.f32 %v17011_v9, 0.0  ;;  %v11698_v51 = vld [vmem:[%s16784_s3 + $0x248] ss:$16 sps:$4 sm:$0xff]   ;;  %v11706_v47 = vld [vmem:[%s16784_s3 + $0x26c] ss:$16 sps:$4 sm:$0xff]  }
 0x266   : > { %v2063_v40 = vmax.f32 %v17014_v2, %v1947_v32  ;;  %v17015_v57 = vmax.f32 %v13553_v28, 0.0  ;;  %v17017_v36 = vmax.f32 %v17016_v35, 0.0  ;;  %v17018_v33 = vmax.f32 %v13459_v27, 0.0  ;;  %v11710_v19 = vld [vmem:[%s16784_s3 + $0x288] ss:$16 sps:$4 sm:$0xff]  }
 0x267   : > { %v2059_v8 = vmax.f32 %v17012_v45, %v1944_v30  ;;  %v2091_v52 = vpack.c.bf16 %v2047_v3, %v2043_v22  ;;  %v2095_v1 = vpack.c.bf16 %v2055_v46, %v2051_v24  ;;  %v17019_v30 = vmax.f32 %v13532_v43, 0.0  ;;  %v11704_v3 = vld [vmem:[%s16784_s3 + $0x268] ss:$16 sps:$4 sm:$0xff]   ;;  %v11718_v24 = vld [vmem:[%s16784_s3 + $0x2ac] ss:$16 sps:$4 sm:$0xff]  }
 0x268   : > { %v2036_v42 = vmax.f32 %v17015_v57, %v11415_v50  ;;  %v2067_v34 = vmax.f32 %v17017_v36, %v1950_v4  ;;  %v2071_v60 = vmax.f32 %v17018_v33, %v1953_v58  ;;  %v17020_v28 = vmax.f32 %v13542_v7, 0.0  ;;  %v11688_v4 = vld [vmem:[%s16784_s3 + $0x20c] ss:$16 sps:$4 sm:$0xff]   ;;  %v11716_v62 = vld [vmem:[%s16784_s3 + $0x2a8] ss:$16 sps:$4 sm:$0xff]  }
 0x269   : > { %v2099_v0 = vpack.c.bf16 %v2063_v40, %v2059_v8  ;;  %v2048_v32 = vmax.f32 %v17019_v30, %v11421_v48  ;;  %v17021_v27 = vmax.f32 %v13571_v18, 0.0  ;;  %v17022_v13 = vmax.f32 %v13579_v63, 0.0  ;;  %3610 = vmatprep.subr.bf16.mxu0 %v11688_v4  ;;  %v11724_v59 = vld [vmem:[%s16784_s3 + $0x2cc] ss:$16 sps:$4 sm:$0xff]   ;;  %v11722_v46 = vld [vmem:[%s16784_s3 + $0x2c8] ss:$16 sps:$4 sm:$0xff]  }
 0x26a   : > { %v2103_v41 = vpack.c.bf16 %v2071_v60, %v2067_v34  ;;  %v2088_v39 = vpack.c.bf16 %v2040_v17, %v2036_v42  ;;  %v2044_v50 = vmax.f32 %v17020_v28, %v11420_v37  ;;  %v17023_v43 = vmax.f32 %v13557_v20, 0.0  ;;  %v17029_v20 = vld [vmem:[#allocation31_spill] sm:$0xff]  ;;  %3611 = vmatpush1.bf16.msra.mxu0 %v11686_v29 }
 0x26b   : > { %v2056_v56 = vmax.f32 %v17021_v27, %v11426_v23  ;;  %v2052_v38 = vmax.f32 %v17022_v13, %v11425_v21  ;;  %v17024_v7 = vmax.f32 %v13574_v6, 0.0  ;;  %v17026_v18 = vmax.f32 %v17025_v16, 0.0  ;;  %3612 = vmatprep.subr.bf16.mxu0 %v11694_v26  ;;  %v11730_v9 = vld [vmem:[%s16784_s3 + $0x2ec] ss:$16 sps:$4 sm:$0xff]   ;;  %v11728_v45 = vld [vmem:[%s16784_s3 + $0x2e8] ss:$16 sps:$4 sm:$0xff]  }
 0x26c   : > { %2612 = vmatmul.mubr.bf16.gmra.mrb[60].mxu0 %v2083_v5  ;;  %v2092_v10 = vpack.c.bf16 %v2048_v32, %v2044_v50  ;;  %v2064_v48 = vmax.f32 %v17023_v43, %v11431_v53  ;;  %v17028_v63 = vmax.f32 %v17027_v49, 0.0  ;;  %v17030_v53 = vmax.f32 %v17029_v20, 0.0  ;;  %v11736_v8 = vld [vmem:[%s16784_s3 + $0x30c] ss:$16 sps:$4 sm:$0xff]   ;;  %v11734_v40 = vld [vmem:[%s16784_s3 + $0x308] ss:$16 sps:$4 sm:$0xff]  }
 0x26d   : > { %9863 = vmatprep.mubr.msk.bf16.mxu0 %vm2433_vm3, %v2088_v39  ;;  %v2096_v11 = vpack.c.bf16 %v2056_v56, %v2052_v38  ;;  %v2060_v37 = vmax.f32 %v17024_v7, %v11430_v54  ;;  %v2072_v23 = vmax.f32 %v17026_v18, %v11436_v61  ;;  %v1956_v6 = vsel %vm1911_vm2, %v11401_v15, %v1910_v55  ;;  %v17031_v61 = vld [vmem:[#allocation28_spill] sm:$0xff]  ;;  %v11692_v15 = vld [vmem:[%s16784_s3 + $0x228] ss:$16 sps:$4 sm:$0xff]   ;;  %v11742_v42 = vld [vmem:[%s16784_s3 + $0x32c] ss:$16 sps:$4 sm:$0xff]  }
 0x26e   : > { %v2068_v21 = vmax.f32 %v17028_v63, %v11435_v31  ;;  %v2076_v58 = vmax.f32 %v17030_v53, %v1910_v55  ;;  %v17032_v14 = vmax.f32 %v17031_v61, 0.0  ;;  %3613 = vmatpush1.bf16.msra.mxu0 %v11692_v15 }
 0x26f   : > { %v2100_v5 = vpack.c.bf16 %v2064_v48, %v2060_v37 }
 0x270   : > { %v2104_v22 = vpack.c.bf16 %v2072_v23, %v2068_v21  ;;  %v2108_v54 = vpack.c.bf16 %v2076_v58, %v2076_v58  ;;  %v2075_v17 = vmax.f32 %v17032_v14, %v1956_v6 }
 0x272   : > { %v2107_v31 = vpack.c.bf16 %v2075_v17, %v2075_v17 }
 0x274   : > { %2622 = vmatmul.mubr.bf16.gmra.mrb[64].mxu0 %v2087_v44  ;;  %v11700_v44 = vld [vmem:[%s16784_s3 + $0x24c] ss:$16 sps:$4 sm:$0xff]  }
 0x275   : > { %9864 = vmatprep.mubr.msk.bf16.mxu0 %vm2433_vm3, %v2092_v10  ;;  %3614 = vmatprep.subr.bf16.mxu0 %v11700_v44 }
 0x276   : > { %3615 = vmatpush1.bf16.msra.mxu0 %v11698_v51 }
 0x277   : > { %3616 = vmatprep.subr.bf16.mxu0 %v11706_v47 }
 0x27a   : > { %3617 = vmatpush1.bf16.msra.mxu0 %v11704_v3 }
 0x27b   : > { %3618 = vmatprep.subr.bf16.mxu0 %v11712_v12 }
 0x27c   : > { %2632 = vmatmul.mubr.bf16.gmra.mrb[68].mxu0 %v2091_v52 }
 0x27d   : > { %9865 = vmatprep.mubr.msk.bf16.mxu0 %vm2433_vm3, %v2096_v11 }
 0x27e   : > { %3619 = vmatpush1.bf16.msra.mxu0 %v11710_v19 }
 0x27f   : > { %3620 = vmatprep.subr.bf16.mxu0 %v11718_v24 }
 0x282   : > { %3621 = vmatpush1.bf16.msra.mxu0 %v11716_v62 }
 0x283   : > { %3622 = vmatprep.subr.bf16.mxu0 %v11724_v59 }
 0x284   : > { %2642 = vmatmul.mubr.bf16.gmra.mrb[72].mxu0 %v2095_v1  ;;  %v11740_v1 = vld [vmem:[%s16784_s3 + $0x328] ss:$16 sps:$4 sm:$0xff]  }
 0x285   : > { %9866 = vmatprep.mubr.msk.bf16.mxu0 %vm2433_vm3, %v2100_v5 }
 0x286   : > { %3623 = vmatpush1.bf16.msra.mxu0 %v11722_v46 }
 0x287   : > { %3624 = vmatprep.subr.bf16.mxu0 %v11730_v9 }
 0x28a   : > { %3625 = vmatpush1.bf16.msra.mxu0 %v11728_v45 }
 0x28b   : > { %3626 = vmatprep.subr.bf16.mxu0 %v11736_v8 }
 0x28c   : > { %2652 = vmatmul.mubr.bf16.gmra.mrb[76].mxu0 %v2099_v0 }
 0x28d   : > { %9867 = vmatprep.mubr.msk.bf16.mxu0 %vm2433_vm3, %v2104_v22 }
 0x28e   : > { %3627 = vmatpush1.bf16.msra.mxu0 %v11734_v40 }
 0x28f   : > { %3628 = vmatprep.subr.bf16.mxu0 %v11742_v42 }
 0x292   : > { %3629 = vmatpush1.bf16.msra.mxu0 %v11740_v1 }
 0x294   : > { %2662 = vmatmul.mubr.bf16.gmra.mrb[80].mxu0 %v2103_v41 }
 0x295   : > { %9868 = vmatprep.mubr.msk.bf16.mxu0 %vm2433_vm3, %v2108_v54 }
 0x29c   : > { %2672 = vmatmul.mubr.bf16.gmra.mrb[84].mxu0 %v2107_v31 }
 0x337   : > { %v2603_v25 = vpop.f32.mrb[56].mxu0 }
 0x338   : > { %v2605_v2 = vpop.f32.mrb[57].mxu0  ;;  %v2710_v52 = vrot.slane %v2603_v25, 1 }
 0x339   : > { %v2607_v57 = vpop.f32.mrb[58].mxu0  ;;  %v2713_v34 = vrot.slane %v2605_v2, 1 }
 0x33a   : > { %v2711_v35 = vrot.slane %v2607_v57, 1  ;;  %v2609_v36 = vpop.f32.mrb[59].mxu0 }
 0x33b   : > { %v2714_v33 = vrot.slane %v2609_v36, 1 }
 0x33c   : > { %v2712_v60 = vsel %vm675_vm0, %v2710_v52, %v2711_v35 }
 0x33d   : > { %v2798_v0 = vmax.f32 %v2603_v25, %v2712_v60  ;;  %v2715_v41 = vsel %vm675_vm0, %v2713_v34, %v2714_v33 }
 0x33e   : > { %v2799_v39 = vmax.f32 %v2605_v2, %v2715_v41 }
 0x33f   : > { %v2613_v30 = vpop.f32.mrb[60].mxu0 }
 0x340   : > { %v2716_v32 = vrot.slane %v2613_v30, 1  ;;  %v2615_v28 = vpop.f32.mrb[61].mxu0 }
 0x341   : > { %v2718_v50 = vrot.slane %v2615_v28, 1  ;;  %v2617_v10 = vpop.f32.mrb[62].mxu0 }
 0x342   : > { %v2717_v27 = vsel %vm675_vm0, %v2711_v35, %v2716_v32  ;;  %v2720_v56 = vrot.slane %v2617_v10, 1  ;;  %v2619_v13 = vpop.f32.mrb[63].mxu0 }
 0x343   : > { %v2800_v38 = vmax.f32 %v2607_v57, %v2717_v27  ;;  %v2719_v11 = vsel %vm675_vm0, %v2714_v33, %v2718_v50  ;;  %v2722_v43 = vrot.slane %v2619_v13, 1 }
 0x344   : > { %v2721_v48 = vsel %vm675_vm0, %v2716_v32, %v2720_v56  ;;  %v2801_v7 = vmax.f32 %v2609_v36, %v2719_v11 }
 0x345   : > { %v2802_v37 = vmax.f32 %v2613_v30, %v2721_v48  ;;  %v2723_v5 = vsel %vm675_vm0, %v2718_v50, %v2722_v43  ;;  %v2828_v16 = vpack.c.bf16 %v2800_v38, %v2798_v0 }
 0x346   : > { %v2829_v18 = vpack.c.bf16 %v2801_v7, %v2799_v39  ;;  %v2803_v23 = vmax.f32 %v2615_v28, %v2723_v5 }
 0x347   : > { %v2623_v49 = vpop.f32.mrb[64].mxu0 }
 0x348   : > { %v2724_v63 = vrot.slane %v2623_v49, 1  ;;  %v2625_v21 = vpop.f32.mrb[65].mxu0  ;;  %2895 = vmatprep.subr.bf16.mxu1 %v2829_v18 }
 0x349   : > { %v2726_v22 = vrot.slane %v2625_v21, 1  ;;  %v2627_v55 = vpop.f32.mrb[66].mxu0  ;;  %2896 = vmatpush1.bf16.msra.mxu1 %v2828_v16 }
 0x34a   : > { %v2725_v20 = vsel %vm675_vm0, %v2720_v56, %v2724_v63  ;;  %v2728_v53 = vrot.slane %v2627_v55, 1  ;;  %v2629_v58 = vpop.f32.mrb[67].mxu0 }
 0x34b   : > { %v2804_v6 = vmax.f32 %v2617_v10, %v2725_v20  ;;  %v2727_v54 = vsel %vm675_vm0, %v2722_v43, %v2726_v22  ;;  %v2730_v61 = vrot.slane %v2629_v58, 1 }
 0x34c   : > { %v2729_v14 = vsel %vm675_vm0, %v2724_v63, %v2728_v53  ;;  %v2805_v17 = vmax.f32 %v2619_v13, %v2727_v54 }
 0x34d   : > { %v2806_v31 = vmax.f32 %v2623_v49, %v2729_v14  ;;  %v2731_v29 = vsel %vm675_vm0, %v2726_v22, %v2730_v61  ;;  %v2830_v4 = vpack.c.bf16 %v2804_v6, %v2802_v37 }
 0x34e   : > { %v2831_v26 = vpack.c.bf16 %v2805_v17, %v2803_v23  ;;  %v2807_v15 = vmax.f32 %v2625_v21, %v2731_v29 }
 0x34f   : > { %v2633_v44 = vpop.f32.mrb[68].mxu0 }
 0x350   : > { %v2732_v51 = vrot.slane %v2633_v44, 1  ;;  %v2635_v47 = vpop.f32.mrb[69].mxu0  ;;  %2897 = vmatprep.subr.bf16.mxu1 %v2831_v26 }
 0x351   : > { %v2734_v3 = vrot.slane %v2635_v47, 1  ;;  %v2637_v12 = vpop.f32.mrb[70].mxu0  ;;  %2898 = vmatpush1.bf16.msra.mxu1 %v2830_v4 }
 0x352   : > { %v2733_v19 = vsel %vm675_vm0, %v2728_v53, %v2732_v51  ;;  %v2736_v24 = vrot.slane %v2637_v12, 1  ;;  %v2639_v62 = vpop.f32.mrb[71].mxu0 }
 0x353   : > { %v2808_v59 = vmax.f32 %v2627_v55, %v2733_v19  ;;  %v2735_v46 = vsel %vm675_vm0, %v2730_v61, %v2734_v3  ;;  %v2738_v9 = vrot.slane %v2639_v62, 1 }
 0x354   : > { %v2737_v45 = vsel %vm675_vm0, %v2732_v51, %v2736_v24  ;;  %v2809_v8 = vmax.f32 %v2629_v58, %v2735_v46 }
 0x355   : > { %v2810_v25 = vmax.f32 %v2633_v44, %v2737_v45  ;;  %v2739_v2 = vsel %vm675_vm0, %v2734_v3, %v2738_v9  ;;  %v2832_v40 = vpack.c.bf16 %v2808_v59, %v2806_v31  ;;  %v16894_v45 = vmov 65535  }
 0x356   : > { %v2833_v57 = vpack.c.bf16 %v2809_v8, %v2807_v15  ;;  %v2811_v42 = vmax.f32 %v2635_v47, %v2739_v2  ;;  %v2887_v8 = vsel %vm2885_vm4, 4294967295, %v16894_v45 }
 0x357   : > { %v2643_v52 = vpop.f32.mrb[72].mxu0 }
 0x358   : > { %v2740_v35 = vrot.slane %v2643_v52, 1  ;;  %v2645_v36 = vpop.f32.mrb[73].mxu0  ;;  %2899 = vmatprep.subr.bf16.mxu1 %v2833_v57 }
 0x359   : > { %v2742_v34 = vrot.slane %v2645_v36, 1  ;;  %v2647_v33 = vpop.f32.mrb[74].mxu0  ;;  %2900 = vmatpush1.bf16.msra.mxu1 %v2832_v40 }
 0x35a   : > { %v2741_v60 = vsel %vm675_vm0, %v2736_v24, %v2740_v35  ;;  %v2744_v1 = vrot.slane %v2647_v33, 1  ;;  %v2649_v0 = vpop.f32.mrb[75].mxu0 }
 0x35b   : > { %v2812_v41 = vmax.f32 %v2637_v12, %v2741_v60  ;;  %v2743_v39 = vsel %vm675_vm0, %v2738_v9, %v2742_v34  ;;  %v2746_v30 = vrot.slane %v2649_v0, 1 }
 0x35c   : > { %v2745_v32 = vsel %vm675_vm0, %v2740_v35, %v2744_v1  ;;  %v2813_v28 = vmax.f32 %v2639_v62, %v2743_v39 }
 0x35d   : > { %v2814_v50 = vmax.f32 %v2643_v52, %v2745_v32  ;;  %v2747_v10 = vsel %vm675_vm0, %v2742_v34, %v2746_v30  ;;  %v2834_v27 = vpack.c.bf16 %v2812_v41, %v2810_v25  ;;  %v2888_v34 = vsel %vm2886_vm5, %v2887_v8, 0  ;;  %v11778_v8 = vld [vmem:[%s16784_s3 + $0x3ec] ss:$16 sps:$4 sm:$0xff]  }
 0x35e   : > { %v2835_v56 = vpack.c.bf16 %v2813_v28, %v2811_v42  ;;  %v2815_v13 = vmax.f32 %v2645_v36, %v2747_v10  ;;  %v11679_v28 = vld [vmem:[%s16791_s10] sm:$0xff]  }
 0x35f   : > { %v2653_v38 = vpop.f32.mrb[76].mxu0  ;;  %v11691_v10 = vld [vmem:[%s16784_s3 + $0x224] ss:$16 sps:$4 sm:$0xff]  }
 0x360   : > { %v2748_v11 = vrot.slane %v2653_v38, 1  ;;  %v2655_v43 = vpop.f32.mrb[77].mxu0  ;;  %2901 = vmatprep.subr.bf16.mxu1 %v2835_v56  ;;  %v11689_v56 = vld [vmem:[%s16784_s3 + $0x220] ss:$16 sps:$4 sm:$0xff]  }
 0x361   : > { %v2750_v48 = vrot.slane %v2655_v43, 1  ;;  %v2657_v7 = vpop.f32.mrb[78].mxu0  ;;  %2902 = vmatpush1.bf16.msra.mxu1 %v2834_v27  ;;  %v17033_v27 = vmov 0  }
 0x362   : > { %v2749_v37 = vsel %vm675_vm0, %v2744_v1, %v2748_v11  ;;  %v2752_v5 = vrot.slane %v2657_v7, 1  ;;  %v2659_v16 = vpop.f32.mrb[79].mxu0 }
 0x363   : > { %v2816_v18 = vmax.f32 %v2647_v33, %v2749_v37  ;;  %v2751_v23 = vsel %vm675_vm0, %v2746_v30, %v2750_v48  ;;  %v2754_v49 = vrot.slane %v2659_v16, 1  ;;  %v11685_v30 = vld [vmem:[%s16784_s3 + $0x204] ss:$16 sps:$4 sm:$0xff]  }
 0x364   : > { %v2753_v63 = vsel %vm675_vm0, %v2748_v11, %v2752_v5  ;;  %v2817_v21 = vmax.f32 %v2649_v0, %v2751_v23  ;;  %v11695_v11 = vld [vmem:[%s16784_s3 + $0x240] ss:$16 sps:$4 sm:$0xff]   ;;  %v11721_v23 = vld [vmem:[%s16784_s3 + $0x2c4] ss:$16 sps:$4 sm:$0xff]  }
 0x365   : > { %v2818_v22 = vmax.f32 %v2653_v38, %v2753_v63  ;;  %v2755_v55 = vsel %vm675_vm0, %v2750_v48, %v2754_v49  ;;  %v2836_v20 = vpack.c.bf16 %v2816_v18, %v2814_v50  ;;  %v11683_v50 = vld [vmem:[%s16784_s3 + $0x200] ss:$16 sps:$4 sm:$0xff]   ;;  %v11680_v38 = vld [vmem:[%s16791_s10 + $0x8] sm:$0xff]  }
 0x366   : > { %v2837_v53 = vpack.c.bf16 %v2817_v21, %v2815_v13  ;;  %v2819_v58 = vmax.f32 %v2655_v43, %v2755_v55  ;;  %v11697_v13 = vld [vmem:[%s16784_s3 + $0x244] ss:$16 sps:$4 sm:$0xff]   ;;  %v11701_v48 = vld [vmem:[%s16784_s3 + $0x260] ss:$16 sps:$4 sm:$0xff]  }
 0x367   : > { %v2663_v6 = vpop.f32.mrb[80].mxu0  ;;  %v11703_v43 = vld [vmem:[%s16784_s3 + $0x264] ss:$16 sps:$4 sm:$0xff]   ;;  %v11713_v18 = vld [vmem:[%s16784_s3 + $0x2a0] ss:$16 sps:$4 sm:$0xff]  }
 0x368   : > { %v2756_v54 = vrot.slane %v2663_v6, 1  ;;  %v2665_v61 = vpop.f32.mrb[81].mxu0  ;;  %2903 = vmatprep.subr.bf16.mxu1 %v2837_v53  ;;  %v11681_v37 = vld [vmem:[%s16791_s10 + $0x10] sm:$0xff]  }
 0x369   : > { %v2758_v14 = vrot.slane %v2665_v61, 1  ;;  %v2667_v17 = vpop.f32.mrb[82].mxu0  ;;  %2904 = vmatpush1.bf16.msra.mxu1 %v2836_v20  ;;  %v11719_v63 = vld [vmem:[%s16784_s3 + $0x2c0] ss:$16 sps:$4 sm:$0xff]   ;;  %v11727_v21 = vld [vmem:[%s16784_s3 + $0x2e4] ss:$16 sps:$4 sm:$0xff]  }
 0x36a   : > { %v2757_v31 = vsel %vm675_vm0, %v2752_v5, %v2756_v54  ;;  %v2760_v29 = vrot.slane %v2667_v17, 1  ;;  %v2669_v4 = vpop.f32.mrb[83].mxu0  ;;  %v11707_v5 = vld [vmem:[%s16784_s3 + $0x280] ss:$16 sps:$4 sm:$0xff]   ;;  %v11733_v55 = vld [vmem:[%s16784_s3 + $0x304] ss:$16 sps:$4 sm:$0xff]  }
 0x36b   : > { %v2820_v26 = vmax.f32 %v2657_v7, %v2757_v31  ;;  %v2759_v15 = vsel %vm675_vm0, %v2754_v49, %v2758_v14  ;;  %v2762_v44 = vrot.slane %v2669_v4, 1  ;;  %v11709_v7 = vld [vmem:[%s16784_s3 + $0x284] ss:$16 sps:$4 sm:$0xff]   ;;  %v11682_v49 = vld [vmem:[%s16791_s10 + $0x18] sm:$0xff]   ;;  %v11731_v20 = vld [vmem:[%s16784_s3 + $0x300] ss:$16 sps:$4 sm:$0xff]  }
 0x36c   : > { %v2761_v51 = vsel %vm675_vm0, %v2756_v54, %v2760_v29  ;;  %v2821_v47 = vmax.f32 %v2659_v16, %v2759_v15  ;;  %v11715_v16 = vld [vmem:[%s16784_s3 + $0x2a4] ss:$16 sps:$4 sm:$0xff]   ;;  %v11748_v54 = vld [vmem:[%s16784_s3 + $0x34c] ss:$16 sps:$4 sm:$0xff]  }
 0x36d   : > { %v2822_v3 = vmax.f32 %v2663_v6, %v2761_v51  ;;  %v2763_v12 = vsel %vm675_vm0, %v2758_v14, %v2762_v44  ;;  %v2838_v19 = vpack.c.bf16 %v2820_v26, %v2818_v22  ;;  %v11725_v22 = vld [vmem:[%s16784_s3 + $0x2e0] ss:$16 sps:$4 sm:$0xff]   ;;  %v11739_v53 = vld [vmem:[%s16784_s3 + $0x324] ss:$16 sps:$4 sm:$0xff]   ;;  %v11746_v14 = vld [vmem:[%s16784_s3 + $0x348] ss:$16 sps:$4 sm:$0xff]   ;;  %3630 = vmatprep.subr.bf16.mxu0 %v11748_v54 }
 0x36e   : > { %v2839_v24 = vpack.c.bf16 %v2821_v47, %v2819_v58  ;;  %v2823_v62 = vmax.f32 %v2665_v61, %v2763_v12  ;;  %v11737_v58 = vld [vmem:[%s16784_s3 + $0x320] ss:$16 sps:$4 sm:$0xff]   ;;  %v11745_v6 = vld [vmem:[%s16784_s3 + $0x344] ss:$16 sps:$4 sm:$0xff]   ;;  %v11754_v31 = vld [vmem:[%s16784_s3 + $0x36c] ss:$16 sps:$4 sm:$0xff]   ;;  %3631 = vmatpush1.bf16.msra.mxu0 %v11746_v14 }
 0x36f   : > { %v2673_v59 = vpop.f32.mrb[84].mxu0  ;;  %v11743_v61 = vld [vmem:[%s16784_s3 + $0x340] ss:$16 sps:$4 sm:$0xff]   ;;  %3632 = vmatprep.subr.bf16.mxu0 %v11754_v31  ;;  %v11757_v26 = vld [vmem:[%s16784_s3 + $0x384] ss:$16 sps:$4 sm:$0xff]  }
 0x370   : > { %v2764_v46 = vrot.slane %v2673_v59, 1  ;;  %v2675_v9 = vpop.f32.mrb[85].mxu0  ;;  %2905 = vmatprep.subr.bf16.mxu1 %v2839_v24  ;;  %v11760_v15 = vld [vmem:[%s16784_s3 + $0x38c] ss:$16 sps:$4 sm:$0xff]   ;;  %v11758_v51 = vld [vmem:[%s16784_s3 + $0x388] ss:$16 sps:$4 sm:$0xff]  }
 0x371   : > { %v2766_v25 = vrot.slane %v2675_v9, 1  ;;  %v2677_v2 = vpop.f32.mrb[86].mxu0  ;;  %2906 = vmatpush1.bf16.msra.mxu1 %v2838_v19  ;;  %v11763_v47 = vld [vmem:[%s16784_s3 + $0x3a4] ss:$16 sps:$4 sm:$0xff]   ;;  %v11761_v12 = vld [vmem:[%s16784_s3 + $0x3a0] ss:$16 sps:$4 sm:$0xff]  }
 0x372   : > { %v2765_v40 = vsel %vm675_vm0, %v2760_v29, %v2764_v46  ;;  %v2678_v57 = vpop.f32.mrb[87].mxu0  ;;  %v2826_v52 = vmax.f32 %v2673_v59, %v2764_v46  ;;  %v11749_v29 = vld [vmem:[%s16784_s3 + $0x360] ss:$16 sps:$4 sm:$0xff]   ;;  %v11764_v19 = vld [vmem:[%s16784_s3 + $0x3a8] ss:$16 sps:$4 sm:$0xff]  }
 0x373   : > { %v2824_v42 = vmax.f32 %v2667_v17, %v2765_v40  ;;  %v2767_v35 = vsel %vm675_vm0, %v2762_v44, %v2766_v25  ;;  %v2827_v36 = vmax.f32 %v2675_v9, %v2766_v25  ;;  %v11751_v17 = vld [vmem:[%s16784_s3 + $0x364] ss:$16 sps:$4 sm:$0xff]   ;;  %v11755_v44 = vld [vmem:[%s16784_s3 + $0x380] ss:$16 sps:$4 sm:$0xff]   ;;  %v11770_v46 = vld [vmem:[%s16784_s3 + $0x3c8] ss:$16 sps:$4 sm:$0xff]  }
 0x374   : > { %v2825_v33 = vmax.f32 %v2669_v4, %v2767_v35  ;;  %v2842_v41 = vpack.c.bf16 %v2826_v52, %v2826_v52  ;;  %v11752_v4 = vld [vmem:[%s16784_s3 + $0x368] ss:$16 sps:$4 sm:$0xff]   ;;  %v11769_v24 = vld [vmem:[%s16784_s3 + $0x3c4] ss:$16 sps:$4 sm:$0xff]   ;;  %v11767_v59 = vld [vmem:[%s16784_s3 + $0x3c0] ss:$16 sps:$4 sm:$0xff]  }
 0x375   : > { %v2843_v60 = vpack.c.bf16 %v2827_v36, %v2827_v36  ;;  %v2840_v1 = vpack.c.bf16 %v2824_v42, %v2822_v3  ;;  %3633 = vmatpush1.bf16.msra.mxu0 %v11752_v4  ;;  %v11766_v3 = vld [vmem:[%s16784_s3 + $0x3ac] ss:$16 sps:$4 sm:$0xff]   ;;  %v11775_v9 = vld [vmem:[%s16784_s3 + $0x3e4] ss:$16 sps:$4 sm:$0xff]   ;;  %v11773_v25 = vld [vmem:[%s16784_s3 + $0x3e0] ss:$16 sps:$4 sm:$0xff]  }
 0x376   : > { %v2841_v0 = vpack.c.bf16 %v2825_v33, %v2823_v62  ;;  %v2890_v32 = vand.u32 %v2888_v34, %v2842_v41  ;;  %3634 = vmatprep.subr.bf16.mxu0 %v11760_v15  ;;  %v11772_v62 = vld [vmem:[%s16784_s3 + $0x3cc] ss:$16 sps:$4 sm:$0xff]   ;;  %v11776_v2 = vld [vmem:[%s16784_s3 + $0x3e8] ss:$16 sps:$4 sm:$0xff]   ;;  %v11781_v40 = vld [vmem:[%s16784_s3 + $0x4] ss:$16 sps:$4 sm:$0xff]  }
 0x377   : > { %v2893_v39 = vand.u32 %v2888_v34, %v2843_v60  ;;  %v11784_v57 = vld [vmem:[%s16784_s3 + $0xc] ss:$16 sps:$4 sm:$0xff]   ;;  %v11788_v31 = vld [vmem:[%s16784_s3 + $0x28] ss:$16 sps:$4 sm:$0xff]   ;;  %v11793_v15 = vld [vmem:[%s16784_s3 + $0x44] ss:$16 sps:$4 sm:$0xff]  }
 0x378   : > { %2907 = vmatprep.subr.bf16.mxu1 %v2841_v0 }
 0x379   : > { %2908 = vmatpush1.bf16.msra.mxu1 %v2840_v1  ;;  %3635 = vmatpush1.bf16.msra.mxu0 %v11758_v51 }
 0x37a   : > { %2909 = vmatprep.subr.bf16.mxu1 %v2893_v39  ;;  %3636 = vmatprep.subr.bf16.mxu0 %v11766_v3 }
 0x37d   : > { %2910 = vmatpush1.bf16.msra.mxu1 %v2890_v32  ;;  %3637 = vmatpush1.bf16.msra.mxu0 %v11764_v19 }
 0x37e   : > { %3537 = vmatprep.subr.bf16.mxu1 %v11685_v30  ;;  %3638 = vmatprep.subr.bf16.mxu0 %v11772_v62  ;;  %v11791_v62 = vld [vmem:[%s16784_s3 + $0x40] ss:$16 sps:$4 sm:$0xff]  }
 0x380   : > { %9873 = vmatmul.mubr.msk.bf16.vlgmr.msra.gmra.mrb[40].mxu1 %vm2872_vm6, %v11679_v28 }
 0x381   : > { %2937 = vmatprep.mubr.bf16.mxu1 %v17033_v27  ;;  %3538 = vmatpush1.bf16.msra.mxu1 %v11683_v50 }
 0x382   : > { %3539 = vmatprep.subr.bf16.mxu1 %v11691_v10  ;;  %3639 = vmatpush1.bf16.msra.mxu0 %v11770_v46 }
 0x383   : > { %3640 = vmatprep.subr.bf16.mxu0 %v11778_v8 }
 0x385   : > { %3540 = vmatpush1.bf16.msra.mxu1 %v11689_v56 }
 0x386   : > { %3541 = vmatprep.subr.bf16.mxu1 %v11697_v13  ;;  %3641 = vmatpush1.bf16.msra.mxu0 %v11776_v2  ;;  %v11802_v2 = vld [vmem:[%s16784_s3 + $0x6c] ss:$16 sps:$4 sm:$0xff]  }
 0x387   : > { %4076 = vmatprep.subr.bf16.mxu0 %v11784_v57 }
 0x388   : > { %9874 = vmatmul.mubr.msk.bf16.gmra.mrb[44].mxu1 %vm2872_vm6, %v11680_v38 }
 0x389   : > { %2947 = vmatprep.mubr.bf16.mxu1 %v17033_v27  ;;  %3542 = vmatpush1.bf16.msra.mxu1 %v11695_v11 }
 0x38a   : > { %3543 = vmatprep.subr.bf16.mxu1 %v11703_v43 }
 0x38d   : > { %3544 = vmatpush1.bf16.msra.mxu1 %v11701_v48 }
 0x38e   : > { %3545 = vmatprep.subr.bf16.mxu1 %v11709_v7 }
 0x390   : > { %9875 = vmatmul.mubr.msk.bf16.gmra.mrb[48].mxu1 %vm2872_vm6, %v11681_v37 }
 0x391   : > { %2957 = vmatprep.mubr.bf16.mxu1 %v17033_v27  ;;  %3546 = vmatpush1.bf16.msra.mxu1 %v11707_v5 }
 0x392   : > { %3547 = vmatprep.subr.bf16.mxu1 %v11715_v16 }
 0x395   : > { %3548 = vmatpush1.bf16.msra.mxu1 %v11713_v18 }
 0x396   : > { %3549 = vmatprep.subr.bf16.mxu1 %v11721_v23 }
 0x398   : > { %9876 = vmatmul.mubr.msk.bf16.gmra.mrb[52].mxu1 %vm2872_vm6, %v11682_v49 }
 0x399   : > { %3550 = vmatpush1.bf16.msra.mxu1 %v11719_v63 }
 0x39a   : > { %3551 = vmatprep.subr.bf16.mxu1 %v11727_v21  ;;  %v11779_v21 = vld [vmem:[%s16784_s3] ss:$16 sps:$4 sm:$0xff]  }
 0x39d   : > { %3552 = vmatpush1.bf16.msra.mxu1 %v11725_v22  ;;  %v11782_v22 = vld [vmem:[%s16784_s3 + $0x8] ss:$16 sps:$4 sm:$0xff]  }
 0x39e   : > { %3553 = vmatprep.subr.bf16.mxu1 %v11733_v55 }
 0x3a1   : > { %3554 = vmatpush1.bf16.msra.mxu1 %v11731_v20 }
 0x3a2   : > { %3555 = vmatprep.subr.bf16.mxu1 %v11739_v53  ;;  %v11787_v53 = vld [vmem:[%s16784_s3 + $0x24] ss:$16 sps:$4 sm:$0xff]  }
 0x3a5   : > { %3556 = vmatpush1.bf16.msra.mxu1 %v11737_v58  ;;  %v11790_v58 = vld [vmem:[%s16784_s3 + $0x2c] ss:$16 sps:$4 sm:$0xff]  }
 0x3a6   : > { %3557 = vmatprep.subr.bf16.mxu1 %v11745_v6 }
 0x3a9   : > { %3558 = vmatpush1.bf16.msra.mxu1 %v11743_v61 }
 0x3aa   : > { %3559 = vmatprep.subr.bf16.mxu1 %v11751_v17  ;;  %v11785_v17 = vld [vmem:[%s16784_s3 + $0x20] ss:$16 sps:$4 sm:$0xff]  }
 0x3ad   : > { %3560 = vmatpush1.bf16.msra.mxu1 %v11749_v29 }
 0x3ae   : > { %3561 = vmatprep.subr.bf16.mxu1 %v11757_v26 }
 0x3b1   : > { %3562 = vmatpush1.bf16.msra.mxu1 %v11755_v44  ;;  %v11796_v44 = vld [vmem:[%s16784_s3 + $0x4c] ss:$16 sps:$4 sm:$0xff]  }
 0x3b2   : > { %3563 = vmatprep.subr.bf16.mxu1 %v11763_v47 }
 0x3b5   : > { %3564 = vmatpush1.bf16.msra.mxu1 %v11761_v12 }
 0x3b6   : > { %3565 = vmatprep.subr.bf16.mxu1 %v11769_v24 }
 0x3b9   : > { %3566 = vmatpush1.bf16.msra.mxu1 %v11767_v59  ;;  %v11794_v59 = vld [vmem:[%s16784_s3 + $0x48] ss:$16 sps:$4 sm:$0xff]  }
 0x3ba   : > { %3567 = vmatprep.subr.bf16.mxu1 %v11775_v9 }
 0x3bd   : > { %3568 = vmatpush1.bf16.msra.mxu1 %v11773_v25  ;;  %v11799_v25 = vld [vmem:[%s16784_s3 + $0x64] ss:$16 sps:$4 sm:$0xff]  }
 0x3be   : > { %4003 = vmatprep.subr.bf16.mxu1 %v11781_v40 }
 0x453   : > { %v2929_v42 = vpop.f32.mrb[40].mxu1 }
 0x454   : > { %2968 = vst [vmem:[#allocation2] sm:$0xff] %v2929_v42  ;;  %v2931_v52 = vpop.f32.mrb[41].mxu1 }
 0x455   : > { %2969 = vst [vmem:[#allocation2 + $0x8] sm:$0xff] %v2931_v52  ;;  %v14236_v35 = vpop.f32.mrb[42].mxu1 }
 0x456   : > { %v14238_v36 = vpop.f32.mrb[43].mxu1  ;;  %v14241_v34 = vpack.c.bf16 %v14236_v35, %v2929_v42 }
 0x457   : > { %v14244_v33 = vpack.c.bf16 %v14238_v36, %v2931_v52  ;;  %v11797_v52 = vld [vmem:[%s16784_s3 + $0x60] ss:$16 sps:$4 sm:$0xff]  }
 0x45b   : > { %v2939_v60 = vpop.f32.mrb[44].mxu1  ;;  %v3073_v1 = vld [vmem:[#allocation2] sm:$0xfe] }
 0x45c   : > { %v2941_v0 = vpop.f32.mrb[45].mxu1  ;;  %v3074_v41 = vld [vmem:[#allocation2 + $0x8] sm:$0xfe]  ;;  %v3077_v39 = vpack.c.bf16 %v14236_v35, %v3073_v1  ;;  %v11805_v1 = vld [vmem:[%s16784_s3 + $0x84] ss:$16 sps:$4 sm:$0xff]  }
 0x45d   : > { %v2943_v30 = vpop.f32.mrb[46].mxu1  ;;  %v3078_v32 = vpack.c.bf16 %v14238_v36, %v3074_v41  ;;  %v11803_v41 = vld [vmem:[%s16784_s3 + $0x80] ss:$16 sps:$4 sm:$0xff]  }
 0x45e   : > { %v2945_v28 = vpop.f32.mrb[47].mxu1  ;;  %v14248_v50 = vpack.c.bf16 %v2943_v30, %v2939_v60  ;;  %v3150_v10 = vshll.u32 %v3077_v39, 16  ;;  %v3148_v38 = vshrl.u32 %v3077_v39, 16  ;;  %v11800_v60 = vld [vmem:[%s16784_s3 + $0x68] ss:$16 sps:$4 sm:$0xff]  }
 0x45f   : > { %v14250_v56 = vpack.c.bf16 %v2945_v28, %v2941_v0  ;;  %v3162_v13 = vshll.u32 %v3078_v32, 16  ;;  %v3160_v48 = vshrl.u32 %v3078_v32, 16  ;;  %v11808_v0 = vld [vmem:[%s16784_s3 + $0x8c] ss:$16 sps:$4 sm:$0xff]   ;;  %v11806_v39 = vld [vmem:[%s16784_s3 + $0x88] ss:$16 sps:$4 sm:$0xff]  }
 0x460   : > { %v3152_v11 = vrot.slane %v3150_v10, 1  ;;  %v3155_v43 = vshll.u32 %v14248_v50, 16  ;;  %v3171_v51 = vshrl.u32 %v14248_v50, 16  ;;  %v11811_v32 = vld [vmem:[%s16784_s3 + $0xa4] ss:$16 sps:$4 sm:$0xff]  }
 0x461   : > { %v3164_v7 = vrot.slane %v3162_v13, 1  ;;  %v3167_v37 = vshll.u32 %v14250_v56, 16  ;;  %v3179_v4 = vshrl.u32 %v14250_v56, 16  ;;  %v11814_v13 = vld [vmem:[%s16784_s3 + $0xac] ss:$16 sps:$4 sm:$0xff]  }
 0x462   : > { %v3153_v5 = vor.u32 %v3152_v11, %v3148_v38  ;;  %v3157_v16 = vrot.slane %v3155_v43, 1 }
 0x463   : > { %v2949_v18 = vpop.f32.mrb[48].mxu1  ;;  %v3165_v23 = vor.u32 %v3164_v7, %v3160_v48  ;;  %v3169_v49 = vrot.slane %v3167_v37, 1  ;;  %v11809_v37 = vld [vmem:[%s16784_s3 + $0xa0] ss:$16 sps:$4 sm:$0xff]  }
 0x464   : > { %v2951_v63 = vpop.f32.mrb[49].mxu1  ;;  %v3158_v54 = vsel %vm3146_vm7, %v3153_v5, %v3157_v16  ;;  %v3173_v46 = vor.u32 %v3171_v51, %v3157_v16  ;;  %v11812_v5 = vld [vmem:[%s16784_s3 + $0xa8] ss:$16 sps:$4 sm:$0xff]   ;;  %v11827_v51 = vld [vmem:[%s16784_s3 + $0x100] ss:$16 sps:$4 sm:$0xff]  }
 0x465   : > { %v2953_v55 = vpop.f32.mrb[50].mxu1  ;;  %v3170_v20 = vsel %vm3146_vm7, %v3165_v23, %v3169_v49  ;;  %v3181_v12 = vor.u32 %v3179_v4, %v3169_v49  ;;  %v11817_v49 = vld [vmem:[%s16784_s3 + $0xc4] ss:$16 sps:$4 sm:$0xff]   ;;  %v11824_v4 = vld [vmem:[%s16784_s3 + $0xe8] ss:$16 sps:$4 sm:$0xff]  }
 0x466   : > { %v2955_v6 = vpop.f32.mrb[51].mxu1  ;;  %3569 = vmatprep.mubr.bf16.mxu1 %v3170_v20  ;;  %3642 = vmatprep.mubr.bf16.mxu0 %v3170_v20  ;;  %v14268_v61 = vpack.c.bf16 %v2953_v55, %v2949_v18 }
 0x467   : > { %3570 = vmatmul.mubr.bf16.vlgmr.msra.gmra.mrb[56].mxu1 %v3158_v54  ;;  %3643 = vmatmul.mubr.bf16.vlgmr.msra.gmra.mrb[88].mxu0 %v3158_v54  ;;  %v14270_v14 = vpack.c.bf16 %v2955_v6, %v2951_v63  ;;  %v11820_v63 = vld [vmem:[%s16784_s3 + $0xcc] ss:$16 sps:$4 sm:$0xff]   ;;  %v11818_v6 = vld [vmem:[%s16784_s3 + $0xc8] ss:$16 sps:$4 sm:$0xff]   ;;  %v11823_v54 = vld [vmem:[%s16784_s3 + $0xe4] ss:$16 sps:$4 sm:$0xff]  }
 0x468   : > { %4004 = vmatpush1.bf16.msra.mxu1 %v11779_v21  ;;  %4077 = vmatpush1.bf16.msra.mxu0 %v11782_v22  ;;  %v3175_v29 = vshll.u32 %v14268_v61, 16  ;;  %v3187_v30 = vshrl.u32 %v14268_v61, 16 }
 0x469   : > { %4005 = vmatprep.subr.bf16.mxu1 %v11787_v53  ;;  %4078 = vmatprep.subr.bf16.mxu0 %v11790_v58  ;;  %v3183_v26 = vshll.u32 %v14270_v14, 16  ;;  %v3195_v28 = vshrl.u32 %v14270_v14, 16  ;;  %v11815_v58 = vld [vmem:[%s16784_s3 + $0xc0] ss:$16 sps:$4 sm:$0xff]  }
 0x46a   : > { %v3177_v47 = vrot.slane %v3175_v29, 1  ;;  %v11821_v29 = vld [vmem:[%s16784_s3 + $0xe0] ss:$16 sps:$4 sm:$0xff]  }
 0x46b   : > { %v14288_v3 = vpop.f32.mrb[52].mxu1  ;;  %v3185_v19 = vrot.slane %v3183_v26, 1  ;;  %v11829_v26 = vld [vmem:[%s16784_s3 + $0x104] ss:$16 sps:$4 sm:$0xff]  }
 0x46c   : > { %v14290_v24 = vpop.f32.mrb[53].mxu1  ;;  %4006 = vmatpush1.bf16.msra.mxu1 %v11785_v17  ;;  %4079 = vmatpush1.bf16.msra.mxu0 %v11788_v31  ;;  %v3178_v57 = vsel %vm3146_vm7, %v3173_v46, %v3177_v47  ;;  %v3189_v48 = vor.u32 %v3187_v30, %v3177_v47  ;;  %v11826_v17 = vld [vmem:[%s16784_s3 + $0xec] ss:$16 sps:$4 sm:$0xff]   ;;  %v11830_v47 = vld [vmem:[%s16784_s3 + $0x108] ss:$16 sps:$4 sm:$0xff]  }
 0x46d   : > { %v2963_v9 = vpop.f32.mrb[54].mxu1  ;;  %v3186_v8 = vsel %vm3146_vm7, %v3181_v12, %v3185_v19  ;;  %4007 = vmatprep.subr.bf16.mxu1 %v11793_v15  ;;  %4080 = vmatprep.subr.bf16.mxu0 %v11796_v44  ;;  %v3197_v16 = vor.u32 %v3195_v28, %v3185_v19  ;;  %v11832_v15 = vld [vmem:[%s16784_s3 + $0x10c] ss:$16 sps:$4 sm:$0xff]   ;;  %v11835_v12 = vld [vmem:[%s16784_s3 + $0x124] ss:$16 sps:$4 sm:$0xff]  }
 0x46e   : > { %2982 = vst [vmem:[#allocation2 + $0x70] sm:$0xff] %v2963_v9  ;;  %v14305_v40 = vpop.f32.mrb[55].mxu1  ;;  %3579 = vmatprep.mubr.bf16.mxu1 %v3186_v8  ;;  %3652 = vmatprep.mubr.bf16.mxu0 %v3186_v8  ;;  %v11838_v19 = vld [vmem:[%s16784_s3 + $0x12c] ss:$16 sps:$4 sm:$0xff]   ;;  %v11841_v46 = vld [vmem:[%s16784_s3 + $0x144] ss:$16 sps:$4 sm:$0xff]  }
 0x46f   : > { %2983 = vst [vmem:[#allocation2 + $0x78] sm:$0xff] %v14305_v40  ;;  %3580 = vmatmul.mubr.bf16.gmra.mrb[60].mxu1 %v3178_v57  ;;  %3653 = vmatmul.mubr.bf16.gmra.mrb[92].mxu0 %v3178_v57  ;;  %v4156_v42 = vpack.c.bf16 %v14305_v40, %v14290_v24  ;;  %v11839_v9 = vld [vmem:[%s16784_s3 + $0x140] ss:$16 sps:$4 sm:$0xff]   ;;  %v11842_v8 = vld [vmem:[%s16784_s3 + $0x148] ss:$16 sps:$4 sm:$0xff]  }
 0x470   : > { %4008 = vmatpush1.bf16.msra.mxu1 %v11791_v62  ;;  %4081 = vmatpush1.bf16.msra.mxu0 %v11794_v59  ;;  %v11833_v62 = vld [vmem:[%s16784_s3 + $0x120] ss:$16 sps:$4 sm:$0xff]   ;;  %v11836_v59 = vld [vmem:[%s16784_s3 + $0x128] ss:$16 sps:$4 sm:$0xff]   ;;  %v11862_v30 = vld [vmem:[%s16784_s3 + $0x1ac] ss:$16 sps:$4 sm:$0xff]  }
 0x471   : > { %4009 = vmatprep.subr.bf16.mxu1 %v11799_v25  ;;  %4082 = vmatprep.subr.bf16.mxu0 %v11802_v2  ;;  %v11847_v25 = vld [vmem:[%s16784_s3 + $0x164] ss:$16 sps:$4 sm:$0xff]   ;;  %v11850_v2 = vld [vmem:[%s16784_s3 + $0x16c] ss:$16 sps:$4 sm:$0xff]   ;;  %v11845_v57 = vld [vmem:[%s16784_s3 + $0x160] ss:$16 sps:$4 sm:$0xff]  }
 0x472   : > { %v11860_v28 = vld [vmem:[%s16784_s3 + $0x1a8] ss:$16 sps:$4 sm:$0xff]  }
 0x473   : > { %v11974_v40 = vld [vmem:[%s16789_s8 + $0x18] ss:$12 sps:$4 sm:$0xff]  }
 0x474   : > { %4010 = vmatpush1.bf16.msra.mxu1 %v11797_v52  ;;  %4083 = vmatpush1.bf16.msra.mxu0 %v11800_v60  ;;  %v11848_v52 = vld [vmem:[%s16784_s3 + $0x168] ss:$16 sps:$4 sm:$0xff]   ;;  %v11853_v60 = vld [vmem:[%s16784_s3 + $0x184] ss:$16 sps:$4 sm:$0xff]  }
 0x475   : > { %4011 = vmatprep.subr.bf16.mxu1 %v11805_v1  ;;  %4084 = vmatprep.subr.bf16.mxu0 %v11808_v0  ;;  %v3075_v10 = vld [vmem:[#allocation2 + $0x70] sm:$0x7f]  ;;  %v11856_v1 = vld [vmem:[%s16784_s3 + $0x18c] ss:$16 sps:$4 sm:$0xff]  }
 0x476   : > { %v3076_v38 = vld [vmem:[#allocation2 + $0x78] sm:$0x7f]  ;;  %v3079_v11 = vpack.c.bf16 %v3075_v10, %v14288_v3  ;;  %v11851_v0 = vld [vmem:[%s16784_s3 + $0x180] ss:$16 sps:$4 sm:$0xff]   ;;  %v11865_v10 = vld [vmem:[%s16784_s3 + $0x1c4] ss:$16 sps:$4 sm:$0xff]  }
 0x477   : > { %v3080_v43 = vpack.c.bf16 %v3076_v38, %v14290_v24  ;;  %v11863_v38 = vld [vmem:[%s16784_s3 + $0x1c0] ss:$16 sps:$4 sm:$0xff]  }
 0x478   : > { %v3191_v7 = vshll.u32 %v3079_v11, 16  ;;  %4012 = vmatpush1.bf16.msra.mxu1 %v11803_v41  ;;  %4085 = vmatpush1.bf16.msra.mxu0 %v11806_v39  ;;  %v3203_v31 = vshrl.u32 %v3079_v11, 16  ;;  %v11854_v41 = vld [vmem:[%s16784_s3 + $0x188] ss:$16 sps:$4 sm:$0xff]   ;;  %v11859_v39 = vld [vmem:[%s16784_s3 + $0x1a4] ss:$16 sps:$4 sm:$0xff]  }
 0x479   : > { %v3199_v18 = vshll.u32 %v3080_v43, 16  ;;  %4013 = vmatprep.subr.bf16.mxu1 %v11811_v32  ;;  %4086 = vmatprep.subr.bf16.mxu0 %v11814_v13  ;;  %v3206_v23 = vshrl.u32 %v3080_v43, 16  ;;  %v11857_v32 = vld [vmem:[%s16784_s3 + $0x1a0] ss:$16 sps:$4 sm:$0xff]   ;;  %v11868_v13 = vld [vmem:[%s16784_s3 + $0x1cc] ss:$16 sps:$4 sm:$0xff]  }
 0x47a   : > { %v3193_v21 = vrot.slane %v3191_v7, 1  ;;  %v11866_v11 = vld [vmem:[%s16784_s3 + $0x1c8] ss:$16 sps:$4 sm:$0xff]   ;;  %v11871_v43 = vld [vmem:[%s16784_s3 + $0x1e4] ss:$16 sps:$4 sm:$0xff]  }
 0x47b   : > { %v3201_v22 = vrot.slane %v3199_v18, 1  ;;  %v11869_v7 = vld [vmem:[%s16784_s3 + $0x1e0] ss:$16 sps:$4 sm:$0xff]  }
 0x47c   : > { %v3194_v55 = vsel %vm3146_vm7, %v3189_v48, %v3193_v21  ;;  %4014 = vmatpush1.bf16.msra.mxu1 %v11809_v37  ;;  %4087 = vmatpush1.bf16.msra.mxu0 %v11812_v5  ;;  %v3205_v44 = vor.u32 %v3203_v31, %v3193_v21  ;;  %v11874_v48 = vld [vmem:[%s16784_s3 + $0x1ec] ss:$16 sps:$4 sm:$0xff]   ;;  %v11872_v37 = vld [vmem:[%s16784_s3 + $0x1e8] ss:$16 sps:$4 sm:$0xff]   ;;  %v11877_v5 = vld [vmem:[%s16784_s3 + $0x404] ss:$16 sps:$4 sm:$0xff]  }
 0x47d   : > { %v3202_v20 = vsel %vm3146_vm7, %v3197_v16, %v3201_v22  ;;  %v3208_v53 = vor.u32 %v3206_v23, %v3201_v22  ;;  %4015 = vmatprep.subr.bf16.mxu1 %v11817_v49  ;;  %4088 = vmatprep.subr.bf16.mxu0 %v11820_v63  ;;  %v11880_v16 = vld [vmem:[%s16784_s3 + $0x40c] ss:$16 sps:$4 sm:$0xff]   ;;  %v11875_v18 = vld [vmem:[%s16784_s3 + $0x400] ss:$16 sps:$4 sm:$0xff]   ;;  %v11878_v23 = vld [vmem:[%s16784_s3 + $0x408] ss:$16 sps:$4 sm:$0xff]  }
 0x47e   : > { %3589 = vmatprep.mubr.bf16.mxu1 %v3202_v20  ;;  %3662 = vmatprep.mubr.bf16.mxu0 %v3202_v20  ;;  %v11883_v49 = vld [vmem:[%s16784_s3 + $0x424] ss:$16 sps:$4 sm:$0xff]   ;;  %v11886_v63 = vld [vmem:[%s16784_s3 + $0x42c] ss:$16 sps:$4 sm:$0xff]   ;;  %v11881_v21 = vld [vmem:[%s16784_s3 + $0x420] ss:$16 sps:$4 sm:$0xff]  }
 0x47f   : > { %3590 = vmatmul.mubr.bf16.gmra.mrb[64].mxu1 %v3194_v55  ;;  %3663 = vmatmul.mubr.bf16.gmra.mrb[96].mxu0 %v3194_v55  ;;  %v11884_v22 = vld [vmem:[%s16784_s3 + $0x428] ss:$16 sps:$4 sm:$0xff]   ;;  %v11892_v55 = vld [vmem:[%s16784_s3 + $0x44c] ss:$16 sps:$4 sm:$0xff]   ;;  %v11887_v20 = vld [vmem:[%s16784_s3 + $0x440] ss:$16 sps:$4 sm:$0xff]  }
 0x480   : > { %3599 = vmatprep.mubr.bf16.mxu1 %v3208_v53  ;;  %3672 = vmatprep.mubr.bf16.mxu0 %v3208_v53  ;;  %v11890_v53 = vld [vmem:[%s16784_s3 + $0x448] ss:$16 sps:$4 sm:$0xff]   ;;  %v11901_v31 = vld [vmem:[%s16784_s3 + $0x484] ss:$16 sps:$4 sm:$0xff]  }
 0x481   : > { %4016 = vmatpush1.bf16.msra.mxu1 %v11815_v58  ;;  %4089 = vmatpush1.bf16.msra.mxu0 %v11818_v6  ;;  %v11895_v58 = vld [vmem:[%s16784_s3 + $0x464] ss:$16 sps:$4 sm:$0xff]   ;;  %v11898_v6 = vld [vmem:[%s16784_s3 + $0x46c] ss:$16 sps:$4 sm:$0xff]  }
 0x482   : > { %4017 = vmatprep.subr.bf16.mxu1 %v11823_v54  ;;  %4090 = vmatprep.subr.bf16.mxu0 %v11826_v17  ;;  %v11893_v54 = vld [vmem:[%s16784_s3 + $0x460] ss:$16 sps:$4 sm:$0xff]   ;;  %v11896_v17 = vld [vmem:[%s16784_s3 + $0x468] ss:$16 sps:$4 sm:$0xff]  }
 0x485   : > { %4018 = vmatpush1.bf16.msra.mxu1 %v11821_v29  ;;  %4091 = vmatpush1.bf16.msra.mxu0 %v11824_v4  ;;  %v11904_v29 = vld [vmem:[%s16784_s3 + $0x48c] ss:$16 sps:$4 sm:$0xff]  }
 0x486   : > { %4019 = vmatprep.subr.bf16.mxu1 %v11829_v26  ;;  %4092 = vmatprep.subr.bf16.mxu0 %v11832_v15  ;;  %v3000_v4 = vld [vmem:[#allocation2 + $0x78] sm:$0x3f]  ;;  %v11899_v26 = vld [vmem:[%s16784_s3 + $0x480] ss:$16 sps:$4 sm:$0xff]  }
 0x487   : > { %3600 = vmatmul.mubr.bf16.gmra.mrb[68].mxu1 %v3205_v44  ;;  %3673 = vmatmul.mubr.bf16.gmra.mrb[100].mxu0 %v3205_v44  ;;  %v11902_v15 = vld [vmem:[%s16784_s3 + $0x488] ss:$16 sps:$4 sm:$0xff]   ;;  %v3008_v44 = vpack.c.bf16 %v3000_v4, %v14290_v24  ;;  %v4149_v4 = vld [vmem:[#allocation2] sm:$0xfc] }
 0x488   : > { %4035 = vmatprep.mubr.bf16.mxu1 %v14244_v33  ;;  %4108 = vmatprep.mubr.bf16.mxu0 %v14244_v33  ;;  %v11844_v33 = vld [vmem:[%s16784_s3 + $0x14c] ss:$16 sps:$4 sm:$0xff]  }
 0x489   : > { %4020 = vmatpush1.bf16.msra.mxu1 %v11827_v51  ;;  %4093 = vmatpush1.bf16.msra.mxu0 %v11830_v47  ;;  %v11907_v51 = vld [vmem:[%s16784_s3 + $0x4a4] ss:$16 sps:$4 sm:$0xff]   ;;  %v11910_v47 = vld [vmem:[%s16784_s3 + $0x4ac] ss:$16 sps:$4 sm:$0xff]  }
 0x48a   : > { %4021 = vmatprep.subr.bf16.mxu1 %v11835_v12  ;;  %4094 = vmatprep.subr.bf16.mxu0 %v11838_v19  ;;  %v4150_v12 = vld [vmem:[#allocation2 + $0x8] sm:$0xfc]  ;;  %v11905_v19 = vld [vmem:[%s16784_s3 + $0x4a0] ss:$16 sps:$4 sm:$0xff]  }
 0x48b   : > { %v11976_v24 = vld [vmem:[%s16789_s8 + $0x1c] ss:$12 sps:$4 sm:$0xff]  }
 0x48d   : > { %4022 = vmatpush1.bf16.msra.mxu1 %v11833_v62  ;;  %4095 = vmatpush1.bf16.msra.mxu0 %v11836_v59  ;;  %v11908_v62 = vld [vmem:[%s16784_s3 + $0x4a8] ss:$16 sps:$4 sm:$0xff]   ;;  %v4154_v59 = vpack.c.bf16 %v14238_v36, %v4150_v12  ;;  %v11911_v36 = vld [vmem:[%s16784_s3 + $0x4c0] ss:$16 sps:$4 sm:$0xff]  }
 0x48e   : > { %4023 = vmatprep.subr.bf16.mxu1 %v11841_v46  ;;  %4096 = vmatprep.subr.bf16.mxu0 %v11844_v33  ;;  %v2999_v46 = vld [vmem:[#allocation2 + $0x70] sm:$0x3f] }
 0x48f   : > { %v11913_v33 = vld [vmem:[%s16784_s3 + $0x4c4] ss:$16 sps:$4 sm:$0xff]  }
 0x491   : > { %4024 = vmatpush1.bf16.msra.mxu1 %v11839_v9  ;;  %4097 = vmatpush1.bf16.msra.mxu0 %v11842_v8  ;;  %v11916_v9 = vld [vmem:[%s16784_s3 + $0x4cc] ss:$16 sps:$4 sm:$0xff]   ;;  %v4235_v8 = vrot.slane %v14250_v56, 1 }
 0x492   : > { %4025 = vmatprep.subr.bf16.mxu1 %v11847_v25  ;;  %4098 = vmatprep.subr.bf16.mxu0 %v11850_v2  ;;  %v3007_v25 = vpack.c.bf16 %v2999_v46, %v14288_v3  ;;  %v11914_v2 = vld [vmem:[%s16784_s3 + $0x4c8] ss:$16 sps:$4 sm:$0xff]  }
 0x495   : > { %4026 = vmatpush1.bf16.msra.mxu1 %v11845_v57  ;;  %4099 = vmatpush1.bf16.msra.mxu0 %v11848_v52  ;;  %v4234_v57 = vrot.slane %v4154_v59, 1  ;;  %v11919_v52 = vld [vmem:[%s16784_s3 + $0x4e4] ss:$16 sps:$4 sm:$0xff]  }
 0x496   : > { %4027 = vmatprep.subr.bf16.mxu1 %v11853_v60  ;;  %4100 = vmatprep.subr.bf16.mxu0 %v11856_v1  ;;  %v11922_v60 = vld [vmem:[%s16784_s3 + $0x4ec] ss:$16 sps:$4 sm:$0xff]  }
 0x497   : > { %v4236_v1 = vsel %vm675_vm0, %v4234_v57, %v4235_v8  ;;  %v11982_v57 = vld [vmem:[%s16789_s8 + $0x4c] ss:$12 sps:$4 sm:$0xff]  }
 0x499   : > { %4028 = vmatpush1.bf16.msra.mxu1 %v11851_v0  ;;  %4101 = vmatpush1.bf16.msra.mxu0 %v11854_v41  ;;  %v11917_v0 = vld [vmem:[%s16784_s3 + $0x4e0] ss:$16 sps:$4 sm:$0xff]   ;;  %v11920_v41 = vld [vmem:[%s16784_s3 + $0x4e8] ss:$16 sps:$4 sm:$0xff]  }
 0x49a   : > { %4029 = vmatprep.subr.bf16.mxu1 %v11859_v39  ;;  %4102 = vmatprep.subr.bf16.mxu0 %v11862_v30  ;;  %v11925_v39 = vld [vmem:[%s16784_s3 + $0x504] ss:$16 sps:$4 sm:$0xff]   ;;  %v11928_v30 = vld [vmem:[%s16784_s3 + $0x50c] ss:$16 sps:$4 sm:$0xff]  }
 0x49d   : > { %4030 = vmatpush1.bf16.msra.mxu1 %v11857_v32  ;;  %4103 = vmatpush1.bf16.msra.mxu0 %v11860_v28  ;;  %v11923_v32 = vld [vmem:[%s16784_s3 + $0x500] ss:$16 sps:$4 sm:$0xff]   ;;  %v11926_v28 = vld [vmem:[%s16784_s3 + $0x508] ss:$16 sps:$4 sm:$0xff]  }
 0x49e   : > { %4031 = vmatprep.subr.bf16.mxu1 %v11865_v10  ;;  %4104 = vmatprep.subr.bf16.mxu0 %v11868_v13  ;;  %v11931_v10 = vld [vmem:[%s16784_s3 + $0x524] ss:$16 sps:$4 sm:$0xff]   ;;  %v11934_v13 = vld [vmem:[%s16784_s3 + $0x52c] ss:$16 sps:$4 sm:$0xff]  }
 0x4a1   : > { %4032 = vmatpush1.bf16.msra.mxu1 %v11863_v38  ;;  %4105 = vmatpush1.bf16.msra.mxu0 %v11866_v11  ;;  %v11929_v38 = vld [vmem:[%s16784_s3 + $0x520] ss:$16 sps:$4 sm:$0xff]   ;;  %v11932_v11 = vld [vmem:[%s16784_s3 + $0x528] ss:$16 sps:$4 sm:$0xff]  }
 0x4a2   : > { %4033 = vmatprep.subr.bf16.mxu1 %v11871_v43  ;;  %4106 = vmatprep.subr.bf16.mxu0 %v11874_v48  ;;  %v11937_v43 = vld [vmem:[%s16784_s3 + $0x544] ss:$16 sps:$4 sm:$0xff]   ;;  %v11940_v48 = vld [vmem:[%s16784_s3 + $0x54c] ss:$16 sps:$4 sm:$0xff]  }
 0x4a5   : > { %4034 = vmatpush1.bf16.msra.mxu1 %v11869_v7  ;;  %4107 = vmatpush1.bf16.msra.mxu0 %v11872_v37  ;;  %v11935_v7 = vld [vmem:[%s16784_s3 + $0x540] ss:$16 sps:$4 sm:$0xff]   ;;  %v11938_v37 = vld [vmem:[%s16784_s3 + $0x548] ss:$16 sps:$4 sm:$0xff]  }
 0x4a6   : > { %4573 = vmatprep.subr.bf16.mxu1 %v11877_v5  ;;  %4646 = vmatprep.subr.bf16.mxu0 %v11880_v16  ;;  %v11943_v5 = vld [vmem:[%s16784_s3 + $0x564] ss:$16 sps:$4 sm:$0xff]   ;;  %v11946_v16 = vld [vmem:[%s16784_s3 + $0x56c] ss:$16 sps:$4 sm:$0xff]  }
 0x4a8   : > { %4036 = vmatmul.mubr.bf16.vlgmr.msra.gmra.mrb[56].mxu1 %v14241_v34  ;;  %4109 = vmatmul.mubr.bf16.vlgmr.msra.gmra.mrb[88].mxu0 %v14241_v34  ;;  %v11889_v34 = vld [vmem:[%s16784_s3 + $0x444] ss:$16 sps:$4 sm:$0xff]  }
 0x4a9   : > { %4045 = vmatprep.mubr.bf16.mxu1 %v14250_v56  ;;  %4118 = vmatprep.mubr.bf16.mxu0 %v14250_v56 }
 0x4aa   : > { %4574 = vmatpush1.bf16.msra.mxu1 %v11875_v18  ;;  %4647 = vmatpush1.bf16.msra.mxu0 %v11878_v23  ;;  %v11941_v18 = vld [vmem:[%s16784_s3 + $0x560] ss:$16 sps:$4 sm:$0xff]   ;;  %v11944_v23 = vld [vmem:[%s16784_s3 + $0x568] ss:$16 sps:$4 sm:$0xff]  }
 0x4ab   : > { %4575 = vmatprep.subr.bf16.mxu1 %v11883_v49  ;;  %4648 = vmatprep.subr.bf16.mxu0 %v11886_v63  ;;  %v11949_v49 = vld [vmem:[%s16784_s3 + $0x584] ss:$16 sps:$4 sm:$0xff]   ;;  %v11952_v63 = vld [vmem:[%s16784_s3 + $0x58c] ss:$16 sps:$4 sm:$0xff]  }
 0x4ae   : > { %4576 = vmatpush1.bf16.msra.mxu1 %v11881_v21  ;;  %4649 = vmatpush1.bf16.msra.mxu0 %v11884_v22  ;;  %v11947_v21 = vld [vmem:[%s16784_s3 + $0x580] ss:$16 sps:$4 sm:$0xff]   ;;  %v11950_v22 = vld [vmem:[%s16784_s3 + $0x588] ss:$16 sps:$4 sm:$0xff]  }
 0x4af   : > { %4577 = vmatprep.subr.bf16.mxu1 %v11889_v34  ;;  %4650 = vmatprep.subr.bf16.mxu0 %v11892_v55  ;;  %v11955_v34 = vld [vmem:[%s16784_s3 + $0x5a4] ss:$16 sps:$4 sm:$0xff]   ;;  %v11958_v55 = vld [vmem:[%s16784_s3 + $0x5ac] ss:$16 sps:$4 sm:$0xff]  }
 0x4b0   : > { %4046 = vmatmul.mubr.bf16.gmra.mrb[60].mxu1 %v14248_v50  ;;  %4119 = vmatmul.mubr.bf16.gmra.mrb[92].mxu0 %v14248_v50 }
 0x4b1   : > { %4055 = vmatprep.mubr.bf16.mxu1 %v14270_v14  ;;  %4128 = vmatprep.mubr.bf16.mxu0 %v14270_v14 }
 0x4b2   : > { %4578 = vmatpush1.bf16.msra.mxu1 %v11887_v20  ;;  %4651 = vmatpush1.bf16.msra.mxu0 %v11890_v53  ;;  %v11953_v20 = vld [vmem:[%s16784_s3 + $0x5a0] ss:$16 sps:$4 sm:$0xff]   ;;  %v11956_v53 = vld [vmem:[%s16784_s3 + $0x5a8] ss:$16 sps:$4 sm:$0xff]  }
 0x4b3   : > { %4579 = vmatprep.subr.bf16.mxu1 %v11895_v58  ;;  %4652 = vmatprep.subr.bf16.mxu0 %v11898_v6  ;;  %v11961_v58 = vld [vmem:[%s16784_s3 + $0x5c4] ss:$16 sps:$4 sm:$0xff]   ;;  %v11964_v6 = vld [vmem:[%s16784_s3 + $0x5cc] ss:$16 sps:$4 sm:$0xff]  }
 0x4b6   : > { %4580 = vmatpush1.bf16.msra.mxu1 %v11893_v54  ;;  %4653 = vmatpush1.bf16.msra.mxu0 %v11896_v17  ;;  %v11959_v54 = vld [vmem:[%s16784_s3 + $0x5c0] ss:$16 sps:$4 sm:$0xff]   ;;  %v11962_v17 = vld [vmem:[%s16784_s3 + $0x5c8] ss:$16 sps:$4 sm:$0xff]  }
 0x4b7   : > { %4581 = vmatprep.subr.bf16.mxu1 %v11901_v31  ;;  %4654 = vmatprep.subr.bf16.mxu0 %v11904_v29  ;;  %v11967_v31 = vld [vmem:[%s16784_s3 + $0x5e4] ss:$16 sps:$4 sm:$0xff]   ;;  %v11970_v29 = vld [vmem:[%s16784_s3 + $0x5ec] ss:$16 sps:$4 sm:$0xff]  }
 0x4b8   : > { %4056 = vmatmul.mubr.bf16.gmra.mrb[64].mxu1 %v14268_v61  ;;  %4129 = vmatmul.mubr.bf16.gmra.mrb[96].mxu0 %v14268_v61 }
 0x4b9   : > { %4065 = vmatprep.mubr.bf16.mxu1 %v3008_v44  ;;  %4138 = vmatprep.mubr.bf16.mxu0 %v3008_v44  ;;  %v4153_v44 = vpack.c.bf16 %v14236_v35, %v4149_v4  ;;  %v4237_v35 = vrot.slane %v14268_v61, 1  ;;  %v11971_v61 = vld [vmem:[%s16789_s8] ss:$12 sps:$4 sm:$0xff]   ;;  %v12025_v4 = vld [vmem:[%s16789_s8 + $0x150] ss:$12 sps:$4 sm:$0xff]  }
 0x4ba   : > { %4582 = vmatpush1.bf16.msra.mxu1 %v11899_v26  ;;  %4655 = vmatpush1.bf16.msra.mxu0 %v11902_v15  ;;  %v11965_v26 = vld [vmem:[%s16784_s3 + $0x5e0] ss:$16 sps:$4 sm:$0xff]   ;;  %v11968_v15 = vld [vmem:[%s16784_s3 + $0x5e8] ss:$16 sps:$4 sm:$0xff]  }
 0x4bb   : > { %4583 = vmatprep.subr.bf16.mxu1 %v11907_v51  ;;  %4656 = vmatprep.subr.bf16.mxu0 %v11910_v47  ;;  %v4232_v51 = vrot.slane %v14248_v50, 1  ;;  %v4239_v47 = vrot.slane %v14270_v14, 1  ;;  %v4231_v12 = vrot.slane %v4153_v44, 1  ;;  %v4243_v50 = vrot.slane %v4156_v42, 1  ;;  %v4151_v14 = vld [vmem:[#allocation2 + $0x70] sm:$0xff] }
 0x4bc   : > { %v4155_v46 = vpack.c.bf16 %v4151_v14, %v14288_v3  ;;  %v11973_v3 = vld [vmem:[%s16789_s8 + $0x4] ss:$12 sps:$4 sm:$0xff]   ;;  %v11979_v42 = vld [vmem:[%s16789_s8 + $0x34] ss:$12 sps:$4 sm:$0xff]  }
 0x4bd   : > { %v4238_v59 = vsel %vm675_vm0, %v4232_v51, %v4237_v35 }
 0x4be   : > { %4584 = vmatpush1.bf16.msra.mxu1 %v11905_v19  ;;  %4657 = vmatpush1.bf16.msra.mxu0 %v11908_v62  ;;  %v4233_v19 = vsel %vm675_vm0, %v4231_v12, %v4232_v51  ;;  %v4240_v62 = vsel %vm675_vm0, %v4235_v8, %v4239_v47  ;;  %v4241_v56 = vrot.slane %v4155_v46, 1  ;;  %v11998_v8 = vld [vmem:[%s16789_s8 + $0xc8] ss:$12 sps:$4 sm:$0xff]  }
 0x4bf   : > { %4585 = vmatprep.subr.bf16.mxu1 %v11913_v33  ;;  %4658 = vmatprep.subr.bf16.mxu0 %v11916_v9  ;;  %v4244_v33 = vsel %vm675_vm0, %v4239_v47, %v4243_v50  ;;  %v17036_v51 = vld [vmem:[#allocation13_spill] sm:$0xff] }
 0x4c0   : > { %4066 = vmatmul.mubr.bf16.gmra.mrb[68].mxu1 %v3007_v25  ;;  %4139 = vmatmul.mubr.bf16.gmra.mrb[100].mxu0 %v3007_v25  ;;  %v4242_v9 = vsel %vm675_vm0, %v4237_v35, %v4241_v56  ;;  %v11999_v25 = vld [vmem:[%s16789_s8 + $0x8] ss:$12 sps:$4 sm:$0xff]  }
 0x4c1   : > { %4605 = vmatprep.mubr.bf16.mxu1 %v4236_v1  ;;  %4678 = vmatprep.mubr.bf16.mxu0 %v4236_v1  ;;  %v11980_v1 = vld [vmem:[%s16789_s8 + $0x48] ss:$12 sps:$4 sm:$0xff]  }
 0x4c2   : > { %4586 = vmatpush1.bf16.msra.mxu1 %v11911_v36  ;;  %4659 = vmatpush1.bf16.msra.mxu0 %v11914_v2  ;;  %v11977_v36 = vld [vmem:[%s16789_s8 + $0x30] ss:$12 sps:$4 sm:$0xff]   ;;  %v12003_v2 = vld [vmem:[%s16789_s8 + $0xe0] ss:$12 sps:$4 sm:$0xff]  }
 0x4c3   : > { %4587 = vmatprep.subr.bf16.mxu1 %v11919_v52  ;;  %4660 = vmatprep.subr.bf16.mxu0 %v11922_v60  ;;  %v12004_v52 = vld [vmem:[%s16789_s8 + $0x20] ss:$12 sps:$4 sm:$0xff]   ;;  %v12008_v60 = vld [vmem:[%s16789_s8 + $0xf8] ss:$12 sps:$4 sm:$0xff]  }
 0x4c6   : > { %4588 = vmatpush1.bf16.msra.mxu1 %v11917_v0  ;;  %4661 = vmatpush1.bf16.msra.mxu0 %v11920_v41  ;;  %v11985_v0 = vld [vmem:[%s16789_s8 + $0x64] ss:$12 sps:$4 sm:$0xff]  }
 0x4c7   : > { %4589 = vmatprep.subr.bf16.mxu1 %v11925_v39  ;;  %4662 = vmatprep.subr.bf16.mxu0 %v11928_v30  ;;  %v12009_v41 = vld [vmem:[%s16789_s8 + $0x38] ss:$12 sps:$4 sm:$0xff]   ;;  %v12013_v39 = vld [vmem:[%s16789_s8 + $0x110] ss:$12 sps:$4 sm:$0xff]   ;;  %v11983_v30 = vld [vmem:[%s16789_s8 + $0x60] ss:$12 sps:$4 sm:$0xff]  }
 0x4ca   : > { %4590 = vmatpush1.bf16.msra.mxu1 %v11923_v32  ;;  %4663 = vmatpush1.bf16.msra.mxu0 %v11926_v28  ;;  %v11988_v32 = vld [vmem:[%s16789_s8 + $0x7c] ss:$12 sps:$4 sm:$0xff]  }
 0x4cb   : > { %4591 = vmatprep.subr.bf16.mxu1 %v11931_v10  ;;  %4664 = vmatprep.subr.bf16.mxu0 %v11934_v13  ;;  %v12014_v28 = vld [vmem:[%s16789_s8 + $0x50] ss:$12 sps:$4 sm:$0xff]   ;;  %v12018_v10 = vld [vmem:[%s16789_s8 + $0x128] ss:$12 sps:$4 sm:$0xff]   ;;  %v11986_v13 = vld [vmem:[%s16789_s8 + $0x78] ss:$12 sps:$4 sm:$0xff]  }
 0x4ce   : > { %4592 = vmatpush1.bf16.msra.mxu1 %v11929_v38  ;;  %4665 = vmatpush1.bf16.msra.mxu0 %v11932_v11  ;;  %v11991_v38 = vld [vmem:[%s16789_s8 + $0x94] ss:$12 sps:$4 sm:$0xff]  }
 0x4cf   : > { %4593 = vmatprep.subr.bf16.mxu1 %v11937_v43  ;;  %4666 = vmatprep.subr.bf16.mxu0 %v11940_v48  ;;  %v12019_v11 = vld [vmem:[%s16789_s8 + $0x68] ss:$12 sps:$4 sm:$0xff]   ;;  %v12023_v43 = vld [vmem:[%s16789_s8 + $0x140] ss:$12 sps:$4 sm:$0xff]   ;;  %v11989_v48 = vld [vmem:[%s16789_s8 + $0x90] ss:$12 sps:$4 sm:$0xff]  }
 0x4d2   : > { %4594 = vmatpush1.bf16.msra.mxu1 %v11935_v7  ;;  %4667 = vmatpush1.bf16.msra.mxu0 %v11938_v37  ;;  %v11994_v7 = vld [vmem:[%s16789_s8 + $0xac] ss:$12 sps:$4 sm:$0xff]  }
 0x4d3   : > { %4595 = vmatprep.subr.bf16.mxu1 %v11943_v5  ;;  %4668 = vmatprep.subr.bf16.mxu0 %v11946_v16  ;;  %v12024_v37 = vld [vmem:[%s16789_s8 + $0x80] ss:$12 sps:$4 sm:$0xff]   ;;  %v11992_v5 = vld [vmem:[%s16789_s8 + $0xa8] ss:$12 sps:$4 sm:$0xff]   ;;  %v11997_v16 = vld [vmem:[%s16789_s8 + $0xc4] ss:$12 sps:$4 sm:$0xff]  }
 0x4d6   : > { %4596 = vmatpush1.bf16.msra.mxu1 %v11941_v18  ;;  %4669 = vmatpush1.bf16.msra.mxu0 %v11944_v23  ;;  %v11995_v18 = vld [vmem:[%s16789_s8 + $0xc0] ss:$12 sps:$4 sm:$0xff]   ;;  %v12002_v23 = vld [vmem:[%s16789_s8 + $0xdc] ss:$12 sps:$4 sm:$0xff]  }
 0x4d7   : > { %4597 = vmatprep.subr.bf16.mxu1 %v11949_v49  ;;  %4670 = vmatprep.subr.bf16.mxu0 %v11952_v63  ;;  %v12000_v49 = vld [vmem:[%s16789_s8 + $0xd8] ss:$12 sps:$4 sm:$0xff]   ;;  %v12007_v63 = vld [vmem:[%s16789_s8 + $0xf4] ss:$12 sps:$4 sm:$0xff]  }
 0x4da   : > { %4598 = vmatpush1.bf16.msra.mxu1 %v11947_v21  ;;  %4671 = vmatpush1.bf16.msra.mxu0 %v11950_v22  ;;  %v12005_v21 = vld [vmem:[%s16789_s8 + $0xf0] ss:$12 sps:$4 sm:$0xff]   ;;  %v12012_v22 = vld [vmem:[%s16789_s8 + $0x10c] ss:$12 sps:$4 sm:$0xff]  }
 0x4db   : > { %4599 = vmatprep.subr.bf16.mxu1 %v11955_v34  ;;  %4672 = vmatprep.subr.bf16.mxu0 %v11958_v55  ;;  %v12010_v34 = vld [vmem:[%s16789_s8 + $0x108] ss:$12 sps:$4 sm:$0xff]   ;;  %v12017_v55 = vld [vmem:[%s16789_s8 + $0x124] ss:$12 sps:$4 sm:$0xff]  }
 0x4de   : > { %4600 = vmatpush1.bf16.msra.mxu1 %v11953_v20  ;;  %4673 = vmatpush1.bf16.msra.mxu0 %v11956_v53  ;;  %v12015_v20 = vld [vmem:[%s16789_s8 + $0x120] ss:$12 sps:$4 sm:$0xff]   ;;  %v12022_v53 = vld [vmem:[%s16789_s8 + $0x13c] ss:$12 sps:$4 sm:$0xff]  }
 0x4df   : > { %4601 = vmatprep.subr.bf16.mxu1 %v11961_v58  ;;  %4674 = vmatprep.subr.bf16.mxu0 %v11964_v6  ;;  %v12020_v58 = vld [vmem:[%s16789_s8 + $0x138] ss:$12 sps:$4 sm:$0xff]   ;;  %v14816_v6 = vld [vmem:[%s16785_s4] sm:$0xf] }
 0x4e0   : > { %v14837_v47 = vrot.slane %v14816_v6, %v17036_v51 }
 0x4e2   : > { %4602 = vmatpush1.bf16.msra.mxu1 %v11959_v54  ;;  %4675 = vmatpush1.bf16.msra.mxu0 %v11962_v17  ;;  %v17034_v54 = vld [vmem:[#allocation12_spill] sm:$0xff] }
 0x4e3   : > { %4603 = vmatprep.subr.bf16.mxu1 %v11967_v31  ;;  %4676 = vmatprep.subr.bf16.mxu0 %v11970_v29  ;;  %v14820_v17 = vrot.slane %v14816_v6, %v17034_v54  ;;  %v17035_v31 = vld [vmem:[#allocation14_spill] sm:$0xff] }
 0x4e4   : > { %v14824_v29 = vrot.slane %v14816_v6, %v17035_v31 }
 0x4e6   : > { %4604 = vmatpush1.bf16.msra.mxu1 %v11965_v26  ;;  %4677 = vmatpush1.bf16.msra.mxu0 %v11968_v15  ;;  %v12027_v26 = vld [vmem:[%s16789_s8 + $0x154] ss:$12 sps:$4 sm:$0xff]   ;;  %v12028_v15 = vld [vmem:[%s16789_s8 + $0x158] ss:$12 sps:$4 sm:$0xff]  }
 0x4e7   : > { %5570 = vmatprep.subr.bf16.mxu1 %v11973_v3  ;;  %10821 = vmatprep.subr.bf16.mxu0 %v11998_v8  ;;  %v12030_v8 = vld [vmem:[%s16789_s8 + $0x168] ss:$12 sps:$4 sm:$0xff]  }
 0x4e9   : > { %4606 = vmatmul.mubr.bf16.vlgmr.msra.gmra.mrb[56].mxu1 %v4233_v19  ;;  %4679 = vmatmul.mubr.bf16.vlgmr.msra.gmra.mrb[88].mxu0 %v4233_v19  ;;  %v12029_v19 = vld [vmem:[%s16789_s8 + $0x98] ss:$12 sps:$4 sm:$0xff]  }
 0x4ea   : > { %4615 = vmatprep.mubr.bf16.mxu1 %v4240_v62  ;;  %4688 = vmatprep.mubr.bf16.mxu0 %v4240_v62 }
 0x4eb   : > { %5571 = vmatpush1.bf16.msra.mxu1 %v11971_v61  ;;  %10822 = vmatpush3.bf16.msra.mxu0 %v11999_v25  ;;  %v12032_v25 = vld [vmem:[%s16789_s8 + $0x16c] ss:$12 sps:$4 sm:$0xff]  }
 0x4ec   : > { %5572 = vmatprep.subr.bf16.mxu1 %v11976_v24  ;;  %10823 = vmatprep.subr.bf16.mxu0 %v12003_v2  ;;  %v12033_v2 = vld [vmem:[%s16789_s8 + $0x170] ss:$12 sps:$4 sm:$0xff]  }
 0x4ef   : > { %5573 = vmatpush1.bf16.msra.mxu1 %v11974_v40  ;;  %10824 = vmatpush3.bf16.msra.mxu0 %v12004_v52 }
 0x4f0   : > { %5574 = vmatprep.subr.bf16.mxu1 %v11979_v42  ;;  %10825 = vmatprep.subr.bf16.mxu0 %v12008_v60 }
 0x4f1   : > { %4616 = vmatmul.mubr.bf16.gmra.mrb[60].mxu1 %v4238_v59  ;;  %4689 = vmatmul.mubr.bf16.gmra.mrb[92].mxu0 %v4238_v59 }
 0x4f2   : > { %4625 = vmatprep.mubr.bf16.mxu1 %v4244_v33  ;;  %4698 = vmatprep.mubr.bf16.mxu0 %v4244_v33 }
 0x4f3   : > { %5575 = vmatpush1.bf16.msra.mxu1 %v11977_v36  ;;  %10826 = vmatpush3.bf16.msra.mxu0 %v12009_v41 }
 0x4f4   : > { %5576 = vmatprep.subr.bf16.mxu1 %v11982_v57  ;;  %10827 = vmatprep.subr.bf16.mxu0 %v12013_v39  ;;  %v12034_v57 = vld [vmem:[%s16789_s8 + $0xb0] ss:$12 sps:$4 sm:$0xff]  }
 0x4f7   : > { %5577 = vmatpush1.bf16.msra.mxu1 %v11980_v1  ;;  %10828 = vmatpush3.bf16.msra.mxu0 %v12014_v28 }
 0x4f8   : > { %5578 = vmatprep.subr.bf16.mxu1 %v11985_v0  ;;  %10829 = vmatprep.subr.bf16.mxu0 %v12018_v10  ;;  %v12037_v0 = vld [vmem:[%s16789_s8 + $0x184] ss:$12 sps:$4 sm:$0xff]  }
 0x4f9   : > { %4626 = vmatmul.mubr.bf16.gmra.mrb[64].mxu1 %v4242_v9  ;;  %4699 = vmatmul.mubr.bf16.gmra.mrb[96].mxu0 %v4242_v9 }
 0x4fa   : > { %4635 = vmatprep.mubr.bf16.mxu1 %v4243_v50  ;;  %4708 = vmatprep.mubr.bf16.mxu0 %v4243_v50 }
 0x4fb   : > { %5579 = vmatpush1.bf16.msra.mxu1 %v11983_v30  ;;  %10830 = vmatpush3.bf16.msra.mxu0 %v12019_v11 }
 0x4fc   : > { %5580 = vmatprep.subr.bf16.mxu1 %v11988_v32  ;;  %10831 = vmatprep.subr.bf16.mxu0 %v12023_v43 }
 0x4ff   : > { %5581 = vmatpush1.bf16.msra.mxu1 %v11986_v13  ;;  %10832 = vmatpush3.bf16.msra.mxu0 %v12024_v37 }
 0x500   : > { %5582 = vmatprep.subr.bf16.mxu1 %v11991_v38  ;;  %10833 = vmatprep.subr.bf16.mxu0 %v12028_v15 }
 0x501   : > { %4636 = vmatmul.mubr.bf16.gmra.mrb[68].mxu1 %v4241_v56  ;;  %4709 = vmatmul.mubr.bf16.gmra.mrb[100].mxu0 %v4241_v56 }
 0x503   : > { %5583 = vmatpush1.bf16.msra.mxu1 %v11989_v48  ;;  %10834 = vmatpush3.bf16.msra.mxu0 %v12029_v19 }
 0x504   : > { %5584 = vmatprep.subr.bf16.mxu1 %v11994_v7  ;;  %10835 = vmatprep.subr.bf16.mxu0 %v12033_v2 }
 0x507   : > { %5585 = vmatpush1.bf16.msra.mxu1 %v11992_v5  ;;  %10836 = vmatpush3.bf16.msra.mxu0 %v12034_v57 }
 0x508   : > { %5586 = vmatprep.subr.bf16.mxu1 %v11997_v16  ;;  %5781 = vmatprep.subr.bf16.mxu0 %v17033_v27 }
 0x50b   : > { %5587 = vmatpush1.bf16.msra.mxu1 %v11995_v18 }
 0x50c   : > { %5588 = vmatprep.subr.bf16.mxu1 %v12002_v23 }
 0x50f   : > { %5589 = vmatpush1.bf16.msra.mxu1 %v12000_v49 }
 0x510   : > { %5590 = vmatprep.subr.bf16.mxu1 %v12007_v63 }
 0x513   : > { %5591 = vmatpush1.bf16.msra.mxu1 %v12005_v21 }
 0x514   : > { %5592 = vmatprep.subr.bf16.mxu1 %v12012_v22 }
 0x517   : > { %5593 = vmatpush1.bf16.msra.mxu1 %v12010_v34 }
 0x518   : > { %5594 = vmatprep.subr.bf16.mxu1 %v12017_v55 }
 0x51b   : > { %5595 = vmatpush1.bf16.msra.mxu1 %v12015_v20 }
 0x51c   : > { %5596 = vmatprep.subr.bf16.mxu1 %v12022_v53 }
 0x51f   : > { %5597 = vmatpush1.bf16.msra.mxu1 %v12020_v58 }
 0x520   : > { %5598 = vmatprep.subr.bf16.mxu1 %v12027_v26 }
 0x523   : > { %5599 = vmatpush1.bf16.msra.mxu1 %v12025_v4 }
 0x524   : > { %5600 = vmatprep.subr.bf16.mxu1 %v12032_v25 }
 0x527   : > { %5601 = vmatpush1.bf16.msra.mxu1 %v12030_v8 }
 0x528   : > { %5643 = vmatprep.subr.bf16.mxu1 %v12037_v0 }
 0x5bc   : > { %v4607_v44 = vpop.f32.mrb[56].mxu1  ;;  %v4680_v12 = vpop.f32.mrb[88].mxu0 }
 0x5bd   : > { %v14843_v62 = vadd.f32 %v14820_v17, %v4680_v12  ;;  %v4609_v35 = vpop.f32.mrb[57].mxu1  ;;  %v14845_v50 = vpop.f32.mrb[89].mxu0  ;;  %v14860_v24 = vadd.f32 %v14837_v47, %v4607_v44 }
 0x5be   : > { %v14848_v14 = vadd.f32 %v14824_v29, %v4609_v35  ;;  %v4611_v59 = vpop.f32.mrb[58].mxu1  ;;  %v4684_v46 = vpop.f32.mrb[90].mxu0 }
 0x5bf   : > { %v16900_v33 = vmax.f32 %v14843_v62, 0.0  ;;  %v14852_v56 = vadd.f32 %v14837_v47, %v4611_v59  ;;  %v14855_v9 = vadd.f32 %v14820_v17, %v4684_v46  ;;  %v4613_v61 = vpop.f32.mrb[59].mxu1  ;;  %v14857_v3 = vpop.f32.mrb[91].mxu0  ;;  %v4804_v41 = vmax.f32 %v14860_v24, 0.0 }
 0x5c0   : > { %v4805_v40 = vmax.f32 %v14848_v14, 0.0  ;;  %v14864_v42 = vadd.f32 %v14824_v29, %v4613_v61 }
 0x5c1   : > { %v16902_v36 = vmax.f32 %v14855_v9, 0.0  ;;  %v4808_v60 = vmax.f32 %v14852_v56, 0.0 }
 0x5c2   : > { %v11437_v52 = vpack.i.bf16 %v16900_v33, %v4805_v40  ;;  %v4809_v1 = vmax.f32 %v14864_v42, 0.0  ;;  %v12038_v42 = vld [vmem:[%s16789_s8 + $0x188] ss:$12 sps:$4 sm:$0xff]  }
 0x5c3   : > { %v11447_v38 = vpack.i.bf16 %v4808_v60, %v4804_v41 }
 0x5c4   : > { %v11442_v39 = vpack.i.bf16 %v16902_v36, %v4809_v1  ;;  %v4617_v30 = vpop.f32.mrb[60].mxu1  ;;  %11438 = vrot.lane.b32.xlu1 %v11437_v52, %s12586_s29  ;;  %v4690_v32 = vpop.f32.mrb[92].mxu0 }
 0x5c5   : > { %v14895_v28 = vadd.f32 %v14820_v17, %v4690_v32  ;;  %v4619_v10 = vpop.f32.mrb[61].mxu1  ;;  %v14897_v13 = vpop.f32.mrb[93].mxu0  ;;  %v14916_v23 = vadd.f32 %v14837_v47, %v4617_v30 }
 0x5c6   : > { %v14905_v11 = vadd.f32 %v14824_v29, %v4619_v10  ;;  %v4621_v43 = vpop.f32.mrb[62].mxu1  ;;  %11443 = vrot.lane.b32.xlu0 %v11442_v39, %s12586_s29  ;;  %v4694_v48 = vpop.f32.mrb[94].mxu0 }
 0x5c7   : > { %v16898_v7 = vmax.f32 %v14895_v28, 0.0  ;;  %v14910_v37 = vadd.f32 %v14837_v47, %v4621_v43  ;;  %v14913_v5 = vadd.f32 %v14820_v17, %v4694_v48  ;;  %v4623_v16 = vpop.f32.mrb[63].mxu1  ;;  %v4696_v18 = vpop.f32.mrb[95].mxu0  ;;  %v4812_v20 = vmax.f32 %v14916_v23, 0.0 }
 0x5c8   : > { %v4813_v49 = vmax.f32 %v14905_v11, 0.0  ;;  %v14920_v63 = vadd.f32 %v14824_v29, %v4623_v16  ;;  %11448 = vrot.lane.b32.xlu1 %v11447_v38, %s12586_s29 }
 0x5c9   : > { %v16897_v21 = vmax.f32 %v14913_v5, 0.0  ;;  %v4816_v34 = vmax.f32 %v14910_v37, 0.0 }
 0x5ca   : > { %v11452_v22 = vpack.i.bf16 %v16898_v7, %v4813_v49  ;;  %v4817_v55 = vmax.f32 %v14920_v63, 0.0 }
 0x5cb   : > { %v11462_v12 = vpack.i.bf16 %v4816_v34, %v4812_v20 }
 0x5cc   : > { %v11457_v53 = vpack.i.bf16 %v16897_v21, %v4817_v55  ;;  %v4627_v58 = vpop.f32.mrb[64].mxu1  ;;  %11453 = vrot.lane.b32.xlu0 %v11452_v22, %s12586_s29  ;;  %v4700_v4 = vpop.f32.mrb[96].mxu0  ;;  %v17037_v22 = vld [vmem:[#allocation27_spill] sm:$0xff] }
 0x5cd   : > { %v14937_v26 = vadd.f32 %v14820_v17, %v4700_v4  ;;  %v4629_v15 = vpop.f32.mrb[65].mxu1  ;;  %v4702_v44 = vpop.f32.mrb[97].mxu0  ;;  %v14955_v57 = vadd.f32 %v14837_v47, %v4627_v58 }
 0x5ce   : > { %v14944_v19 = vadd.f32 %v14824_v29, %v4629_v15  ;;  %v4631_v35 = vpop.f32.mrb[66].mxu1  ;;  %11458 = vrot.lane.b32.xlu1 %v11457_v53, %s12586_s29  ;;  %v4704_v59 = vpop.f32.mrb[98].mxu0  ;;  %v4767_v53 = vrot.slane %v14816_v6, %v17037_v22 }
 0x5cf   : > { %v16896_v46 = vmax.f32 %v14937_v26, 0.0  ;;  %v14949_v61 = vadd.f32 %v14837_v47, %v4631_v35  ;;  %v14952_v8 = vadd.f32 %v14820_v17, %v4704_v59  ;;  %v4633_v25 = vpop.f32.mrb[67].mxu1  ;;  %v4706_v2 = vpop.f32.mrb[99].mxu0  ;;  %v16917_v38 = vmax.f32 %v14955_v57, 0.0 }
 0x5d0   : > { %v4821_v52 = vmax.f32 %v14944_v19, 0.0  ;;  %v14959_v0 = vadd.f32 %v14824_v29, %v4633_v25  ;;  %11463 = vrot.lane.b32.xlu0 %v11462_v12, %s12586_s29  ;;  %v15010_v7 = vadd.f32 %v4767_v53, %v4696_v18  ;;  %v15032_v33 = vadd.f32 %v4767_v53, %v4702_v44 }
 0x5d1   : > { %v16895_v39 = vmax.f32 %v14952_v8, 0.0  ;;  %v16916_v32 = vmax.f32 %v14949_v61, 0.0  ;;  %v17039_v19 = vmax.f32 %v14949_v61, 0.0 }
 0x5d2   : > { %v11467_v30 = vpack.i.bf16 %v16896_v46, %v4821_v52  ;;  %v4825_v10 = vmax.f32 %v14959_v0, 0.0 }
 0x5d3   : > { %v11477_v12 = vpack.i.bf16 %v16916_v32, %v16917_v38 }
 0x5d4   : > { %v11472_v43 = vpack.i.bf16 %v16895_v39, %v4825_v10  ;;  %v4637_v48 = vpop.f32.mrb[68].mxu1  ;;  %11468 = vrot.lane.b32.xlu1 %v11467_v30, %s12586_s29  ;;  %v4710_v16 = vpop.f32.mrb[100].mxu0  ;;  %v14989_v30 = vadd.f32 %v4767_v53, %v14857_v3  ;;  %v15007_v3 = vadd.f32 %v4767_v53, %v14845_v50  ;;  %v15022_v50 = vadd.f32 %v4767_v53, %v4706_v2 }
 0x5d5   : > { %v14978_v58 = vadd.f32 %v14820_v17, %v4710_v16  ;;  %v4639_v4 = vpop.f32.mrb[69].mxu1  ;;  %v4712_v15 = vpop.f32.mrb[101].mxu0 }
 0x5d6   : > { %v14985_v35 = vadd.f32 %v14824_v29, %v4639_v4  ;;  %v4641_v59 = vpop.f32.mrb[70].mxu1  ;;  %11473 = vrot.lane.b32.xlu0 %v11472_v43, %s12586_s29  ;;  %v4714_v25 = vpop.f32.mrb[102].mxu0  ;;  %v14999_v4 = vadd.f32 %v14837_v47, %v4637_v48  ;;  %v16906_v36 = vmax.f32 %v15022_v50, 0.0  ;;  %v15047_v44 = vadd.f32 %v4767_v53, %v4712_v15 }
 0x5d7   : > { %v16899_v6 = vmax.f32 %v14978_v58, 0.0  ;;  %v14993_v16 = vadd.f32 %v14837_v47, %v4641_v59  ;;  %v14996_v45 = vadd.f32 %v14820_v17, %v4714_v25  ;;  %v4643_v39 = vpop.f32.mrb[71].mxu1  ;;  %v4716_v46 = vpop.f32.mrb[103].mxu0  ;;  %v16904_v25 = vmax.f32 %v15007_v3, 0.0 }
 0x5d8   : > { %v16915_v21 = vmax.f32 %v14985_v35, 0.0  ;;  %v15003_v43 = vadd.f32 %v14824_v29, %v4643_v39  ;;  %11478 = vrot.lane.b32.xlu1 %v11477_v12, %s12586_s29  ;;  %v16911_v29 = vmax.f32 %v14989_v30, 0.0  ;;  %v15020_v39 = vadd.f32 %v4767_v53, %v14897_v13 }
 0x5d9   : > { %v16901_v59 = vmax.f32 %v14996_v45, 0.0  ;;  %v16903_v47 = vmax.f32 %v14993_v16, 0.0  ;;  %v16912_v12 = vmax.f32 %v14999_v4, 0.0  ;;  %v15038_v2 = vadd.f32 %v4767_v53, %v4716_v46 }
 0x5da   : > { %v11482_v17 = vpack.i.bf16 %v16899_v6, %v16915_v21  ;;  %v16913_v48 = vmax.f32 %v15003_v43, 0.0  ;;  %v16910_v6 = vmax.f32 %v15010_v7, 0.0  ;;  %v16908_v53 = vmax.f32 %v15047_v44, 0.0 }
 0x5db   : > { %v11492_v13 = vpack.i.bf16 %v16903_v47, %v16912_v12  ;;  %v16909_v47 = vmax.f32 %v15038_v2, 0.0 }
 0x5dc   : > { %v11487_v18 = vpack.i.bf16 %v16901_v59, %v16913_v48  ;;  %11483 = vrot.lane.b32.xlu0 %v11482_v17, %s12586_s29  ;;  %v11497_v17 = vpack.i.bf16 %v16911_v29, %v16904_v25  ;;  %v16907_v59 = vmax.f32 %v15020_v39, 0.0 }
 0x5dd   : > { %v11512_v15 = vpack.i.bf16 %v16909_v47, %v16908_v53 }
 0x5de   : > { %11488 = vrot.lane.b32.xlu1 %v11487_v18, %s12586_s29  ;;  %v11502_v46 = vpack.i.bf16 %v16910_v6, %v16907_v59  ;;  %v16905_v18 = vmax.f32 %v15032_v33, 0.0 }
 0x5e0   : > { %11493 = vrot.lane.b32.xlu0 %v11492_v13, %s12586_s29  ;;  %v11507_v25 = vpack.i.bf16 %v16906_v36, %v16905_v18 }
 0x5e2   : > { %11498 = vrot.lane.b32.xlu1 %v11497_v17, %s12586_s29 }
 0x5e4   : > { %11503 = vrot.lane.b32.xlu0 %v11502_v46, %s12586_s29 }
 0x5e6   : > { %11508 = vrot.lane.b32.xlu1 %v11507_v25, %s12586_s29 }
 0x5e8   : > { %11513 = vrot.lane.b32.xlu0 %v11512_v15, %s12586_s29  ;;  %s9635_s29 = scalar_lea.sflag [#allocation5], %s540_s21 }
 0x636   : > { %v15069_v13 = vpop.permute.xlu1 %11438 }
 0x637   : > { %v16914_v17 = vunpack.i.h.bf16 %v15069_v13  ;;  %v11440_v18 = vunpack.i.l.bf16 %v15069_v13 }
 0x638   : > { %v15073_v36 = vpop.permute.xlu0 %11443 }
 0x639   : > { %v4934_v46 = vsel %vm4932_vm8, %v11440_v18, %v16914_v17  ;;  %v16918_v59 = vunpack.i.h.bf16 %v15073_v36  ;;  %v11445_v53 = vunpack.i.l.bf16 %v15073_v36 }
 0x63a   : > { %v11449_v25 = vpop.permute.xlu1 %11448  ;;  %v4990_v29 = vmax.f32 %v4805_v40, %v4934_v46  ;;  %v12035_v40 = vld [vmem:[%s16789_s8 + $0x180] ss:$12 sps:$4 sm:$0xff]  }
 0x63b   : > { %v4937_v15 = vsel %vm4932_vm8, %v11445_v53, %v16918_v59  ;;  %v11451_v47 = vunpack.i.h.bf16 %v11449_v25  ;;  %v11450_v6 = vunpack.i.l.bf16 %v11449_v25  ;;  %v12045_v46 = vld [vmem:[%s16789_s8 + $0x1b4] ss:$12 sps:$4 sm:$0xff]  }
 0x63c   : > { %v4994_v12 = vmax.f32 %v4809_v1, %v4937_v15 }
 0x63d   : > { %v4933_v48 = vsel %vm4932_vm8, %v11450_v6, %v11440_v18  ;;  %v4936_v17 = vsel %vm4932_vm8, %v11451_v47, %v11445_v53 }
 0x63e   : > { %v4989_v21 = vmax.f32 %v4804_v41, %v4933_v48  ;;  %v4993_v32 = vmax.f32 %v4808_v60, %v4936_v17  ;;  %v15093_v38 = vpop.permute.xlu0 %11453  ;;  %v5022_v59 = vpack.c.bf16 %v4994_v12, %v4990_v29  ;;  %v12041_v60 = vld [vmem:[%s16789_s8 + $0x19c] ss:$12 sps:$4 sm:$0xff]   ;;  %v12039_v48 = vld [vmem:[%s16789_s8 + $0x198] ss:$12 sps:$4 sm:$0xff]   ;;  %v12042_v29 = vld [vmem:[%s16789_s8 + $0x1a0] ss:$12 sps:$4 sm:$0xff]  }
 0x63f   : > { %v11456_v25 = vunpack.i.h.bf16 %v15093_v38  ;;  %v11455_v14 = vunpack.i.l.bf16 %v15093_v38  ;;  %v17055_v38 = vmax.f32 %v15032_v33, 0.0  ;;  %v17056_v33 = vmax.f32 %v14937_v26, 0.0 }
 0x640   : > { %v5021_v24 = vpack.c.bf16 %v4993_v32, %v4989_v21  ;;  %5602 = vmatprep.mubr.bf16.mxu1 %v5022_v59  ;;  %5748 = vmatprep.mubr.bf16.mxu0 %v5022_v59  ;;  %v15103_v56 = vpop.permute.xlu1 %11458 }
 0x641   : > { %v4940_v1 = vsel %vm4932_vm8, %v11455_v14, %v11456_v25  ;;  %v11461_v41 = vunpack.i.h.bf16 %v15103_v56  ;;  %v11460_v6 = vunpack.i.l.bf16 %v15103_v56 }
 0x642   : > { %5603 = vmatmul.mubr.bf16.vlgmr.msra.gmra.mrb[72].mxu1 %v5021_v24  ;;  %5749 = vmatmul.mubr.bf16.vlgmr.msra.gmra.mrb[104].mxu0 %v5021_v24  ;;  %v11464_v47 = vpop.permute.xlu0 %11463  ;;  %v4998_v12 = vmax.f32 %v4813_v49, %v4940_v1 }
 0x643   : > { %v4943_v21 = vsel %vm4932_vm8, %v11460_v6, %v11461_v41  ;;  %5644 = vmatpush1.bf16.msra.mxu1 %v12035_v40  ;;  %5782 = vmatpush1.bf16.msra.mxu0 %v12038_v42  ;;  %v11466_v32 = vunpack.i.h.bf16 %v11464_v47  ;;  %v11465_v59 = vunpack.i.l.bf16 %v11464_v47 }
 0x644   : > { %5645 = vmatprep.subr.bf16.mxu1 %v12041_v60  ;;  %5783 = vmatprep.subr.bf16.mxu0 %v17033_v27  ;;  %v5002_v18 = vmax.f32 %v4817_v55, %v4943_v21  ;;  %v12043_v55 = vld [vmem:[%s16789_s8 + $0x1b0] ss:$12 sps:$4 sm:$0xff]  }
 0x645   : > { %v4939_v53 = vsel %vm4932_vm8, %v11465_v59, %v11455_v14  ;;  %v4942_v17 = vsel %vm4932_vm8, %v11466_v32, %v11460_v6  ;;  %v12046_v14 = vld [vmem:[%s16789_s8 + $0x1b8] ss:$12 sps:$4 sm:$0xff]   ;;  %v12047_v32 = vld [vmem:[%s16789_s8 + $0x1c8] ss:$12 sps:$4 sm:$0xff]   ;;  %v12050_v59 = vld [vmem:[%s16789_s8 + $0x1d0] ss:$12 sps:$4 sm:$0xff]  }
 0x646   : > { %v15132_v15 = vpop.permute.xlu1 %11468  ;;  %v5026_v40 = vpack.c.bf16 %v5002_v18, %v4998_v12  ;;  %v4997_v42 = vmax.f32 %v4812_v20, %v4939_v53  ;;  %v5001_v11 = vmax.f32 %v4816_v34, %v4942_v17  ;;  %v12049_v34 = vld [vmem:[%s16789_s8 + $0x1cc] ss:$12 sps:$4 sm:$0xff]   ;;  %v12053_v53 = vld [vmem:[%s16789_s8 + $0x1e4] ss:$12 sps:$4 sm:$0xff]  }
 0x647   : > { %5646 = vmatpush1.bf16.msra.mxu1 %v12039_v48  ;;  %5784 = vmatpush1.bf16.msra.mxu0 %v12042_v29  ;;  %v11471_v49 = vunpack.i.h.bf16 %v15132_v15  ;;  %v11470_v63 = vunpack.i.l.bf16 %v15132_v15 }
 0x648   : > { %5612 = vmatprep.mubr.bf16.mxu1 %v5026_v40  ;;  %5756 = vmatprep.mubr.bf16.mxu0 %v5026_v40  ;;  %v15146_v23 = vpop.permute.xlu0 %11473  ;;  %v5025_v37 = vpack.c.bf16 %v5001_v11, %v4997_v42  ;;  %v17038_v40 = vmax.f32 %v14955_v57, 0.0  ;;  %v12051_v11 = vld [vmem:[%s16789_s8 + $0x1e0] ss:$12 sps:$4 sm:$0xff]  }
 0x649   : > { %v4946_v20 = vsel %vm4932_vm8, %v11470_v63, %v11471_v49  ;;  %v11476_v24 = vunpack.i.h.bf16 %v15146_v23  ;;  %v11475_v60 = vunpack.i.l.bf16 %v15146_v23  ;;  %5647 = vmatprep.subr.bf16.mxu1 %v12045_v46  ;;  %5785 = vmatprep.subr.bf16.mxu0 %v17033_v27  ;;  %v17057_v23 = vmax.f32 %v14952_v8, 0.0 }
 0x64a   : > { %5613 = vmatmul.mubr.bf16.gmra.mrb[76].mxu1 %v5025_v37  ;;  %5757 = vmatmul.mubr.bf16.gmra.mrb[108].mxu0 %v5025_v37  ;;  %v11479_v1 = vpop.permute.xlu1 %11478  ;;  %v5006_v48 = vmax.f32 %v4821_v52, %v4946_v20  ;;  %v17060_v8 = vmax.f32 %v14978_v58, 0.0  ;;  %v12086_v58 = vld [vmem:[%s16786_s5 + $0x264] ss:$16 sps:$4 sm:$0xff]  }
 0x64b   : > { %v4949_v6 = vsel %vm4932_vm8, %v11475_v60, %v11476_v24  ;;  %5648 = vmatpush1.bf16.msra.mxu1 %v12043_v55  ;;  %5786 = vmatpush1.bf16.msra.mxu0 %v12046_v14  ;;  %v11481_v47 = vunpack.i.h.bf16 %v11479_v1  ;;  %v11480_v21 = vunpack.i.l.bf16 %v11479_v1  ;;  %v12057_v55 = vld [vmem:[%s16789_s8 + $0x1fc] ss:$12 sps:$4 sm:$0xff]  }
 0x64c   : > { %5649 = vmatprep.subr.bf16.mxu1 %v12049_v34  ;;  %5787 = vmatprep.subr.bf16.mxu0 %v17033_v27  ;;  %v5010_v29 = vmax.f32 %v4825_v10, %v4949_v6 }
 0x64d   : > { %v4945_v12 = vsel %vm4932_vm8, %v11480_v21, %v11470_v63  ;;  %v4948_v18 = vsel %vm4932_vm8, %v11481_v47, %v11475_v60  ;;  %v12054_v63 = vld [vmem:[%s16789_s8 + $0x1e8] ss:$12 sps:$4 sm:$0xff]   ;;  %v12055_v47 = vld [vmem:[%s16789_s8 + $0x1f8] ss:$12 sps:$4 sm:$0xff]  }
 0x64e   : > { %v15176_v17 = vpop.permute.xlu0 %11483  ;;  %v5030_v46 = vpack.c.bf16 %v5010_v29, %v5006_v48  ;;  %v5005_v42 = vmax.f32 %v17038_v40, %v4945_v12  ;;  %v5009_v52 = vmax.f32 %v17039_v19, %v4948_v18  ;;  %v17041_v29 = vmax.f32 %v15003_v43, 0.0 }
 0x64f   : > { %5650 = vmatpush1.bf16.msra.mxu1 %v12047_v32  ;;  %5788 = vmatpush1.bf16.msra.mxu0 %v12050_v59  ;;  %v11486_v0 = vunpack.i.h.bf16 %v15176_v17  ;;  %v11485_v10 = vunpack.i.l.bf16 %v15176_v17  ;;  %v12058_v32 = vld [vmem:[%s16789_s8 + $0x200] ss:$12 sps:$4 sm:$0xff]   ;;  %v17040_v59 = vmax.f32 %v14985_v35, 0.0  ;;  %v17043_v35 = vmax.f32 %v14993_v16, 0.0  ;;  %v12062_v16 = vld [vmem:[%s16789_s8 + $0x218] ss:$12 sps:$4 sm:$0xff]  }
 0x650   : > { %5622 = vmatprep.mubr.bf16.mxu1 %v5030_v46  ;;  %5764 = vmatprep.mubr.bf16.mxu0 %v5030_v46  ;;  %v15190_v57 = vpop.permute.xlu1 %11488  ;;  %v5029_v61 = vpack.c.bf16 %v5009_v52, %v5005_v42  ;;  %v12061_v42 = vld [vmem:[%s16789_s8 + $0x214] ss:$12 sps:$4 sm:$0xff]   ;;  %v17042_v52 = vmax.f32 %v14999_v4, 0.0  ;;  %v17044_v43 = vmax.f32 %v14989_v30, 0.0  ;;  %v12065_v30 = vld [vmem:[%s16789_s8 + $0x22c] ss:$12 sps:$4 sm:$0xff]  }
 0x651   : > { %v4952_v14 = vsel %vm4932_vm8, %v11485_v10, %v11486_v0  ;;  %v11491_v37 = vunpack.i.h.bf16 %v15190_v57  ;;  %v11490_v34 = vunpack.i.l.bf16 %v15190_v57  ;;  %5651 = vmatprep.subr.bf16.mxu1 %v12053_v53  ;;  %5789 = vmatprep.subr.bf16.mxu0 %v17033_v27  ;;  %v12078_v17 = vld [vmem:[%s16786_s5 + $0x240] ss:$16 sps:$4 sm:$0xff]  }
 0x652   : > { %5623 = vmatmul.mubr.bf16.gmra.mrb[80].mxu1 %v5029_v61  ;;  %5765 = vmatmul.mubr.bf16.gmra.mrb[112].mxu0 %v5029_v61  ;;  %v11494_v20 = vpop.permute.xlu0 %11493  ;;  %v5014_v48 = vmax.f32 %v17040_v59, %v4952_v14  ;;  %v12059_v14 = vld [vmem:[%s16789_s8 + $0x210] ss:$12 sps:$4 sm:$0xff]  }
 0x653   : > { %v4955_v60 = vsel %vm4932_vm8, %v11490_v34, %v11491_v37  ;;  %5652 = vmatpush1.bf16.msra.mxu1 %v12051_v11  ;;  %5790 = vmatpush1.bf16.msra.mxu0 %v12054_v63  ;;  %v11496_v1 = vunpack.i.h.bf16 %v11494_v20  ;;  %v11495_v6 = vunpack.i.l.bf16 %v11494_v20  ;;  %v12066_v20 = vld [vmem:[%s16789_s8 + $0x230] ss:$12 sps:$4 sm:$0xff]  }
 0x654   : > { %v11499_v21 = vpop.permute.xlu1 %11498  ;;  %5653 = vmatprep.subr.bf16.mxu1 %v12057_v55  ;;  %5791 = vmatprep.subr.bf16.mxu0 %v17033_v27  ;;  %v5018_v12 = vmax.f32 %v17041_v29, %v4955_v60  ;;  %v12069_v60 = vld [vmem:[%s16789_s8 + $0x244] ss:$12 sps:$4 sm:$0xff]  }
 0x655   : > { %v4951_v18 = vsel %vm4932_vm8, %v11495_v6, %v11485_v10  ;;  %v4954_v53 = vsel %vm4932_vm8, %v11496_v1, %v11490_v34  ;;  %v11501_v46 = vunpack.i.h.bf16 %v11499_v21  ;;  %v11500_v40 = vunpack.i.l.bf16 %v11499_v21  ;;  %v12067_v6 = vld [vmem:[%s16789_s8 + $0x240] ss:$12 sps:$4 sm:$0xff]   ;;  %v12073_v21 = vld [vmem:[%s16789_s8 + $0x25c] ss:$12 sps:$4 sm:$0xff]  }
 0x656   : > { %v5034_v19 = vpack.c.bf16 %v5018_v12, %v5014_v48  ;;  %v5013_v11 = vmax.f32 %v17042_v52, %v4951_v18  ;;  %v5017_v63 = vmax.f32 %v17043_v35, %v4954_v53  ;;  %v17045_v10 = vmax.f32 %v15007_v3, 0.0  ;;  %v12063_v3 = vld [vmem:[%s16789_s8 + $0x228] ss:$12 sps:$4 sm:$0xff]   ;;  %v11504_v1 = vpop.permute.xlu0 %11503  ;;  %v12071_v53 = vld [vmem:[%s16789_s8 + $0x258] ss:$12 sps:$4 sm:$0xff]  }
 0x657   : > { %v4996_v61 = vmax.f32 %v17044_v43, %v11501_v46  ;;  %5654 = vmatpush1.bf16.msra.mxu1 %v12055_v47  ;;  %5792 = vmatpush1.bf16.msra.mxu0 %v12058_v32  ;;  %v12070_v47 = vld [vmem:[%s16789_s8 + $0x248] ss:$12 sps:$4 sm:$0xff]   ;;  %v17046_v32 = vunpack.i.h.bf16 %v15073_v36  ;;  %v17047_v48 = vunpack.i.h.bf16 %v15069_v13  ;;  %v11506_v12 = vunpack.i.h.bf16 %v11504_v1  ;;  %v12074_v13 = vld [vmem:[%s16789_s8 + $0x260] ss:$12 sps:$4 sm:$0xff]  }
 0x658   : > { %v4992_v55 = vmax.f32 %v17045_v10, %v11500_v40  ;;  %5632 = vmatprep.mubr.bf16.mxu1 %v5034_v19  ;;  %5772 = vmatprep.mubr.bf16.mxu0 %v5034_v19  ;;  %v5033_v4 = vpack.c.bf16 %v5017_v63, %v5013_v11  ;;  %v11505_v18 = vunpack.i.l.bf16 %v11504_v1  ;;  %v17049_v36 = vmax.f32 %v14843_v62, 0.0  ;;  %v11509_v63 = vpop.permute.xlu1 %11508 }
 0x659   : > { %5655 = vmatprep.subr.bf16.mxu1 %v12061_v42  ;;  %5793 = vmatprep.subr.bf16.mxu0 %v17033_v27  ;;  %v4938_v59 = vsel %vm4932_vm8, %v17046_v32, %v11501_v46  ;;  %v4935_v29 = vsel %vm4932_vm8, %v17047_v48, %v11500_v40  ;;  %v17048_v42 = vmax.f32 %v14855_v9, 0.0  ;;  %v17050_v46 = vmax.f32 %v15010_v7, 0.0 }
 0x65a   : > { %v5024_v34 = vpack.c.bf16 %v4996_v61, %v4992_v55  ;;  %5633 = vmatmul.mubr.bf16.gmra.mrb[84].mxu1 %v5033_v4  ;;  %5773 = vmatmul.mubr.bf16.gmra.mrb[116].mxu0 %v5033_v4  ;;  %v4991_v52 = vmax.f32 %v17049_v36, %v4935_v29  ;;  %v17051_v11 = vmax.f32 %v15020_v39, 0.0  ;;  %v11511_v43 = vunpack.i.h.bf16 %v11509_v63  ;;  %v11514_v4 = vpop.permute.xlu0 %11513  ;;  %v12096_v36 = vld [vmem:[%s16786_s5 + $0x2a0] ss:$16 sps:$4 sm:$0xff]  }
 0x65b   : > { %5656 = vmatpush1.bf16.msra.mxu1 %v12059_v14  ;;  %5794 = vmatpush1.bf16.msra.mxu0 %v12062_v16  ;;  %v4995_v19 = vmax.f32 %v17048_v42, %v4938_v59  ;;  %v5004_v40 = vmax.f32 %v17050_v46, %v11506_v12  ;;  %v4944_v62 = vsel %vm4932_vm8, %v11461_v41, %v11506_v12  ;;  %v11510_v10 = vunpack.i.l.bf16 %v11509_v63  ;;  %v12098_v42 = vld [vmem:[%s16786_s5 + $0x2a4] ss:$16 sps:$4 sm:$0xff]  }
 0x65c   : > { %10275 = vmatprep.mubr.msk.bf16.mxu1 %vm5557_vm9, %v5024_v34  ;;  %10279 = vmatprep.mubr.msk.bf16.mxu0 %vm5557_vm9, %v5024_v34  ;;  %v5000_v35 = vmax.f32 %v17051_v11, %v11505_v18  ;;  %v4941_v61 = vsel %vm4932_vm8, %v11456_v25, %v11505_v18  ;;  %v17052_v39 = vmax.f32 %v14895_v28, 0.0  ;;  %v17053_v14 = vmax.f32 %v14913_v5, 0.0  ;;  %v12090_v18 = vld [vmem:[%s16786_s5 + $0x280] ss:$16 sps:$4 sm:$0xff]  }
 0x65d   : > { %5657 = vmatprep.subr.bf16.mxu1 %v12065_v30  ;;  %5795 = vmatprep.subr.bf16.mxu0 %v17033_v27  ;;  %v5023_v9 = vpack.c.bf16 %v4995_v19, %v4991_v52  ;;  %v17054_v41 = vmax.f32 %v15022_v50, 0.0  ;;  %v5008_v25 = vmax.f32 %v17055_v38, %v11510_v10  ;;  %v4950_v16 = vsel %vm4932_vm8, %v11476_v24, %v11511_v43  ;;  %v12104_v52 = vld [vmem:[%s16786_s5 + $0x2c4] ss:$16 sps:$4 sm:$0xff]   ;;  %v12120_v38 = vld [vmem:[%s16786_s5 + $0x320] ss:$16 sps:$4 sm:$0xff]  }
 0x65e   : > { %v5028_v7 = vpack.c.bf16 %v5004_v40, %v5000_v35  ;;  %v4999_v55 = vmax.f32 %v17052_v39, %v4941_v61  ;;  %v5003_v56 = vmax.f32 %v17053_v14, %v4944_v62  ;;  %v4947_v28 = vsel %vm4932_vm8, %v11471_v49, %v11510_v10  ;;  %v12102_v35 = vld [vmem:[%s16786_s5 + $0x2c0] ss:$16 sps:$4 sm:$0xff]   ;;  %v12116_v61 = vld [vmem:[%s16786_s5 + $0x304] ss:$16 sps:$4 sm:$0xff]  }
 0x65f   : > { %5658 = vmatpush1.bf16.msra.mxu1 %v12063_v3  ;;  %5796 = vmatpush1.bf16.msra.mxu0 %v12066_v20  ;;  %v5012_v34 = vmax.f32 %v17054_v41, %v11511_v43  ;;  %v11516_v20 = vunpack.i.h.bf16 %v11514_v4  ;;  %v11515_v5 = vunpack.i.l.bf16 %v11514_v4  ;;  %v5007_v50 = vmax.f32 %v17056_v33, %v4947_v28  ;;  %v12108_v62 = vld [vmem:[%s16786_s5 + $0x2e0] ss:$16 sps:$4 sm:$0xff]   ;;  %v12122_v41 = vld [vmem:[%s16786_s5 + $0x324] ss:$16 sps:$4 sm:$0xff]  }
 0x660   : > { %5659 = vmatprep.subr.bf16.mxu1 %v12069_v60  ;;  %5797 = vmatprep.subr.bf16.mxu0 %v17033_v27  ;;  %v5027_v30 = vpack.c.bf16 %v5003_v56, %v4999_v55  ;;  %v5011_v24 = vmax.f32 %v17057_v23, %v4950_v16  ;;  %v17058_v60 = vmax.f32 %v15038_v2, 0.0  ;;  %v17059_v49 = vmax.f32 %v15047_v44, 0.0  ;;  %v12114_v14 = vld [vmem:[%s16786_s5 + $0x300] ss:$16 sps:$4 sm:$0xff]  }
 0x661   : > { %v5032_v3 = vpack.c.bf16 %v5012_v34, %v5008_v25  ;;  %v17061_v44 = vmax.f32 %v14996_v45, 0.0  ;;  %v12084_v45 = vld [vmem:[%s16786_s5 + $0x260] ss:$16 sps:$4 sm:$0xff]   ;;  %v12128_v25 = vld [vmem:[%s16786_s5 + $0x344] ss:$16 sps:$4 sm:$0xff]  }
 0x662   : > { %v5020_v15 = vmax.f32 %v17058_v60, %v11516_v20  ;;  %v5016_v1 = vmax.f32 %v17059_v49, %v11515_v5  ;;  %v12126_v16 = vld [vmem:[%s16786_s5 + $0x340] ss:$16 sps:$4 sm:$0xff]  }
 0x663   : > { %5660 = vmatpush1.bf16.msra.mxu1 %v12067_v6  ;;  %5798 = vmatpush1.bf16.msra.mxu0 %v12070_v47  ;;  %v5031_v6 = vpack.c.bf16 %v5011_v24, %v5007_v50  ;;  %v4956_v47 = vsel %vm4932_vm8, %v11491_v37, %v11516_v20  ;;  %v12092_v37 = vld [vmem:[%s16786_s5 + $0x284] ss:$16 sps:$4 sm:$0xff]  }
 0x664   : > { %5661 = vmatprep.subr.bf16.mxu1 %v12073_v21  ;;  %5799 = vmatprep.subr.bf16.mxu0 %v17033_v27  ;;  %v4953_v21 = vsel %vm4932_vm8, %v11486_v0, %v11515_v5  ;;  %v5036_v26 = vpack.c.bf16 %v5020_v15, %v5016_v1  ;;  %v5019_v32 = vmax.f32 %v17061_v44, %v4956_v47  ;;  %v12080_v0 = vld [vmem:[%s16786_s5 + $0x244] ss:$16 sps:$4 sm:$0xff]  }
 0x665   : > { %v5015_v2 = vmax.f32 %v17060_v8, %v4953_v21 }
 0x667   : > { %5662 = vmatpush1.bf16.msra.mxu1 %v12071_v53  ;;  %5800 = vmatpush1.bf16.msra.mxu0 %v12074_v13  ;;  %v5035_v57 = vpack.c.bf16 %v5019_v32, %v5015_v2 }
 0x668   : > { %6774 = vmatprep.subr.bf16.mxu0 %v12080_v0 }
 0x66a   : > { %5676 = vmatmul.mubr.bf16.vlgmr.msra.gmra.mrb[72].mxu1 %v5023_v9  ;;  %5814 = vmatmul.mubr.bf16.vlgmr.msra.gmra.mrb[120].mxu0 %v5023_v9  ;;  %v12110_v9 = vld [vmem:[%s16786_s5 + $0x2e4] ss:$16 sps:$4 sm:$0xff]  }
 0x66b   : > { %10276 = vmatprep.mubr.msk.bf16.mxu1 %vm5557_vm9, %v5028_v7  ;;  %10280 = vmatprep.mubr.msk.bf16.mxu0 %vm5557_vm9, %v5028_v7 }
 0x66c   : > { %6775 = vmatpush1.bf16.msra.mxu0 %v12078_v17 }
 0x66d   : > { %6776 = vmatprep.subr.bf16.mxu0 %v12086_v58 }
 0x670   : > { %6777 = vmatpush1.bf16.msra.mxu0 %v12084_v45 }
 0x671   : > { %6778 = vmatprep.subr.bf16.mxu0 %v12092_v37 }
 0x672   : > { %5686 = vmatmul.mubr.bf16.gmra.mrb[76].mxu1 %v5027_v30  ;;  %5822 = vmatmul.mubr.bf16.gmra.mrb[124].mxu0 %v5027_v30 }
 0x673   : > { %10277 = vmatprep.mubr.msk.bf16.mxu1 %vm5557_vm9, %v5032_v3  ;;  %10281 = vmatprep.mubr.msk.bf16.mxu0 %vm5557_vm9, %v5032_v3 }
 0x674   : > { %6779 = vmatpush1.bf16.msra.mxu0 %v12090_v18 }
 0x675   : > { %6780 = vmatprep.subr.bf16.mxu0 %v12098_v42 }
 0x678   : > { %6781 = vmatpush1.bf16.msra.mxu0 %v12096_v36 }
 0x679   : > { %6782 = vmatprep.subr.bf16.mxu0 %v12104_v52 }
 0x67a   : > { %5696 = vmatmul.mubr.bf16.gmra.mrb[80].mxu1 %v5031_v6  ;;  %5830 = vmatmul.mubr.bf16.gmra.mrb[128].mxu0 %v5031_v6 }
 0x67b   : > { %10278 = vmatprep.mubr.msk.bf16.mxu1 %vm5557_vm9, %v5036_v26  ;;  %10282 = vmatprep.mubr.msk.bf16.mxu0 %vm5557_vm9, %v5036_v26 }
 0x67c   : > { %6783 = vmatpush1.bf16.msra.mxu0 %v12102_v35 }
 0x67d   : > { %6784 = vmatprep.subr.bf16.mxu0 %v12110_v9 }
 0x680   : > { %6785 = vmatpush1.bf16.msra.mxu0 %v12108_v62 }
 0x681   : > { %6786 = vmatprep.subr.bf16.mxu0 %v12116_v61 }
 0x682   : > { %5706 = vmatmul.mubr.bf16.gmra.mrb[84].mxu1 %v5035_v57  ;;  %5838 = vmatmul.mubr.bf16.gmra.mrb[132].mxu0 %v5035_v57 }
 0x683   : > { %6047 = vmatprep.mubr.bf16.mxu1 %v17033_v27 }
 0x684   : > { %6787 = vmatpush1.bf16.msra.mxu0 %v12114_v14 }
 0x685   : > { %6788 = vmatprep.subr.bf16.mxu0 %v12122_v41 }
 0x688   : > { %6789 = vmatpush1.bf16.msra.mxu0 %v12120_v38 }
 0x689   : > { %6790 = vmatprep.subr.bf16.mxu0 %v12128_v25 }
 0x68c   : > { %6791 = vmatpush1.bf16.msra.mxu0 %v12126_v16 }
 0x715   : > { %v10837_v59 = vpop.f32.mrb[104].mxu0 }
 0x716   : > { %v10838_v48 = vpop.f32.mrb[105].mxu0 }
 0x717   : > { %v10839_v29 = vadd.f32 %v10838_v48, %v10837_v59  ;;  %v10840_v12 = vpop.f32.mrb[106].mxu0 }
 0x718   : > { %v10841_v53 = vpop.f32.mrb[107].mxu0 }
 0x719   : > { %v10842_v19 = vadd.f32 %v10841_v53, %v10840_v12 }
 0x71d   : > { %v10843_v13 = vpop.f32.mrb[108].mxu0 }
 0x71e   : > { %v10844_v46 = vpop.f32.mrb[109].mxu0 }
 0x71f   : > { %v10845_v40 = vadd.f32 %v10844_v46, %v10843_v13  ;;  %v10846_v11 = vpop.f32.mrb[110].mxu0 }
 0x720   : > { %v10847_v63 = vpop.f32.mrb[111].mxu0 }
 0x721   : > { %v15359_v43 = vadd.f32 %v10847_v63, %v10846_v11 }
 0x725   : > { %v10849_v7 = vpop.f32.mrb[112].mxu0 }
 0x726   : > { %v10850_v10 = vpop.f32.mrb[113].mxu0 }
 0x727   : > { %v15367_v39 = vadd.f32 %v10850_v10, %v10849_v7  ;;  %v10852_v55 = vpop.f32.mrb[114].mxu0 }
 0x728   : > { %v10853_v56 = vpop.f32.mrb[115].mxu0 }
 0x729   : > { %v15375_v34 = vadd.f32 %v10853_v56, %v10852_v55 }
 0x72d   : > { %v10855_v4 = vpop.f32.mrb[116].mxu0 }
 0x72e   : > { %v10856_v30 = vpop.f32.mrb[117].mxu0 }
 0x72f   : > { %v15386_v28 = vadd.f32 %v10856_v30, %v10855_v4  ;;  %v10858_v3 = vpop.f32.mrb[118].mxu0 }
 0x730   : > { %v10859_v20 = vpop.f32.mrb[119].mxu0 }
 0x731   : > { %v15388_v5 = vadd.f32 %v10859_v20, %v10858_v3 }
 0x73d   : > { %v5677_v33 = vpop.f32.mrb[72].mxu1  ;;  %v5815_v50 = vpop.f32.mrb[120].mxu0 }
 0x73e   : > { %v5679_v23 = vpop.f32.mrb[73].mxu1  ;;  %v5816_v24 = vadd.f32 %v10839_v29, %v5815_v50  ;;  %v5817_v60 = vpop.f32.mrb[121].mxu0  ;;  %v5870_v49 = vrot.slane %v5677_v33, 1 }
 0x73f   : > { %v5681_v15 = vpop.f32.mrb[74].mxu1  ;;  %v5818_v6 = vpop.f32.mrb[122].mxu0  ;;  %v5873_v21 = vrot.slane %v5679_v23, 1 }
 0x740   : > { %v5871_v1 = vrot.slane %v5681_v15, 1  ;;  %v5683_v47 = vpop.f32.mrb[75].mxu1  ;;  %v5819_v26 = vadd.f32 %v10842_v19, %v5818_v6  ;;  %v5820_v2 = vpop.f32.mrb[123].mxu0  ;;  %v5876_v32 = vrot.slane %v5816_v24, 1 }
 0x741   : > { %v5874_v8 = vrot.slane %v5683_v47, 1 }
 0x742   : > { %v5872_v44 = vsel %vm675_vm0, %v5870_v49, %v5871_v1  ;;  %v5877_v17 = vrot.slane %v5819_v26, 1 }
 0x743   : > { %v5939_v57 = vmax.f32 %v5677_v33, %v5872_v44  ;;  %v5875_v0 = vsel %vm675_vm0, %v5873_v21, %v5874_v8 }
 0x744   : > { %v5940_v58 = vmax.f32 %v5679_v23, %v5875_v0  ;;  %v5878_v45 = vsel %vm675_vm0, %v5876_v32, %v5877_v17 }
 0x745   : > { %v5687_v37 = vpop.f32.mrb[76].mxu1  ;;  %v5941_v59 = vmax.f32 %v5816_v24, %v5878_v45  ;;  %v5823_v29 = vpop.f32.mrb[124].mxu0 }
 0x746   : > { %v5879_v48 = vrot.slane %v5687_v37, 1  ;;  %v5689_v12 = vpop.f32.mrb[77].mxu1  ;;  %v15393_v18 = vadd.f32 %v10845_v40, %v5823_v29  ;;  %v5825_v42 = vpop.f32.mrb[125].mxu0  ;;  %v17062_v29 = vmov 65535  }
 0x747   : > { %v5881_v53 = vrot.slane %v5689_v12, 1  ;;  %v5691_v19 = vpop.f32.mrb[78].mxu1  ;;  %v5826_v13 = vpop.f32.mrb[126].mxu0 }
 0x748   : > { %v5880_v36 = vsel %vm675_vm0, %v5871_v1, %v5879_v48  ;;  %v5885_v52 = vrot.slane %v5691_v19, 1  ;;  %v5693_v46 = vpop.f32.mrb[79].mxu1  ;;  %v5883_v35 = vrot.slane %v15393_v18, 1  ;;  %v5827_v9 = vadd.f32 %v15359_v43, %v5826_v13  ;;  %v5828_v62 = vpop.f32.mrb[127].mxu0 }
 0x749   : > { %v5942_v11 = vmax.f32 %v5681_v15, %v5880_v36  ;;  %v5882_v63 = vsel %vm675_vm0, %v5874_v8, %v5881_v53  ;;  %v5887_v40 = vrot.slane %v5693_v46, 1 }
 0x74a   : > { %v5886_v61 = vsel %vm675_vm0, %v5879_v48, %v5885_v52  ;;  %v5943_v7 = vmax.f32 %v5683_v47, %v5882_v63  ;;  %v5884_v10 = vsel %vm675_vm0, %v5877_v17, %v5883_v35  ;;  %v5889_v14 = vrot.slane %v5827_v9, 1 }
 0x74b   : > { %v5945_v55 = vmax.f32 %v5687_v37, %v5886_v61  ;;  %v5963_v56 = vpack.c.bf16 %v5942_v11, %v5939_v57  ;;  %v5944_v41 = vmax.f32 %v5819_v26, %v5884_v10  ;;  %v5888_v38 = vsel %vm675_vm0, %v5881_v53, %v5887_v40 }
 0x74c   : > { %v5964_v25 = vpack.c.bf16 %v5943_v7, %v5940_v58  ;;  %v5890_v4 = vsel %vm675_vm0, %v5883_v35, %v5889_v14  ;;  %v5946_v30 = vmax.f32 %v5689_v12, %v5888_v38  ;;  %v6004_v12 = vsel %vm6003_vm10, 4294967295, %v17062_v29  ;;  %v12107_v29 = vld [vmem:[%s16786_s5 + $0x2cc] ss:$16 sps:$4 sm:$0xff]  }
 0x74d   : > { %v15403_v16 = vpop.f32.mrb[80].mxu1  ;;  %v5947_v43 = vmax.f32 %v15393_v18, %v5890_v4  ;;  %v5831_v20 = vpop.f32.mrb[128].mxu0  ;;  %v15409_v50 = vpack.c.bf16 %v5944_v41, %v5941_v59  ;;  %v6005_v61 = vsel %vm675_vm0, %v6004_v12, 0  ;;  %v12105_v12 = vld [vmem:[%s16786_s5 + $0x2c8] ss:$16 sps:$4 sm:$0xff]  }
 0x74e   : > { %v5891_v3 = vrot.slane %v15403_v16, 1  ;;  %v15407_v33 = vpop.f32.mrb[81].mxu1  ;;  %6015 = vmatprep.subr.bf16.mxu1 %v5964_v25  ;;  %v15412_v23 = vadd.f32 %v15367_v39, %v5831_v20  ;;  %v5833_v60 = vpop.f32.mrb[129].mxu0 }
 0x74f   : > { %v5893_v24 = vrot.slane %v15407_v33, 1  ;;  %v5701_v15 = vpop.f32.mrb[82].mxu1  ;;  %6016 = vmatpush1.bf16.msra.mxu1 %v5963_v56  ;;  %v5834_v6 = vpop.f32.mrb[130].mxu0 }
 0x750   : > { %v5892_v49 = vsel %vm675_vm0, %v5885_v52, %v5891_v3  ;;  %v5897_v1 = vrot.slane %v5701_v15, 1  ;;  %v5703_v47 = vpop.f32.mrb[83].mxu1  ;;  %v5895_v26 = vrot.slane %v15412_v23, 1  ;;  %v5835_v2 = vadd.f32 %v15375_v34, %v5834_v6  ;;  %v5836_v44 = vpop.f32.mrb[131].mxu0 }
 0x751   : > { %v5948_v21 = vmax.f32 %v5691_v19, %v5892_v49  ;;  %v5894_v8 = vsel %vm675_vm0, %v5887_v40, %v5893_v24  ;;  %v5899_v32 = vrot.slane %v5703_v47, 1 }
 0x752   : > { %v5898_v39 = vsel %vm675_vm0, %v5891_v3, %v5897_v1  ;;  %v5949_v57 = vmax.f32 %v5693_v46, %v5894_v8  ;;  %v5896_v17 = vsel %vm675_vm0, %v5889_v14, %v5895_v26  ;;  %v5901_v58 = vrot.slane %v5835_v2, 1 }
 0x753   : > { %v5951_v0 = vmax.f32 %v15403_v16, %v5898_v39  ;;  %v5966_v45 = vpack.c.bf16 %v5948_v21, %v5945_v55  ;;  %v5950_v37 = vmax.f32 %v5827_v9, %v5896_v17  ;;  %v5900_v59 = vsel %vm675_vm0, %v5893_v24, %v5899_v32  ;;  %v12081_v17 = vld [vmem:[%s16786_s5 + $0x248] ss:$16 sps:$4 sm:$0xff]  }
 0x754   : > { %v5967_v48 = vpack.c.bf16 %v5949_v57, %v5946_v30  ;;  %v5902_v34 = vsel %vm675_vm0, %v5895_v26, %v5901_v58  ;;  %v5952_v53 = vmax.f32 %v15407_v33, %v5900_v59  ;;  %v12587_v39 = vmov 0.0   ;;  %v12077_v57 = vld [vmem:[%s16792_s11 + $0x10] ss:$0 sps:$4 sm:$0x33]   ;;  %v12101_v59 = vld [vmem:[%s16786_s5 + $0x2ac] ss:$16 sps:$4 sm:$0xff]  }
 0x755   : > { %v5707_v18 = vpop.f32.mrb[84].mxu1  ;;  %v5953_v42 = vmax.f32 %v15412_v23, %v5902_v34  ;;  %v5839_v36 = vpop.f32.mrb[132].mxu0  ;;  %v5968_v13 = vpack.c.bf16 %v5950_v37, %v5947_v43  ;;  %v12093_v37 = vld [vmem:[%s16786_s5 + $0x288] ss:$16 sps:$4 sm:$0xff]   ;;  %v12113_v34 = vld [vmem:[%s16786_s5 + $0x2ec] ss:$16 sps:$4 sm:$0xff]  }
 0x756   : > { %v5903_v19 = vrot.slane %v5707_v18, 1  ;;  %v5709_v52 = vpop.f32.mrb[85].mxu1  ;;  %6017 = vmatprep.subr.bf16.mxu1 %v5967_v48  ;;  %v5840_v46 = vadd.f32 %v15386_v28, %v5839_v36  ;;  %v5841_v35 = vpop.f32.mrb[133].mxu0  ;;  %v12099_v48 = vld [vmem:[%s16786_s5 + $0x2a8] ss:$16 sps:$4 sm:$0xff]  }
 0x757   : > { %v5905_v11 = vrot.slane %v5709_v52, 1  ;;  %v5711_v63 = vpop.f32.mrb[86].mxu1  ;;  %6018 = vmatpush1.bf16.msra.mxu1 %v5966_v45  ;;  %v5842_v40 = vpop.f32.mrb[134].mxu0  ;;  %v12095_v45 = vld [vmem:[%s16786_s5 + $0x28c] ss:$16 sps:$4 sm:$0xff]  }
 0x758   : > { %v5904_v9 = vsel %vm675_vm0, %v5897_v1, %v5903_v19  ;;  %v5909_v62 = vrot.slane %v5711_v63, 1  ;;  %v5713_v7 = vpop.f32.mrb[87].mxu1  ;;  %v5907_v55 = vrot.slane %v5840_v46, 1  ;;  %v5843_v56 = vadd.f32 %v15388_v5, %v5842_v40  ;;  %v5844_v41 = vpop.f32.mrb[135].mxu0  ;;  %v12123_v36 = vld [vmem:[%s16786_s5 + $0x328] ss:$16 sps:$4 sm:$0xff]  }
 0x759   : > { %v5954_v10 = vmax.f32 %v5701_v15, %v5904_v9  ;;  %v5906_v14 = vsel %vm675_vm0, %v5899_v32, %v5905_v11  ;;  %v5911_v25 = vrot.slane %v5713_v7, 1  ;;  %v12076_v32 = vld [vmem:[%s16792_s11 + $0x8] sm:$0xff]   ;;  %v12132_v35 = vld [vmem:[%s16786_s5 + $0x360] ss:$16 sps:$4 sm:$0xff]   ;;  %v12140_v9 = vld [vmem:[%s16786_s5 + $0x384] ss:$16 sps:$4 sm:$0xff]  }
 0x75a   : > { %v5910_v28 = vsel %vm675_vm0, %v5903_v19, %v5909_v62  ;;  %v5960_v38 = vmax.f32 %v5711_v63, %v5909_v62  ;;  %v5955_v4 = vmax.f32 %v5703_v47, %v5906_v14  ;;  %v5908_v16 = vsel %vm675_vm0, %v5901_v58, %v5907_v55  ;;  %v12087_v58 = vld [vmem:[%s16786_s5 + $0x268] ss:$16 sps:$4 sm:$0xff]   ;;  %v12125_v19 = vld [vmem:[%s16786_s5 + $0x32c] ss:$16 sps:$4 sm:$0xff]  }
 0x75b   : > { %v5957_v30 = vmax.f32 %v5707_v18, %v5910_v28  ;;  %v5913_v43 = vrot.slane %v5843_v56, 1  ;;  %v5969_v3 = vpack.c.bf16 %v5954_v10, %v5951_v0  ;;  %v5956_v20 = vmax.f32 %v5835_v2, %v5908_v16  ;;  %v12075_v2 = vld [vmem:[%s16792_s11] sm:$0xff]   ;;  %v12089_v0 = vld [vmem:[%s16786_s5 + $0x26c] ss:$16 sps:$4 sm:$0xff]   ;;  %v12111_v18 = vld [vmem:[%s16786_s5 + $0x2e8] ss:$16 sps:$4 sm:$0xff]  }
 0x75c   : > { %v5912_v33 = vsel %vm675_vm0, %v5905_v11, %v5911_v25  ;;  %v5961_v23 = vmax.f32 %v5713_v7, %v5911_v25  ;;  %v5970_v24 = vpack.c.bf16 %v5955_v4, %v5952_v53  ;;  %v12119_v53 = vld [vmem:[%s16786_s5 + $0x30c] ss:$16 sps:$4 sm:$0xff]   ;;  %v12135_v63 = vld [vmem:[%s16786_s5 + $0x368] ss:$16 sps:$4 sm:$0xff]   ;;  %v12146_v7 = vld [vmem:[%s16786_s5 + $0x3a4] ss:$16 sps:$4 sm:$0xff]  }
 0x75d   : > { %v5972_v60 = vpack.c.bf16 %v5960_v38, %v5957_v30  ;;  %v5914_v15 = vsel %vm675_vm0, %v5907_v55, %v5913_v43  ;;  %v5962_v5 = vmax.f32 %v5843_v56, %v5913_v43  ;;  %v5958_v49 = vmax.f32 %v5709_v52, %v5912_v33  ;;  %v12131_v52 = vld [vmem:[%s16786_s5 + $0x34c] ss:$16 sps:$4 sm:$0xff]   ;;  %v12141_v40 = vld [vmem:[%s16786_s5 + $0x388] ss:$16 sps:$4 sm:$0xff]   ;;  %v12144_v55 = vld [vmem:[%s16786_s5 + $0x3a0] ss:$16 sps:$4 sm:$0xff]  }
 0x75e   : > { %v5959_v1 = vmax.f32 %v5840_v46, %v5914_v15  ;;  %6019 = vmatprep.subr.bf16.mxu1 %v5970_v24  ;;  %v5971_v6 = vpack.c.bf16 %v5956_v20, %v5953_v42  ;;  %v12117_v42 = vld [vmem:[%s16786_s5 + $0x308] ss:$16 sps:$4 sm:$0xff]   ;;  %v12134_v46 = vld [vmem:[%s16786_s5 + $0x364] ss:$16 sps:$4 sm:$0xff]   ;;  %v12137_v11 = vld [vmem:[%s16786_s5 + $0x36c] ss:$16 sps:$4 sm:$0xff]  }
 0x75f   : > { %v6007_v21 = vand.u32 %v6005_v61, %v5972_v60  ;;  %v5973_v47 = vpack.c.bf16 %v5961_v23, %v5958_v49  ;;  %6020 = vmatpush1.bf16.msra.mxu1 %v5969_v3  ;;  %6792 = vmatprep.subr.bf16.mxu0 %v12134_v46  ;;  %v12143_v62 = vld [vmem:[%s16786_s5 + $0x38c] ss:$16 sps:$4 sm:$0xff]   ;;  %v12147_v14 = vld [vmem:[%s16786_s5 + $0x3a8] ss:$16 sps:$4 sm:$0xff]   ;;  %v12152_v56 = vld [vmem:[%s16786_s5 + $0x3c4] ss:$16 sps:$4 sm:$0xff]  }
 0x760   : > { %v5974_v26 = vpack.c.bf16 %v5962_v5, %v5959_v1  ;;  %6793 = vmatpush1.bf16.msra.mxu0 %v12132_v35  ;;  %v12149_v10 = vld [vmem:[%s16786_s5 + $0x3ac] ss:$16 sps:$4 sm:$0xff]   ;;  %v12150_v28 = vld [vmem:[%s16786_s5 + $0x3c0] ss:$16 sps:$4 sm:$0xff]   ;;  %v12153_v38 = vld [vmem:[%s16786_s5 + $0x3c8] ss:$16 sps:$4 sm:$0xff]  }
 0x761   : > { %v6010_v8 = vand.u32 %v6005_v61, %v5973_v47  ;;  %6794 = vmatprep.subr.bf16.mxu0 %v12140_v9  ;;  %v12155_v41 = vld [vmem:[%s16786_s5 + $0x3cc] ss:$16 sps:$4 sm:$0xff]   ;;  %v12158_v25 = vld [vmem:[%s16786_s5 + $0x3e4] ss:$16 sps:$4 sm:$0xff]   ;;  %v12156_v16 = vld [vmem:[%s16786_s5 + $0x3e0] ss:$16 sps:$4 sm:$0xff]  }
 0x762   : > { %v6013_v44 = vand.u32 %v6005_v61, %v5974_v26  ;;  %v12138_v61 = vld [vmem:[%s16786_s5 + $0x380] ss:$16 sps:$4 sm:$0xff]   ;;  %v12161_v4 = vld [vmem:[%s16786_s5 + $0x3ec] ss:$16 sps:$4 sm:$0xff]   ;;  %v12159_v30 = vld [vmem:[%s16786_s5 + $0x3e8] ss:$16 sps:$4 sm:$0xff]  }
 0x763   : > { %6021 = vmatprep.subr.bf16.mxu1 %v6010_v8  ;;  %v12164_v43 = vld [vmem:[%s16786_s5 + $0x404] ss:$16 sps:$4 sm:$0xff]   ;;  %v12167_v3 = vld [vmem:[%s16786_s5 + $0x40c] ss:$16 sps:$4 sm:$0xff]   ;;  %v12162_v20 = vld [vmem:[%s16786_s5 + $0x400] ss:$16 sps:$4 sm:$0xff]  }
 0x764   : > { %6022 = vmatpush1.bf16.msra.mxu1 %v6007_v21  ;;  %6795 = vmatpush1.bf16.msra.mxu0 %v12138_v61  ;;  %v12165_v33 = vld [vmem:[%s16786_s5 + $0x408] ss:$16 sps:$4 sm:$0xff]   ;;  %v12170_v23 = vld [vmem:[%s16786_s5 + $0x424] ss:$16 sps:$4 sm:$0xff]   ;;  %v12173_v24 = vld [vmem:[%s16786_s5 + $0x42c] ss:$16 sps:$4 sm:$0xff]  }
 0x765   : > { %10877 = vmatprep.subr.bf16.mxu1 %v12587_v39  ;;  %6796 = vmatprep.subr.bf16.mxu0 %v12146_v7  ;;  %v12168_v60 = vld [vmem:[%s16786_s5 + $0x420] ss:$16 sps:$4 sm:$0xff]   ;;  %v12171_v15 = vld [vmem:[%s16786_s5 + $0x428] ss:$16 sps:$4 sm:$0xff]   ;;  %v12176_v5 = vld [vmem:[%s16786_s5 + $0x444] ss:$16 sps:$4 sm:$0xff]  }
 0x766   : > { %v12179_v49 = vld [vmem:[%s16786_s5 + $0x44c] ss:$16 sps:$4 sm:$0xff]   ;;  %v12174_v35 = vld [vmem:[%s16786_s5 + $0x440] ss:$16 sps:$4 sm:$0xff]   ;;  %v12182_v61 = vld [vmem:[%s16786_s5 + $0x464] ss:$16 sps:$4 sm:$0xff]  }
 0x767   : > { %10286 = vmatmul.mubr.msk.bf16.vlgmr.msra.gmra.mrb[88].mxu1 %vm5993_vm11, %v12075_v2 }
 0x768   : > { %10878 = vmatpush3.bf16.msra.mxu1 %v15409_v50  ;;  %6057 = vmatprep.mubr.bf16.mxu1 %v17033_v27  ;;  %v12083_v50 = vld [vmem:[%s16786_s5 + $0x24c] ss:$16 sps:$4 sm:$0xff]  }
 0x769   : > { %10879 = vmatprep.subr.bf16.mxu1 %v12587_v39  ;;  %6797 = vmatpush1.bf16.msra.mxu0 %v12144_v55  ;;  %v12180_v55 = vld [vmem:[%s16786_s5 + $0x460] ss:$16 sps:$4 sm:$0xff]  }
 0x76a   : > { %6798 = vmatprep.subr.bf16.mxu0 %v12152_v56  ;;  %v12188_v56 = vld [vmem:[%s16786_s5 + $0x4] ss:$16 sps:$4 sm:$0xff]  }
 0x76c   : > { %10880 = vmatpush3.bf16.msra.mxu1 %v5968_v13  ;;  %v12129_v13 = vld [vmem:[%s16786_s5 + $0x348] ss:$16 sps:$4 sm:$0xff]  }
 0x76d   : > { %10881 = vmatprep.subr.bf16.mxu1 %v12587_v39  ;;  %6799 = vmatpush1.bf16.msra.mxu0 %v12150_v28 }
 0x76e   : > { %6800 = vmatprep.subr.bf16.mxu0 %v12158_v25 }
 0x76f   : > { %10287 = vmatmul.mubr.msk.bf16.gmra.mrb[92].mxu1 %vm5993_vm11, %v12076_v32 }
 0x770   : > { %10882 = vmatpush3.bf16.msra.mxu1 %v5971_v6  ;;  %6067 = vmatprep.mubr.bf16.mxu1 %v17033_v27 }
 0x771   : > { %10883 = vmatprep.subr.bf16.mxu1 %v12587_v39  ;;  %6801 = vmatpush1.bf16.msra.mxu0 %v12156_v16 }
 0x772   : > { %6802 = vmatprep.subr.bf16.mxu0 %v12164_v43 }
 0x774   : > { %10884 = vmatpush3.bf16.msra.mxu1 %v6013_v44 }
 0x775   : > { %6896 = vmatprep.subr.bf16.mxu1 %v12083_v50  ;;  %6803 = vmatpush1.bf16.msra.mxu0 %v12162_v20 }
 0x776   : > { %6804 = vmatprep.subr.bf16.mxu0 %v12170_v23 }
 0x777   : > { %10288 = vmatmul.mubr.msk.bf16.gmra.mrb[96].mxu1 %vm5993_vm11, %v12077_v57 }
 0x778   : > { %10885 = vmatprep.mubr.msk.bf16.mxu1 %vm12588_vm12, %v12587_v39 }
 0x779   : > { %6805 = vmatpush1.bf16.msra.mxu0 %v12168_v60 }
 0x77a   : > { %6835 = vmatprep.subr.bf16.mxu0 %v12176_v5 }
 0x77f   : > { %10886 = vmatmul.mubr.msk.bf16.vlgmr.msra.gmra.mrb[100].mxu1 %vm5993_vm11, %v12075_v2 }
 0x780   : > { %10889 = vmatprep.mubr.msk.bf16.mxu1 %vm12588_vm12, %v12587_v39  ;;  %6897 = vmatpush1.bf16.msra.mxu1 %v12081_v17 }
 0x781   : > { %6898 = vmatprep.subr.bf16.mxu1 %v12089_v0 }
 0x784   : > { %6899 = vmatpush1.bf16.msra.mxu1 %v12087_v58 }
 0x785   : > { %6900 = vmatprep.subr.bf16.mxu1 %v12095_v45 }
 0x787   : > { %10890 = vmatmul.mubr.msk.bf16.gmra.mrb[104].mxu1 %vm5993_vm11, %v12076_v32 }
 0x788   : > { %10893 = vmatprep.mubr.msk.bf16.mxu1 %vm12588_vm12, %v12587_v39  ;;  %6901 = vmatpush1.bf16.msra.mxu1 %v12093_v37 }
 0x789   : > { %6902 = vmatprep.subr.bf16.mxu1 %v12101_v59 }
 0x78c   : > { %6903 = vmatpush1.bf16.msra.mxu1 %v12099_v48 }
 0x78d   : > { %6904 = vmatprep.subr.bf16.mxu1 %v12107_v29 }
 0x78f   : > { %10894 = vmatmul.mubr.msk.bf16.gmra.mrb[108].mxu1 %vm5993_vm11, %v12077_v57 }
 0x790   : > { %6905 = vmatpush1.bf16.msra.mxu1 %v12105_v12 }
 0x791   : > { %6906 = vmatprep.subr.bf16.mxu1 %v12113_v34 }
 0x794   : > { %6907 = vmatpush1.bf16.msra.mxu1 %v12111_v18 }
 0x795   : > { %6908 = vmatprep.subr.bf16.mxu1 %v12119_v53 }
 0x798   : > { %6909 = vmatpush1.bf16.msra.mxu1 %v12117_v42 }
 0x799   : > { %6910 = vmatprep.subr.bf16.mxu1 %v12125_v19 }
 0x79c   : > { %6911 = vmatpush1.bf16.msra.mxu1 %v12123_v36 }
 0x79d   : > { %6912 = vmatprep.subr.bf16.mxu1 %v12131_v52 }
 0x7a0   : > { %6913 = vmatpush1.bf16.msra.mxu1 %v12129_v13 }
 0x7a1   : > { %6914 = vmatprep.subr.bf16.mxu1 %v12137_v11 }
 0x7a4   : > { %6915 = vmatpush1.bf16.msra.mxu1 %v12135_v63  ;;  %v12177_v63 = vld [vmem:[%s16786_s5 + $0x448] ss:$16 sps:$4 sm:$0xff]  }
 0x7a5   : > { %6916 = vmatprep.subr.bf16.mxu1 %v12143_v62 }
 0x7a8   : > { %6917 = vmatpush1.bf16.msra.mxu1 %v12141_v40  ;;  %v12185_v40 = vld [vmem:[%s16786_s5 + $0x46c] ss:$16 sps:$4 sm:$0xff]  }
 0x7a9   : > { %6918 = vmatprep.subr.bf16.mxu1 %v12149_v10 }
 0x7ac   : > { %6919 = vmatpush1.bf16.msra.mxu1 %v12147_v14  ;;  %v12183_v14 = vld [vmem:[%s16786_s5 + $0x468] ss:$16 sps:$4 sm:$0xff]  }
 0x7ad   : > { %6920 = vmatprep.subr.bf16.mxu1 %v12155_v41  ;;  %v12191_v41 = vld [vmem:[%s16786_s5 + $0xc] ss:$16 sps:$4 sm:$0xff]  }
 0x7b0   : > { %6921 = vmatpush1.bf16.msra.mxu1 %v12153_v38 }
 0x7b1   : > { %6922 = vmatprep.subr.bf16.mxu1 %v12161_v4 }
 0x7b4   : > { %6923 = vmatpush1.bf16.msra.mxu1 %v12159_v30 }
 0x7b5   : > { %6924 = vmatprep.subr.bf16.mxu1 %v12167_v3 }
 0x7b8   : > { %6925 = vmatpush1.bf16.msra.mxu1 %v12165_v33 }
 0x7b9   : > { %6926 = vmatprep.subr.bf16.mxu1 %v12173_v24 }
 0x7bc   : > { %6927 = vmatpush1.bf16.msra.mxu1 %v12171_v15 }
 0x7bd   : > { %6957 = vmatprep.subr.bf16.mxu1 %v12179_v49 }
 0x83a   : > { %v6049_v1 = vpop.f32.mrb[88].mxu1 }
 0x83b   : > { %6132 = vst [vmem:[#allocation3] sm:$0xff] %v6049_v1  ;;  %v6051_v6 = vpop.f32.mrb[89].mxu1 }
 0x83c   : > { %6133 = vst [vmem:[#allocation3 + $0x8] sm:$0xff] %v6051_v6  ;;  %v15608_v21 = vpop.f32.mrb[90].mxu1 }
 0x83d   : > { %v15610_v47 = vpop.f32.mrb[91].mxu1  ;;  %v15613_v26 = vpack.c.bf16 %v15608_v21, %v6049_v1 }
 0x83e   : > { %v15616_v8 = vpack.c.bf16 %v15610_v47, %v6051_v6 }
 0x842   : > { %v6059_v44 = vpop.f32.mrb[92].mxu1  ;;  %v6245_v2 = vld [vmem:[#allocation3] sm:$0xfe] }
 0x843   : > { %v6061_v32 = vpop.f32.mrb[93].mxu1  ;;  %v6246_v50 = vld [vmem:[#allocation3 + $0x8] sm:$0xfe]  ;;  %v6251_v57 = vpack.c.bf16 %v15608_v21, %v6245_v2 }
 0x844   : > { %v6063_v17 = vpop.f32.mrb[94].mxu1  ;;  %v6252_v0 = vpack.c.bf16 %v15610_v47, %v6246_v50 }
 0x845   : > { %v6065_v58 = vpop.f32.mrb[95].mxu1  ;;  %v15620_v45 = vpack.c.bf16 %v6063_v17, %v6059_v44  ;;  %v6333_v37 = vshll.u32 %v6251_v57, 16  ;;  %v6331_v29 = vshrl.u32 %v6251_v57, 16 }
 0x846   : > { %v15622_v59 = vpack.c.bf16 %v6065_v58, %v6061_v32  ;;  %v6345_v48 = vshll.u32 %v6252_v0, 16  ;;  %v6343_v18 = vshrl.u32 %v6252_v0, 16 }
 0x847   : > { %v6335_v12 = vrot.slane %v6333_v37, 1  ;;  %v6338_v34 = vshll.u32 %v15620_v45, 16  ;;  %v6366_v24 = vshrl.u32 %v15620_v45, 16 }
 0x848   : > { %v6347_v53 = vrot.slane %v6345_v48, 1  ;;  %v6350_v42 = vshll.u32 %v15622_v59, 16  ;;  %v6374_v33 = vshrl.u32 %v15622_v59, 16 }
 0x849   : > { %v6336_v19 = vor.u32 %v6335_v12, %v6331_v29  ;;  %v6340_v36 = vrot.slane %v6338_v34, 1 }
 0x84a   : > { %v6069_v52 = vpop.f32.mrb[96].mxu1  ;;  %v6348_v13 = vor.u32 %v6347_v53, %v6343_v18  ;;  %v6352_v46 = vrot.slane %v6350_v42, 1 }
 0x84b   : > { %6144 = vst [vmem:[#allocation3 + $0x60] sm:$0xf] %v6069_v52  ;;  %v6071_v11 = vpop.f32.mrb[97].mxu1  ;;  %v6341_v10 = vsel %vm3146_vm7, %v6336_v19, %v6340_v36  ;;  %v6368_v1 = vor.u32 %v6366_v24, %v6340_v36  ;;  %v12204_v24 = vld [vmem:[%s16786_s5 + $0x60] ss:$16 sps:$4 sm:$0xff]  }
 0x84c   : > { %6145 = vst [vmem:[#allocation3 + $0x68] sm:$0xf] %v6071_v11  ;;  %v6073_v9 = vpop.f32.mrb[98].mxu1  ;;  %v6353_v62 = vsel %vm3146_vm7, %v6348_v13, %v6352_v46  ;;  %v6376_v15 = vor.u32 %v6374_v33, %v6352_v46 }
 0x84d   : > { %v6074_v7 = vpop.f32.mrb[99].mxu1  ;;  %6806 = vmatprep.mubr.bf16.mxu0 %v6353_v62  ;;  %6928 = vmatprep.mubr.bf16.mxu1 %v6353_v62 }
 0x84e   : > { %6807 = vmatmul.mubr.bf16.vlgmr.msra.gmra.mrb[136].mxu0 %v6341_v10  ;;  %6929 = vmatmul.mubr.bf16.vlgmr.msra.gmra.mrb[112].mxu1 %v6341_v10 }
 0x84f   : > { %6836 = vmatpush1.bf16.msra.mxu0 %v12174_v35  ;;  %6958 = vmatpush1.bf16.msra.mxu1 %v12177_v63  ;;  %v12186_v35 = vld [vmem:[%s16786_s5] ss:$16 sps:$4 sm:$0xff]   ;;  %v12189_v63 = vld [vmem:[%s16786_s5 + $0x8] ss:$16 sps:$4 sm:$0xff]  }
 0x850   : > { %6837 = vmatprep.subr.bf16.mxu0 %v12182_v61  ;;  %6959 = vmatprep.subr.bf16.mxu1 %v12185_v40  ;;  %v12194_v61 = vld [vmem:[%s16786_s5 + $0x24] ss:$16 sps:$4 sm:$0xff]   ;;  %v12197_v40 = vld [vmem:[%s16786_s5 + $0x2c] ss:$16 sps:$4 sm:$0xff]  }
 0x852   : > { %v6110_v28 = vpop.f32.mrb[100].mxu1  ;;  %v6248_v38 = vld [vmem:[#allocation3 + $0x60] sm:$0x7] }
 0x853   : > { %6134 = vst.msk [vmem:[#allocation3 + $0x10] sm:$0xff] %vm5557_vm9, %v6110_v28  ;;  %v10887_v25 = vpop.f32.mrb[101].mxu1  ;;  %v6249_v4 = vld [vmem:[#allocation3 + $0x68] sm:$0x7]  ;;  %v6254_v16 = vpack.c.bf16 %v6248_v38, %v6248_v38  ;;  %6838 = vmatpush1.bf16.msra.mxu0 %v12180_v55  ;;  %6960 = vmatpush1.bf16.msra.mxu1 %v12183_v14  ;;  %v12192_v14 = vld [vmem:[%s16786_s5 + $0x20] ss:$16 sps:$4 sm:$0xff]  }
 0x854   : > { %v6113_v30 = vpop.f32.mrb[102].mxu1  ;;  %v6255_v43 = vpack.c.bf16 %v6249_v4, %v6249_v4  ;;  %7386 = vmatprep.subr.bf16.mxu0 %v12188_v56  ;;  %7508 = vmatprep.subr.bf16.mxu1 %v12191_v41  ;;  %v12195_v56 = vld [vmem:[%s16786_s5 + $0x28] ss:$16 sps:$4 sm:$0xff]   ;;  %v12200_v28 = vld [vmem:[%s16786_s5 + $0x44] ss:$16 sps:$4 sm:$0xff]  }
 0x855   : > { %6137 = vst.msk [vmem:[#allocation3 + $0x28] sm:$0xff] %vm5557_vm9, %v6113_v30  ;;  %v10888_v3 = vpop.f32.mrb[103].mxu1  ;;  %v6370_v20 = vshll.u32 %v6254_v16, 16  ;;  %v6390_v48 = vshrl.u32 %v6254_v16, 16  ;;  %v12203_v38 = vld [vmem:[%s16786_s5 + $0x4c] ss:$16 sps:$4 sm:$0xff]  }
 0x856   : > { %v6378_v23 = vshll.u32 %v6255_v43, 16  ;;  %v6393_v49 = vshrl.u32 %v6255_v43, 16  ;;  %v12198_v16 = vld [vmem:[%s16786_s5 + $0x40] ss:$16 sps:$4 sm:$0xff]   ;;  %v12201_v30 = vld [vmem:[%s16786_s5 + $0x48] ss:$16 sps:$4 sm:$0xff]  }
 0x857   : > { %v6372_v60 = vrot.slane %v6370_v20, 1  ;;  %v12206_v3 = vld [vmem:[%s16786_s5 + $0x64] ss:$16 sps:$4 sm:$0xff]   ;;  %v12209_v20 = vld [vmem:[%s16786_s5 + $0x6c] ss:$16 sps:$4 sm:$0xff]  }
 0x858   : > { %v6380_v5 = vrot.slane %v6378_v23, 1 }
 0x859   : > { %v6373_v50 = vsel %vm3146_vm7, %v6368_v1, %v6372_v60  ;;  %v6392_v34 = vor.u32 %v6390_v48, %v6372_v60  ;;  %v12207_v60 = vld [vmem:[%s16786_s5 + $0x68] ss:$16 sps:$4 sm:$0xff]   ;;  %v12210_v1 = vld [vmem:[%s16786_s5 + $0x80] ss:$16 sps:$4 sm:$0xff]   ;;  %v12233_v48 = vld [vmem:[%s16786_s5 + $0xec] ss:$16 sps:$4 sm:$0xff]  }
 0x85a   : > { %v6118_v6 = vpop.f32.mrb[104].mxu1  ;;  %v6381_v44 = vsel %vm3146_vm7, %v6376_v15, %v6380_v5  ;;  %v6395_v2 = vor.u32 %v6393_v49, %v6380_v5  ;;  %v6247_v0 = vld [vmem:[#allocation3 + $0x10] sm:$0xfe]  ;;  %v12215_v5 = vld [vmem:[%s16786_s5 + $0x8c] ss:$16 sps:$4 sm:$0xff]  }
 0x85b   : > { %6140 = vst.msk [vmem:[#allocation3 + $0x40] sm:$0xff] %vm5557_vm9, %v6118_v6  ;;  %v10891_v32 = vpop.f32.mrb[105].mxu1  ;;  %6816 = vmatprep.mubr.bf16.mxu0 %v6381_v44  ;;  %6938 = vmatprep.mubr.bf16.mxu1 %v6381_v44  ;;  %v12212_v15 = vld [vmem:[%s16786_s5 + $0x84] ss:$16 sps:$4 sm:$0xff]   ;;  %v12213_v6 = vld [vmem:[%s16786_s5 + $0x88] ss:$16 sps:$4 sm:$0xff]  }
 0x85c   : > { %v6121_v57 = vpop.f32.mrb[106].mxu1  ;;  %6817 = vmatmul.mubr.bf16.gmra.mrb[140].mxu0 %v6373_v50  ;;  %6939 = vmatmul.mubr.bf16.gmra.mrb[116].mxu1 %v6373_v50  ;;  %v15659_v17 = vld [vmem:[#allocation3 + $0x28] sm:$0xff]  ;;  %v12218_v44 = vld [vmem:[%s16786_s5 + $0xa4] ss:$16 sps:$4 sm:$0xff]   ;;  %v12216_v32 = vld [vmem:[%s16786_s5 + $0xa0] ss:$16 sps:$4 sm:$0xff]  }
 0x85d   : > { %6143 = vst.msk [vmem:[#allocation3 + $0x58] sm:$0xff] %vm5557_vm9, %v6121_v57  ;;  %v10892_v58 = vpop.f32.mrb[107].mxu1  ;;  %6826 = vmatprep.mubr.bf16.mxu0 %v6395_v2  ;;  %6948 = vmatprep.mubr.bf16.mxu1 %v6395_v2  ;;  %v6253_v37 = vpack.c.bf16 %v15659_v17, %v6247_v0  ;;  %v12221_v2 = vld [vmem:[%s16786_s5 + $0xac] ss:$16 sps:$4 sm:$0xff]   ;;  %v12219_v50 = vld [vmem:[%s16786_s5 + $0xa8] ss:$16 sps:$4 sm:$0xff]  }
 0x85e   : > { %v12224_v57 = vld [vmem:[%s16786_s5 + $0xc4] ss:$16 sps:$4 sm:$0xff]   ;;  %v12227_v0 = vld [vmem:[%s16786_s5 + $0xcc] ss:$16 sps:$4 sm:$0xff]   ;;  %v12222_v58 = vld [vmem:[%s16786_s5 + $0xc0] ss:$16 sps:$4 sm:$0xff]  }
 0x85f   : > { %v6357_v29 = vshll.u32 %v6253_v37, 16  ;;  %v6355_v46 = vshrl.u32 %v6253_v37, 16  ;;  %v12230_v37 = vld [vmem:[%s16786_s5 + $0xe4] ss:$16 sps:$4 sm:$0xff]  }
 0x861   : > { %v6359_v52 = vrot.slane %v6357_v29, 1  ;;  %v12228_v29 = vld [vmem:[%s16786_s5 + $0xe0] ss:$16 sps:$4 sm:$0xff]  }
 0x862   : > { %v6126_v12 = vpop.f32.mrb[108].mxu1  ;;  %v6157_v53 = vld [vmem:[#allocation3 + $0x40] sm:$0xff] }
 0x863   : > { %6147 = vst.msk [vmem:[#allocation3 + $0x70] sm:$0xf] %vm6146_vm13, %v6126_v12  ;;  %v10895_v18 = vpop.f32.mrb[109].mxu1  ;;  %v6360_v9 = vor.u32 %v6359_v52, %v6355_v46  ;;  %v12231_v12 = vld [vmem:[%s16786_s5 + $0xe8] ss:$16 sps:$4 sm:$0xff]  }
 0x864   : > { %6827 = vmatmul.mubr.bf16.gmra.mrb[144].mxu0 %v6392_v34  ;;  %6949 = vmatmul.mubr.bf16.gmra.mrb[120].mxu1 %v6392_v34  ;;  %v6160_v42 = vld [vmem:[#allocation3 + $0x58] sm:$0xff]  ;;  %v6129_v19 = vpop.f32.mrb[110].mxu1  ;;  %v12236_v34 = vld [vmem:[%s16786_s5 + $0x104] ss:$16 sps:$4 sm:$0xff]  }
 0x865   : > { %6867 = vmatprep.mubr.bf16.mxu0 %v17033_v27  ;;  %6989 = vmatprep.mubr.bf16.mxu1 %v17033_v27  ;;  %v15665_v36 = vpack.c.bf16 %v6160_v42, %v6157_v53  ;;  %v10896_v13 = vpop.f32.mrb[111].mxu1  ;;  %v12239_v18 = vld [vmem:[%s16786_s5 + $0x10c] ss:$16 sps:$4 sm:$0xff]   ;;  %v12234_v53 = vld [vmem:[%s16786_s5 + $0x100] ss:$16 sps:$4 sm:$0xff]  }
 0x866   : > { %v12237_v42 = vld [vmem:[%s16786_s5 + $0x108] ss:$16 sps:$4 sm:$0xff]   ;;  %v12242_v19 = vld [vmem:[%s16786_s5 + $0x124] ss:$16 sps:$4 sm:$0xff]   ;;  %v12245_v52 = vld [vmem:[%s16786_s5 + $0x12c] ss:$16 sps:$4 sm:$0xff]  }
 0x867   : > { %v6362_v11 = vshll.u32 %v15665_v36, 16  ;;  %v6382_v25 = vshrl.u32 %v15665_v36, 16  ;;  %v12240_v13 = vld [vmem:[%s16786_s5 + $0x120] ss:$16 sps:$4 sm:$0xff]   ;;  %v12243_v46 = vld [vmem:[%s16786_s5 + $0x128] ss:$16 sps:$4 sm:$0xff]  }
 0x869   : > { %v6364_v62 = vrot.slane %v6362_v11, 1  ;;  %v12248_v11 = vld [vmem:[%s16786_s5 + $0x144] ss:$16 sps:$4 sm:$0xff]  }
 0x86a   : > { %v6250_v7 = vld [vmem:[#allocation3 + $0x70] sm:$0x7] }
 0x86b   : > { %v6365_v10 = vsel %vm3146_vm7, %v6360_v9, %v6364_v62  ;;  %v6256_v55 = vpack.c.bf16 %v6250_v7, %v6250_v7  ;;  %v6384_v43 = vor.u32 %v6382_v25, %v6364_v62  ;;  %v12249_v9 = vld [vmem:[%s16786_s5 + $0x148] ss:$16 sps:$4 sm:$0xff]   ;;  %v12254_v62 = vld [vmem:[%s16786_s5 + $0x164] ss:$16 sps:$4 sm:$0xff]  }
 0x86c   : > { %10436 = vmatmul.mubr.msk.bf16.vlgmr.msra.gmra.mrb[136].mxu0 %vm5557_vm9, %v6365_v10  ;;  %10439 = vmatmul.mubr.msk.bf16.vlgmr.msra.gmra.mrb[112].mxu1 %vm5557_vm9, %v6365_v10  ;;  %v12255_v7 = vld [vmem:[%s16786_s5 + $0x168] ss:$16 sps:$4 sm:$0xff]   ;;  %v12260_v10 = vld [vmem:[%s16786_s5 + $0x184] ss:$16 sps:$4 sm:$0xff]  }
 0x86d   : > { %7387 = vmatpush1.bf16.msra.mxu0 %v12186_v35  ;;  %7509 = vmatpush1.bf16.msra.mxu1 %v12189_v63  ;;  %v6386_v41 = vshll.u32 %v6256_v55, 16  ;;  %v6396_v23 = vshrl.u32 %v6256_v55, 16  ;;  %v12251_v35 = vld [vmem:[%s16786_s5 + $0x14c] ss:$16 sps:$4 sm:$0xff]   ;;  %v12246_v63 = vld [vmem:[%s16786_s5 + $0x140] ss:$16 sps:$4 sm:$0xff]  }
 0x86e   : > { %7388 = vmatprep.subr.bf16.mxu0 %v12194_v61  ;;  %7510 = vmatprep.subr.bf16.mxu1 %v12197_v40  ;;  %v12257_v61 = vld [vmem:[%s16786_s5 + $0x16c] ss:$16 sps:$4 sm:$0xff]   ;;  %v12252_v40 = vld [vmem:[%s16786_s5 + $0x160] ss:$16 sps:$4 sm:$0xff]   ;;  %v12267_v25 = vld [vmem:[%s16786_s5 + $0x1a8] ss:$16 sps:$4 sm:$0xff]  }
 0x86f   : > { %6877 = vmatprep.mubr.bf16.mxu0 %v17033_v27  ;;  %6999 = vmatprep.mubr.bf16.mxu1 %v17033_v27  ;;  %v6388_v4 = vrot.slane %v6386_v41, 1  ;;  %v12263_v55 = vld [vmem:[%s16786_s5 + $0x18c] ss:$16 sps:$4 sm:$0xff]   ;;  %v12266_v41 = vld [vmem:[%s16786_s5 + $0x1a4] ss:$16 sps:$4 sm:$0xff]  }
 0x871   : > { %7389 = vmatpush1.bf16.msra.mxu0 %v12192_v14  ;;  %7511 = vmatpush1.bf16.msra.mxu1 %v12195_v56  ;;  %v6389_v33 = vsel %vm3146_vm7, %v6384_v43, %v6388_v4  ;;  %v6398_v49 = vor.u32 %v6396_v23, %v6388_v4  ;;  %v12258_v14 = vld [vmem:[%s16786_s5 + $0x180] ss:$16 sps:$4 sm:$0xff]   ;;  %v12261_v56 = vld [vmem:[%s16786_s5 + $0x188] ss:$16 sps:$4 sm:$0xff]   ;;  %v12272_v4 = vld [vmem:[%s16786_s5 + $0x1c4] ss:$16 sps:$4 sm:$0xff]  }
 0x872   : > { %7390 = vmatprep.subr.bf16.mxu0 %v12200_v28  ;;  %7512 = vmatprep.subr.bf16.mxu1 %v12203_v38  ;;  %v12269_v28 = vld [vmem:[%s16786_s5 + $0x1ac] ss:$16 sps:$4 sm:$0xff]   ;;  %v12264_v38 = vld [vmem:[%s16786_s5 + $0x1a0] ss:$16 sps:$4 sm:$0xff]   ;;  %v12273_v43 = vld [vmem:[%s16786_s5 + $0x1c8] ss:$16 sps:$4 sm:$0xff]  }
 0x873   : > { %v12279_v23 = vld [vmem:[%s16786_s5 + $0x1e8] ss:$16 sps:$4 sm:$0xff]  }
 0x874   : > { %10437 = vmatmul.mubr.msk.bf16.gmra.mrb[140].mxu0 %vm5557_vm9, %v6389_v33  ;;  %10440 = vmatmul.mubr.msk.bf16.gmra.mrb[116].mxu1 %vm5557_vm9, %v6389_v33  ;;  %v12276_v33 = vld [vmem:[%s16786_s5 + $0x1e0] ss:$16 sps:$4 sm:$0xff]  }
 0x875   : > { %7391 = vmatpush1.bf16.msra.mxu0 %v12198_v16  ;;  %7513 = vmatpush1.bf16.msra.mxu1 %v12201_v30  ;;  %v12275_v16 = vld [vmem:[%s16786_s5 + $0x1cc] ss:$16 sps:$4 sm:$0xff]   ;;  %v12270_v30 = vld [vmem:[%s16786_s5 + $0x1c0] ss:$16 sps:$4 sm:$0xff]  }
 0x876   : > { %7392 = vmatprep.subr.bf16.mxu0 %v12206_v3  ;;  %7514 = vmatprep.subr.bf16.mxu1 %v12209_v20  ;;  %v12278_v3 = vld [vmem:[%s16786_s5 + $0x1e4] ss:$16 sps:$4 sm:$0xff]   ;;  %v12281_v20 = vld [vmem:[%s16786_s5 + $0x1ec] ss:$16 sps:$4 sm:$0xff]  }
 0x877   : > { %6887 = vmatprep.mubr.bf16.mxu0 %v17033_v27  ;;  %7009 = vmatprep.mubr.bf16.mxu1 %v17033_v27 }
 0x879   : > { %7393 = vmatpush1.bf16.msra.mxu0 %v12204_v24  ;;  %7515 = vmatpush1.bf16.msra.mxu1 %v12207_v60  ;;  %v12284_v24 = vld [vmem:[%s16786_s5 + $0x204] ss:$16 sps:$4 sm:$0xff]   ;;  %v12287_v60 = vld [vmem:[%s16786_s5 + $0x20c] ss:$16 sps:$4 sm:$0xff]  }
 0x87a   : > { %7394 = vmatprep.subr.bf16.mxu0 %v12212_v15  ;;  %7516 = vmatprep.subr.bf16.mxu1 %v12215_v5  ;;  %v12282_v15 = vld [vmem:[%s16786_s5 + $0x200] ss:$16 sps:$4 sm:$0xff]   ;;  %v12285_v5 = vld [vmem:[%s16786_s5 + $0x208] ss:$16 sps:$4 sm:$0xff]  }
 0x87c   : > { %10438 = vmatmul.mubr.msk.bf16.gmra.mrb[148].mxu0 %vm5557_vm9, %v6398_v49  ;;  %10441 = vmatmul.mubr.msk.bf16.gmra.mrb[124].mxu1 %vm5557_vm9, %v6398_v49  ;;  %v12290_v49 = vld [vmem:[%s16786_s5 + $0x224] ss:$16 sps:$4 sm:$0xff]  }
 0x87d   : > { %7395 = vmatpush1.bf16.msra.mxu0 %v12210_v1  ;;  %7517 = vmatpush1.bf16.msra.mxu1 %v12213_v6  ;;  %v12293_v1 = vld [vmem:[%s16786_s5 + $0x22c] ss:$16 sps:$4 sm:$0xff]   ;;  %v12288_v6 = vld [vmem:[%s16786_s5 + $0x220] ss:$16 sps:$4 sm:$0xff]  }
 0x87e   : > { %7418 = vmatprep.mubr.bf16.mxu0 %v15616_v8  ;;  %7540 = vmatprep.mubr.bf16.mxu1 %v15616_v8  ;;  %v12225_v8 = vld [vmem:[%s16786_s5 + $0xc8] ss:$16 sps:$4 sm:$0xff]  }
 0x87f   : > { %7396 = vmatprep.subr.bf16.mxu0 %v12218_v44  ;;  %7518 = vmatprep.subr.bf16.mxu1 %v12221_v2  ;;  %v12291_v44 = vld [vmem:[%s16786_s5 + $0x228] ss:$16 sps:$4 sm:$0xff]   ;;  %v12299_v2 = vld [vmem:[%s16786_s5 + $0x48c] ss:$16 sps:$4 sm:$0xff]  }
 0x881   : > { %7397 = vmatpush1.bf16.msra.mxu0 %v12216_v32  ;;  %7519 = vmatpush1.bf16.msra.mxu1 %v12219_v50  ;;  %v6162_v32 = vld [vmem:[#allocation3 + $0x68] sm:$0x3] }
 0x882   : > { %7398 = vmatprep.subr.bf16.mxu0 %v12224_v57  ;;  %7520 = vmatprep.subr.bf16.mxu1 %v12227_v0  ;;  %v6171_v50 = vpack.c.bf16 %v6162_v32, %v6162_v32  ;;  %v6161_v57 = vld [vmem:[#allocation3 + $0x60] sm:$0x3] }
 0x883   : > { %v6170_v0 = vpack.c.bf16 %v6161_v57, %v6161_v57  ;;  %v12354_v32 = vld [vmem:[%s16786_s5 + $0x5c0] ss:$16 sps:$4 sm:$0xff]   ;;  %v12362_v57 = vld [vmem:[%s16786_s5 + $0x5e4] ss:$16 sps:$4 sm:$0xff]  }
 0x885   : > { %7399 = vmatpush1.bf16.msra.mxu0 %v12222_v58  ;;  %7521 = vmatpush1.bf16.msra.mxu1 %v12225_v8  ;;  %v12294_v58 = vld [vmem:[%s16786_s5 + $0x480] ss:$16 sps:$4 sm:$0xff]   ;;  %v12297_v8 = vld [vmem:[%s16786_s5 + $0x488] ss:$16 sps:$4 sm:$0xff]  }
 0x886   : > { %7400 = vmatprep.subr.bf16.mxu0 %v12230_v37  ;;  %7522 = vmatprep.subr.bf16.mxu1 %v12233_v48  ;;  %v6151_v37 = vld [vmem:[#allocation3 + $0x10] sm:$0xff] }
 0x887   : > { %v6166_v48 = vpack.c.bf16 %v15659_v17, %v6151_v37  ;;  %v12368_v37 = vld [vmem:[%s16786_s5 + $0x604] ss:$16 sps:$4 sm:$0xff]  }
 0x889   : > { %7401 = vmatpush1.bf16.msra.mxu0 %v12228_v29  ;;  %7523 = vmatpush1.bf16.msra.mxu1 %v12231_v12  ;;  %v12302_v29 = vld [vmem:[%s16786_s5 + $0x4a4] ss:$16 sps:$4 sm:$0xff]   ;;  %v12305_v12 = vld [vmem:[%s16786_s5 + $0x4ac] ss:$16 sps:$4 sm:$0xff]  }
 0x88a   : > { %7402 = vmatprep.subr.bf16.mxu0 %v12236_v34  ;;  %7524 = vmatprep.subr.bf16.mxu1 %v12239_v18  ;;  %v12300_v34 = vld [vmem:[%s16786_s5 + $0x4a0] ss:$16 sps:$4 sm:$0xff]   ;;  %v12303_v18 = vld [vmem:[%s16786_s5 + $0x4a8] ss:$16 sps:$4 sm:$0xff]  }
 0x88d   : > { %7403 = vmatpush1.bf16.msra.mxu0 %v12234_v53  ;;  %7525 = vmatpush1.bf16.msra.mxu1 %v12237_v42  ;;  %v12308_v53 = vld [vmem:[%s16786_s5 + $0x4c4] ss:$16 sps:$4 sm:$0xff]   ;;  %v12311_v42 = vld [vmem:[%s16786_s5 + $0x4cc] ss:$16 sps:$4 sm:$0xff]  }
 0x88e   : > { %7404 = vmatprep.subr.bf16.mxu0 %v12242_v19  ;;  %7526 = vmatprep.subr.bf16.mxu1 %v12245_v52  ;;  %v12306_v19 = vld [vmem:[%s16786_s5 + $0x4c0] ss:$16 sps:$4 sm:$0xff]   ;;  %v12309_v52 = vld [vmem:[%s16786_s5 + $0x4c8] ss:$16 sps:$4 sm:$0xff]  }
 0x891   : > { %7405 = vmatpush1.bf16.msra.mxu0 %v12240_v13  ;;  %7527 = vmatpush1.bf16.msra.mxu1 %v12243_v46  ;;  %v12314_v13 = vld [vmem:[%s16786_s5 + $0x4e4] ss:$16 sps:$4 sm:$0xff]   ;;  %v12317_v46 = vld [vmem:[%s16786_s5 + $0x4ec] ss:$16 sps:$4 sm:$0xff]  }
 0x892   : > { %7406 = vmatprep.subr.bf16.mxu0 %v12248_v11  ;;  %7528 = vmatprep.subr.bf16.mxu1 %v12251_v35  ;;  %v7631_v11 = vld [vmem:[#allocation3 + $0x8] sm:$0xfc]  ;;  %v12312_v35 = vld [vmem:[%s16786_s5 + $0x4e0] ss:$16 sps:$4 sm:$0xff]  }
 0x895   : > { %7407 = vmatpush1.bf16.msra.mxu0 %v12246_v63  ;;  %7529 = vmatpush1.bf16.msra.mxu1 %v12249_v9  ;;  %v12315_v63 = vld [vmem:[%s16786_s5 + $0x4e8] ss:$16 sps:$4 sm:$0xff]   ;;  %v12320_v9 = vld [vmem:[%s16786_s5 + $0x504] ss:$16 sps:$4 sm:$0xff]  }
 0x896   : > { %7408 = vmatprep.subr.bf16.mxu0 %v12254_v62  ;;  %7530 = vmatprep.subr.bf16.mxu1 %v12257_v61  ;;  %v12323_v62 = vld [vmem:[%s16786_s5 + $0x50c] ss:$16 sps:$4 sm:$0xff]   ;;  %v6163_v61 = vld [vmem:[#allocation3 + $0x70] sm:$0x3] }
 0x899   : > { %7409 = vmatpush1.bf16.msra.mxu0 %v12252_v40  ;;  %7531 = vmatpush1.bf16.msra.mxu1 %v12255_v7  ;;  %v7637_v40 = vpack.c.bf16 %v15610_v47, %v7631_v11  ;;  %v12318_v7 = vld [vmem:[%s16786_s5 + $0x500] ss:$16 sps:$4 sm:$0xff]   ;;  %v12326_v47 = vld [vmem:[%s16786_s5 + $0x524] ss:$16 sps:$4 sm:$0xff]   ;;  %v7634_v11 = vld [vmem:[#allocation3 + $0x68] sm:$0xf] }
 0x89a   : > { %7410 = vmatprep.subr.bf16.mxu0 %v12260_v10  ;;  %7532 = vmatprep.subr.bf16.mxu1 %v12263_v55  ;;  %v12321_v10 = vld [vmem:[%s16786_s5 + $0x508] ss:$16 sps:$4 sm:$0xff]   ;;  %v7728_v55 = vrot.slane %v15622_v59, 1 }
 0x89d   : > { %7411 = vmatpush1.bf16.msra.mxu0 %v12258_v14  ;;  %7533 = vmatpush1.bf16.msra.mxu1 %v12261_v56  ;;  %v6172_v14 = vpack.c.bf16 %v6163_v61, %v6163_v61  ;;  %v7727_v56 = vrot.slane %v7637_v40, 1  ;;  %v12384_v61 = vld [vmem:[%s16786_s5 + $0x660] ss:$16 sps:$4 sm:$0xff]   ;;  %v12387_v40 = vld [vmem:[%s16786_s5 + $0x668] ss:$16 sps:$4 sm:$0xff]  }
 0x89e   : > { %7412 = vmatprep.subr.bf16.mxu0 %v12266_v41  ;;  %7534 = vmatprep.subr.bf16.mxu1 %v12269_v28  ;;  %v12329_v41 = vld [vmem:[%s16786_s5 + $0x52c] ss:$16 sps:$4 sm:$0xff]  }
 0x89f   : > { %v7729_v28 = vsel %vm675_vm0, %v7727_v56, %v7728_v55  ;;  %v7725_v56 = vrot.slane %v15620_v45, 1 }
 0x8a1   : > { %7413 = vmatpush1.bf16.msra.mxu0 %v12264_v38  ;;  %7535 = vmatpush1.bf16.msra.mxu1 %v12267_v25  ;;  %v12324_v38 = vld [vmem:[%s16786_s5 + $0x520] ss:$16 sps:$4 sm:$0xff]   ;;  %v12327_v25 = vld [vmem:[%s16786_s5 + $0x528] ss:$16 sps:$4 sm:$0xff]  }
 0x8a2   : > { %7414 = vmatprep.subr.bf16.mxu0 %v12272_v4  ;;  %7536 = vmatprep.subr.bf16.mxu1 %v12275_v16  ;;  %v12332_v4 = vld [vmem:[%s16786_s5 + $0x544] ss:$16 sps:$4 sm:$0xff]   ;;  %v12335_v16 = vld [vmem:[%s16786_s5 + $0x54c] ss:$16 sps:$4 sm:$0xff]  }
 0x8a5   : > { %7415 = vmatpush1.bf16.msra.mxu0 %v12270_v30  ;;  %7537 = vmatpush1.bf16.msra.mxu1 %v12273_v43  ;;  %v12330_v30 = vld [vmem:[%s16786_s5 + $0x540] ss:$16 sps:$4 sm:$0xff]   ;;  %v12333_v43 = vld [vmem:[%s16786_s5 + $0x548] ss:$16 sps:$4 sm:$0xff]  }
 0x8a6   : > { %7416 = vmatprep.subr.bf16.mxu0 %v12278_v3  ;;  %7538 = vmatprep.subr.bf16.mxu1 %v12281_v20  ;;  %v12338_v3 = vld [vmem:[%s16786_s5 + $0x564] ss:$16 sps:$4 sm:$0xff]   ;;  %v12341_v20 = vld [vmem:[%s16786_s5 + $0x56c] ss:$16 sps:$4 sm:$0xff]  }
 0x8a9   : > { %7417 = vmatpush1.bf16.msra.mxu0 %v12276_v33  ;;  %7539 = vmatpush1.bf16.msra.mxu1 %v12279_v23  ;;  %v12336_v33 = vld [vmem:[%s16786_s5 + $0x560] ss:$16 sps:$4 sm:$0xff]   ;;  %v12339_v23 = vld [vmem:[%s16786_s5 + $0x568] ss:$16 sps:$4 sm:$0xff]  }
 0x8aa   : > { %7447 = vmatprep.subr.bf16.mxu0 %v12284_v24  ;;  %7569 = vmatprep.subr.bf16.mxu1 %v12287_v60  ;;  %v12344_v24 = vld [vmem:[%s16786_s5 + $0x584] ss:$16 sps:$4 sm:$0xff]   ;;  %v12347_v60 = vld [vmem:[%s16786_s5 + $0x58c] ss:$16 sps:$4 sm:$0xff]  }
 0x8ac   : > { %7419 = vmatmul.mubr.bf16.vlgmr.msra.gmra.mrb[136].mxu0 %v15613_v26  ;;  %7541 = vmatmul.mubr.bf16.vlgmr.msra.gmra.mrb[112].mxu1 %v15613_v26  ;;  %v12296_v26 = vld [vmem:[%s16786_s5 + $0x484] ss:$16 sps:$4 sm:$0xff]  }
 0x8ad   : > { %7428 = vmatprep.mubr.bf16.mxu0 %v15622_v59  ;;  %7550 = vmatprep.mubr.bf16.mxu1 %v15622_v59 }
 0x8ae   : > { %7448 = vmatpush1.bf16.msra.mxu0 %v12282_v15  ;;  %7570 = vmatpush1.bf16.msra.mxu1 %v12285_v5  ;;  %v12342_v15 = vld [vmem:[%s16786_s5 + $0x580] ss:$16 sps:$4 sm:$0xff]   ;;  %v12345_v5 = vld [vmem:[%s16786_s5 + $0x588] ss:$16 sps:$4 sm:$0xff]  }
 0x8af   : > { %7449 = vmatprep.subr.bf16.mxu0 %v12290_v49  ;;  %7571 = vmatprep.subr.bf16.mxu1 %v12293_v1  ;;  %v12350_v49 = vld [vmem:[%s16786_s5 + $0x5a4] ss:$16 sps:$4 sm:$0xff]   ;;  %v12353_v1 = vld [vmem:[%s16786_s5 + $0x5ac] ss:$16 sps:$4 sm:$0xff]  }
 0x8b2   : > { %7450 = vmatpush1.bf16.msra.mxu0 %v12288_v6  ;;  %7572 = vmatpush1.bf16.msra.mxu1 %v12291_v44  ;;  %v12348_v6 = vld [vmem:[%s16786_s5 + $0x5a0] ss:$16 sps:$4 sm:$0xff]   ;;  %v12351_v44 = vld [vmem:[%s16786_s5 + $0x5a8] ss:$16 sps:$4 sm:$0xff]  }
 0x8b3   : > { %8114 = vmatprep.subr.bf16.mxu0 %v12296_v26  ;;  %8236 = vmatprep.subr.bf16.mxu1 %v12299_v2  ;;  %v12356_v26 = vld [vmem:[%s16786_s5 + $0x5c4] ss:$16 sps:$4 sm:$0xff]   ;;  %v12359_v2 = vld [vmem:[%s16786_s5 + $0x5cc] ss:$16 sps:$4 sm:$0xff]  }
 0x8b4   : > { %7429 = vmatmul.mubr.bf16.gmra.mrb[140].mxu0 %v15620_v45  ;;  %7551 = vmatmul.mubr.bf16.gmra.mrb[116].mxu1 %v15620_v45  ;;  %v12398_v45 = vld [vmem:[%s16786_s5 + $0x6a4] ss:$16 sps:$4 sm:$0xff]  }
 0x8b5   : > { %7438 = vmatprep.mubr.bf16.mxu0 %v6171_v50  ;;  %7560 = vmatprep.mubr.bf16.mxu1 %v6171_v50  ;;  %v12357_v50 = vld [vmem:[%s16786_s5 + $0x5c8] ss:$16 sps:$4 sm:$0xff]  }
 0x8bc   : > { %7439 = vmatmul.mubr.bf16.gmra.mrb[152].mxu0 %v6170_v0  ;;  %7561 = vmatmul.mubr.bf16.gmra.mrb[128].mxu1 %v6170_v0  ;;  %v12365_v0 = vld [vmem:[%s16786_s5 + $0x5ec] ss:$16 sps:$4 sm:$0xff]  }
 0x8bd   : > { %7479 = vmatprep.mubr.bf16.mxu0 %v17033_v27  ;;  %7601 = vmatprep.mubr.bf16.mxu1 %v17033_v27 }
 0x8c4   : > { %10514 = vmatmul.mubr.msk.bf16.vlgmr.msra.gmra.mrb[136].mxu0 %vm5557_vm9, %v6166_v48  ;;  %10517 = vmatmul.mubr.msk.bf16.vlgmr.msra.gmra.mrb[112].mxu1 %vm5557_vm9, %v6166_v48  ;;  %v12371_v48 = vld [vmem:[%s16786_s5 + $0x60c] ss:$16 sps:$4 sm:$0xff]  }
 0x8c5   : > { %8115 = vmatpush1.bf16.msra.mxu0 %v12294_v58  ;;  %8237 = vmatpush1.bf16.msra.mxu1 %v12297_v8  ;;  %v12360_v58 = vld [vmem:[%s16786_s5 + $0x5e0] ss:$16 sps:$4 sm:$0xff]   ;;  %v12363_v8 = vld [vmem:[%s16786_s5 + $0x5e8] ss:$16 sps:$4 sm:$0xff]  }
 0x8c6   : > { %8116 = vmatprep.subr.bf16.mxu0 %v12302_v29  ;;  %8238 = vmatprep.subr.bf16.mxu1 %v12305_v12  ;;  %v12366_v29 = vld [vmem:[%s16786_s5 + $0x600] ss:$16 sps:$4 sm:$0xff]   ;;  %v12369_v12 = vld [vmem:[%s16786_s5 + $0x608] ss:$16 sps:$4 sm:$0xff]  }
 0x8c7   : > { %7489 = vmatprep.mubr.bf16.mxu0 %v17033_v27  ;;  %7611 = vmatprep.mubr.bf16.mxu1 %v17033_v27 }
 0x8c9   : > { %8117 = vmatpush1.bf16.msra.mxu0 %v12300_v34  ;;  %8239 = vmatpush1.bf16.msra.mxu1 %v12303_v18  ;;  %v12374_v34 = vld [vmem:[%s16786_s5 + $0x624] ss:$16 sps:$4 sm:$0xff]   ;;  %v12377_v18 = vld [vmem:[%s16786_s5 + $0x62c] ss:$16 sps:$4 sm:$0xff]  }
 0x8ca   : > { %8118 = vmatprep.subr.bf16.mxu0 %v12308_v53  ;;  %8240 = vmatprep.subr.bf16.mxu1 %v12311_v42  ;;  %v12372_v53 = vld [vmem:[%s16786_s5 + $0x620] ss:$16 sps:$4 sm:$0xff]   ;;  %v12375_v42 = vld [vmem:[%s16786_s5 + $0x628] ss:$16 sps:$4 sm:$0xff]  }
 0x8cc   : > { %10515 = vmatmul.mubr.msk.bf16.gmra.mrb[140].mxu0 %vm5557_vm9, %v15665_v36  ;;  %10518 = vmatmul.mubr.msk.bf16.gmra.mrb[116].mxu1 %vm5557_vm9, %v15665_v36 }
 0x8cd   : > { %8119 = vmatpush1.bf16.msra.mxu0 %v12306_v19  ;;  %8241 = vmatpush1.bf16.msra.mxu1 %v12309_v52  ;;  %v12380_v19 = vld [vmem:[%s16786_s5 + $0x644] ss:$16 sps:$4 sm:$0xff]   ;;  %v12383_v52 = vld [vmem:[%s16786_s5 + $0x64c] ss:$16 sps:$4 sm:$0xff]  }
 0x8ce   : > { %8120 = vmatprep.subr.bf16.mxu0 %v12314_v13  ;;  %8242 = vmatprep.subr.bf16.mxu1 %v12317_v46  ;;  %v12378_v13 = vld [vmem:[%s16786_s5 + $0x640] ss:$16 sps:$4 sm:$0xff]   ;;  %v12381_v46 = vld [vmem:[%s16786_s5 + $0x648] ss:$16 sps:$4 sm:$0xff]  }
 0x8cf   : > { %7499 = vmatprep.mubr.bf16.mxu0 %v17033_v27  ;;  %7621 = vmatprep.mubr.bf16.mxu1 %v17033_v27 }
 0x8d1   : > { %8121 = vmatpush1.bf16.msra.mxu0 %v12312_v35  ;;  %8243 = vmatpush1.bf16.msra.mxu1 %v12315_v63  ;;  %v12386_v35 = vld [vmem:[%s16786_s5 + $0x664] ss:$16 sps:$4 sm:$0xff]   ;;  %v12389_v63 = vld [vmem:[%s16786_s5 + $0x66c] ss:$16 sps:$4 sm:$0xff]  }
 0x8d2   : > { %8122 = vmatprep.subr.bf16.mxu0 %v12320_v9  ;;  %8244 = vmatprep.subr.bf16.mxu1 %v12323_v62  ;;  %v7630_v9 = vld [vmem:[#allocation3] sm:$0xfc]  ;;  %v7640_v62 = vpack.c.bf16 %v7634_v11, %v7634_v11 }
 0x8d4   : > { %10516 = vmatmul.mubr.msk.bf16.gmra.mrb[156].mxu0 %vm5557_vm9, %v6172_v14  ;;  %10519 = vmatmul.mubr.msk.bf16.gmra.mrb[132].mxu1 %vm5557_vm9, %v6172_v14  ;;  %v12395_v14 = vld [vmem:[%s16786_s5 + $0x68c] ss:$16 sps:$4 sm:$0xff]  }
 0x8d5   : > { %8123 = vmatpush1.bf16.msra.mxu0 %v12318_v7  ;;  %8245 = vmatpush1.bf16.msra.mxu1 %v12321_v10  ;;  %v7636_v7 = vpack.c.bf16 %v15608_v21, %v7630_v9  ;;  %v12392_v10 = vld [vmem:[%s16786_s5 + $0x684] ss:$16 sps:$4 sm:$0xff]   ;;  %v12390_v21 = vld [vmem:[%s16786_s5 + $0x680] ss:$16 sps:$4 sm:$0xff]  }
 0x8d6   : > { %8146 = vmatprep.mubr.bf16.mxu0 %v7729_v28  ;;  %8268 = vmatprep.mubr.bf16.mxu1 %v7729_v28 }
 0x8d7   : > { %8124 = vmatprep.subr.bf16.mxu0 %v12326_v47  ;;  %8246 = vmatprep.subr.bf16.mxu1 %v12329_v41  ;;  %v7735_v47 = vrot.slane %v7640_v62, 1  ;;  %v7633_v41 = vld [vmem:[#allocation3 + $0x60] sm:$0xf]  ;;  %v7724_v28 = vrot.slane %v7636_v7, 1 }
 0x8d9   : > { %8125 = vmatpush1.bf16.msra.mxu0 %v12324_v38  ;;  %8247 = vmatpush1.bf16.msra.mxu1 %v12327_v25  ;;  %v12393_v38 = vld [vmem:[%s16786_s5 + $0x688] ss:$16 sps:$4 sm:$0xff]   ;;  %v7726_v25 = vsel %vm675_vm0, %v7724_v28, %v7725_v56 }
 0x8da   : > { %8126 = vmatprep.subr.bf16.mxu0 %v12332_v4  ;;  %8248 = vmatprep.subr.bf16.mxu1 %v12335_v16  ;;  %v7639_v4 = vpack.c.bf16 %v7633_v41, %v7633_v41  ;;  %v12401_v16 = vld [vmem:[%s16786_s5 + $0x6ac] ss:$16 sps:$4 sm:$0xff]   ;;  %v12408_v28 = vld [vmem:[%s16790_s9 + $0x20] ss:$8 sps:$4 sm:$0xff]  }
 0x8db   : > { %v12410_v41 = vld [vmem:[%s16790_s9 + $0x24] ss:$8 sps:$4 sm:$0xff]  }
 0x8dd   : > { %8127 = vmatpush1.bf16.msra.mxu0 %v12330_v30  ;;  %8249 = vmatpush1.bf16.msra.mxu1 %v12333_v43  ;;  %v7736_v30 = vsel %vm675_vm0, %v7728_v55, %v7735_v47  ;;  %v12396_v43 = vld [vmem:[%s16786_s5 + $0x6a0] ss:$16 sps:$4 sm:$0xff]  }
 0x8de   : > { %8128 = vmatprep.subr.bf16.mxu0 %v12338_v3  ;;  %8250 = vmatprep.subr.bf16.mxu1 %v12341_v20  ;;  %v12399_v3 = vld [vmem:[%s16786_s5 + $0x6a8] ss:$16 sps:$4 sm:$0xff]   ;;  %v7733_v20 = vrot.slane %v7639_v4, 1  ;;  %v7632_v55 = vld [vmem:[#allocation3 + $0x10] sm:$0xfc] }
 0x8df   : > { %v12414_v4 = vld [vmem:[%s16790_s9 + $0x40] ss:$8 sps:$4 sm:$0xff]  }
 0x8e0   : > { %v7734_v59 = vsel %vm675_vm0, %v7725_v56, %v7733_v20  ;;  %v12407_v56 = vld [vmem:[%s16790_s9 + $0x14] ss:$8 sps:$4 sm:$0xff]  }
 0x8e1   : > { %8129 = vmatpush1.bf16.msra.mxu0 %v12336_v33  ;;  %8251 = vmatpush1.bf16.msra.mxu1 %v12339_v23  ;;  %v7638_v33 = vpack.c.bf16 %v15659_v17, %v7632_v55  ;;  %v7731_v23 = vrot.slane %v15665_v36, 1 }
 0x8e2   : > { %8130 = vmatprep.subr.bf16.mxu0 %v12344_v24  ;;  %8252 = vmatprep.subr.bf16.mxu1 %v12347_v60  ;;  %v7635_v24 = vld [vmem:[#allocation3 + $0x70] sm:$0xf] }
 0x8e3   : > { %v7730_v60 = vrot.slane %v7638_v33, 1 }
 0x8e5   : > { %8131 = vmatpush1.bf16.msra.mxu0 %v12342_v15  ;;  %8253 = vmatpush1.bf16.msra.mxu1 %v12345_v5  ;;  %v7732_v15 = vsel %vm675_vm0, %v7730_v60, %v7731_v23  ;;  %v7641_v5 = vpack.c.bf16 %v7635_v24, %v7635_v24 }
 0x8e6   : > { %8132 = vmatprep.subr.bf16.mxu0 %v12350_v49  ;;  %8254 = vmatprep.subr.bf16.mxu1 %v12353_v1 }
 0x8e7   : > { %v7737_v49 = vrot.slane %v7641_v5, 1 }
 0x8e9   : > { %8133 = vmatpush1.bf16.msra.mxu0 %v12348_v6  ;;  %8255 = vmatpush1.bf16.msra.mxu1 %v12351_v44  ;;  %v7738_v1 = vsel %vm675_vm0, %v7731_v23, %v7737_v49 }
 0x8ea   : > { %8134 = vmatprep.subr.bf16.mxu0 %v12356_v26  ;;  %8256 = vmatprep.subr.bf16.mxu1 %v12359_v2 }
 0x8ed   : > { %8135 = vmatpush1.bf16.msra.mxu0 %v12354_v32  ;;  %8257 = vmatpush1.bf16.msra.mxu1 %v12357_v50 }
 0x8ee   : > { %8136 = vmatprep.subr.bf16.mxu0 %v12362_v57  ;;  %8258 = vmatprep.subr.bf16.mxu1 %v12365_v0 }
 0x8f1   : > { %8137 = vmatpush1.bf16.msra.mxu0 %v12360_v58  ;;  %8259 = vmatpush1.bf16.msra.mxu1 %v12363_v8 }
 0x8f2   : > { %8138 = vmatprep.subr.bf16.mxu0 %v12368_v37  ;;  %8260 = vmatprep.subr.bf16.mxu1 %v12371_v48 }
 0x8f5   : > { %8139 = vmatpush1.bf16.msra.mxu0 %v12366_v29  ;;  %8261 = vmatpush1.bf16.msra.mxu1 %v12369_v12 }
 0x8f6   : > { %8140 = vmatprep.subr.bf16.mxu0 %v12374_v34  ;;  %8262 = vmatprep.subr.bf16.mxu1 %v12377_v18 }
 0x8f9   : > { %8141 = vmatpush1.bf16.msra.mxu0 %v12372_v53  ;;  %8263 = vmatpush1.bf16.msra.mxu1 %v12375_v42 }
 0x8fa   : > { %8142 = vmatprep.subr.bf16.mxu0 %v12380_v19  ;;  %8264 = vmatprep.subr.bf16.mxu1 %v12383_v52 }
 0x8fd   : > { %8143 = vmatpush1.bf16.msra.mxu0 %v12378_v13  ;;  %8265 = vmatpush1.bf16.msra.mxu1 %v12381_v46 }
 0x8fe   : > { %8144 = vmatprep.subr.bf16.mxu0 %v12386_v35  ;;  %8266 = vmatprep.subr.bf16.mxu1 %v12389_v63 }
 0x901   : > { %8145 = vmatpush1.bf16.msra.mxu0 %v12384_v61  ;;  %8267 = vmatpush1.bf16.msra.mxu1 %v12387_v40 }
 0x902   : > { %8175 = vmatprep.subr.bf16.mxu0 %v12392_v10  ;;  %8297 = vmatprep.subr.bf16.mxu1 %v12395_v14  ;;  %v12402_v10 = vld [vmem:[%s16790_s9] ss:$8 sps:$4 sm:$0xff]   ;;  %v12404_v14 = vld [vmem:[%s16790_s9 + $0x4] ss:$8 sps:$4 sm:$0xff]  }
 0x904   : > { %8147 = vmatmul.mubr.bf16.vlgmr.msra.gmra.mrb[136].mxu0 %v7726_v25  ;;  %8269 = vmatmul.mubr.bf16.vlgmr.msra.gmra.mrb[112].mxu1 %v7726_v25  ;;  %v12416_v25 = vld [vmem:[%s16790_s9 + $0x44] ss:$8 sps:$4 sm:$0xff]  }
 0x905   : > { %8156 = vmatprep.mubr.bf16.mxu0 %v7736_v30  ;;  %8278 = vmatprep.mubr.bf16.mxu1 %v7736_v30 }
 0x906   : > { %8176 = vmatpush1.bf16.msra.mxu0 %v12390_v21  ;;  %8298 = vmatpush1.bf16.msra.mxu1 %v12393_v38  ;;  %v12413_v21 = vld [vmem:[%s16790_s9 + $0x34] ss:$8 sps:$4 sm:$0xff]   ;;  %v12411_v38 = vld [vmem:[%s16790_s9 + $0x30] ss:$8 sps:$4 sm:$0xff]  }
 0x907   : > { %8177 = vmatprep.subr.bf16.mxu0 %v12398_v45  ;;  %8299 = vmatprep.subr.bf16.mxu1 %v12401_v16  ;;  %v12419_v45 = vld [vmem:[%s16790_s9 + $0x54] ss:$8 sps:$4 sm:$0xff]   ;;  %v12417_v16 = vld [vmem:[%s16790_s9 + $0x50] ss:$8 sps:$4 sm:$0xff]  }
 0x90a   : > { %8178 = vmatpush1.bf16.msra.mxu0 %v12396_v43  ;;  %8300 = vmatpush1.bf16.msra.mxu1 %v12399_v3  ;;  %v12422_v3 = vld [vmem:[%s16790_s9 + $0x64] ss:$8 sps:$4 sm:$0xff]  }
 0x90b   : > { %8842 = vmatprep.subr.bf16.mxu0 %v12404_v14 }
 0x90c   : > { %8157 = vmatmul.mubr.bf16.gmra.mrb[140].mxu0 %v7734_v59  ;;  %8279 = vmatmul.mubr.bf16.gmra.mrb[116].mxu1 %v7734_v59 }
 0x90d   : > { %8166 = vmatprep.mubr.bf16.mxu0 %v7735_v47  ;;  %8288 = vmatprep.mubr.bf16.mxu1 %v7735_v47  ;;  %v12405_v47 = vld [vmem:[%s16790_s9 + $0x10] ss:$8 sps:$4 sm:$0xff]  }
 0x914   : > { %8167 = vmatmul.mubr.bf16.gmra.mrb[160].mxu0 %v7733_v20  ;;  %8289 = vmatmul.mubr.bf16.gmra.mrb[136].mxu1 %v7733_v20 }
 0x915   : > { %8207 = vmatprep.mubr.bf16.mxu0 %v17033_v27  ;;  %8329 = vmatprep.mubr.bf16.mxu1 %v17033_v27 }
 0x91c   : > { %10664 = vmatmul.mubr.msk.bf16.vlgmr.msra.gmra.mrb[136].mxu0 %vm5557_vm9, %v7732_v15  ;;  %10667 = vmatmul.mubr.msk.bf16.vlgmr.msra.gmra.mrb[112].mxu1 %vm5557_vm9, %v7732_v15 }
 0x91d   : > { %8217 = vmatprep.mubr.bf16.mxu0 %v17033_v27  ;;  %8339 = vmatprep.mubr.bf16.mxu1 %v17033_v27 }
 0x91e   : > { %8843 = vmatpush1.bf16.msra.mxu0 %v12402_v10 }
 0x91f   : > { %8844 = vmatprep.subr.bf16.mxu0 %v12407_v56 }
 0x922   : > { %8845 = vmatpush1.bf16.msra.mxu0 %v12405_v47 }
 0x923   : > { %8846 = vmatprep.subr.bf16.mxu0 %v12410_v41 }
 0x924   : > { %10665 = vmatmul.mubr.msk.bf16.gmra.mrb[140].mxu0 %vm5557_vm9, %v7738_v1  ;;  %10668 = vmatmul.mubr.msk.bf16.gmra.mrb[116].mxu1 %vm5557_vm9, %v7738_v1  ;;  %v12420_v1 = vld [vmem:[%s16790_s9 + $0x60] ss:$8 sps:$4 sm:$0xff]  }
 0x925   : > { %8227 = vmatprep.mubr.bf16.mxu0 %v17033_v27  ;;  %8349 = vmatprep.mubr.bf16.mxu1 %v17033_v27 }
 0x926   : > { %8847 = vmatpush1.bf16.msra.mxu0 %v12408_v28 }
 0x927   : > { %8848 = vmatprep.subr.bf16.mxu0 %v12413_v21 }
 0x92a   : > { %8849 = vmatpush1.bf16.msra.mxu0 %v12411_v38  ;;  %v12449_v38 = vld [vmem:[%s16790_s9 + $0xf4] ss:$8 sps:$4 sm:$0xff]  }
 0x92b   : > { %8850 = vmatprep.subr.bf16.mxu0 %v12416_v25 }
 0x92c   : > { %10666 = vmatmul.mubr.msk.bf16.gmra.mrb[164].mxu0 %vm5557_vm9, %v7737_v49  ;;  %10669 = vmatmul.mubr.msk.bf16.gmra.mrb[140].mxu1 %vm5557_vm9, %v7737_v49 }
 0x92d   : > { %9070 = vmatprep.mubr.bf16.mxu1 %v17033_v27 }
 0x92e   : > { %8851 = vmatpush1.bf16.msra.mxu0 %v12414_v4 }
 0x92f   : > { %8852 = vmatprep.subr.bf16.mxu0 %v12419_v45 }
 0x932   : > { %8853 = vmatpush1.bf16.msra.mxu0 %v12417_v16 }
 0x933   : > { %8854 = vmatprep.subr.bf16.mxu0 %v12422_v3 }
 0x936   : > { %8855 = vmatpush1.bf16.msra.mxu0 %v12420_v1 }
 0x937   : > { %v6828_v17 = vpop.f32.mrb[144].mxu0  ;;  %v6950_v36 = vpop.f32.mrb[120].mxu1 }
 0x938   : > { %v6830_v6 = vpop.f32.mrb[145].mxu0  ;;  %v6952_v44 = vpop.f32.mrb[121].mxu1 }
 0x939   : > { %v6832_v26 = vpop.f32.mrb[146].mxu0  ;;  %v6954_v2 = vpop.f32.mrb[122].mxu1 }
 0x93a   : > { %v6833_v32 = vpop.f32.mrb[147].mxu0  ;;  %v6955_v50 = vpop.f32.mrb[123].mxu1  ;;  %v12431_v26 = vld [vmem:[%s16790_s9 + $0x94] ss:$8 sps:$4 sm:$0xff]   ;;  %v12429_v2 = vld [vmem:[%s16790_s9 + $0x90] ss:$8 sps:$4 sm:$0xff]  }
 0x93b   : > { %v12434_v32 = vld [vmem:[%s16790_s9 + $0xa4] ss:$8 sps:$4 sm:$0xff]   ;;  %v12432_v50 = vld [vmem:[%s16790_s9 + $0xa0] ss:$8 sps:$4 sm:$0xff]  }
 0x94f   : > { %v6889_v57 = vpop.f32.mrb[148].mxu0  ;;  %v7011_v0 = vpop.f32.mrb[124].mxu1 }
 0x950   : > { %v6890_v58 = vadd.f32 %v6889_v57, %v6828_v17  ;;  %v7012_v8 = vadd.f32 %v7011_v0, %v6950_v36  ;;  %v6891_v37 = vpop.f32.mrb[149].mxu0  ;;  %v7013_v48 = vpop.f32.mrb[125].mxu1  ;;  %v12425_v17 = vld [vmem:[%s16790_s9 + $0x74] ss:$8 sps:$4 sm:$0xff]   ;;  %v12423_v36 = vld [vmem:[%s16790_s9 + $0x70] ss:$8 sps:$4 sm:$0xff]  }
 0x951   : > { %v6892_v29 = vadd.f32 %v6891_v37, %v6830_v6  ;;  %v7014_v12 = vadd.f32 %v7013_v48, %v6952_v44  ;;  %v6893_v34 = vpop.f32.mrb[150].mxu0  ;;  %v7015_v18 = vpop.f32.mrb[126].mxu1  ;;  %8856 = vmatprep.subr.bf16.mxu0 %v12425_v17  ;;  %v12428_v6 = vld [vmem:[%s16790_s9 + $0x84] ss:$8 sps:$4 sm:$0xff]   ;;  %v12426_v44 = vld [vmem:[%s16790_s9 + $0x80] ss:$8 sps:$4 sm:$0xff]  }
 0x952   : > { %v6894_v53 = vpop.f32.mrb[151].mxu0  ;;  %v7016_v42 = vpop.f32.mrb[127].mxu1  ;;  %8857 = vmatpush1.bf16.msra.mxu0 %v12423_v36  ;;  %v12437_v57 = vld [vmem:[%s16790_s9 + $0xb4] ss:$8 sps:$4 sm:$0xff]   ;;  %v12435_v0 = vld [vmem:[%s16790_s9 + $0xb0] ss:$8 sps:$4 sm:$0xff]  }
 0x953   : > { %8858 = vmatprep.subr.bf16.mxu0 %v12428_v6  ;;  %v12443_v37 = vld [vmem:[%s16790_s9 + $0xd4] ss:$8 sps:$4 sm:$0xff]   ;;  %v12441_v48 = vld [vmem:[%s16790_s9 + $0xd0] ss:$8 sps:$4 sm:$0xff]  }
 0x956   : > { %8859 = vmatpush1.bf16.msra.mxu0 %v12426_v44 }
 0x957   : > { %8860 = vmatprep.subr.bf16.mxu0 %v12431_v26 }
 0x95a   : > { %8861 = vmatpush1.bf16.msra.mxu0 %v12429_v2 }
 0x95b   : > { %8862 = vmatprep.subr.bf16.mxu0 %v12434_v32 }
 0x95e   : > { %8863 = vmatpush1.bf16.msra.mxu0 %v12432_v50 }
 0x95f   : > { %8864 = vmatprep.subr.bf16.mxu0 %v12437_v57 }
 0x962   : > { %8865 = vmatpush1.bf16.msra.mxu0 %v12435_v0 }
 0x98f   : > { %v7440_v19 = vpop.f32.mrb[152].mxu0  ;;  %v7562_v52 = vpop.f32.mrb[128].mxu1 }
 0x990   : > { %v7441_v13 = vadd.f32 %v7440_v19, %v6890_v58  ;;  %v7563_v46 = vadd.f32 %v7562_v52, %v7012_v8  ;;  %v7442_v11 = vpop.f32.mrb[153].mxu0  ;;  %v7564_v35 = vpop.f32.mrb[129].mxu1  ;;  %v12440_v58 = vld [vmem:[%s16790_s9 + $0xc4] ss:$8 sps:$4 sm:$0xff]   ;;  %v12438_v8 = vld [vmem:[%s16790_s9 + $0xc0] ss:$8 sps:$4 sm:$0xff]  }
 0x991   : > { %v7443_v63 = vadd.f32 %v7442_v11, %v6892_v29  ;;  %v7565_v9 = vadd.f32 %v7564_v35, %v7014_v12  ;;  %v7444_v62 = vpop.f32.mrb[154].mxu0  ;;  %v7566_v61 = vpop.f32.mrb[130].mxu1  ;;  %8866 = vmatprep.subr.bf16.mxu0 %v12440_v58  ;;  %v6148_v19 = vld [vmem:[%s16787_s6] sm:$0xf] }
 0x992   : > { %v7445_v40 = vpop.f32.mrb[155].mxu0  ;;  %v7567_v7 = vpop.f32.mrb[131].mxu1  ;;  %8867 = vmatpush1.bf16.msra.mxu0 %v12438_v8  ;;  %v16266_v11 = vrot.slane %v6148_v19, %v17035_v31  ;;  %v16269_v35 = vrot.slane %v6148_v19, %v17037_v22  ;;  %v16278_v61 = vrot.slane %v6148_v19, %v17036_v51 }
 0x993   : > { %8868 = vmatprep.subr.bf16.mxu0 %v12443_v37 }
 0x996   : > { %8869 = vmatpush1.bf16.msra.mxu0 %v12441_v48 }
 0x9a7   : > { %v7501_v30 = vpop.f32.mrb[156].mxu0  ;;  %v7623_v43 = vpop.f32.mrb[132].mxu1 }
 0x9a8   : > { %v16198_v20 = vadd.f32 %v7501_v30, %v7441_v13  ;;  %v16200_v59 = vadd.f32 %v7623_v43, %v7563_v46  ;;  %v7503_v55 = vpop.f32.mrb[157].mxu0  ;;  %v7625_v33 = vpop.f32.mrb[133].mxu1  ;;  %v16263_v46 = vrot.slane %v6148_v19, %v17034_v54  ;;  %v12447_v30 = vld [vmem:[%s16790_s9 + $0xf0] ss:$8 sps:$4 sm:$0xff]  }
 0x9a9   : > { %v16202_v23 = vadd.f32 %v7503_v55, %v7443_v63  ;;  %v16204_v24 = vadd.f32 %v7625_v33, %v7565_v9  ;;  %v7505_v60 = vpop.f32.mrb[158].mxu0  ;;  %v7627_v15 = vpop.f32.mrb[134].mxu1  ;;  %v12444_v63 = vld [vmem:[%s16790_s9 + $0xe0] ss:$8 sps:$4 sm:$0xff]   ;;  %v12446_v9 = vld [vmem:[%s16790_s9 + $0xe4] ss:$8 sps:$4 sm:$0xff]  }
 0x9aa   : > { %v7506_v5 = vpop.f32.mrb[159].mxu0  ;;  %v7628_v49 = vpop.f32.mrb[135].mxu1  ;;  %8870 = vmatprep.subr.bf16.mxu0 %v12446_v9 }
 0x9ab   : > { %8871 = vmatpush1.bf16.msra.mxu0 %v12444_v63  ;;  %v12452_v5 = vld [vmem:[%s16790_s9 + $0x104] ss:$8 sps:$4 sm:$0xff]  }
 0x9ac   : > { %8872 = vmatprep.subr.bf16.mxu0 %v12449_v38 }
 0x9af   : > { %8873 = vmatpush1.bf16.msra.mxu0 %v12447_v30 }
 0x9b0   : > { %8903 = vmatprep.subr.bf16.mxu0 %v12452_v5 }
 0x9e7   : > { %v16251_v29 = vpop.f32.mrb[160].mxu0  ;;  %v16253_v12 = vpop.f32.mrb[136].mxu1 }
 0x9e8   : > { %v16255_v34 = vpop.f32.mrb[161].mxu0  ;;  %v16257_v18 = vpop.f32.mrb[137].mxu1 }
 0x9e9   : > { %v8172_v53 = vpop.f32.mrb[162].mxu0  ;;  %v8294_v42 = vpop.f32.mrb[138].mxu1 }
 0x9ea   : > { %v8173_v52 = vpop.f32.mrb[163].mxu0  ;;  %v8295_v13 = vpop.f32.mrb[139].mxu1 }
 0x9ef   : > { %v8209_v62 = vpop.f32.mrb[136].mxu0  ;;  %v8331_v54 = vpop.f32.mrb[112].mxu1 }
 0x9f0   : > { %v16281_v40 = vadd.f32 %v16263_v46, %v8331_v54  ;;  %v8211_v31 = vpop.f32.mrb[137].mxu0  ;;  %v8333_v7 = vpop.f32.mrb[113].mxu1  ;;  %v16298_v25 = vadd.f32 %v16278_v61, %v8209_v62 }
 0x9f1   : > { %v16284_v22 = vadd.f32 %v16266_v11, %v8211_v31  ;;  %v8402_v10 = vadd.f32 %v16269_v35, %v8333_v7  ;;  %v8213_v14 = vpop.f32.mrb[138].mxu0  ;;  %v8335_v56 = vpop.f32.mrb[114].mxu1 }
 0x9f2   : > { %v8421_v47 = vmax.f32 %v16281_v40, 0.0  ;;  %v16289_v51 = vadd.f32 %v16278_v61, %v8213_v14  ;;  %v16292_v41 = vadd.f32 %v16263_v46, %v8335_v56  ;;  %v8215_v28 = vpop.f32.mrb[139].mxu0  ;;  %v8337_v21 = vpop.f32.mrb[115].mxu1  ;;  %v8419_v49 = vmax.f32 %v16298_v25, 0.0 }
 0x9f3   : > { %v8420_v4 = vmax.f32 %v16284_v22, 0.0  ;;  %v16302_v45 = vadd.f32 %v16266_v11, %v8215_v28  ;;  %v8406_v16 = vadd.f32 %v16269_v35, %v8337_v21  ;;  %v8422_v43 = vmax.f32 %v8402_v10, 0.0 }
 0x9f4   : > { %v8425_v3 = vmax.f32 %v16292_v41, 0.0  ;;  %v8423_v33 = vmax.f32 %v16289_v51, 0.0  ;;  %v12455_v51 = vld [vmem:[%s16790_s9 + $0x114] ss:$8 sps:$4 sm:$0xff]  }
 0x9f5   : > { %v11517_v55 = vpack.i.bf16 %v8421_v47, %v8420_v4  ;;  %v8424_v60 = vmax.f32 %v16302_v45, 0.0  ;;  %v8426_v15 = vmax.f32 %v8406_v16, 0.0 }
 0x9f6   : > { %v11527_v32 = vpack.i.bf16 %v8423_v33, %v8419_v49 }
 0x9f7   : > { %v11522_v1 = vpack.i.bf16 %v8425_v3, %v8424_v60  ;;  %v16323_v17 = vpack.i.bf16 %v8426_v15, %v8422_v43  ;;  %v8219_v36 = vpop.f32.mrb[140].mxu0  ;;  %11518 = vrot.lane.b32.xlu1 %v11517_v55, %s12589_s0  ;;  %v8341_v6 = vpop.f32.mrb[116].mxu1 }
 0x9f8   : > { %v16327_v44 = vadd.f32 %v16263_v46, %v8341_v6  ;;  %v8221_v26 = vpop.f32.mrb[141].mxu0  ;;  %v8343_v2 = vpop.f32.mrb[117].mxu1  ;;  %v16346_v19 = vadd.f32 %v16278_v61, %v8219_v36 }
 0x9f9   : > { %v16334_v50 = vadd.f32 %v16266_v11, %v8221_v26  ;;  %v8410_v57 = vadd.f32 %v16269_v35, %v8343_v2  ;;  %v8223_v0 = vpop.f32.mrb[142].mxu0  ;;  %11523 = vrot.lane.b32.xlu0 %v11522_v1, %s12589_s0  ;;  %v8345_v58 = vpop.f32.mrb[118].mxu1 }
 0x9fa   : > { %v8429_v8 = vmax.f32 %v16327_v44, 0.0  ;;  %v16340_v37 = vadd.f32 %v16278_v61, %v8223_v0  ;;  %v16343_v48 = vadd.f32 %v16263_v46, %v8345_v58  ;;  %v8225_v53 = vpop.f32.mrb[143].mxu0  ;;  %v8347_v42 = vpop.f32.mrb[119].mxu1  ;;  %v8427_v14 = vmax.f32 %v16346_v19, 0.0 }
 0x9fb   : > { %v8428_v52 = vmax.f32 %v16334_v50, 0.0  ;;  %v16350_v13 = vadd.f32 %v16266_v11, %v8225_v53  ;;  %v8414_v63 = vadd.f32 %v16269_v35, %v8347_v42  ;;  %11528 = vrot.lane.b32.xlu1 %v11527_v32, %s12589_s0  ;;  %v8430_v9 = vmax.f32 %v8410_v57, 0.0  ;;  %v12456_v50 = vld [vmem:[%s16790_s9 + $0x120] ss:$8 sps:$4 sm:$0xff]  }
 0x9fc   : > { %v8433_v62 = vmax.f32 %v16343_v48, 0.0  ;;  %v8431_v31 = vmax.f32 %v16340_v37, 0.0  ;;  %v12459_v37 = vld [vmem:[%s16790_s9 + $0x130] ss:$8 sps:$4 sm:$0xff]  }
 0x9fd   : > { %v11532_v54 = vpack.i.bf16 %v8429_v8, %v8428_v52  ;;  %v8432_v7 = vmax.f32 %v16350_v13, 0.0  ;;  %v8434_v10 = vmax.f32 %v8414_v63, 0.0  ;;  %v12461_v13 = vld [vmem:[%s16790_s9 + $0x134] ss:$8 sps:$4 sm:$0xff]  }
 0x9fe   : > { %v11542_v15 = vpack.i.bf16 %v8431_v31, %v8427_v14 }
 0x9ff   : > { %v11537_v56 = vpack.i.bf16 %v8433_v62, %v8432_v7  ;;  %v11557_v28 = vpack.i.bf16 %v8434_v10, %v8430_v9  ;;  %v8229_v21 = vpop.f32.mrb[164].mxu0  ;;  %11533 = vrot.lane.b32.xlu0 %v11532_v54, %s12589_s0  ;;  %v8351_v38 = vpop.f32.mrb[140].mxu1 }
 0xa00   : > { %v8230_v16 = vadd.f32 %v8229_v21, %v16251_v29  ;;  %v8352_v30 = vadd.f32 %v8351_v38, %v16253_v12  ;;  %v8231_v43 = vpop.f32.mrb[165].mxu0  ;;  %v8353_v55 = vpop.f32.mrb[141].mxu1 }
 0xa01   : > { %v8232_v5 = vadd.f32 %v8231_v43, %v16255_v34  ;;  %v8354_v1 = vadd.f32 %v8353_v55, %v16257_v18  ;;  %v8233_v36 = vpop.f32.mrb[166].mxu0  ;;  %11538 = vrot.lane.b32.xlu1 %v11537_v56, %s12589_s0  ;;  %v8355_v6 = vpop.f32.mrb[142].mxu1 }
 0xa02   : > { %v8374_v26 = vadd.f32 %v8230_v16, %v16198_v20  ;;  %v8376_v29 = vadd.f32 %v8352_v30, %v16200_v59  ;;  %v8234_v12 = vpop.f32.mrb[167].mxu0  ;;  %v8356_v2 = vpop.f32.mrb[143].mxu1 }
 0xa03   : > { %v8375_v32 = vadd.f32 %v8232_v5, %v16202_v23  ;;  %v8377_v57 = vadd.f32 %v8354_v1, %v16204_v24  ;;  %11543 = vrot.lane.b32.xlu0 %v11542_v15, %s12589_s0 }
 0xa04   : > { %v16382_v34 = vadd.f32 %v16263_v46, %v8376_v29  ;;  %v16385_v18 = vadd.f32 %v16278_v61, %v8374_v26  ;;  %v12453_v29 = vld [vmem:[%s16790_s9 + $0x110] ss:$8 sps:$4 sm:$0xff]  }
 0xa05   : > { %v16388_v0 = vadd.f32 %v16266_v11, %v8375_v32  ;;  %v8418_v24 = vadd.f32 %v16269_v35, %v8377_v57  ;;  %v12458_v32 = vld [vmem:[%s16790_s9 + $0x124] ss:$8 sps:$4 sm:$0xff]  }
 0xa06   : > { %v8437_v20 = vmax.f32 %v16382_v34, 0.0  ;;  %v8435_v59 = vmax.f32 %v16385_v18, 0.0  ;;  %v12465_v18 = vld [vmem:[%s16790_s9 + $0x150] ss:$8 sps:$4 sm:$0xff]  }
 0xa07   : > { %v8436_v58 = vmax.f32 %v16388_v0, 0.0  ;;  %v8438_v46 = vmax.f32 %v8418_v24, 0.0  ;;  %v12470_v0 = vld [vmem:[%s16790_s9 + $0x164] ss:$8 sps:$4 sm:$0xff]  }
 0xa08   : > { %8491 = vrot.lane.b32.xlu0 %v8435_v59, %s12589_s0 }
 0xa09   : > { %v11547_v23 = vpack.i.bf16 %v8437_v20, %v8436_v58 }
 0xa0b   : > { %11548 = vrot.lane.b32.xlu1 %v11547_v23, %s12589_s0 }
 0xa0c   : > { %11558 = vrot.lane.b32.xlu0 %v11557_v28, %s12589_s0 }
 0xa0f   : > { %11553 = vrot.lane.b32.xlu1 %v16323_v17, %s12589_s0 }
 0xa13   : > { %8497 = vrot.lane.b32.xlu1 %v8438_v46, %s12589_s0 }
 0xa69   : > { %v16406_v11 = vpop.permute.xlu1 %11518 }
 0xa6a   : > { %v11521_v61 = vunpack.i.h.bf16 %v16406_v11  ;;  %v11520_v53 = vunpack.i.l.bf16 %v16406_v11 }
 0xa6b   : > { %v16410_v42 = vpop.permute.xlu0 %11523 }
 0xa6c   : > { %v8501_v63 = vsel %vm8499_vm14, %v11520_v53, %v11521_v61  ;;  %v11526_v35 = vunpack.i.h.bf16 %v16410_v42  ;;  %v11525_v17 = vunpack.i.l.bf16 %v16410_v42 }
 0xa6d   : > { %v11529_v9 = vpop.permute.xlu1 %11528  ;;  %v8531_v28 = vmax.f32 %v8420_v4, %v8501_v63  ;;  %v12450_v4 = vld [vmem:[%s16790_s9 + $0x100] ss:$8 sps:$4 sm:$0xff]   ;;  %v12464_v63 = vld [vmem:[%s16790_s9 + $0x144] ss:$8 sps:$4 sm:$0xff]  }
 0xa6e   : > { %v8504_v54 = vsel %vm8499_vm14, %v11525_v17, %v11526_v35  ;;  %v11531_v10 = vunpack.i.h.bf16 %v11529_v9  ;;  %v11530_v56 = vunpack.i.l.bf16 %v11529_v9 }
 0xa6f   : > { %v8534_v21 = vmax.f32 %v8424_v60, %v8504_v54 }
 0xa70   : > { %v8500_v38 = vsel %vm8499_vm14, %v11530_v56, %v11520_v53  ;;  %v8503_v16 = vsel %vm8499_vm14, %v11531_v10, %v11525_v17  ;;  %v12462_v56 = vld [vmem:[%s16790_s9 + $0x140] ss:$8 sps:$4 sm:$0xff]  }
 0xa71   : > { %v8530_v30 = vmax.f32 %v8419_v49, %v8500_v38  ;;  %v8533_v43 = vmax.f32 %v8423_v33, %v8503_v16  ;;  %v16430_v55 = vpop.permute.xlu0 %11533  ;;  %v8546_v15 = vpack.c.bf16 %v8534_v21, %v8531_v28  ;;  %v12467_v38 = vld [vmem:[%s16790_s9 + $0x154] ss:$8 sps:$4 sm:$0xff]  }
 0xa72   : > { %v11536_v5 = vunpack.i.h.bf16 %v16430_v55  ;;  %v11535_v22 = vunpack.i.l.bf16 %v16430_v55 }
 0xa73   : > { %v8545_v45 = vpack.c.bf16 %v8533_v43, %v8530_v30  ;;  %8874 = vmatprep.mubr.bf16.mxu0 %v8546_v15  ;;  %v16437_v60 = vpop.permute.xlu1 %11538  ;;  %v12468_v30 = vld [vmem:[%s16790_s9 + $0x160] ss:$8 sps:$4 sm:$0xff]   ;;  %v12473_v43 = vld [vmem:[%s16790_s9 + $0x174] ss:$8 sps:$4 sm:$0xff]  }
 0xa74   : > { %v8507_v25 = vsel %vm8499_vm14, %v11535_v22, %v11536_v5  ;;  %v11541_v33 = vunpack.i.h.bf16 %v16437_v60  ;;  %v11540_v49 = vunpack.i.l.bf16 %v16437_v60 }
 0xa75   : > { %8875 = vmatmul.mubr.bf16.vlgmr.msra.gmra.mrb[168].mxu0 %v8545_v45  ;;  %v11544_v1 = vpop.permute.xlu0 %11543  ;;  %v8537_v12 = vmax.f32 %v8428_v52, %v8507_v25  ;;  %v12471_v45 = vld [vmem:[%s16790_s9 + $0x170] ss:$8 sps:$4 sm:$0xff]  }
 0xa76   : > { %v8510_v36 = vsel %vm8499_vm14, %v11540_v49, %v11541_v33  ;;  %8904 = vmatpush1.bf16.msra.mxu0 %v12450_v4  ;;  %v11546_v6 = vunpack.i.h.bf16 %v11544_v1  ;;  %v11545_v26 = vunpack.i.l.bf16 %v11544_v1 }
 0xa77   : > { %8905 = vmatprep.subr.bf16.mxu0 %v12455_v51  ;;  %v8540_v2 = vmax.f32 %v8432_v7, %v8510_v36 }
 0xa78   : > { %v8506_v57 = vsel %vm8499_vm14, %v11545_v26, %v11535_v22  ;;  %v8509_v23 = vsel %vm8499_vm14, %v11546_v6, %v11540_v49 }
 0xa79   : > { %v8549_v24 = vpack.c.bf16 %v8540_v2, %v8537_v12  ;;  %v8536_v46 = vmax.f32 %v8427_v14, %v8506_v57  ;;  %v8539_v53 = vmax.f32 %v8431_v31, %v8509_v23 }
 0xa7a   : > { %8906 = vmatpush1.bf16.msra.mxu0 %v12453_v29  ;;  %v8492_v31 = vpop.permute.xlu0 %8491 }
 0xa7b   : > { %8884 = vmatprep.mubr.bf16.mxu0 %v8549_v24  ;;  %8907 = vmatprep.subr.bf16.mxu0 %v12458_v32  ;;  %v8548_v52 = vpack.c.bf16 %v8539_v53, %v8536_v46 }
 0xa7d   : > { %8885 = vmatmul.mubr.bf16.gmra.mrb[172].mxu0 %v8548_v52  ;;  %v11549_v7 = vpop.permute.xlu1 %11548 }
 0xa7e   : > { %8908 = vmatpush1.bf16.msra.mxu0 %v12456_v50  ;;  %v11551_v19 = vunpack.i.h.bf16 %v11549_v7  ;;  %v11550_v14 = vunpack.i.l.bf16 %v11549_v7  ;;  %v11559_v4 = vpop.permute.xlu0 %11558 }
 0xa7f   : > { %8909 = vmatprep.subr.bf16.mxu0 %v12461_v13  ;;  %v11561_v42 = vunpack.i.h.bf16 %v11559_v4  ;;  %v11560_v49 = vunpack.i.l.bf16 %v11559_v4 }
 0xa80   : > { %v8513_v17 = vsel %vm8499_vm14, %v11550_v14, %v11551_v19  ;;  %v8512_v9 = vsel %vm8499_vm14, %v8492_v31, %v11550_v14 }
 0xa81   : > { %v8543_v54 = vmax.f32 %v8436_v58, %v8513_v17  ;;  %v8542_v10 = vmax.f32 %v8435_v59, %v8512_v9  ;;  %v11554_v16 = vpop.permute.xlu1 %11553  ;;  %v8511_v11 = vsel %vm8499_vm14, %v11541_v33, %v11561_v42  ;;  %v12475_v42 = vld [vmem:[%s16794_s13] sm:$0xff]  }
 0xa82   : > { %8910 = vmatpush1.bf16.msra.mxu0 %v12459_v37  ;;  %v11556_v59 = vunpack.i.h.bf16 %v11554_v16  ;;  %v11555_v58 = vunpack.i.l.bf16 %v11554_v16 }
 0xa83   : > { %8911 = vmatprep.subr.bf16.mxu0 %v12464_v63  ;;  %v8552_v28 = vpack.c.bf16 %v8543_v54, %v8543_v54  ;;  %v8551_v21 = vpack.c.bf16 %v8542_v10, %v8542_v10 }
 0xa84   : > { %v8505_v15 = vsel %vm8499_vm14, %v11526_v35, %v11556_v59  ;;  %v8502_v22 = vsel %vm8499_vm14, %v11521_v61, %v11555_v58  ;;  %v8508_v61 = vsel %vm8499_vm14, %v11536_v5, %v11560_v49  ;;  %v9031_v58 = vsel %vm9029_vm15, 65535, %v17033_v27  ;;  %v12476_v49 = vld [vmem:[%s16794_s13 + $0x8] sm:$0xff]  }
 0xa85   : > { %8894 = vmatprep.mubr.bf16.mxu0 %v8552_v28  ;;  %v8535_v51 = vmax.f32 %v8425_v3, %v8505_v15  ;;  %v8532_v25 = vmax.f32 %v8421_v47, %v8502_v22  ;;  %v8538_v40 = vmax.f32 %v8429_v8, %v8508_v61  ;;  %v8541_v47 = vmax.f32 %v8433_v62, %v8511_v11  ;;  %v8498_v41 = vpop.permute.xlu1 %8497  ;;  %v12478_v11 = vld [vmem:[%s16794_s13 + $0x18] sm:$0xff]   ;;  %v12479_v61 = vld [vmem:[%s16794_s13 + $0x20] sm:$0xff]  }
 0xa86   : > { %8912 = vmatpush1.bf16.msra.mxu0 %v12462_v56  ;;  %v8514_v1 = vsel %vm8499_vm14, %v11551_v19, %v8498_v41  ;;  %v12482_v41 = vld [vmem:[%s16794_s13 + $0x38] sm:$0xff]  }
 0xa87   : > { %8895 = vmatmul.mubr.bf16.gmra.mrb[176].mxu0 %v8551_v21  ;;  %8913 = vmatprep.subr.bf16.mxu0 %v12467_v38  ;;  %v8547_v35 = vpack.c.bf16 %v8535_v51, %v8532_v25  ;;  %v8550_v3 = vpack.c.bf16 %v8541_v47, %v8538_v40  ;;  %v8544_v55 = vmax.f32 %v8437_v20, %v8514_v1  ;;  %v12474_v25 = vld [vmem:[%s16793_s12] sm:$0x3f]   ;;  %v12480_v40 = vld [vmem:[%s16794_s13 + $0x28] sm:$0xff]   ;;  %v12481_v47 = vld [vmem:[%s16794_s13 + $0x30] sm:$0xff]  }
 0xa88   : > { %8935 = vmatprep.mubr.bf16.mxu0 %v17033_v27  ;;  %v12484_v1 = vld [vmem:[%s16794_s13 + $0x48] sm:$0xff]  }
 0xa89   : > { %v8553_v5 = vpack.c.bf16 %v8544_v55, %v8544_v55  ;;  %v12485_v55 = vld [vmem:[%s16794_s13 + $0x50] sm:$0xff]  }
 0xa8a   : > { %8914 = vmatpush1.bf16.msra.mxu0 %v12465_v18 }
 0xa8b   : > { %8915 = vmatprep.subr.bf16.mxu0 %v12470_v0 }
 0xa8e   : > { %8916 = vmatpush1.bf16.msra.mxu0 %v12468_v30 }
 0xa8f   : > { %8917 = vmatprep.subr.bf16.mxu0 %v12473_v43 }
 0xa92   : > { %8918 = vmatpush1.bf16.msra.mxu0 %v12471_v45 }
 0xa93   : > { %10897 = vmatprep.subr.bf16.mxu0 %v12587_v39 }
 0xa95   : > { %8936 = vmatmul.mubr.bf16.vlgmr.msra.gmra.mrb[168].mxu0 %v8547_v35  ;;  %v12477_v35 = vld [vmem:[%s16794_s13 + $0x10] sm:$0xff]  }
 0xa96   : > { %8945 = vmatprep.mubr.bf16.mxu0 %v17033_v27 }
 0xa9d   : > { %8946 = vmatmul.mubr.bf16.gmra.mrb[172].mxu0 %v8550_v3  ;;  %v12483_v3 = vld [vmem:[%s16794_s13 + $0x40] sm:$0xff]  }
 0xa9e   : > { %8955 = vmatprep.mubr.bf16.mxu0 %v17033_v27 }
 0xaa5   : > { %8956 = vmatmul.mubr.bf16.gmra.mrb[176].mxu0 %v8553_v5  ;;  %v12486_v5 = vld [vmem:[%s16794_s13 + $0x58] sm:$0xff]  }
 0xaa6   : > { %10913 = vmatprep.mubr.msk.bf16.mxu0 %vm12588_vm12, %v12587_v39 }
 0xb68   : > { %v8937_v44 = vpop.f32.mrb[168].mxu0 }
 0xb69   : > { %v8939_v8 = vpop.f32.mrb[169].mxu0  ;;  %v8974_v48 = vrot.slane %v8937_v44, 1 }
 0xb6a   : > { %v8941_v60 = vpop.f32.mrb[170].mxu0  ;;  %v8977_v36 = vrot.slane %v8939_v8, 1 }
 0xb6b   : > { %v8975_v62 = vrot.slane %v8941_v60, 1  ;;  %v8943_v33 = vpop.f32.mrb[171].mxu0 }
 0xb6c   : > { %v8978_v6 = vrot.slane %v8943_v33, 1 }
 0xb6d   : > { %v8976_v26 = vsel %vm675_vm0, %v8974_v48, %v8975_v62  ;;  %v12514_v48 = vld [vmem:[%s16796_s15 + $0x18] sm:$0xff]  }
 0xb6e   : > { %v9002_v29 = vmax.f32 %v8937_v44, %v8976_v26  ;;  %v8979_v12 = vsel %vm675_vm0, %v8977_v36, %v8978_v6  ;;  %v12511_v44 = vld [vmem:[%s16796_s15] sm:$0xff]  }
 0xb6f   : > { %v9003_v34 = vmax.f32 %v8939_v8, %v8979_v12  ;;  %10898 = vmatpush3.bf16.msra.mxu0 %v12511_v44  ;;  %v12512_v8 = vld [vmem:[%s16796_s15 + $0x8] sm:$0xff]  }
 0xb70   : > { %v8947_v20 = vpop.f32.mrb[172].mxu0  ;;  %10899 = vmatprep.subr.bf16.mxu0 %v12587_v39 }
 0xb71   : > { %v8980_v2 = vrot.slane %v8947_v20, 1  ;;  %v8949_v32 = vpop.f32.mrb[173].mxu0 }
 0xb72   : > { %v8982_v57 = vrot.slane %v8949_v32, 1  ;;  %v8951_v23 = vpop.f32.mrb[174].mxu0 }
 0xb73   : > { %v8981_v24 = vsel %vm675_vm0, %v8975_v62, %v8980_v2  ;;  %v8984_v46 = vrot.slane %v8951_v23, 1  ;;  %v8953_v53 = vpop.f32.mrb[175].mxu0  ;;  %10900 = vmatpush3.bf16.msra.mxu0 %v12512_v8  ;;  %v12515_v62 = vld [vmem:[%s16796_s15 + $0x20] sm:$0xff]  }
 0xb74   : > { %v9004_v50 = vmax.f32 %v8941_v60, %v8981_v24  ;;  %v8983_v52 = vsel %vm675_vm0, %v8978_v6, %v8982_v57  ;;  %v8986_v13 = vrot.slane %v8953_v53, 1  ;;  %v12513_v60 = vld [vmem:[%s16796_s15 + $0x10] sm:$0xff]   ;;  %10901 = vmatprep.subr.bf16.mxu0 %v12587_v39  ;;  %v12491_v24 = vld [vmem:[%s16794_s13 + $0x80] sm:$0xff]  }
 0xb75   : > { %v8985_v7 = vsel %vm675_vm0, %v8980_v2, %v8984_v46  ;;  %v9005_v19 = vmax.f32 %v8943_v33, %v8983_v52  ;;  %v12516_v33 = vld [vmem:[%s16796_s15 + $0x28] sm:$0xff]   ;;  %v12495_v52 = vld [vmem:[%s16794_s13 + $0xa0] sm:$0xff]  }
 0xb76   : > { %v9006_v14 = vmax.f32 %v8947_v20, %v8985_v7  ;;  %v8987_v37 = vsel %vm675_vm0, %v8982_v57, %v8986_v13  ;;  %v9012_v31 = vpack.c.bf16 %v9004_v50, %v9002_v29  ;;  %v12487_v29 = vld [vmem:[%s16794_s13 + $0x60] sm:$0xff]   ;;  %v12489_v57 = vld [vmem:[%s16794_s13 + $0x70] sm:$0xff]   ;;  %v12494_v50 = vld [vmem:[%s16794_s13 + $0x98] sm:$0xff]  }
 0xb77   : > { %v9013_v63 = vpack.c.bf16 %v9005_v19, %v9003_v34  ;;  %v9007_v17 = vmax.f32 %v8949_v32, %v8987_v37  ;;  %10902 = vmatpush3.bf16.msra.mxu0 %v12513_v60  ;;  %v12488_v32 = vld [vmem:[%s16794_s13 + $0x68] sm:$0xff]   ;;  %v12497_v7 = vld [vmem:[%s16794_s13 + $0xb0] sm:$0xff]   ;;  %v12498_v19 = vld [vmem:[%s16794_s13 + $0xb8] sm:$0xff]  }
 0xb78   : > { %v8957_v9 = vpop.f32.mrb[176].mxu0  ;;  %10903 = vmatprep.subr.bf16.mxu0 %v12587_v39 }
 0xb79   : > { %v8988_v54 = vrot.slane %v8957_v9, 1  ;;  %v8959_v10 = vpop.f32.mrb[177].mxu0  ;;  %9038 = vmatprep.subr.bf16.mxu1 %v9013_v63  ;;  %v12500_v63 = vld [vmem:[%s16794_s13 + $0xc8] sm:$0xff]  }
 0xb7a   : > { %v8990_v56 = vrot.slane %v8959_v10, 1  ;;  %v8961_v28 = vpop.f32.mrb[178].mxu0  ;;  %9039 = vmatpush1.bf16.msra.mxu1 %v9012_v31 }
 0xb7b   : > { %v8989_v21 = vsel %vm675_vm0, %v8984_v46, %v8988_v54  ;;  %v8962_v38 = vpop.f32.mrb[179].mxu0  ;;  %v9010_v18 = vmax.f32 %v8957_v9, %v8988_v54  ;;  %10904 = vmatpush3.bf16.msra.mxu0 %v12514_v48  ;;  %v12492_v46 = vld [vmem:[%s16794_s13 + $0x88] sm:$0xff]   ;;  %v12502_v9 = vld [vmem:[%s16794_s13 + $0xd8] sm:$0xff]   ;;  %v12503_v54 = vld [vmem:[%s16794_s13 + $0xe0] sm:$0xff]  }
 0xb7c   : > { %v9008_v16 = vmax.f32 %v8951_v23, %v8989_v21  ;;  %v8991_v0 = vsel %vm675_vm0, %v8986_v13, %v8990_v56  ;;  %v9011_v59 = vmax.f32 %v8959_v10, %v8990_v56  ;;  %10905 = vmatprep.subr.bf16.mxu0 %v12587_v39  ;;  %v12490_v23 = vld [vmem:[%s16794_s13 + $0x78] sm:$0xff]   ;;  %v12496_v13 = vld [vmem:[%s16794_s13 + $0xa8] sm:$0xff]   ;;  %v12505_v56 = vld [vmem:[%s16794_s13 + $0xf0] sm:$0xff]  }
 0xb7d   : > { %v9009_v30 = vmax.f32 %v8953_v53, %v8991_v0  ;;  %v9016_v4 = vpack.c.bf16 %v9010_v18, %v9010_v18  ;;  %v12493_v53 = vld [vmem:[%s16794_s13 + $0x90] sm:$0xff]   ;;  %v12504_v10 = vld [vmem:[%s16794_s13 + $0xe8] sm:$0xff]   ;;  %v12506_v28 = vld [vmem:[%s16794_s13 + $0xf8] sm:$0xff]  }
 0xb7e   : > { %v9017_v43 = vpack.c.bf16 %v9011_v59, %v9011_v59  ;;  %v9014_v15 = vpack.c.bf16 %v9008_v16, %v9006_v14  ;;  %v12499_v14 = vld [vmem:[%s16794_s13 + $0xc0] sm:$0xff]   ;;  %v12508_v38 = vld [vmem:[%s16794_s13 + $0x108] sm:$0xff]   ;;  %v12509_v16 = vld [vmem:[%s16794_s13 + $0x110] sm:$0xff]  }
 0xb7f   : > { %v9015_v22 = vpack.c.bf16 %v9009_v30, %v9007_v17  ;;  %v9033_v51 = vand.u32 %v9031_v58, %v9016_v4  ;;  %10906 = vmatpush3.bf16.msra.mxu0 %v12515_v62  ;;  %v12501_v17 = vld [vmem:[%s16794_s13 + $0xd0] sm:$0xff]   ;;  %v12507_v21 = vld [vmem:[%s16794_s13 + $0x100] sm:$0xff]   ;;  %v12510_v18 = vld [vmem:[%s16794_s13 + $0x118] sm:$0xff]  }
 0xb80   : > { %v9036_v45 = vand.u32 %v9031_v58, %v9017_v43  ;;  %10907 = vmatprep.subr.bf16.mxu0 %v12587_v39  ;;  %v12517_v59 = vld [vmem:[%s16796_s15 + $0x30] sm:$0xff]   ;;  %v12518_v58 = vld [vmem:[%s16796_s15 + $0x38] sm:$0xff]  }
 0xb81   : > { %9040 = vmatprep.subr.bf16.mxu1 %v9015_v22 }
 0xb82   : > { %9041 = vmatpush1.bf16.msra.mxu1 %v9014_v15 }
 0xb83   : > { %9042 = vmatprep.subr.bf16.mxu1 %v9036_v45  ;;  %10908 = vmatpush3.bf16.msra.mxu0 %v12516_v33 }
 0xb84   : > { %10909 = vmatprep.subr.bf16.mxu0 %v12587_v39 }
 0xb86   : > { %9043 = vmatpush1.bf16.msra.mxu1 %v9033_v51 }
 0xb87   : > { %9183 = vmatprep.subr.bf16.mxu1 %v17033_v27  ;;  %10910 = vmatpush3.bf16.msra.mxu0 %v12517_v59 }
 0xb88   : > { %10911 = vmatprep.subr.bf16.mxu0 %v12587_v39  ;;  %v10808_v39 = vld [vmem:[%s16797_s16] ss:$0 sm:$0xff] }
 0xb89   : > { %10719 = vmatmul.mubr.msk.bf16.vlgmr.msra.gmra.mrb[144].mxu1 %vm9025_vm1, %v12474_v25 }
 0xb8a   : > { %9184 = vmatpush1.bf16.msra.mxu1 %v12475_v42 }
 0xb8b   : > { %9185 = vmatprep.subr.bf16.mxu1 %v17033_v27  ;;  %10912 = vmatpush3.bf16.msra.mxu0 %v12518_v58 }
 0xb8e   : > { %9186 = vmatpush1.bf16.msra.mxu1 %v12476_v49 }
 0xb8f   : > { %9187 = vmatprep.subr.bf16.mxu1 %v17033_v27 }
 0xb92   : > { %9188 = vmatpush1.bf16.msra.mxu1 %v12477_v35 }
 0xb93   : > { %9189 = vmatprep.subr.bf16.mxu1 %v17033_v27 }
 0xb96   : > { %9190 = vmatpush1.bf16.msra.mxu1 %v12478_v11 }
 0xb97   : > { %9191 = vmatprep.subr.bf16.mxu1 %v17033_v27 }
 0xb9a   : > { %9192 = vmatpush1.bf16.msra.mxu1 %v12479_v61 }
 0xb9b   : > { %9193 = vmatprep.subr.bf16.mxu1 %v17033_v27 }
 0xb9e   : > { %9194 = vmatpush1.bf16.msra.mxu1 %v12480_v40 }
 0xb9f   : > { %9195 = vmatprep.subr.bf16.mxu1 %v17033_v27 }
 0xba2   : > { %9196 = vmatpush1.bf16.msra.mxu1 %v12481_v47 }
 0xba3   : > { %9197 = vmatprep.subr.bf16.mxu1 %v17033_v27 }
 0xba6   : > { %9198 = vmatpush1.bf16.msra.mxu1 %v12482_v41 }
 0xba7   : > { %9199 = vmatprep.subr.bf16.mxu1 %v17033_v27 }
 0xbaa   : > { %9200 = vmatpush1.bf16.msra.mxu1 %v12483_v3 }
 0xbab   : > { %9201 = vmatprep.subr.bf16.mxu1 %v17033_v27 }
 0xbae   : > { %9202 = vmatpush1.bf16.msra.mxu1 %v12484_v1 }
 0xbaf   : > { %9203 = vmatprep.subr.bf16.mxu1 %v17033_v27 }
 0xbb2   : > { %9204 = vmatpush1.bf16.msra.mxu1 %v12485_v55 }
 0xbb3   : > { %9205 = vmatprep.subr.bf16.mxu1 %v17033_v27 }
 0xbb6   : > { %9206 = vmatpush1.bf16.msra.mxu1 %v12486_v5 }
 0xbb7   : > { %9335 = vmatprep.subr.bf16.mxu1 %v17033_v27 }
 0xc5c   : > { %v9072_v36 = vpop.f32.mrb[144].mxu1 }
 0xc5d   : > { %v9074_v6 = vpop.f32.mrb[145].mxu1  ;;  %v9082_v34 = vpack.c.bf16 %v9072_v36, %v9072_v36 }
 0xc5e   : > { %v9083_v26 = vpack.c.bf16 %v9074_v6, %v9074_v6  ;;  %v16622_v12 = vpop.f32.mrb[146].mxu1 }
 0xc5f   : > { %v9078_v20 = vpop.f32.mrb[147].mxu1  ;;  %v9257_v37 = vrot.slane %v9082_v34, 2  ;;  %v9376_v0 = vpack.c.bf16 %v16622_v12, %v16622_v12 }
 0xc60   : > { %v9258_v2 = vrot.slane %v9083_v26, 2  ;;  %10732 = vmatprep.mubr.msk.bf16.mxu1 %vm8499_vm14, %v9083_v26  ;;  %v9377_v31 = vpack.c.bf16 %v9078_v20, %v9078_v20 }
 0xc61   : > { %9216 = vmatmul.mubr.bf16.vlgmr.msra.gmra.mrb[148].mxu1 %v9082_v34 }
 0xc62   : > { %9336 = vmatpush1.bf16.msra.mxu1 %v12487_v29  ;;  %10770 = vmatprep.mubr.msk.bf16.mxu1 %vm8499_vm14, %v9258_v2 }
 0xc63   : > { %9337 = vmatprep.subr.bf16.mxu1 %v17033_v27 }
 0xc66   : > { %9338 = vmatpush1.bf16.msra.mxu1 %v12488_v32 }
 0xc67   : > { %9339 = vmatprep.subr.bf16.mxu1 %v17033_v27 }
 0xc6a   : > { %9340 = vmatpush1.bf16.msra.mxu1 %v12489_v57 }
 0xc6b   : > { %9341 = vmatprep.subr.bf16.mxu1 %v17033_v27 }
 0xc6e   : > { %9342 = vmatpush1.bf16.msra.mxu1 %v12490_v23 }
 0xc6f   : > { %9343 = vmatprep.subr.bf16.mxu1 %v17033_v27 }
 0xc72   : > { %9344 = vmatpush1.bf16.msra.mxu1 %v12491_v24 }
 0xc73   : > { %9345 = vmatprep.subr.bf16.mxu1 %v17033_v27 }
 0xc76   : > { %9346 = vmatpush1.bf16.msra.mxu1 %v12492_v46 }
 0xc77   : > { %9347 = vmatprep.subr.bf16.mxu1 %v17033_v27 }
 0xc7a   : > { %9348 = vmatpush1.bf16.msra.mxu1 %v12493_v53 }
 0xc7b   : > { %9349 = vmatprep.subr.bf16.mxu1 %v17033_v27 }
 0xc7e   : > { %9350 = vmatpush1.bf16.msra.mxu1 %v12494_v50 }
 0xc7f   : > { %9351 = vmatprep.subr.bf16.mxu1 %v17033_v27 }
 0xc82   : > { %9352 = vmatpush1.bf16.msra.mxu1 %v12495_v52 }
 0xc83   : > { %9353 = vmatprep.subr.bf16.mxu1 %v17033_v27 }
 0xc86   : > { %9354 = vmatpush1.bf16.msra.mxu1 %v12496_v13 }
 0xc87   : > { %9355 = vmatprep.subr.bf16.mxu1 %v17033_v27 }
 0xc8a   : > { %9356 = vmatpush1.bf16.msra.mxu1 %v12497_v7 }
 0xc8b   : > { %9357 = vmatprep.subr.bf16.mxu1 %v17033_v27 }
 0xc8e   : > { %9358 = vmatpush1.bf16.msra.mxu1 %v12498_v19 }
 0xc8f   : > { %9478 = vmatprep.subr.bf16.mxu1 %v17033_v27 }
 0xc91   : > { %9368 = vmatmul.mubr.bf16.vlgmr.msra.gmra.mrb[148].mxu1 %v9257_v37 }
 0xc92   : > { %9479 = vmatpush1.bf16.msra.mxu1 %v12499_v14  ;;  %10807 = vmatprep.mubr.msk.bf16.mxu1 %vm8499_vm14, %v9377_v31 }
 0xc93   : > { %9480 = vmatprep.subr.bf16.mxu1 %v17033_v27 }
 0xc96   : > { %9481 = vmatpush1.bf16.msra.mxu1 %v12500_v63 }
 0xc97   : > { %9482 = vmatprep.subr.bf16.mxu1 %v17033_v27 }
 0xc9a   : > { %9483 = vmatpush1.bf16.msra.mxu1 %v12501_v17 }
 0xc9b   : > { %9484 = vmatprep.subr.bf16.mxu1 %v17033_v27 }
 0xc9e   : > { %9485 = vmatpush1.bf16.msra.mxu1 %v12502_v9 }
 0xc9f   : > { %9486 = vmatprep.subr.bf16.mxu1 %v17033_v27 }
 0xca2   : > { %9487 = vmatpush1.bf16.msra.mxu1 %v12503_v54 }
 0xca3   : > { %9488 = vmatprep.subr.bf16.mxu1 %v17033_v27 }
 0xca6   : > { %9489 = vmatpush1.bf16.msra.mxu1 %v12504_v10 }
 0xca7   : > { %9490 = vmatprep.subr.bf16.mxu1 %v17033_v27 }
 0xcaa   : > { %9491 = vmatpush1.bf16.msra.mxu1 %v12505_v56 }
 0xcab   : > { %9492 = vmatprep.subr.bf16.mxu1 %v17033_v27 }
 0xcae   : > { %9493 = vmatpush1.bf16.msra.mxu1 %v12506_v28 }
 0xcaf   : > { %9494 = vmatprep.subr.bf16.mxu1 %v17033_v27 }
 0xcb2   : > { %9495 = vmatpush1.bf16.msra.mxu1 %v12507_v21 }
 0xcb3   : > { %9496 = vmatprep.subr.bf16.mxu1 %v17033_v27 }
 0xcb6   : > { %9497 = vmatpush1.bf16.msra.mxu1 %v12508_v38 }
 0xcb7   : > { %9498 = vmatprep.subr.bf16.mxu1 %v17033_v27 }
 0xcba   : > { %9499 = vmatpush1.bf16.msra.mxu1 %v12509_v16 }
 0xcbb   : > { %9500 = vmatprep.subr.bf16.mxu1 %v17033_v27  ;;  %v10733_v27 = vld [vmem:[%s16795_s14] ss:$0 sm:$0xff] }
 0xcbe   : > { %9501 = vmatpush1.bf16.msra.mxu1 %v12510_v18 }
 0xcc1   : > { %9511 = vmatmul.mubr.bf16.vlgmr.msra.gmra.mrb[148].mxu1 %v9376_v0 }
 0xd94   : > { %v9512_v30 = vpop.f32.mrb[148].mxu1 }
 0xd95   : > { %v10937_v43 = vadd.f32 %v10733_v27, %v9512_v30  ;;  %v9514_v15 = vpop.f32.mrb[149].mxu1 }
 0xd96   : > { %v9515_v22 = vpop.f32.mrb[150].mxu1 }
 0xd97   : > { %v9519_v4 = vmax.f32 %v10937_v43, 0.0  ;;  %v9516_v45 = vpop.f32.mrb[151].mxu1 }
 0xd99   : > { %v9520_v51 = vpack.c.bf16 %v9519_v4, %v9519_v4 }
 0xd9b   : > { %10914 = vmatmul.mubr.bf16.vlgmr.msra.gmra.mrb[180].mxu0 %v9520_v51 }
 0xe6e   : > { %v9626_v25 = vpop.f32.mrb[180].mxu0 }
 0xe6f   : > { %v9627_v42 = vadd.f32 %v10808_v39, %v9626_v25  ;;  %v10915_v49 = vpop.f32.mrb[181].mxu0 }
 0xe70   : > { %v9629_v35 = vpop.f32.mrb[182].mxu0 }
 0xe71   : > { %v9632_v11 = vmax.f32 %v9627_v42, 0.0  ;;  %v10916_v61 = vpop.f32.mrb[183].mxu0 }
 0xe73   : > { %9633 = vst [vmem:[%s542_s19] sm:$0xf] %v9632_v11 }
 0xe74   : > { %12532 = shalt.err (!%p12529_p3)
}
 0xe75   : > { %s12533_s21 = scalar_lea.hbm %s16739_s24, 64  ;;  %s12537_s0 = scalar_lea.hbm %s16798_s17, 128 }
 0xe76   : > { %p12534_p4 = scmp.ne.s32.totalorder %s16739_s24, %s12533_s21  ;;  %p12538_p9 = scmp.lt.u32.totalorder %s16739_s24, %s16798_s17 }
 0xe77   : > { %p12539_p10 = scmp.lt.u32.totalorder %s12537_s0, %s12533_s21  ;;  %p12541_p12 = scmp.lt.u32.totalorder %s12533_s21, %s16739_s24 }
 0xe78   : > { %p12535_p7 = pnand %p12534_p4, %p12719_p5 }
 0xe79   : > { %p12540_p11 = por %p12539_p10, %p12538_p9 }
 0xe7a   : > { %p12536_p8 = pneg %p12535_p7 }
 0xe7b   : > { %p12542_p13 = por %p12541_p12, %p12540_p11 }
 0xe7d   : > { %p12543_p0 = pnand %p12542_p13, %p12536_p8 }
 0xe7f   : > { %12546 = shalt.err (!%p12543_p0)
}
 0xe80   : > { %11246 = dma.vmem_to_hbm [thread:$0]  (%p12719_p5), %s16741_s18, 64, %s16739_s24, %s9635_s29  }
 0xe81 PF: > { %s17063_s2 = sld [smem:[#allocation7_spill]]  ;;  %p11252_p1 = scmp.ge.s32.totalorder %s12581_s27, 2 }
 0xe83   : > { %p11249_p2 = pnand %p11252_p1, %p12723_p6 }
 0xe87   : > { %s9660_s30 = sand.u32 1, %s17063_s2  }
 0xe88   : > { %s9661_s26 = scalar_lea.sflag [#allocation5], %s9660_s30 }
 0xe89   : > { %12564 = dma.done.wait (!%p11249_p2), %s9661_s26, 64  }
 0xe8a   : > { %12566 = vsyncadd (!%p11249_p2), %s9661_s26, 4294967232  ;;  %s17065_s27 = sld [smem:[#allocation9_spill]]  ;;  %s17066_s21 = sld [smem:[#allocation8_spill]] }
 0xe8b   : > { %s17067_s26 = sld [smem:[#allocation10_spill]]  ;;  %s17068_s24 = smov %s12573_s25 }
 0xe90   : > { %p27_p3 = scmp.ge.s32.totalorder %s17065_s27, 4   ;;  %s17069_s25 = smov %s17066_s21 }
 0xe92   :  { %29 = sbr.rel (!%p27_p3) target bundleno = 7 (0x7), region = 131 }
 0xe99   :  { %9666 = vsyncpa [#allocation5], 1 }
 0xe9a   :  { %9668 = vsyncpa [#allocation5 + $0x1], 1 }

</bundles_post_ra>
